<compile_context>
chip_gen: v5e
topology: v5e:2x2
jax: 0.10.0
libtpu: 0.0.40
codegen_flags: <defaults>
</compile_context>

<pallas_src>
import math

import jax
import jax.numpy as jnp
from jax.experimental import pallas as pl
from jax.experimental.pallas import tpu as pltpu

LAM = 1e-4                                   # `lam` from the PyTorch file
BETA1, BETA2, ADAM_EPS = 0.9, 0.999, 1e-8    # torch.optim.Adam defaults


def _make_br_kernel(br_iters: int, sigma: float, inner_lr: float):
    inv2s2 = 1.0 / (2.0 * sigma * sigma)
    invs2 = 1.0 / (sigma * sigma)

    # Bias corrections depend only on the static step index: fold them (and the
    # learning rate) into compile-time Python-float constants.
    step_c = [inner_lr / (1.0 - BETA1 ** t) for t in range(1, br_iters + 1)]
    inv_sqrt_bc2 = [1.0 / math.sqrt(1.0 - BETA2 ** t) for t in range(1, br_iters + 1)]

    def kernel(metanash_ref, x0_ref, agent_xs_ref, mus_ref, musT_ref, St_ref, out_ref):
        metanash = metanash_ref[...]      # (N, 1)  per-problem weights
        agent_xs = agent_xs_ref[...]      # (N, 2)  shared population strategies
        mus = mus_ref[...]                # (K, 2)  mixture centers (prologue only)
        musT = musT_ref[...]              # (2, K)  centers, K on lanes (loop)
        St = St_ref[...]                  # (K, K)  S transposed
        x = x0_ref[...]                   # (2, 1)  initial br.x (column)

        # ---- loop-invariant opponent terms ---------------------------------
        # GMM_popn.agg_agents_test(metanash):  y = sum_j metanash[j] * agent_j.x
        y_row = jnp.sum(metanash * agent_xs, axis=0, keepdims=True)              # (1, 2)
        dy = mus - y_row                                                          # (K, 2)
        py_col = jnp.exp(-jnp.sum(dy * dy, axis=1, keepdims=True) * inv2s2)       # (K, 1)
        # Spy[i] = sum_j S[i, j] * py[j], laid out with i on the lane axis.
        Spy_row = jnp.sum(St * py_col, axis=0, keepdims=True)                     # (1, K)
        Spy_scaled = invs2 * Spy_row                                              # (1, K)

        # ---- Adam best-response loop (fully unrolled) -----------------------
        m = jnp.zeros_like(x)
        v = jnp.zeros_like(x)
        for t in range(br_iters):
            dx = x - musT                                                          # (2, K)
            px = jnp.exp(jnp.sum(dx * dx, axis=0, keepdims=True) * (-inv2s2))      # (1, K)
            # grad of  loss = -payoff + lam/2 ||x||^2
            g = jnp.sum(Spy_scaled * px * dx, axis=1, keepdims=True) + LAM * x     # (2, 1)
            m = BETA1 * m + (1.0 - BETA1) * g
            v = BETA2 * v + (1.0 - BETA2) * g * g
            denom = jnp.sqrt(v) * inv_sqrt_bc2[t] + ADAM_EPS
            x = x - step_c[t] * m * pl.reciprocal(denom, approx=True)

        # ---- final payoff + packed output -----------------------------------
        dxf = x - musT
        pxf = jnp.exp(jnp.sum(dxf * dxf, axis=0, keepdims=True) * (-inv2s2))       # (1, K)
        payoff = jnp.sum(pxf * Spy_row, axis=1, keepdims=True)                     # (1, 1)
        out_ref[0:1, :] = payoff           # single coalesced (3,1) output:
        out_ref[1:3, :] = x                #   [payoff; x0; x1]

    return kernel


def implicit_best_responder_pallas(mus, S, agent_xs, metanash, x0,
                                   br_iters, inner_lr, sigma=1.0):
    """Mirrors implicit_best_responder.forward.

    Accepts a single problem (metanash (N,), x0 (2,)) or a batch of problems
    (metanash (B, N), x0 (B, 2)); the batch is mapped onto a parallel grid axis.
    Returns (r, br) — scalars/(2,) for a single problem, (B,)/(B,2) for a batch.
    """
    mus_f = jnp.asarray(mus, jnp.float32)
    S_f = jnp.asarray(S, jnp.float32)
    agent_xs_f = jnp.asarray(agent_xs, jnp.float32)
    metanash = jnp.asarray(metanash, jnp.float32)
    x0 = jnp.asarray(x0, jnp.float32)

    single = metanash.ndim == 1
    if single:
        metanash = metanash[None, :]
        x0 = x0[None, :]
    B, N = metanash.shape
    K = mus_f.shape[0]

    kernel = _make_br_kernel(int(br_iters), float(sigma), float(inner_lr))

    out = pl.pallas_call(
        kernel,
        out_shape=jax.ShapeDtypeStruct((B, 3, 1), jnp.float32),
        grid=(B,),
        in_specs=[
            pl.BlockSpec((None, N, 1), lambda b: (b, 0, 0)),   # metanash  (per problem)
            pl.BlockSpec((None, 2, 1), lambda b: (b, 0, 0)),   # x0        (per problem)
            pl.BlockSpec((N, 2), lambda b: (0, 0)),            # agent_xs  (shared)
            pl.BlockSpec((K, 2), lambda b: (0, 0)),            # mus       (shared)
            pl.BlockSpec((2, K), lambda b: (0, 0)),            # mus^T     (shared)
            pl.BlockSpec((K, K), lambda b: (0, 0)),            # S^T       (shared)
        ],
        out_specs=pl.BlockSpec((None, 3, 1), lambda b: (b, 0, 0)),
        compiler_params=pltpu.CompilerParams(dimension_semantics=("parallel",)),
    )(
        metanash.reshape(B, N, 1),
        x0.reshape(B, 2, 1),
        agent_xs_f,
        mus_f,
        mus_f.T,
        S_f.T,
    )

    r = out[:, 0, 0]        # (B,)
    br = out[:, 1:3, 0]     # (B, 2)
    if single:
        return r[0], br[0]
    return r, br


def _reference(mus, S, agent_xs, metanash, x0, br_iters, inner_lr, sigma=1.0):
    """Pure-JAX single-problem reference with exact Adam math (sanity check)."""
    inv2s2 = 1.0 / (2.0 * sigma * sigma)
    invs2 = 1.0 / (sigma * sigma)
    y = metanash @ agent_xs                                             # (2,)
    py = jnp.exp(-jnp.sum((mus - y) ** 2, axis=1) * inv2s2)             # (K,)
    Spy = S @ py                                                        # (K,)

    def payoff_grad(x):
        dx = x - mus
        px = jnp.exp(-jnp.sum(dx * dx, axis=1) * inv2s2)
        payoff = jnp.sum(px * Spy)
        gpay = -invs2 * jnp.sum((Spy * px)[:, None] * dx, axis=0)
        return payoff, gpay

    x = x0.reshape(2)
    m = jnp.zeros(2, jnp.float32)
    v = jnp.zeros(2, jnp.float32)
    for t in range(1, br_iters + 1):
        _, gpay = payoff_grad(x)
        g = -gpay + LAM * x
        m = BETA1 * m + (1.0 - BETA1) * g
        v = BETA2 * v + (1.0 - BETA2) * g * g
        denom = jnp.sqrt(v) / math.sqrt(1.0 - BETA2 ** t) + ADAM_EPS
        x = x - (inner_lr / (1.0 - BETA1 ** t)) * m / denom
    payoff, _ = payoff_grad(x)
    return payoff, x


if __name__ == "__main__":
    key = jax.random.PRNGKey(0)
    k1, k2, k3 = jax.random.split(key, 3)

    K, N, B = 7, 4, 2                  # mixture components / population size / batch
    br_iters, inner_lr, sigma = 50, 0.05, 1.0

    # Deterministic mixture centers on a circle + cyclic antisymmetric RPS matrix.
    ang = 2.0 * math.pi * jnp.arange(K, dtype=jnp.float32) / K
    mus = 2.0 * jnp.stack([jnp.cos(ang), jnp.sin(ang)], axis=1)          # (K, 2)
    ii = jnp.arange(K)[:, None]
    jj = jnp.arange(K)[None, :]
    d = (jj - ii) % K
    S = jnp.where(d == 0, 0.0,
                  jnp.where(d <= (K - 1) // 2, 1.0, -1.0)).astype(jnp.float32)

    agent_xs = jax.random.normal(k1, (N, 2), dtype=jnp.float32)          # population strategies
    metanash = jax.nn.softmax(jax.random.normal(k2, (B, N), dtype=jnp.float32), axis=-1)
    x0 = 0.01 * jax.random.normal(k3, (B, 2), dtype=jnp.float32)         # br.x = 0.01*randn(2)

    # Batched call: B best-response problems in one pallas_call (parallel grid axis).
    r, br = implicit_best_responder_pallas(mus, S, agent_xs, metanash, x0,
                                           br_iters, inner_lr, sigma)
    jax.block_until_ready((r, br))

    for b in range(B):
        r_ref, br_ref = _reference(mus, S, agent_xs, metanash[b], x0[b],
                                   br_iters, inner_lr, sigma)
        # 2e-3 tolerance: the kernel uses an approximate EUP reciprocal in the Adam
        # denominator (each of the 50 serial steps is perturbed at the ~1e-4 level).
        assert jnp.allclose(r[b], r_ref, atol=2e-3, rtol=2e-3), (b, r[b], r_ref)
        assert jnp.allclose(br[b], br_ref, atol=2e-3, rtol=2e-3), (b, br[b], br_ref)

    # Single-problem call path (what the nn.Module forward actually does).
    r0, br0 = implicit_best_responder_pallas(mus, S, agent_xs, metanash[0], x0[0],
                                             br_iters, inner_lr, sigma)
    jax.block_until_ready((r0, br0))
    assert jnp.allclose(r0, r[0], atol=1e-5), (r0, r[0])
    assert jnp.allclose(br0, br[0], atol=1e-5), (br0, br[0])

    print("KERNEL_OK")
</pallas_src>

<mosaic_0001>
module attributes {stable_mosaic.version = 11 : i64} {
  func.func @kernel(%arg0: i32, %arg1: memref<1x4x1xf32, #tpu.memory_space<vmem>>, %arg2: memref<1x2x1xf32, #tpu.memory_space<vmem>>, %arg3: memref<4x2xf32, #tpu.memory_space<vmem>>, %arg4: memref<7x2xf32, #tpu.memory_space<vmem>>, %arg5: memref<2x7xf32, #tpu.memory_space<vmem>>, %arg6: memref<7x7xf32, #tpu.memory_space<vmem>>, %arg7: memref<1x3x1xf32, #tpu.memory_space<vmem>>) attributes {dimension_semantics = [#tpu.dimension_semantics<parallel>], iteration_bounds = array<i64: 2>, scalar_prefetch = 0 : i64, scratch_operands = 0 : i64, tpu.core_type = #tpu.core_type<tc>, window_params = [{transform_indices = @transform_0, window_bounds = array<i64: 1, 4, 1>}, {transform_indices = @transform_1, window_bounds = array<i64: 1, 2, 1>}, {pipeline_mode = #tpu.pipeline_mode<synchronous>, transform_indices = @transform_2, window_bounds = array<i64: 4, 2>}, {pipeline_mode = #tpu.pipeline_mode<synchronous>, transform_indices = @transform_3, window_bounds = array<i64: 7, 2>}, {pipeline_mode = #tpu.pipeline_mode<synchronous>, transform_indices = @transform_4, window_bounds = array<i64: 2, 7>}, {pipeline_mode = #tpu.pipeline_mode<synchronous>, transform_indices = @transform_5, window_bounds = array<i64: 7, 7>}, {transform_indices = @transform_6, window_bounds = array<i64: 1, 3, 1>}]} {
    %c0 = arith.constant 0 : index
    %c0_0 = arith.constant 0 : index
    %c0_1 = arith.constant 0 : index
    %0 = vector.load %arg1[%c0, %c0_0, %c0_1] : memref<1x4x1xf32, #tpu.memory_space<vmem>>, vector<1x4x1xf32>
    %1 = vector.shape_cast %0 : vector<1x4x1xf32> to vector<4x1xf32>
    %c0_2 = arith.constant 0 : index
    %c0_3 = arith.constant 0 : index
    %2 = vector.load %arg3[%c0_2, %c0_3] : memref<4x2xf32, #tpu.memory_space<vmem>>, vector<4x2xf32>
    %c0_4 = arith.constant 0 : index
    %c0_5 = arith.constant 0 : index
    %3 = vector.load %arg4[%c0_4, %c0_5] : memref<7x2xf32, #tpu.memory_space<vmem>>, vector<7x2xf32>
    %c0_6 = arith.constant 0 : index
    %c0_7 = arith.constant 0 : index
    %4 = vector.load %arg5[%c0_6, %c0_7] : memref<2x7xf32, #tpu.memory_space<vmem>>, vector<2x7xf32>
    %c0_8 = arith.constant 0 : index
    %c0_9 = arith.constant 0 : index
    %5 = vector.load %arg6[%c0_8, %c0_9] : memref<7x7xf32, #tpu.memory_space<vmem>>, vector<7x7xf32>
    %c0_10 = arith.constant 0 : index
    %c0_11 = arith.constant 0 : index
    %c0_12 = arith.constant 0 : index
    %6 = vector.load %arg2[%c0_10, %c0_11, %c0_12] : memref<1x2x1xf32, #tpu.memory_space<vmem>>, vector<1x2x1xf32>
    %7 = vector.shape_cast %6 : vector<1x2x1xf32> to vector<2x1xf32>
    %8 = vector.broadcast %1 : vector<4x1xf32> to vector<4x2xf32>
    %9 = arith.mulf %8, %2 : vector<4x2xf32>
    %cst = arith.constant dense<0.000000e+00> : vector<2xf32>
    %10 = vector.multi_reduction <add>, %9, %cst [0] : vector<4x2xf32> to vector<2xf32>
    %11 = vector.shape_cast %10 : vector<2xf32> to vector<1x2xf32>
    %12 = vector.broadcast %11 : vector<1x2xf32> to vector<7x2xf32>
    %13 = arith.subf %3, %12 : vector<7x2xf32>
    %14 = arith.mulf %13, %13 : vector<7x2xf32>
    %cst_13 = arith.constant dense<0.000000e+00> : vector<7xf32>
    %15 = vector.multi_reduction <add>, %14, %cst_13 [1] : vector<7x2xf32> to vector<7xf32>
    %16 = vector.shape_cast %15 : vector<7xf32> to vector<7x1xf32>
    %cst_14 = arith.constant 0.000000e+00 : f32
    %17 = vector.broadcast %cst_14 : f32 to vector<7x1xf32>
    %18 = arith.subf %17, %16 : vector<7x1xf32>
    %cst_15 = arith.constant 5.000000e-01 : f32
    %19 = vector.broadcast %cst_15 : f32 to vector<7x1xf32>
    %20 = arith.mulf %18, %19 : vector<7x1xf32>
    %21 = math.exp %20 : vector<7x1xf32>
    %22 = vector.broadcast %21 : vector<7x1xf32> to vector<7x7xf32>
    %23 = arith.mulf %5, %22 : vector<7x7xf32>
    %cst_16 = arith.constant dense<0.000000e+00> : vector<7xf32>
    %24 = vector.multi_reduction <add>, %23, %cst_16 [0] : vector<7x7xf32> to vector<7xf32>
    %25 = vector.shape_cast %24 : vector<7xf32> to vector<1x7xf32>
    %cst_17 = arith.constant 1.000000e+00 : f32
    %26 = vector.broadcast %cst_17 : f32 to vector<1x7xf32>
    %27 = arith.mulf %26, %25 : vector<1x7xf32>
    %cst_18 = arith.constant 0.000000e+00 : f32
    %28 = vector.broadcast %cst_18 : f32 to vector<2x1xf32>
    %cst_19 = arith.constant 0.000000e+00 : f32
    %29 = vector.broadcast %cst_19 : f32 to vector<2x1xf32>
    %30 = vector.broadcast %7 : vector<2x1xf32> to vector<2x7xf32>
    %31 = arith.subf %30, %4 : vector<2x7xf32>
    %32 = arith.mulf %31, %31 : vector<2x7xf32>
    %cst_20 = arith.constant dense<0.000000e+00> : vector<7xf32>
    %33 = vector.multi_reduction <add>, %32, %cst_20 [0] : vector<2x7xf32> to vector<7xf32>
    %34 = vector.shape_cast %33 : vector<7xf32> to vector<1x7xf32>
    %cst_21 = arith.constant -5.000000e-01 : f32
    %35 = vector.broadcast %cst_21 : f32 to vector<1x7xf32>
    %36 = arith.mulf %34, %35 : vector<1x7xf32>
    %37 = math.exp %36 : vector<1x7xf32>
    %38 = arith.mulf %27, %37 : vector<1x7xf32>
    %39 = vector.broadcast %38 : vector<1x7xf32> to vector<2x7xf32>
    %40 = arith.mulf %39, %31 : vector<2x7xf32>
    %cst_22 = arith.constant dense<0.000000e+00> : vector<2xf32>
    %41 = vector.multi_reduction <add>, %40, %cst_22 [1] : vector<2x7xf32> to vector<2xf32>
    %42 = vector.shape_cast %41 : vector<2xf32> to vector<2x1xf32>
    %cst_23 = arith.constant 9.99999974E-5 : f32
    %43 = vector.broadcast %cst_23 : f32 to vector<2x1xf32>
    %44 = arith.mulf %43, %7 : vector<2x1xf32>
    %45 = arith.addf %42, %44 : vector<2x1xf32>
    %cst_24 = arith.constant 0.899999976 : f32
    %46 = vector.broadcast %cst_24 : f32 to vector<2x1xf32>
    %47 = arith.mulf %46, %28 : vector<2x1xf32>
    %cst_25 = arith.constant 1.000000e-01 : f32
    %48 = vector.broadcast %cst_25 : f32 to vector<2x1xf32>
    %49 = arith.mulf %48, %45 : vector<2x1xf32>
    %50 = arith.addf %47, %49 : vector<2x1xf32>
    %cst_26 = arith.constant 9.990000e-01 : f32
    %51 = vector.broadcast %cst_26 : f32 to vector<2x1xf32>
    %52 = arith.mulf %51, %29 : vector<2x1xf32>
    %cst_27 = arith.constant 1.000000e-03 : f32
    %53 = vector.broadcast %cst_27 : f32 to vector<2x1xf32>
    %54 = arith.mulf %53, %45 : vector<2x1xf32>
    %55 = arith.mulf %54, %45 : vector<2x1xf32>
    %56 = arith.addf %52, %55 : vector<2x1xf32>
    %57 = math.sqrt %56 : vector<2x1xf32>
    %cst_28 = arith.constant 31.622776 : f32
    %58 = vector.broadcast %cst_28 : f32 to vector<2x1xf32>
    %59 = arith.mulf %57, %58 : vector<2x1xf32>
    %cst_29 = arith.constant 9.99999993E-9 : f32
    %60 = vector.broadcast %cst_29 : f32 to vector<2x1xf32>
    %61 = arith.addf %59, %60 : vector<2x1xf32>
    %cst_30 = arith.constant 5.000000e-01 : f32
    %62 = vector.broadcast %cst_30 : f32 to vector<2x1xf32>
    %63 = arith.mulf %62, %50 : vector<2x1xf32>
    %64 = tpu.reciprocal %61 {approx = true} : vector<2x1xf32> -> vector<2x1xf32>
    %65 = arith.mulf %63, %64 : vector<2x1xf32>
    %66 = arith.subf %7, %65 : vector<2x1xf32>
    %67 = vector.broadcast %66 : vector<2x1xf32> to vector<2x7xf32>
    %68 = arith.subf %67, %4 : vector<2x7xf32>
    %69 = arith.mulf %68, %68 : vector<2x7xf32>
    %cst_31 = arith.constant dense<0.000000e+00> : vector<7xf32>
    %70 = vector.multi_reduction <add>, %69, %cst_31 [0] : vector<2x7xf32> to vector<7xf32>
    %71 = vector.shape_cast %70 : vector<7xf32> to vector<1x7xf32>
    %cst_32 = arith.constant -5.000000e-01 : f32
    %72 = vector.broadcast %cst_32 : f32 to vector<1x7xf32>
    %73 = arith.mulf %71, %72 : vector<1x7xf32>
    %74 = math.exp %73 : vector<1x7xf32>
    %75 = arith.mulf %27, %74 : vector<1x7xf32>
    %76 = vector.broadcast %75 : vector<1x7xf32> to vector<2x7xf32>
    %77 = arith.mulf %76, %68 : vector<2x7xf32>
    %cst_33 = arith.constant dense<0.000000e+00> : vector<2xf32>
    %78 = vector.multi_reduction <add>, %77, %cst_33 [1] : vector<2x7xf32> to vector<2xf32>
    %79 = vector.shape_cast %78 : vector<2xf32> to vector<2x1xf32>
    %cst_34 = arith.constant 9.99999974E-5 : f32
    %80 = vector.broadcast %cst_34 : f32 to vector<2x1xf32>
    %81 = arith.mulf %80, %66 : vector<2x1xf32>
    %82 = arith.addf %79, %81 : vector<2x1xf32>
    %cst_35 = arith.constant 0.899999976 : f32
    %83 = vector.broadcast %cst_35 : f32 to vector<2x1xf32>
    %84 = arith.mulf %83, %50 : vector<2x1xf32>
    %cst_36 = arith.constant 1.000000e-01 : f32
    %85 = vector.broadcast %cst_36 : f32 to vector<2x1xf32>
    %86 = arith.mulf %85, %82 : vector<2x1xf32>
    %87 = arith.addf %84, %86 : vector<2x1xf32>
    %cst_37 = arith.constant 9.990000e-01 : f32
    %88 = vector.broadcast %cst_37 : f32 to vector<2x1xf32>
    %89 = arith.mulf %88, %56 : vector<2x1xf32>
    %cst_38 = arith.constant 1.000000e-03 : f32
    %90 = vector.broadcast %cst_38 : f32 to vector<2x1xf32>
    %91 = arith.mulf %90, %82 : vector<2x1xf32>
    %92 = arith.mulf %91, %82 : vector<2x1xf32>
    %93 = arith.addf %89, %92 : vector<2x1xf32>
    %94 = math.sqrt %93 : vector<2x1xf32>
    %cst_39 = arith.constant 22.366272 : f32
    %95 = vector.broadcast %cst_39 : f32 to vector<2x1xf32>
    %96 = arith.mulf %94, %95 : vector<2x1xf32>
    %cst_40 = arith.constant 9.99999993E-9 : f32
    %97 = vector.broadcast %cst_40 : f32 to vector<2x1xf32>
    %98 = arith.addf %96, %97 : vector<2x1xf32>
    %cst_41 = arith.constant 0.263157904 : f32
    %99 = vector.broadcast %cst_41 : f32 to vector<2x1xf32>
    %100 = arith.mulf %99, %87 : vector<2x1xf32>
    %101 = tpu.reciprocal %98 {approx = true} : vector<2x1xf32> -> vector<2x1xf32>
    %102 = arith.mulf %100, %101 : vector<2x1xf32>
    %103 = arith.subf %66, %102 : vector<2x1xf32>
    %104 = vector.broadcast %103 : vector<2x1xf32> to vector<2x7xf32>
    %105 = arith.subf %104, %4 : vector<2x7xf32>
    %106 = arith.mulf %105, %105 : vector<2x7xf32>
    %cst_42 = arith.constant dense<0.000000e+00> : vector<7xf32>
    %107 = vector.multi_reduction <add>, %106, %cst_42 [0] : vector<2x7xf32> to vector<7xf32>
    %108 = vector.shape_cast %107 : vector<7xf32> to vector<1x7xf32>
    %cst_43 = arith.constant -5.000000e-01 : f32
    %109 = vector.broadcast %cst_43 : f32 to vector<1x7xf32>
    %110 = arith.mulf %108, %109 : vector<1x7xf32>
    %111 = math.exp %110 : vector<1x7xf32>
    %112 = arith.mulf %27, %111 : vector<1x7xf32>
    %113 = vector.broadcast %112 : vector<1x7xf32> to vector<2x7xf32>
    %114 = arith.mulf %113, %105 : vector<2x7xf32>
    %cst_44 = arith.constant dense<0.000000e+00> : vector<2xf32>
    %115 = vector.multi_reduction <add>, %114, %cst_44 [1] : vector<2x7xf32> to vector<2xf32>
    %116 = vector.shape_cast %115 : vector<2xf32> to vector<2x1xf32>
    %cst_45 = arith.constant 9.99999974E-5 : f32
    %117 = vector.broadcast %cst_45 : f32 to vector<2x1xf32>
    %118 = arith.mulf %117, %103 : vector<2x1xf32>
    %119 = arith.addf %116, %118 : vector<2x1xf32>
    %cst_46 = arith.constant 0.899999976 : f32
    %120 = vector.broadcast %cst_46 : f32 to vector<2x1xf32>
    %121 = arith.mulf %120, %87 : vector<2x1xf32>
    %cst_47 = arith.constant 1.000000e-01 : f32
    %122 = vector.broadcast %cst_47 : f32 to vector<2x1xf32>
    %123 = arith.mulf %122, %119 : vector<2x1xf32>
    %124 = arith.addf %121, %123 : vector<2x1xf32>
    %cst_48 = arith.constant 9.990000e-01 : f32
    %125 = vector.broadcast %cst_48 : f32 to vector<2x1xf32>
    %126 = arith.mulf %125, %93 : vector<2x1xf32>
    %cst_49 = arith.constant 1.000000e-03 : f32
    %127 = vector.broadcast %cst_49 : f32 to vector<2x1xf32>
    %128 = arith.mulf %127, %119 : vector<2x1xf32>
    %129 = arith.mulf %128, %119 : vector<2x1xf32>
    %130 = arith.addf %126, %129 : vector<2x1xf32>
    %131 = math.sqrt %130 : vector<2x1xf32>
    %cst_50 = arith.constant 18.266552 : f32
    %132 = vector.broadcast %cst_50 : f32 to vector<2x1xf32>
    %133 = arith.mulf %131, %132 : vector<2x1xf32>
    %cst_51 = arith.constant 9.99999993E-9 : f32
    %134 = vector.broadcast %cst_51 : f32 to vector<2x1xf32>
    %135 = arith.addf %133, %134 : vector<2x1xf32>
    %cst_52 = arith.constant 0.184501842 : f32
    %136 = vector.broadcast %cst_52 : f32 to vector<2x1xf32>
    %137 = arith.mulf %136, %124 : vector<2x1xf32>
    %138 = tpu.reciprocal %135 {approx = true} : vector<2x1xf32> -> vector<2x1xf32>
    %139 = arith.mulf %137, %138 : vector<2x1xf32>
    %140 = arith.subf %103, %139 : vector<2x1xf32>
    %141 = vector.broadcast %140 : vector<2x1xf32> to vector<2x7xf32>
    %142 = arith.subf %141, %4 : vector<2x7xf32>
    %143 = arith.mulf %142, %142 : vector<2x7xf32>
    %cst_53 = arith.constant dense<0.000000e+00> : vector<7xf32>
    %144 = vector.multi_reduction <add>, %143, %cst_53 [0] : vector<2x7xf32> to vector<7xf32>
    %145 = vector.shape_cast %144 : vector<7xf32> to vector<1x7xf32>
    %cst_54 = arith.constant -5.000000e-01 : f32
    %146 = vector.broadcast %cst_54 : f32 to vector<1x7xf32>
    %147 = arith.mulf %145, %146 : vector<1x7xf32>
    %148 = math.exp %147 : vector<1x7xf32>
    %149 = arith.mulf %27, %148 : vector<1x7xf32>
    %150 = vector.broadcast %149 : vector<1x7xf32> to vector<2x7xf32>
    %151 = arith.mulf %150, %142 : vector<2x7xf32>
    %cst_55 = arith.constant dense<0.000000e+00> : vector<2xf32>
    %152 = vector.multi_reduction <add>, %151, %cst_55 [1] : vector<2x7xf32> to vector<2xf32>
    %153 = vector.shape_cast %152 : vector<2xf32> to vector<2x1xf32>
    %cst_56 = arith.constant 9.99999974E-5 : f32
    %154 = vector.broadcast %cst_56 : f32 to vector<2x1xf32>
    %155 = arith.mulf %154, %140 : vector<2x1xf32>
    %156 = arith.addf %153, %155 : vector<2x1xf32>
    %cst_57 = arith.constant 0.899999976 : f32
    %157 = vector.broadcast %cst_57 : f32 to vector<2x1xf32>
    %158 = arith.mulf %157, %124 : vector<2x1xf32>
    %cst_58 = arith.constant 1.000000e-01 : f32
    %159 = vector.broadcast %cst_58 : f32 to vector<2x1xf32>
    %160 = arith.mulf %159, %156 : vector<2x1xf32>
    %161 = arith.addf %158, %160 : vector<2x1xf32>
    %cst_59 = arith.constant 9.990000e-01 : f32
    %162 = vector.broadcast %cst_59 : f32 to vector<2x1xf32>
    %163 = arith.mulf %162, %130 : vector<2x1xf32>
    %cst_60 = arith.constant 1.000000e-03 : f32
    %164 = vector.broadcast %cst_60 : f32 to vector<2x1xf32>
    %165 = arith.mulf %164, %156 : vector<2x1xf32>
    %166 = arith.mulf %165, %156 : vector<2x1xf32>
    %167 = arith.addf %163, %166 : vector<2x1xf32>
    %168 = math.sqrt %167 : vector<2x1xf32>
    %cst_61 = arith.constant 15.8232527 : f32
    %169 = vector.broadcast %cst_61 : f32 to vector<2x1xf32>
    %170 = arith.mulf %168, %169 : vector<2x1xf32>
    %cst_62 = arith.constant 9.99999993E-9 : f32
    %171 = vector.broadcast %cst_62 : f32 to vector<2x1xf32>
    %172 = arith.addf %170, %171 : vector<2x1xf32>
    %cst_63 = arith.constant 0.145391107 : f32
    %173 = vector.broadcast %cst_63 : f32 to vector<2x1xf32>
    %174 = arith.mulf %173, %161 : vector<2x1xf32>
    %175 = tpu.reciprocal %172 {approx = true} : vector<2x1xf32> -> vector<2x1xf32>
    %176 = arith.mulf %174, %175 : vector<2x1xf32>
    %177 = arith.subf %140, %176 : vector<2x1xf32>
    %178 = vector.broadcast %177 : vector<2x1xf32> to vector<2x7xf32>
    %179 = arith.subf %178, %4 : vector<2x7xf32>
    %180 = arith.mulf %179, %179 : vector<2x7xf32>
    %cst_64 = arith.constant dense<0.000000e+00> : vector<7xf32>
    %181 = vector.multi_reduction <add>, %180, %cst_64 [0] : vector<2x7xf32> to vector<7xf32>
    %182 = vector.shape_cast %181 : vector<7xf32> to vector<1x7xf32>
    %cst_65 = arith.constant -5.000000e-01 : f32
    %183 = vector.broadcast %cst_65 : f32 to vector<1x7xf32>
    %184 = arith.mulf %182, %183 : vector<1x7xf32>
    %185 = math.exp %184 : vector<1x7xf32>
    %186 = arith.mulf %27, %185 : vector<1x7xf32>
    %187 = vector.broadcast %186 : vector<1x7xf32> to vector<2x7xf32>
    %188 = arith.mulf %187, %179 : vector<2x7xf32>
    %cst_66 = arith.constant dense<0.000000e+00> : vector<2xf32>
    %189 = vector.multi_reduction <add>, %188, %cst_66 [1] : vector<2x7xf32> to vector<2xf32>
    %190 = vector.shape_cast %189 : vector<2xf32> to vector<2x1xf32>
    %cst_67 = arith.constant 9.99999974E-5 : f32
    %191 = vector.broadcast %cst_67 : f32 to vector<2x1xf32>
    %192 = arith.mulf %191, %177 : vector<2x1xf32>
    %193 = arith.addf %190, %192 : vector<2x1xf32>
    %cst_68 = arith.constant 0.899999976 : f32
    %194 = vector.broadcast %cst_68 : f32 to vector<2x1xf32>
    %195 = arith.mulf %194, %161 : vector<2x1xf32>
    %cst_69 = arith.constant 1.000000e-01 : f32
    %196 = vector.broadcast %cst_69 : f32 to vector<2x1xf32>
    %197 = arith.mulf %196, %193 : vector<2x1xf32>
    %198 = arith.addf %195, %197 : vector<2x1xf32>
    %cst_70 = arith.constant 9.990000e-01 : f32
    %199 = vector.broadcast %cst_70 : f32 to vector<2x1xf32>
    %200 = arith.mulf %199, %167 : vector<2x1xf32>
    %cst_71 = arith.constant 1.000000e-03 : f32
    %201 = vector.broadcast %cst_71 : f32 to vector<2x1xf32>
    %202 = arith.mulf %201, %193 : vector<2x1xf32>
    %203 = arith.mulf %202, %193 : vector<2x1xf32>
    %204 = arith.addf %200, %203 : vector<2x1xf32>
    %205 = math.sqrt %204 : vector<2x1xf32>
    %cst_72 = arith.constant 14.1562853 : f32
    %206 = vector.broadcast %cst_72 : f32 to vector<2x1xf32>
    %207 = arith.mulf %205, %206 : vector<2x1xf32>
    %cst_73 = arith.constant 9.99999993E-9 : f32
    %208 = vector.broadcast %cst_73 : f32 to vector<2x1xf32>
    %209 = arith.addf %207, %208 : vector<2x1xf32>
    %cst_74 = arith.constant 0.122097142 : f32
    %210 = vector.broadcast %cst_74 : f32 to vector<2x1xf32>
    %211 = arith.mulf %210, %198 : vector<2x1xf32>
    %212 = tpu.reciprocal %209 {approx = true} : vector<2x1xf32> -> vector<2x1xf32>
    %213 = arith.mulf %211, %212 : vector<2x1xf32>
    %214 = arith.subf %177, %213 : vector<2x1xf32>
    %215 = vector.broadcast %214 : vector<2x1xf32> to vector<2x7xf32>
    %216 = arith.subf %215, %4 : vector<2x7xf32>
    %217 = arith.mulf %216, %216 : vector<2x7xf32>
    %cst_75 = arith.constant dense<0.000000e+00> : vector<7xf32>
    %218 = vector.multi_reduction <add>, %217, %cst_75 [0] : vector<2x7xf32> to vector<7xf32>
    %219 = vector.shape_cast %218 : vector<7xf32> to vector<1x7xf32>
    %cst_76 = arith.constant -5.000000e-01 : f32
    %220 = vector.broadcast %cst_76 : f32 to vector<1x7xf32>
    %221 = arith.mulf %219, %220 : vector<1x7xf32>
    %222 = math.exp %221 : vector<1x7xf32>
    %223 = arith.mulf %27, %222 : vector<1x7xf32>
    %224 = vector.broadcast %223 : vector<1x7xf32> to vector<2x7xf32>
    %225 = arith.mulf %224, %216 : vector<2x7xf32>
    %cst_77 = arith.constant dense<0.000000e+00> : vector<2xf32>
    %226 = vector.multi_reduction <add>, %225, %cst_77 [1] : vector<2x7xf32> to vector<2xf32>
    %227 = vector.shape_cast %226 : vector<2xf32> to vector<2x1xf32>
    %cst_78 = arith.constant 9.99999974E-5 : f32
    %228 = vector.broadcast %cst_78 : f32 to vector<2x1xf32>
    %229 = arith.mulf %228, %214 : vector<2x1xf32>
    %230 = arith.addf %227, %229 : vector<2x1xf32>
    %cst_79 = arith.constant 0.899999976 : f32
    %231 = vector.broadcast %cst_79 : f32 to vector<2x1xf32>
    %232 = arith.mulf %231, %198 : vector<2x1xf32>
    %cst_80 = arith.constant 1.000000e-01 : f32
    %233 = vector.broadcast %cst_80 : f32 to vector<2x1xf32>
    %234 = arith.mulf %233, %230 : vector<2x1xf32>
    %235 = arith.addf %232, %234 : vector<2x1xf32>
    %cst_81 = arith.constant 9.990000e-01 : f32
    %236 = vector.broadcast %cst_81 : f32 to vector<2x1xf32>
    %237 = arith.mulf %236, %204 : vector<2x1xf32>
    %cst_82 = arith.constant 1.000000e-03 : f32
    %238 = vector.broadcast %cst_82 : f32 to vector<2x1xf32>
    %239 = arith.mulf %238, %230 : vector<2x1xf32>
    %240 = arith.mulf %239, %230 : vector<2x1xf32>
    %241 = arith.addf %237, %240 : vector<2x1xf32>
    %242 = math.sqrt %241 : vector<2x1xf32>
    %cst_83 = arith.constant 12.9260902 : f32
    %243 = vector.broadcast %cst_83 : f32 to vector<2x1xf32>
    %244 = arith.mulf %242, %243 : vector<2x1xf32>
    %cst_84 = arith.constant 9.99999993E-9 : f32
    %245 = vector.broadcast %cst_84 : f32 to vector<2x1xf32>
    %246 = arith.addf %244, %245 : vector<2x1xf32>
    %cst_85 = arith.constant 0.106710151 : f32
    %247 = vector.broadcast %cst_85 : f32 to vector<2x1xf32>
    %248 = arith.mulf %247, %235 : vector<2x1xf32>
    %249 = tpu.reciprocal %246 {approx = true} : vector<2x1xf32> -> vector<2x1xf32>
    %250 = arith.mulf %248, %249 : vector<2x1xf32>
    %251 = arith.subf %214, %250 : vector<2x1xf32>
    %252 = vector.broadcast %251 : vector<2x1xf32> to vector<2x7xf32>
    %253 = arith.subf %252, %4 : vector<2x7xf32>
    %254 = arith.mulf %253, %253 : vector<2x7xf32>
    %cst_86 = arith.constant dense<0.000000e+00> : vector<7xf32>
    %255 = vector.multi_reduction <add>, %254, %cst_86 [0] : vector<2x7xf32> to vector<7xf32>
    %256 = vector.shape_cast %255 : vector<7xf32> to vector<1x7xf32>
    %cst_87 = arith.constant -5.000000e-01 : f32
    %257 = vector.broadcast %cst_87 : f32 to vector<1x7xf32>
    %258 = arith.mulf %256, %257 : vector<1x7xf32>
    %259 = math.exp %258 : vector<1x7xf32>
    %260 = arith.mulf %27, %259 : vector<1x7xf32>
    %261 = vector.broadcast %260 : vector<1x7xf32> to vector<2x7xf32>
    %262 = arith.mulf %261, %253 : vector<2x7xf32>
    %cst_88 = arith.constant dense<0.000000e+00> : vector<2xf32>
    %263 = vector.multi_reduction <add>, %262, %cst_88 [1] : vector<2x7xf32> to vector<2xf32>
    %264 = vector.shape_cast %263 : vector<2xf32> to vector<2x1xf32>
    %cst_89 = arith.constant 9.99999974E-5 : f32
    %265 = vector.broadcast %cst_89 : f32 to vector<2x1xf32>
    %266 = arith.mulf %265, %251 : vector<2x1xf32>
    %267 = arith.addf %264, %266 : vector<2x1xf32>
    %cst_90 = arith.constant 0.899999976 : f32
    %268 = vector.broadcast %cst_90 : f32 to vector<2x1xf32>
    %269 = arith.mulf %268, %235 : vector<2x1xf32>
    %cst_91 = arith.constant 1.000000e-01 : f32
    %270 = vector.broadcast %cst_91 : f32 to vector<2x1xf32>
    %271 = arith.mulf %270, %267 : vector<2x1xf32>
    %272 = arith.addf %269, %271 : vector<2x1xf32>
    %cst_92 = arith.constant 9.990000e-01 : f32
    %273 = vector.broadcast %cst_92 : f32 to vector<2x1xf32>
    %274 = arith.mulf %273, %241 : vector<2x1xf32>
    %cst_93 = arith.constant 1.000000e-03 : f32
    %275 = vector.broadcast %cst_93 : f32 to vector<2x1xf32>
    %276 = arith.mulf %275, %267 : vector<2x1xf32>
    %277 = arith.mulf %276, %267 : vector<2x1xf32>
    %278 = arith.addf %274, %277 : vector<2x1xf32>
    %279 = math.sqrt %278 : vector<2x1xf32>
    %cst_94 = arith.constant 11.9702253 : f32
    %280 = vector.broadcast %cst_94 : f32 to vector<2x1xf32>
    %281 = arith.mulf %279, %280 : vector<2x1xf32>
    %cst_95 = arith.constant 9.99999993E-9 : f32
    %282 = vector.broadcast %cst_95 : f32 to vector<2x1xf32>
    %283 = arith.addf %281, %282 : vector<2x1xf32>
    %cst_96 = arith.constant 0.0958399549 : f32
    %284 = vector.broadcast %cst_96 : f32 to vector<2x1xf32>
    %285 = arith.mulf %284, %272 : vector<2x1xf32>
    %286 = tpu.reciprocal %283 {approx = true} : vector<2x1xf32> -> vector<2x1xf32>
    %287 = arith.mulf %285, %286 : vector<2x1xf32>
    %288 = arith.subf %251, %287 : vector<2x1xf32>
    %289 = vector.broadcast %288 : vector<2x1xf32> to vector<2x7xf32>
    %290 = arith.subf %289, %4 : vector<2x7xf32>
    %291 = arith.mulf %290, %290 : vector<2x7xf32>
    %cst_97 = arith.constant dense<0.000000e+00> : vector<7xf32>
    %292 = vector.multi_reduction <add>, %291, %cst_97 [0] : vector<2x7xf32> to vector<7xf32>
    %293 = vector.shape_cast %292 : vector<7xf32> to vector<1x7xf32>
    %cst_98 = arith.constant -5.000000e-01 : f32
    %294 = vector.broadcast %cst_98 : f32 to vector<1x7xf32>
    %295 = arith.mulf %293, %294 : vector<1x7xf32>
    %296 = math.exp %295 : vector<1x7xf32>
    %297 = arith.mulf %27, %296 : vector<1x7xf32>
    %298 = vector.broadcast %297 : vector<1x7xf32> to vector<2x7xf32>
    %299 = arith.mulf %298, %290 : vector<2x7xf32>
    %cst_99 = arith.constant dense<0.000000e+00> : vector<2xf32>
    %300 = vector.multi_reduction <add>, %299, %cst_99 [1] : vector<2x7xf32> to vector<2xf32>
    %301 = vector.shape_cast %300 : vector<2xf32> to vector<2x1xf32>
    %cst_100 = arith.constant 9.99999974E-5 : f32
    %302 = vector.broadcast %cst_100 : f32 to vector<2x1xf32>
    %303 = arith.mulf %302, %288 : vector<2x1xf32>
    %304 = arith.addf %301, %303 : vector<2x1xf32>
    %cst_101 = arith.constant 0.899999976 : f32
    %305 = vector.broadcast %cst_101 : f32 to vector<2x1xf32>
    %306 = arith.mulf %305, %272 : vector<2x1xf32>
    %cst_102 = arith.constant 1.000000e-01 : f32
    %307 = vector.broadcast %cst_102 : f32 to vector<2x1xf32>
    %308 = arith.mulf %307, %304 : vector<2x1xf32>
    %309 = arith.addf %306, %308 : vector<2x1xf32>
    %cst_103 = arith.constant 9.990000e-01 : f32
    %310 = vector.broadcast %cst_103 : f32 to vector<2x1xf32>
    %311 = arith.mulf %310, %278 : vector<2x1xf32>
    %cst_104 = arith.constant 1.000000e-03 : f32
    %312 = vector.broadcast %cst_104 : f32 to vector<2x1xf32>
    %313 = arith.mulf %312, %304 : vector<2x1xf32>
    %314 = arith.mulf %313, %304 : vector<2x1xf32>
    %315 = arith.addf %311, %314 : vector<2x1xf32>
    %316 = math.sqrt %315 : vector<2x1xf32>
    %cst_105 = arith.constant 11.1999178 : f32
    %317 = vector.broadcast %cst_105 : f32 to vector<2x1xf32>
    %318 = arith.mulf %316, %317 : vector<2x1xf32>
    %cst_106 = arith.constant 9.99999993E-9 : f32
    %319 = vector.broadcast %cst_106 : f32 to vector<2x1xf32>
    %320 = arith.addf %318, %319 : vector<2x1xf32>
    %cst_107 = arith.constant 0.0877912566 : f32
    %321 = vector.broadcast %cst_107 : f32 to vector<2x1xf32>
    %322 = arith.mulf %321, %309 : vector<2x1xf32>
    %323 = tpu.reciprocal %320 {approx = true} : vector<2x1xf32> -> vector<2x1xf32>
    %324 = arith.mulf %322, %323 : vector<2x1xf32>
    %325 = arith.subf %288, %324 : vector<2x1xf32>
    %326 = vector.broadcast %325 : vector<2x1xf32> to vector<2x7xf32>
    %327 = arith.subf %326, %4 : vector<2x7xf32>
    %328 = arith.mulf %327, %327 : vector<2x7xf32>
    %cst_108 = arith.constant dense<0.000000e+00> : vector<7xf32>
    %329 = vector.multi_reduction <add>, %328, %cst_108 [0] : vector<2x7xf32> to vector<7xf32>
    %330 = vector.shape_cast %329 : vector<7xf32> to vector<1x7xf32>
    %cst_109 = arith.constant -5.000000e-01 : f32
    %331 = vector.broadcast %cst_109 : f32 to vector<1x7xf32>
    %332 = arith.mulf %330, %331 : vector<1x7xf32>
    %333 = math.exp %332 : vector<1x7xf32>
    %334 = arith.mulf %27, %333 : vector<1x7xf32>
    %335 = vector.broadcast %334 : vector<1x7xf32> to vector<2x7xf32>
    %336 = arith.mulf %335, %327 : vector<2x7xf32>
    %cst_110 = arith.constant dense<0.000000e+00> : vector<2xf32>
    %337 = vector.multi_reduction <add>, %336, %cst_110 [1] : vector<2x7xf32> to vector<2xf32>
    %338 = vector.shape_cast %337 : vector<2xf32> to vector<2x1xf32>
    %cst_111 = arith.constant 9.99999974E-5 : f32
    %339 = vector.broadcast %cst_111 : f32 to vector<2x1xf32>
    %340 = arith.mulf %339, %325 : vector<2x1xf32>
    %341 = arith.addf %338, %340 : vector<2x1xf32>
    %cst_112 = arith.constant 0.899999976 : f32
    %342 = vector.broadcast %cst_112 : f32 to vector<2x1xf32>
    %343 = arith.mulf %342, %309 : vector<2x1xf32>
    %cst_113 = arith.constant 1.000000e-01 : f32
    %344 = vector.broadcast %cst_113 : f32 to vector<2x1xf32>
    %345 = arith.mulf %344, %341 : vector<2x1xf32>
    %346 = arith.addf %343, %345 : vector<2x1xf32>
    %cst_114 = arith.constant 9.990000e-01 : f32
    %347 = vector.broadcast %cst_114 : f32 to vector<2x1xf32>
    %348 = arith.mulf %347, %315 : vector<2x1xf32>
    %cst_115 = arith.constant 1.000000e-03 : f32
    %349 = vector.broadcast %cst_115 : f32 to vector<2x1xf32>
    %350 = arith.mulf %349, %341 : vector<2x1xf32>
    %351 = arith.mulf %350, %341 : vector<2x1xf32>
    %352 = arith.addf %348, %351 : vector<2x1xf32>
    %353 = math.sqrt %352 : vector<2x1xf32>
    %cst_116 = arith.constant 10.5620213 : f32
    %354 = vector.broadcast %cst_116 : f32 to vector<2x1xf32>
    %355 = arith.mulf %353, %354 : vector<2x1xf32>
    %cst_117 = arith.constant 9.99999993E-9 : f32
    %356 = vector.broadcast %cst_117 : f32 to vector<2x1xf32>
    %357 = arith.addf %355, %356 : vector<2x1xf32>
    %cst_118 = arith.constant 0.0816220566 : f32
    %358 = vector.broadcast %cst_118 : f32 to vector<2x1xf32>
    %359 = arith.mulf %358, %346 : vector<2x1xf32>
    %360 = tpu.reciprocal %357 {approx = true} : vector<2x1xf32> -> vector<2x1xf32>
    %361 = arith.mulf %359, %360 : vector<2x1xf32>
    %362 = arith.subf %325, %361 : vector<2x1xf32>
    %363 = vector.broadcast %362 : vector<2x1xf32> to vector<2x7xf32>
    %364 = arith.subf %363, %4 : vector<2x7xf32>
    %365 = arith.mulf %364, %364 : vector<2x7xf32>
    %cst_119 = arith.constant dense<0.000000e+00> : vector<7xf32>
    %366 = vector.multi_reduction <add>, %365, %cst_119 [0] : vector<2x7xf32> to vector<7xf32>
    %367 = vector.shape_cast %366 : vector<7xf32> to vector<1x7xf32>
    %cst_120 = arith.constant -5.000000e-01 : f32
    %368 = vector.broadcast %cst_120 : f32 to vector<1x7xf32>
    %369 = arith.mulf %367, %368 : vector<1x7xf32>
    %370 = math.exp %369 : vector<1x7xf32>
    %371 = arith.mulf %27, %370 : vector<1x7xf32>
    %372 = vector.broadcast %371 : vector<1x7xf32> to vector<2x7xf32>
    %373 = arith.mulf %372, %364 : vector<2x7xf32>
    %cst_121 = arith.constant dense<0.000000e+00> : vector<2xf32>
    %374 = vector.multi_reduction <add>, %373, %cst_121 [1] : vector<2x7xf32> to vector<2xf32>
    %375 = vector.shape_cast %374 : vector<2xf32> to vector<2x1xf32>
    %cst_122 = arith.constant 9.99999974E-5 : f32
    %376 = vector.broadcast %cst_122 : f32 to vector<2x1xf32>
    %377 = arith.mulf %376, %362 : vector<2x1xf32>
    %378 = arith.addf %375, %377 : vector<2x1xf32>
    %cst_123 = arith.constant 0.899999976 : f32
    %379 = vector.broadcast %cst_123 : f32 to vector<2x1xf32>
    %380 = arith.mulf %379, %346 : vector<2x1xf32>
    %cst_124 = arith.constant 1.000000e-01 : f32
    %381 = vector.broadcast %cst_124 : f32 to vector<2x1xf32>
    %382 = arith.mulf %381, %378 : vector<2x1xf32>
    %383 = arith.addf %380, %382 : vector<2x1xf32>
    %cst_125 = arith.constant 9.990000e-01 : f32
    %384 = vector.broadcast %cst_125 : f32 to vector<2x1xf32>
    %385 = arith.mulf %384, %352 : vector<2x1xf32>
    %cst_126 = arith.constant 1.000000e-03 : f32
    %386 = vector.broadcast %cst_126 : f32 to vector<2x1xf32>
    %387 = arith.mulf %386, %378 : vector<2x1xf32>
    %388 = arith.mulf %387, %378 : vector<2x1xf32>
    %389 = arith.addf %385, %388 : vector<2x1xf32>
    %390 = math.sqrt %389 : vector<2x1xf32>
    %cst_127 = arith.constant 10.0225163 : f32
    %391 = vector.broadcast %cst_127 : f32 to vector<2x1xf32>
    %392 = arith.mulf %390, %391 : vector<2x1xf32>
    %cst_128 = arith.constant 9.99999993E-9 : f32
    %393 = vector.broadcast %cst_128 : f32 to vector<2x1xf32>
    %394 = arith.addf %392, %393 : vector<2x1xf32>
    %cst_129 = arith.constant 0.0767669975 : f32
    %395 = vector.broadcast %cst_129 : f32 to vector<2x1xf32>
    %396 = arith.mulf %395, %383 : vector<2x1xf32>
    %397 = tpu.reciprocal %394 {approx = true} : vector<2x1xf32> -> vector<2x1xf32>
    %398 = arith.mulf %396, %397 : vector<2x1xf32>
    %399 = arith.subf %362, %398 : vector<2x1xf32>
    %400 = vector.broadcast %399 : vector<2x1xf32> to vector<2x7xf32>
    %401 = arith.subf %400, %4 : vector<2x7xf32>
    %402 = arith.mulf %401, %401 : vector<2x7xf32>
    %cst_130 = arith.constant dense<0.000000e+00> : vector<7xf32>
    %403 = vector.multi_reduction <add>, %402, %cst_130 [0] : vector<2x7xf32> to vector<7xf32>
    %404 = vector.shape_cast %403 : vector<7xf32> to vector<1x7xf32>
    %cst_131 = arith.constant -5.000000e-01 : f32
    %405 = vector.broadcast %cst_131 : f32 to vector<1x7xf32>
    %406 = arith.mulf %404, %405 : vector<1x7xf32>
    %407 = math.exp %406 : vector<1x7xf32>
    %408 = arith.mulf %27, %407 : vector<1x7xf32>
    %409 = vector.broadcast %408 : vector<1x7xf32> to vector<2x7xf32>
    %410 = arith.mulf %409, %401 : vector<2x7xf32>
    %cst_132 = arith.constant dense<0.000000e+00> : vector<2xf32>
    %411 = vector.multi_reduction <add>, %410, %cst_132 [1] : vector<2x7xf32> to vector<2xf32>
    %412 = vector.shape_cast %411 : vector<2xf32> to vector<2x1xf32>
    %cst_133 = arith.constant 9.99999974E-5 : f32
    %413 = vector.broadcast %cst_133 : f32 to vector<2x1xf32>
    %414 = arith.mulf %413, %399 : vector<2x1xf32>
    %415 = arith.addf %412, %414 : vector<2x1xf32>
    %cst_134 = arith.constant 0.899999976 : f32
    %416 = vector.broadcast %cst_134 : f32 to vector<2x1xf32>
    %417 = arith.mulf %416, %383 : vector<2x1xf32>
    %cst_135 = arith.constant 1.000000e-01 : f32
    %418 = vector.broadcast %cst_135 : f32 to vector<2x1xf32>
    %419 = arith.mulf %418, %415 : vector<2x1xf32>
    %420 = arith.addf %417, %419 : vector<2x1xf32>
    %cst_136 = arith.constant 9.990000e-01 : f32
    %421 = vector.broadcast %cst_136 : f32 to vector<2x1xf32>
    %422 = arith.mulf %421, %389 : vector<2x1xf32>
    %cst_137 = arith.constant 1.000000e-03 : f32
    %423 = vector.broadcast %cst_137 : f32 to vector<2x1xf32>
    %424 = arith.mulf %423, %415 : vector<2x1xf32>
    %425 = arith.mulf %424, %415 : vector<2x1xf32>
    %426 = arith.addf %422, %425 : vector<2x1xf32>
    %427 = math.sqrt %426 : vector<2x1xf32>
    %cst_138 = arith.constant 9.558480e+00 : f32
    %428 = vector.broadcast %cst_138 : f32 to vector<2x1xf32>
    %429 = arith.mulf %427, %428 : vector<2x1xf32>
    %cst_139 = arith.constant 9.99999993E-9 : f32
    %430 = vector.broadcast %cst_139 : f32 to vector<2x1xf32>
    %431 = arith.addf %429, %430 : vector<2x1xf32>
    %cst_140 = arith.constant 0.072866179 : f32
    %432 = vector.broadcast %cst_140 : f32 to vector<2x1xf32>
    %433 = arith.mulf %432, %420 : vector<2x1xf32>
    %434 = tpu.reciprocal %431 {approx = true} : vector<2x1xf32> -> vector<2x1xf32>
    %435 = arith.mulf %433, %434 : vector<2x1xf32>
    %436 = arith.subf %399, %435 : vector<2x1xf32>
    %437 = vector.broadcast %436 : vector<2x1xf32> to vector<2x7xf32>
    %438 = arith.subf %437, %4 : vector<2x7xf32>
    %439 = arith.mulf %438, %438 : vector<2x7xf32>
    %cst_141 = arith.constant dense<0.000000e+00> : vector<7xf32>
    %440 = vector.multi_reduction <add>, %439, %cst_141 [0] : vector<2x7xf32> to vector<7xf32>
    %441 = vector.shape_cast %440 : vector<7xf32> to vector<1x7xf32>
    %cst_142 = arith.constant -5.000000e-01 : f32
    %442 = vector.broadcast %cst_142 : f32 to vector<1x7xf32>
    %443 = arith.mulf %441, %442 : vector<1x7xf32>
    %444 = math.exp %443 : vector<1x7xf32>
    %445 = arith.mulf %27, %444 : vector<1x7xf32>
    %446 = vector.broadcast %445 : vector<1x7xf32> to vector<2x7xf32>
    %447 = arith.mulf %446, %438 : vector<2x7xf32>
    %cst_143 = arith.constant dense<0.000000e+00> : vector<2xf32>
    %448 = vector.multi_reduction <add>, %447, %cst_143 [1] : vector<2x7xf32> to vector<2xf32>
    %449 = vector.shape_cast %448 : vector<2xf32> to vector<2x1xf32>
    %cst_144 = arith.constant 9.99999974E-5 : f32
    %450 = vector.broadcast %cst_144 : f32 to vector<2x1xf32>
    %451 = arith.mulf %450, %436 : vector<2x1xf32>
    %452 = arith.addf %449, %451 : vector<2x1xf32>
    %cst_145 = arith.constant 0.899999976 : f32
    %453 = vector.broadcast %cst_145 : f32 to vector<2x1xf32>
    %454 = arith.mulf %453, %420 : vector<2x1xf32>
    %cst_146 = arith.constant 1.000000e-01 : f32
    %455 = vector.broadcast %cst_146 : f32 to vector<2x1xf32>
    %456 = arith.mulf %455, %452 : vector<2x1xf32>
    %457 = arith.addf %454, %456 : vector<2x1xf32>
    %cst_147 = arith.constant 9.990000e-01 : f32
    %458 = vector.broadcast %cst_147 : f32 to vector<2x1xf32>
    %459 = arith.mulf %458, %426 : vector<2x1xf32>
    %cst_148 = arith.constant 1.000000e-03 : f32
    %460 = vector.broadcast %cst_148 : f32 to vector<2x1xf32>
    %461 = arith.mulf %460, %452 : vector<2x1xf32>
    %462 = arith.mulf %461, %452 : vector<2x1xf32>
    %463 = arith.addf %459, %462 : vector<2x1xf32>
    %464 = math.sqrt %463 : vector<2x1xf32>
    %cst_149 = arith.constant 9.15383338 : f32
    %465 = vector.broadcast %cst_149 : f32 to vector<2x1xf32>
    %466 = arith.mulf %464, %465 : vector<2x1xf32>
    %cst_150 = arith.constant 9.99999993E-9 : f32
    %467 = vector.broadcast %cst_150 : f32 to vector<2x1xf32>
    %468 = arith.addf %466, %467 : vector<2x1xf32>
    %cst_151 = arith.constant 0.0696795657 : f32
    %469 = vector.broadcast %cst_151 : f32 to vector<2x1xf32>
    %470 = arith.mulf %469, %457 : vector<2x1xf32>
    %471 = tpu.reciprocal %468 {approx = true} : vector<2x1xf32> -> vector<2x1xf32>
    %472 = arith.mulf %470, %471 : vector<2x1xf32>
    %473 = arith.subf %436, %472 : vector<2x1xf32>
    %474 = vector.broadcast %473 : vector<2x1xf32> to vector<2x7xf32>
    %475 = arith.subf %474, %4 : vector<2x7xf32>
    %476 = arith.mulf %475, %475 : vector<2x7xf32>
    %cst_152 = arith.constant dense<0.000000e+00> : vector<7xf32>
    %477 = vector.multi_reduction <add>, %476, %cst_152 [0] : vector<2x7xf32> to vector<7xf32>
    %478 = vector.shape_cast %477 : vector<7xf32> to vector<1x7xf32>
    %cst_153 = arith.constant -5.000000e-01 : f32
    %479 = vector.broadcast %cst_153 : f32 to vector<1x7xf32>
    %480 = arith.mulf %478, %479 : vector<1x7xf32>
    %481 = math.exp %480 : vector<1x7xf32>
    %482 = arith.mulf %27, %481 : vector<1x7xf32>
    %483 = vector.broadcast %482 : vector<1x7xf32> to vector<2x7xf32>
    %484 = arith.mulf %483, %475 : vector<2x7xf32>
    %cst_154 = arith.constant dense<0.000000e+00> : vector<2xf32>
    %485 = vector.multi_reduction <add>, %484, %cst_154 [1] : vector<2x7xf32> to vector<2xf32>
    %486 = vector.shape_cast %485 : vector<2xf32> to vector<2x1xf32>
    %cst_155 = arith.constant 9.99999974E-5 : f32
    %487 = vector.broadcast %cst_155 : f32 to vector<2x1xf32>
    %488 = arith.mulf %487, %473 : vector<2x1xf32>
    %489 = arith.addf %486, %488 : vector<2x1xf32>
    %cst_156 = arith.constant 0.899999976 : f32
    %490 = vector.broadcast %cst_156 : f32 to vector<2x1xf32>
    %491 = arith.mulf %490, %457 : vector<2x1xf32>
    %cst_157 = arith.constant 1.000000e-01 : f32
    %492 = vector.broadcast %cst_157 : f32 to vector<2x1xf32>
    %493 = arith.mulf %492, %489 : vector<2x1xf32>
    %494 = arith.addf %491, %493 : vector<2x1xf32>
    %cst_158 = arith.constant 9.990000e-01 : f32
    %495 = vector.broadcast %cst_158 : f32 to vector<2x1xf32>
    %496 = arith.mulf %495, %463 : vector<2x1xf32>
    %cst_159 = arith.constant 1.000000e-03 : f32
    %497 = vector.broadcast %cst_159 : f32 to vector<2x1xf32>
    %498 = arith.mulf %497, %489 : vector<2x1xf32>
    %499 = arith.mulf %498, %489 : vector<2x1xf32>
    %500 = arith.addf %496, %499 : vector<2x1xf32>
    %501 = math.sqrt %500 : vector<2x1xf32>
    %cst_160 = arith.constant 8.7969141 : f32
    %502 = vector.broadcast %cst_160 : f32 to vector<2x1xf32>
    %503 = arith.mulf %501, %502 : vector<2x1xf32>
    %cst_161 = arith.constant 9.99999993E-9 : f32
    %504 = vector.broadcast %cst_161 : f32 to vector<2x1xf32>
    %505 = arith.addf %503, %504 : vector<2x1xf32>
    %cst_162 = arith.constant 6.704090e-02 : f32
    %506 = vector.broadcast %cst_162 : f32 to vector<2x1xf32>
    %507 = arith.mulf %506, %494 : vector<2x1xf32>
    %508 = tpu.reciprocal %505 {approx = true} : vector<2x1xf32> -> vector<2x1xf32>
    %509 = arith.mulf %507, %508 : vector<2x1xf32>
    %510 = arith.subf %473, %509 : vector<2x1xf32>
    %511 = vector.broadcast %510 : vector<2x1xf32> to vector<2x7xf32>
    %512 = arith.subf %511, %4 : vector<2x7xf32>
    %513 = arith.mulf %512, %512 : vector<2x7xf32>
    %cst_163 = arith.constant dense<0.000000e+00> : vector<7xf32>
    %514 = vector.multi_reduction <add>, %513, %cst_163 [0] : vector<2x7xf32> to vector<7xf32>
    %515 = vector.shape_cast %514 : vector<7xf32> to vector<1x7xf32>
    %cst_164 = arith.constant -5.000000e-01 : f32
    %516 = vector.broadcast %cst_164 : f32 to vector<1x7xf32>
    %517 = arith.mulf %515, %516 : vector<1x7xf32>
    %518 = math.exp %517 : vector<1x7xf32>
    %519 = arith.mulf %27, %518 : vector<1x7xf32>
    %520 = vector.broadcast %519 : vector<1x7xf32> to vector<2x7xf32>
    %521 = arith.mulf %520, %512 : vector<2x7xf32>
    %cst_165 = arith.constant dense<0.000000e+00> : vector<2xf32>
    %522 = vector.multi_reduction <add>, %521, %cst_165 [1] : vector<2x7xf32> to vector<2xf32>
    %523 = vector.shape_cast %522 : vector<2xf32> to vector<2x1xf32>
    %cst_166 = arith.constant 9.99999974E-5 : f32
    %524 = vector.broadcast %cst_166 : f32 to vector<2x1xf32>
    %525 = arith.mulf %524, %510 : vector<2x1xf32>
    %526 = arith.addf %523, %525 : vector<2x1xf32>
    %cst_167 = arith.constant 0.899999976 : f32
    %527 = vector.broadcast %cst_167 : f32 to vector<2x1xf32>
    %528 = arith.mulf %527, %494 : vector<2x1xf32>
    %cst_168 = arith.constant 1.000000e-01 : f32
    %529 = vector.broadcast %cst_168 : f32 to vector<2x1xf32>
    %530 = arith.mulf %529, %526 : vector<2x1xf32>
    %531 = arith.addf %528, %530 : vector<2x1xf32>
    %cst_169 = arith.constant 9.990000e-01 : f32
    %532 = vector.broadcast %cst_169 : f32 to vector<2x1xf32>
    %533 = arith.mulf %532, %500 : vector<2x1xf32>
    %cst_170 = arith.constant 1.000000e-03 : f32
    %534 = vector.broadcast %cst_170 : f32 to vector<2x1xf32>
    %535 = arith.mulf %534, %526 : vector<2x1xf32>
    %536 = arith.mulf %535, %526 : vector<2x1xf32>
    %537 = arith.addf %533, %536 : vector<2x1xf32>
    %538 = math.sqrt %537 : vector<2x1xf32>
    %cst_171 = arith.constant 8.47903442 : f32
    %539 = vector.broadcast %cst_171 : f32 to vector<2x1xf32>
    %540 = arith.mulf %538, %539 : vector<2x1xf32>
    %cst_172 = arith.constant 9.99999993E-9 : f32
    %541 = vector.broadcast %cst_172 : f32 to vector<2x1xf32>
    %542 = arith.addf %540, %541 : vector<2x1xf32>
    %cst_173 = arith.constant 0.0648313314 : f32
    %543 = vector.broadcast %cst_173 : f32 to vector<2x1xf32>
    %544 = arith.mulf %543, %531 : vector<2x1xf32>
    %545 = tpu.reciprocal %542 {approx = true} : vector<2x1xf32> -> vector<2x1xf32>
    %546 = arith.mulf %544, %545 : vector<2x1xf32>
    %547 = arith.subf %510, %546 : vector<2x1xf32>
    %548 = vector.broadcast %547 : vector<2x1xf32> to vector<2x7xf32>
    %549 = arith.subf %548, %4 : vector<2x7xf32>
    %550 = arith.mulf %549, %549 : vector<2x7xf32>
    %cst_174 = arith.constant dense<0.000000e+00> : vector<7xf32>
    %551 = vector.multi_reduction <add>, %550, %cst_174 [0] : vector<2x7xf32> to vector<7xf32>
    %552 = vector.shape_cast %551 : vector<7xf32> to vector<1x7xf32>
    %cst_175 = arith.constant -5.000000e-01 : f32
    %553 = vector.broadcast %cst_175 : f32 to vector<1x7xf32>
    %554 = arith.mulf %552, %553 : vector<1x7xf32>
    %555 = math.exp %554 : vector<1x7xf32>
    %556 = arith.mulf %27, %555 : vector<1x7xf32>
    %557 = vector.broadcast %556 : vector<1x7xf32> to vector<2x7xf32>
    %558 = arith.mulf %557, %549 : vector<2x7xf32>
    %cst_176 = arith.constant dense<0.000000e+00> : vector<2xf32>
    %559 = vector.multi_reduction <add>, %558, %cst_176 [1] : vector<2x7xf32> to vector<2xf32>
    %560 = vector.shape_cast %559 : vector<2xf32> to vector<2x1xf32>
    %cst_177 = arith.constant 9.99999974E-5 : f32
    %561 = vector.broadcast %cst_177 : f32 to vector<2x1xf32>
    %562 = arith.mulf %561, %547 : vector<2x1xf32>
    %563 = arith.addf %560, %562 : vector<2x1xf32>
    %cst_178 = arith.constant 0.899999976 : f32
    %564 = vector.broadcast %cst_178 : f32 to vector<2x1xf32>
    %565 = arith.mulf %564, %531 : vector<2x1xf32>
    %cst_179 = arith.constant 1.000000e-01 : f32
    %566 = vector.broadcast %cst_179 : f32 to vector<2x1xf32>
    %567 = arith.mulf %566, %563 : vector<2x1xf32>
    %568 = arith.addf %565, %567 : vector<2x1xf32>
    %cst_180 = arith.constant 9.990000e-01 : f32
    %569 = vector.broadcast %cst_180 : f32 to vector<2x1xf32>
    %570 = arith.mulf %569, %537 : vector<2x1xf32>
    %cst_181 = arith.constant 1.000000e-03 : f32
    %571 = vector.broadcast %cst_181 : f32 to vector<2x1xf32>
    %572 = arith.mulf %571, %563 : vector<2x1xf32>
    %573 = arith.mulf %572, %563 : vector<2x1xf32>
    %574 = arith.addf %570, %573 : vector<2x1xf32>
    %575 = math.sqrt %574 : vector<2x1xf32>
    %cst_182 = arith.constant 8.19356918 : f32
    %576 = vector.broadcast %cst_182 : f32 to vector<2x1xf32>
    %577 = arith.mulf %575, %576 : vector<2x1xf32>
    %cst_183 = arith.constant 9.99999993E-9 : f32
    %578 = vector.broadcast %cst_183 : f32 to vector<2x1xf32>
    %579 = arith.addf %577, %578 : vector<2x1xf32>
    %cst_184 = arith.constant 0.0629636571 : f32
    %580 = vector.broadcast %cst_184 : f32 to vector<2x1xf32>
    %581 = arith.mulf %580, %568 : vector<2x1xf32>
    %582 = tpu.reciprocal %579 {approx = true} : vector<2x1xf32> -> vector<2x1xf32>
    %583 = arith.mulf %581, %582 : vector<2x1xf32>
    %584 = arith.subf %547, %583 : vector<2x1xf32>
    %585 = vector.broadcast %584 : vector<2x1xf32> to vector<2x7xf32>
    %586 = arith.subf %585, %4 : vector<2x7xf32>
    %587 = arith.mulf %586, %586 : vector<2x7xf32>
    %cst_185 = arith.constant dense<0.000000e+00> : vector<7xf32>
    %588 = vector.multi_reduction <add>, %587, %cst_185 [0] : vector<2x7xf32> to vector<7xf32>
    %589 = vector.shape_cast %588 : vector<7xf32> to vector<1x7xf32>
    %cst_186 = arith.constant -5.000000e-01 : f32
    %590 = vector.broadcast %cst_186 : f32 to vector<1x7xf32>
    %591 = arith.mulf %589, %590 : vector<1x7xf32>
    %592 = math.exp %591 : vector<1x7xf32>
    %593 = arith.mulf %27, %592 : vector<1x7xf32>
    %594 = vector.broadcast %593 : vector<1x7xf32> to vector<2x7xf32>
    %595 = arith.mulf %594, %586 : vector<2x7xf32>
    %cst_187 = arith.constant dense<0.000000e+00> : vector<2xf32>
    %596 = vector.multi_reduction <add>, %595, %cst_187 [1] : vector<2x7xf32> to vector<2xf32>
    %597 = vector.shape_cast %596 : vector<2xf32> to vector<2x1xf32>
    %cst_188 = arith.constant 9.99999974E-5 : f32
    %598 = vector.broadcast %cst_188 : f32 to vector<2x1xf32>
    %599 = arith.mulf %598, %584 : vector<2x1xf32>
    %600 = arith.addf %597, %599 : vector<2x1xf32>
    %cst_189 = arith.constant 0.899999976 : f32
    %601 = vector.broadcast %cst_189 : f32 to vector<2x1xf32>
    %602 = arith.mulf %601, %568 : vector<2x1xf32>
    %cst_190 = arith.constant 1.000000e-01 : f32
    %603 = vector.broadcast %cst_190 : f32 to vector<2x1xf32>
    %604 = arith.mulf %603, %600 : vector<2x1xf32>
    %605 = arith.addf %602, %604 : vector<2x1xf32>
    %cst_191 = arith.constant 9.990000e-01 : f32
    %606 = vector.broadcast %cst_191 : f32 to vector<2x1xf32>
    %607 = arith.mulf %606, %574 : vector<2x1xf32>
    %cst_192 = arith.constant 1.000000e-03 : f32
    %608 = vector.broadcast %cst_192 : f32 to vector<2x1xf32>
    %609 = arith.mulf %608, %600 : vector<2x1xf32>
    %610 = arith.mulf %609, %600 : vector<2x1xf32>
    %611 = arith.addf %607, %610 : vector<2x1xf32>
    %612 = math.sqrt %611 : vector<2x1xf32>
    %cst_193 = arith.constant 7.93536901 : f32
    %613 = vector.broadcast %cst_193 : f32 to vector<2x1xf32>
    %614 = arith.mulf %612, %613 : vector<2x1xf32>
    %cst_194 = arith.constant 9.99999993E-9 : f32
    %615 = vector.broadcast %cst_194 : f32 to vector<2x1xf32>
    %616 = arith.addf %614, %615 : vector<2x1xf32>
    %cst_195 = arith.constant 0.0613724366 : f32
    %617 = vector.broadcast %cst_195 : f32 to vector<2x1xf32>
    %618 = arith.mulf %617, %605 : vector<2x1xf32>
    %619 = tpu.reciprocal %616 {approx = true} : vector<2x1xf32> -> vector<2x1xf32>
    %620 = arith.mulf %618, %619 : vector<2x1xf32>
    %621 = arith.subf %584, %620 : vector<2x1xf32>
    %622 = vector.broadcast %621 : vector<2x1xf32> to vector<2x7xf32>
    %623 = arith.subf %622, %4 : vector<2x7xf32>
    %624 = arith.mulf %623, %623 : vector<2x7xf32>
    %cst_196 = arith.constant dense<0.000000e+00> : vector<7xf32>
    %625 = vector.multi_reduction <add>, %624, %cst_196 [0] : vector<2x7xf32> to vector<7xf32>
    %626 = vector.shape_cast %625 : vector<7xf32> to vector<1x7xf32>
    %cst_197 = arith.constant -5.000000e-01 : f32
    %627 = vector.broadcast %cst_197 : f32 to vector<1x7xf32>
    %628 = arith.mulf %626, %627 : vector<1x7xf32>
    %629 = math.exp %628 : vector<1x7xf32>
    %630 = arith.mulf %27, %629 : vector<1x7xf32>
    %631 = vector.broadcast %630 : vector<1x7xf32> to vector<2x7xf32>
    %632 = arith.mulf %631, %623 : vector<2x7xf32>
    %cst_198 = arith.constant dense<0.000000e+00> : vector<2xf32>
    %633 = vector.multi_reduction <add>, %632, %cst_198 [1] : vector<2x7xf32> to vector<2xf32>
    %634 = vector.shape_cast %633 : vector<2xf32> to vector<2x1xf32>
    %cst_199 = arith.constant 9.99999974E-5 : f32
    %635 = vector.broadcast %cst_199 : f32 to vector<2x1xf32>
    %636 = arith.mulf %635, %621 : vector<2x1xf32>
    %637 = arith.addf %634, %636 : vector<2x1xf32>
    %cst_200 = arith.constant 0.899999976 : f32
    %638 = vector.broadcast %cst_200 : f32 to vector<2x1xf32>
    %639 = arith.mulf %638, %605 : vector<2x1xf32>
    %cst_201 = arith.constant 1.000000e-01 : f32
    %640 = vector.broadcast %cst_201 : f32 to vector<2x1xf32>
    %641 = arith.mulf %640, %637 : vector<2x1xf32>
    %642 = arith.addf %639, %641 : vector<2x1xf32>
    %cst_202 = arith.constant 9.990000e-01 : f32
    %643 = vector.broadcast %cst_202 : f32 to vector<2x1xf32>
    %644 = arith.mulf %643, %611 : vector<2x1xf32>
    %cst_203 = arith.constant 1.000000e-03 : f32
    %645 = vector.broadcast %cst_203 : f32 to vector<2x1xf32>
    %646 = arith.mulf %645, %637 : vector<2x1xf32>
    %647 = arith.mulf %646, %637 : vector<2x1xf32>
    %648 = arith.addf %644, %647 : vector<2x1xf32>
    %649 = math.sqrt %648 : vector<2x1xf32>
    %cst_204 = arith.constant 7.70035887 : f32
    %650 = vector.broadcast %cst_204 : f32 to vector<2x1xf32>
    %651 = arith.mulf %649, %650 : vector<2x1xf32>
    %cst_205 = arith.constant 9.99999993E-9 : f32
    %652 = vector.broadcast %cst_205 : f32 to vector<2x1xf32>
    %653 = arith.addf %651, %652 : vector<2x1xf32>
    %cst_206 = arith.constant 0.0600075722 : f32
    %654 = vector.broadcast %cst_206 : f32 to vector<2x1xf32>
    %655 = arith.mulf %654, %642 : vector<2x1xf32>
    %656 = tpu.reciprocal %653 {approx = true} : vector<2x1xf32> -> vector<2x1xf32>
    %657 = arith.mulf %655, %656 : vector<2x1xf32>
    %658 = arith.subf %621, %657 : vector<2x1xf32>
    %659 = vector.broadcast %658 : vector<2x1xf32> to vector<2x7xf32>
    %660 = arith.subf %659, %4 : vector<2x7xf32>
    %661 = arith.mulf %660, %660 : vector<2x7xf32>
    %cst_207 = arith.constant dense<0.000000e+00> : vector<7xf32>
    %662 = vector.multi_reduction <add>, %661, %cst_207 [0] : vector<2x7xf32> to vector<7xf32>
    %663 = vector.shape_cast %662 : vector<7xf32> to vector<1x7xf32>
    %cst_208 = arith.constant -5.000000e-01 : f32
    %664 = vector.broadcast %cst_208 : f32 to vector<1x7xf32>
    %665 = arith.mulf %663, %664 : vector<1x7xf32>
    %666 = math.exp %665 : vector<1x7xf32>
    %667 = arith.mulf %27, %666 : vector<1x7xf32>
    %668 = vector.broadcast %667 : vector<1x7xf32> to vector<2x7xf32>
    %669 = arith.mulf %668, %660 : vector<2x7xf32>
    %cst_209 = arith.constant dense<0.000000e+00> : vector<2xf32>
    %670 = vector.multi_reduction <add>, %669, %cst_209 [1] : vector<2x7xf32> to vector<2xf32>
    %671 = vector.shape_cast %670 : vector<2xf32> to vector<2x1xf32>
    %cst_210 = arith.constant 9.99999974E-5 : f32
    %672 = vector.broadcast %cst_210 : f32 to vector<2x1xf32>
    %673 = arith.mulf %672, %658 : vector<2x1xf32>
    %674 = arith.addf %671, %673 : vector<2x1xf32>
    %cst_211 = arith.constant 0.899999976 : f32
    %675 = vector.broadcast %cst_211 : f32 to vector<2x1xf32>
    %676 = arith.mulf %675, %642 : vector<2x1xf32>
    %cst_212 = arith.constant 1.000000e-01 : f32
    %677 = vector.broadcast %cst_212 : f32 to vector<2x1xf32>
    %678 = arith.mulf %677, %674 : vector<2x1xf32>
    %679 = arith.addf %676, %678 : vector<2x1xf32>
    %cst_213 = arith.constant 9.990000e-01 : f32
    %680 = vector.broadcast %cst_213 : f32 to vector<2x1xf32>
    %681 = arith.mulf %680, %648 : vector<2x1xf32>
    %cst_214 = arith.constant 1.000000e-03 : f32
    %682 = vector.broadcast %cst_214 : f32 to vector<2x1xf32>
    %683 = arith.mulf %682, %674 : vector<2x1xf32>
    %684 = arith.mulf %683, %674 : vector<2x1xf32>
    %685 = arith.addf %681, %684 : vector<2x1xf32>
    %686 = math.sqrt %685 : vector<2x1xf32>
    %cst_215 = arith.constant 7.4852705 : f32
    %687 = vector.broadcast %cst_215 : f32 to vector<2x1xf32>
    %688 = arith.mulf %686, %687 : vector<2x1xf32>
    %cst_216 = arith.constant 9.99999993E-9 : f32
    %689 = vector.broadcast %cst_216 : f32 to vector<2x1xf32>
    %690 = arith.addf %688, %689 : vector<2x1xf32>
    %cst_217 = arith.constant 0.0588300787 : f32
    %691 = vector.broadcast %cst_217 : f32 to vector<2x1xf32>
    %692 = arith.mulf %691, %679 : vector<2x1xf32>
    %693 = tpu.reciprocal %690 {approx = true} : vector<2x1xf32> -> vector<2x1xf32>
    %694 = arith.mulf %692, %693 : vector<2x1xf32>
    %695 = arith.subf %658, %694 : vector<2x1xf32>
    %696 = vector.broadcast %695 : vector<2x1xf32> to vector<2x7xf32>
    %697 = arith.subf %696, %4 : vector<2x7xf32>
    %698 = arith.mulf %697, %697 : vector<2x7xf32>
    %cst_218 = arith.constant dense<0.000000e+00> : vector<7xf32>
    %699 = vector.multi_reduction <add>, %698, %cst_218 [0] : vector<2x7xf32> to vector<7xf32>
    %700 = vector.shape_cast %699 : vector<7xf32> to vector<1x7xf32>
    %cst_219 = arith.constant -5.000000e-01 : f32
    %701 = vector.broadcast %cst_219 : f32 to vector<1x7xf32>
    %702 = arith.mulf %700, %701 : vector<1x7xf32>
    %703 = math.exp %702 : vector<1x7xf32>
    %704 = arith.mulf %27, %703 : vector<1x7xf32>
    %705 = vector.broadcast %704 : vector<1x7xf32> to vector<2x7xf32>
    %706 = arith.mulf %705, %697 : vector<2x7xf32>
    %cst_220 = arith.constant dense<0.000000e+00> : vector<2xf32>
    %707 = vector.multi_reduction <add>, %706, %cst_220 [1] : vector<2x7xf32> to vector<2xf32>
    %708 = vector.shape_cast %707 : vector<2xf32> to vector<2x1xf32>
    %cst_221 = arith.constant 9.99999974E-5 : f32
    %709 = vector.broadcast %cst_221 : f32 to vector<2x1xf32>
    %710 = arith.mulf %709, %695 : vector<2x1xf32>
    %711 = arith.addf %708, %710 : vector<2x1xf32>
    %cst_222 = arith.constant 0.899999976 : f32
    %712 = vector.broadcast %cst_222 : f32 to vector<2x1xf32>
    %713 = arith.mulf %712, %679 : vector<2x1xf32>
    %cst_223 = arith.constant 1.000000e-01 : f32
    %714 = vector.broadcast %cst_223 : f32 to vector<2x1xf32>
    %715 = arith.mulf %714, %711 : vector<2x1xf32>
    %716 = arith.addf %713, %715 : vector<2x1xf32>
    %cst_224 = arith.constant 9.990000e-01 : f32
    %717 = vector.broadcast %cst_224 : f32 to vector<2x1xf32>
    %718 = arith.mulf %717, %685 : vector<2x1xf32>
    %cst_225 = arith.constant 1.000000e-03 : f32
    %719 = vector.broadcast %cst_225 : f32 to vector<2x1xf32>
    %720 = arith.mulf %719, %711 : vector<2x1xf32>
    %721 = arith.mulf %720, %711 : vector<2x1xf32>
    %722 = arith.addf %718, %721 : vector<2x1xf32>
    %723 = math.sqrt %722 : vector<2x1xf32>
    %cst_226 = arith.constant 7.28744411 : f32
    %724 = vector.broadcast %cst_226 : f32 to vector<2x1xf32>
    %725 = arith.mulf %723, %724 : vector<2x1xf32>
    %cst_227 = arith.constant 9.99999993E-9 : f32
    %726 = vector.broadcast %cst_227 : f32 to vector<2x1xf32>
    %727 = arith.addf %725, %726 : vector<2x1xf32>
    %cst_228 = arith.constant 0.0578091592 : f32
    %728 = vector.broadcast %cst_228 : f32 to vector<2x1xf32>
    %729 = arith.mulf %728, %716 : vector<2x1xf32>
    %730 = tpu.reciprocal %727 {approx = true} : vector<2x1xf32> -> vector<2x1xf32>
    %731 = arith.mulf %729, %730 : vector<2x1xf32>
    %732 = arith.subf %695, %731 : vector<2x1xf32>
    %733 = vector.broadcast %732 : vector<2x1xf32> to vector<2x7xf32>
    %734 = arith.subf %733, %4 : vector<2x7xf32>
    %735 = arith.mulf %734, %734 : vector<2x7xf32>
    %cst_229 = arith.constant dense<0.000000e+00> : vector<7xf32>
    %736 = vector.multi_reduction <add>, %735, %cst_229 [0] : vector<2x7xf32> to vector<7xf32>
    %737 = vector.shape_cast %736 : vector<7xf32> to vector<1x7xf32>
    %cst_230 = arith.constant -5.000000e-01 : f32
    %738 = vector.broadcast %cst_230 : f32 to vector<1x7xf32>
    %739 = arith.mulf %737, %738 : vector<1x7xf32>
    %740 = math.exp %739 : vector<1x7xf32>
    %741 = arith.mulf %27, %740 : vector<1x7xf32>
    %742 = vector.broadcast %741 : vector<1x7xf32> to vector<2x7xf32>
    %743 = arith.mulf %742, %734 : vector<2x7xf32>
    %cst_231 = arith.constant dense<0.000000e+00> : vector<2xf32>
    %744 = vector.multi_reduction <add>, %743, %cst_231 [1] : vector<2x7xf32> to vector<2xf32>
    %745 = vector.shape_cast %744 : vector<2xf32> to vector<2x1xf32>
    %cst_232 = arith.constant 9.99999974E-5 : f32
    %746 = vector.broadcast %cst_232 : f32 to vector<2x1xf32>
    %747 = arith.mulf %746, %732 : vector<2x1xf32>
    %748 = arith.addf %745, %747 : vector<2x1xf32>
    %cst_233 = arith.constant 0.899999976 : f32
    %749 = vector.broadcast %cst_233 : f32 to vector<2x1xf32>
    %750 = arith.mulf %749, %716 : vector<2x1xf32>
    %cst_234 = arith.constant 1.000000e-01 : f32
    %751 = vector.broadcast %cst_234 : f32 to vector<2x1xf32>
    %752 = arith.mulf %751, %748 : vector<2x1xf32>
    %753 = arith.addf %750, %752 : vector<2x1xf32>
    %cst_235 = arith.constant 9.990000e-01 : f32
    %754 = vector.broadcast %cst_235 : f32 to vector<2x1xf32>
    %755 = arith.mulf %754, %722 : vector<2x1xf32>
    %cst_236 = arith.constant 1.000000e-03 : f32
    %756 = vector.broadcast %cst_236 : f32 to vector<2x1xf32>
    %757 = arith.mulf %756, %748 : vector<2x1xf32>
    %758 = arith.mulf %757, %748 : vector<2x1xf32>
    %759 = arith.addf %755, %758 : vector<2x1xf32>
    %760 = math.sqrt %759 : vector<2x1xf32>
    %cst_237 = arith.constant 7.10469294 : f32
    %761 = vector.broadcast %cst_237 : f32 to vector<2x1xf32>
    %762 = arith.mulf %760, %761 : vector<2x1xf32>
    %cst_238 = arith.constant 9.99999993E-9 : f32
    %763 = vector.broadcast %cst_238 : f32 to vector<2x1xf32>
    %764 = arith.addf %762, %763 : vector<2x1xf32>
    %cst_239 = arith.constant 0.0569201633 : f32
    %765 = vector.broadcast %cst_239 : f32 to vector<2x1xf32>
    %766 = arith.mulf %765, %753 : vector<2x1xf32>
    %767 = tpu.reciprocal %764 {approx = true} : vector<2x1xf32> -> vector<2x1xf32>
    %768 = arith.mulf %766, %767 : vector<2x1xf32>
    %769 = arith.subf %732, %768 : vector<2x1xf32>
    %770 = vector.broadcast %769 : vector<2x1xf32> to vector<2x7xf32>
    %771 = arith.subf %770, %4 : vector<2x7xf32>
    %772 = arith.mulf %771, %771 : vector<2x7xf32>
    %cst_240 = arith.constant dense<0.000000e+00> : vector<7xf32>
    %773 = vector.multi_reduction <add>, %772, %cst_240 [0] : vector<2x7xf32> to vector<7xf32>
    %774 = vector.shape_cast %773 : vector<7xf32> to vector<1x7xf32>
    %cst_241 = arith.constant -5.000000e-01 : f32
    %775 = vector.broadcast %cst_241 : f32 to vector<1x7xf32>
    %776 = arith.mulf %774, %775 : vector<1x7xf32>
    %777 = math.exp %776 : vector<1x7xf32>
    %778 = arith.mulf %27, %777 : vector<1x7xf32>
    %779 = vector.broadcast %778 : vector<1x7xf32> to vector<2x7xf32>
    %780 = arith.mulf %779, %771 : vector<2x7xf32>
    %cst_242 = arith.constant dense<0.000000e+00> : vector<2xf32>
    %781 = vector.multi_reduction <add>, %780, %cst_242 [1] : vector<2x7xf32> to vector<2xf32>
    %782 = vector.shape_cast %781 : vector<2xf32> to vector<2x1xf32>
    %cst_243 = arith.constant 9.99999974E-5 : f32
    %783 = vector.broadcast %cst_243 : f32 to vector<2x1xf32>
    %784 = arith.mulf %783, %769 : vector<2x1xf32>
    %785 = arith.addf %782, %784 : vector<2x1xf32>
    %cst_244 = arith.constant 0.899999976 : f32
    %786 = vector.broadcast %cst_244 : f32 to vector<2x1xf32>
    %787 = arith.mulf %786, %753 : vector<2x1xf32>
    %cst_245 = arith.constant 1.000000e-01 : f32
    %788 = vector.broadcast %cst_245 : f32 to vector<2x1xf32>
    %789 = arith.mulf %788, %785 : vector<2x1xf32>
    %790 = arith.addf %787, %789 : vector<2x1xf32>
    %cst_246 = arith.constant 9.990000e-01 : f32
    %791 = vector.broadcast %cst_246 : f32 to vector<2x1xf32>
    %792 = arith.mulf %791, %759 : vector<2x1xf32>
    %cst_247 = arith.constant 1.000000e-03 : f32
    %793 = vector.broadcast %cst_247 : f32 to vector<2x1xf32>
    %794 = arith.mulf %793, %785 : vector<2x1xf32>
    %795 = arith.mulf %794, %785 : vector<2x1xf32>
    %796 = arith.addf %792, %795 : vector<2x1xf32>
    %797 = math.sqrt %796 : vector<2x1xf32>
    %cst_248 = arith.constant 6.93519878 : f32
    %798 = vector.broadcast %cst_248 : f32 to vector<2x1xf32>
    %799 = arith.mulf %797, %798 : vector<2x1xf32>
    %cst_249 = arith.constant 9.99999993E-9 : f32
    %800 = vector.broadcast %cst_249 : f32 to vector<2x1xf32>
    %801 = arith.addf %799, %800 : vector<2x1xf32>
    %cst_250 = arith.constant 0.0561431237 : f32
    %802 = vector.broadcast %cst_250 : f32 to vector<2x1xf32>
    %803 = arith.mulf %802, %790 : vector<2x1xf32>
    %804 = tpu.reciprocal %801 {approx = true} : vector<2x1xf32> -> vector<2x1xf32>
    %805 = arith.mulf %803, %804 : vector<2x1xf32>
    %806 = arith.subf %769, %805 : vector<2x1xf32>
    %807 = vector.broadcast %806 : vector<2x1xf32> to vector<2x7xf32>
    %808 = arith.subf %807, %4 : vector<2x7xf32>
    %809 = arith.mulf %808, %808 : vector<2x7xf32>
    %cst_251 = arith.constant dense<0.000000e+00> : vector<7xf32>
    %810 = vector.multi_reduction <add>, %809, %cst_251 [0] : vector<2x7xf32> to vector<7xf32>
    %811 = vector.shape_cast %810 : vector<7xf32> to vector<1x7xf32>
    %cst_252 = arith.constant -5.000000e-01 : f32
    %812 = vector.broadcast %cst_252 : f32 to vector<1x7xf32>
    %813 = arith.mulf %811, %812 : vector<1x7xf32>
    %814 = math.exp %813 : vector<1x7xf32>
    %815 = arith.mulf %27, %814 : vector<1x7xf32>
    %816 = vector.broadcast %815 : vector<1x7xf32> to vector<2x7xf32>
    %817 = arith.mulf %816, %808 : vector<2x7xf32>
    %cst_253 = arith.constant dense<0.000000e+00> : vector<2xf32>
    %818 = vector.multi_reduction <add>, %817, %cst_253 [1] : vector<2x7xf32> to vector<2xf32>
    %819 = vector.shape_cast %818 : vector<2xf32> to vector<2x1xf32>
    %cst_254 = arith.constant 9.99999974E-5 : f32
    %820 = vector.broadcast %cst_254 : f32 to vector<2x1xf32>
    %821 = arith.mulf %820, %806 : vector<2x1xf32>
    %822 = arith.addf %819, %821 : vector<2x1xf32>
    %cst_255 = arith.constant 0.899999976 : f32
    %823 = vector.broadcast %cst_255 : f32 to vector<2x1xf32>
    %824 = arith.mulf %823, %790 : vector<2x1xf32>
    %cst_256 = arith.constant 1.000000e-01 : f32
    %825 = vector.broadcast %cst_256 : f32 to vector<2x1xf32>
    %826 = arith.mulf %825, %822 : vector<2x1xf32>
    %827 = arith.addf %824, %826 : vector<2x1xf32>
    %cst_257 = arith.constant 9.990000e-01 : f32
    %828 = vector.broadcast %cst_257 : f32 to vector<2x1xf32>
    %829 = arith.mulf %828, %796 : vector<2x1xf32>
    %cst_258 = arith.constant 1.000000e-03 : f32
    %830 = vector.broadcast %cst_258 : f32 to vector<2x1xf32>
    %831 = arith.mulf %830, %822 : vector<2x1xf32>
    %832 = arith.mulf %831, %822 : vector<2x1xf32>
    %833 = arith.addf %829, %832 : vector<2x1xf32>
    %834 = math.sqrt %833 : vector<2x1xf32>
    %cst_259 = arith.constant 6.77743673 : f32
    %835 = vector.broadcast %cst_259 : f32 to vector<2x1xf32>
    %836 = arith.mulf %834, %835 : vector<2x1xf32>
    %cst_260 = arith.constant 9.99999993E-9 : f32
    %837 = vector.broadcast %cst_260 : f32 to vector<2x1xf32>
    %838 = arith.addf %836, %837 : vector<2x1xf32>
    %cst_261 = arith.constant 0.0554617085 : f32
    %839 = vector.broadcast %cst_261 : f32 to vector<2x1xf32>
    %840 = arith.mulf %839, %827 : vector<2x1xf32>
    %841 = tpu.reciprocal %838 {approx = true} : vector<2x1xf32> -> vector<2x1xf32>
    %842 = arith.mulf %840, %841 : vector<2x1xf32>
    %843 = arith.subf %806, %842 : vector<2x1xf32>
    %844 = vector.broadcast %843 : vector<2x1xf32> to vector<2x7xf32>
    %845 = arith.subf %844, %4 : vector<2x7xf32>
    %846 = arith.mulf %845, %845 : vector<2x7xf32>
    %cst_262 = arith.constant dense<0.000000e+00> : vector<7xf32>
    %847 = vector.multi_reduction <add>, %846, %cst_262 [0] : vector<2x7xf32> to vector<7xf32>
    %848 = vector.shape_cast %847 : vector<7xf32> to vector<1x7xf32>
    %cst_263 = arith.constant -5.000000e-01 : f32
    %849 = vector.broadcast %cst_263 : f32 to vector<1x7xf32>
    %850 = arith.mulf %848, %849 : vector<1x7xf32>
    %851 = math.exp %850 : vector<1x7xf32>
    %852 = arith.mulf %27, %851 : vector<1x7xf32>
    %853 = vector.broadcast %852 : vector<1x7xf32> to vector<2x7xf32>
    %854 = arith.mulf %853, %845 : vector<2x7xf32>
    %cst_264 = arith.constant dense<0.000000e+00> : vector<2xf32>
    %855 = vector.multi_reduction <add>, %854, %cst_264 [1] : vector<2x7xf32> to vector<2xf32>
    %856 = vector.shape_cast %855 : vector<2xf32> to vector<2x1xf32>
    %cst_265 = arith.constant 9.99999974E-5 : f32
    %857 = vector.broadcast %cst_265 : f32 to vector<2x1xf32>
    %858 = arith.mulf %857, %843 : vector<2x1xf32>
    %859 = arith.addf %856, %858 : vector<2x1xf32>
    %cst_266 = arith.constant 0.899999976 : f32
    %860 = vector.broadcast %cst_266 : f32 to vector<2x1xf32>
    %861 = arith.mulf %860, %827 : vector<2x1xf32>
    %cst_267 = arith.constant 1.000000e-01 : f32
    %862 = vector.broadcast %cst_267 : f32 to vector<2x1xf32>
    %863 = arith.mulf %862, %859 : vector<2x1xf32>
    %864 = arith.addf %861, %863 : vector<2x1xf32>
    %cst_268 = arith.constant 9.990000e-01 : f32
    %865 = vector.broadcast %cst_268 : f32 to vector<2x1xf32>
    %866 = arith.mulf %865, %833 : vector<2x1xf32>
    %cst_269 = arith.constant 1.000000e-03 : f32
    %867 = vector.broadcast %cst_269 : f32 to vector<2x1xf32>
    %868 = arith.mulf %867, %859 : vector<2x1xf32>
    %869 = arith.mulf %868, %859 : vector<2x1xf32>
    %870 = arith.addf %866, %869 : vector<2x1xf32>
    %871 = math.sqrt %870 : vector<2x1xf32>
    %cst_270 = arith.constant 6.63011599 : f32
    %872 = vector.broadcast %cst_270 : f32 to vector<2x1xf32>
    %873 = arith.mulf %871, %872 : vector<2x1xf32>
    %cst_271 = arith.constant 9.99999993E-9 : f32
    %874 = vector.broadcast %cst_271 : f32 to vector<2x1xf32>
    %875 = arith.addf %873, %874 : vector<2x1xf32>
    %cst_272 = arith.constant 0.054862421 : f32
    %876 = vector.broadcast %cst_272 : f32 to vector<2x1xf32>
    %877 = arith.mulf %876, %864 : vector<2x1xf32>
    %878 = tpu.reciprocal %875 {approx = true} : vector<2x1xf32> -> vector<2x1xf32>
    %879 = arith.mulf %877, %878 : vector<2x1xf32>
    %880 = arith.subf %843, %879 : vector<2x1xf32>
    %881 = vector.broadcast %880 : vector<2x1xf32> to vector<2x7xf32>
    %882 = arith.subf %881, %4 : vector<2x7xf32>
    %883 = arith.mulf %882, %882 : vector<2x7xf32>
    %cst_273 = arith.constant dense<0.000000e+00> : vector<7xf32>
    %884 = vector.multi_reduction <add>, %883, %cst_273 [0] : vector<2x7xf32> to vector<7xf32>
    %885 = vector.shape_cast %884 : vector<7xf32> to vector<1x7xf32>
    %cst_274 = arith.constant -5.000000e-01 : f32
    %886 = vector.broadcast %cst_274 : f32 to vector<1x7xf32>
    %887 = arith.mulf %885, %886 : vector<1x7xf32>
    %888 = math.exp %887 : vector<1x7xf32>
    %889 = arith.mulf %27, %888 : vector<1x7xf32>
    %890 = vector.broadcast %889 : vector<1x7xf32> to vector<2x7xf32>
    %891 = arith.mulf %890, %882 : vector<2x7xf32>
    %cst_275 = arith.constant dense<0.000000e+00> : vector<2xf32>
    %892 = vector.multi_reduction <add>, %891, %cst_275 [1] : vector<2x7xf32> to vector<2xf32>
    %893 = vector.shape_cast %892 : vector<2xf32> to vector<2x1xf32>
    %cst_276 = arith.constant 9.99999974E-5 : f32
    %894 = vector.broadcast %cst_276 : f32 to vector<2x1xf32>
    %895 = arith.mulf %894, %880 : vector<2x1xf32>
    %896 = arith.addf %893, %895 : vector<2x1xf32>
    %cst_277 = arith.constant 0.899999976 : f32
    %897 = vector.broadcast %cst_277 : f32 to vector<2x1xf32>
    %898 = arith.mulf %897, %864 : vector<2x1xf32>
    %cst_278 = arith.constant 1.000000e-01 : f32
    %899 = vector.broadcast %cst_278 : f32 to vector<2x1xf32>
    %900 = arith.mulf %899, %896 : vector<2x1xf32>
    %901 = arith.addf %898, %900 : vector<2x1xf32>
    %cst_279 = arith.constant 9.990000e-01 : f32
    %902 = vector.broadcast %cst_279 : f32 to vector<2x1xf32>
    %903 = arith.mulf %902, %870 : vector<2x1xf32>
    %cst_280 = arith.constant 1.000000e-03 : f32
    %904 = vector.broadcast %cst_280 : f32 to vector<2x1xf32>
    %905 = arith.mulf %904, %896 : vector<2x1xf32>
    %906 = arith.mulf %905, %896 : vector<2x1xf32>
    %907 = arith.addf %903, %906 : vector<2x1xf32>
    %908 = math.sqrt %907 : vector<2x1xf32>
    %cst_281 = arith.constant 6.492136 : f32
    %909 = vector.broadcast %cst_281 : f32 to vector<2x1xf32>
    %910 = arith.mulf %908, %909 : vector<2x1xf32>
    %cst_282 = arith.constant 9.99999993E-9 : f32
    %911 = vector.broadcast %cst_282 : f32 to vector<2x1xf32>
    %912 = arith.addf %910, %911 : vector<2x1xf32>
    %cst_283 = arith.constant 0.0543340333 : f32
    %913 = vector.broadcast %cst_283 : f32 to vector<2x1xf32>
    %914 = arith.mulf %913, %901 : vector<2x1xf32>
    %915 = tpu.reciprocal %912 {approx = true} : vector<2x1xf32> -> vector<2x1xf32>
    %916 = arith.mulf %914, %915 : vector<2x1xf32>
    %917 = arith.subf %880, %916 : vector<2x1xf32>
    %918 = vector.broadcast %917 : vector<2x1xf32> to vector<2x7xf32>
    %919 = arith.subf %918, %4 : vector<2x7xf32>
    %920 = arith.mulf %919, %919 : vector<2x7xf32>
    %cst_284 = arith.constant dense<0.000000e+00> : vector<7xf32>
    %921 = vector.multi_reduction <add>, %920, %cst_284 [0] : vector<2x7xf32> to vector<7xf32>
    %922 = vector.shape_cast %921 : vector<7xf32> to vector<1x7xf32>
    %cst_285 = arith.constant -5.000000e-01 : f32
    %923 = vector.broadcast %cst_285 : f32 to vector<1x7xf32>
    %924 = arith.mulf %922, %923 : vector<1x7xf32>
    %925 = math.exp %924 : vector<1x7xf32>
    %926 = arith.mulf %27, %925 : vector<1x7xf32>
    %927 = vector.broadcast %926 : vector<1x7xf32> to vector<2x7xf32>
    %928 = arith.mulf %927, %919 : vector<2x7xf32>
    %cst_286 = arith.constant dense<0.000000e+00> : vector<2xf32>
    %929 = vector.multi_reduction <add>, %928, %cst_286 [1] : vector<2x7xf32> to vector<2xf32>
    %930 = vector.shape_cast %929 : vector<2xf32> to vector<2x1xf32>
    %cst_287 = arith.constant 9.99999974E-5 : f32
    %931 = vector.broadcast %cst_287 : f32 to vector<2x1xf32>
    %932 = arith.mulf %931, %917 : vector<2x1xf32>
    %933 = arith.addf %930, %932 : vector<2x1xf32>
    %cst_288 = arith.constant 0.899999976 : f32
    %934 = vector.broadcast %cst_288 : f32 to vector<2x1xf32>
    %935 = arith.mulf %934, %901 : vector<2x1xf32>
    %cst_289 = arith.constant 1.000000e-01 : f32
    %936 = vector.broadcast %cst_289 : f32 to vector<2x1xf32>
    %937 = arith.mulf %936, %933 : vector<2x1xf32>
    %938 = arith.addf %935, %937 : vector<2x1xf32>
    %cst_290 = arith.constant 9.990000e-01 : f32
    %939 = vector.broadcast %cst_290 : f32 to vector<2x1xf32>
    %940 = arith.mulf %939, %907 : vector<2x1xf32>
    %cst_291 = arith.constant 1.000000e-03 : f32
    %941 = vector.broadcast %cst_291 : f32 to vector<2x1xf32>
    %942 = arith.mulf %941, %933 : vector<2x1xf32>
    %943 = arith.mulf %942, %933 : vector<2x1xf32>
    %944 = arith.addf %940, %943 : vector<2x1xf32>
    %945 = math.sqrt %944 : vector<2x1xf32>
    %cst_292 = arith.constant 6.36255312 : f32
    %946 = vector.broadcast %cst_292 : f32 to vector<2x1xf32>
    %947 = arith.mulf %945, %946 : vector<2x1xf32>
    %cst_293 = arith.constant 9.99999993E-9 : f32
    %948 = vector.broadcast %cst_293 : f32 to vector<2x1xf32>
    %949 = arith.addf %947, %948 : vector<2x1xf32>
    %cst_294 = arith.constant 0.0538671091 : f32
    %950 = vector.broadcast %cst_294 : f32 to vector<2x1xf32>
    %951 = arith.mulf %950, %938 : vector<2x1xf32>
    %952 = tpu.reciprocal %949 {approx = true} : vector<2x1xf32> -> vector<2x1xf32>
    %953 = arith.mulf %951, %952 : vector<2x1xf32>
    %954 = arith.subf %917, %953 : vector<2x1xf32>
    %955 = vector.broadcast %954 : vector<2x1xf32> to vector<2x7xf32>
    %956 = arith.subf %955, %4 : vector<2x7xf32>
    %957 = arith.mulf %956, %956 : vector<2x7xf32>
    %cst_295 = arith.constant dense<0.000000e+00> : vector<7xf32>
    %958 = vector.multi_reduction <add>, %957, %cst_295 [0] : vector<2x7xf32> to vector<7xf32>
    %959 = vector.shape_cast %958 : vector<7xf32> to vector<1x7xf32>
    %cst_296 = arith.constant -5.000000e-01 : f32
    %960 = vector.broadcast %cst_296 : f32 to vector<1x7xf32>
    %961 = arith.mulf %959, %960 : vector<1x7xf32>
    %962 = math.exp %961 : vector<1x7xf32>
    %963 = arith.mulf %27, %962 : vector<1x7xf32>
    %964 = vector.broadcast %963 : vector<1x7xf32> to vector<2x7xf32>
    %965 = arith.mulf %964, %956 : vector<2x7xf32>
    %cst_297 = arith.constant dense<0.000000e+00> : vector<2xf32>
    %966 = vector.multi_reduction <add>, %965, %cst_297 [1] : vector<2x7xf32> to vector<2xf32>
    %967 = vector.shape_cast %966 : vector<2xf32> to vector<2x1xf32>
    %cst_298 = arith.constant 9.99999974E-5 : f32
    %968 = vector.broadcast %cst_298 : f32 to vector<2x1xf32>
    %969 = arith.mulf %968, %954 : vector<2x1xf32>
    %970 = arith.addf %967, %969 : vector<2x1xf32>
    %cst_299 = arith.constant 0.899999976 : f32
    %971 = vector.broadcast %cst_299 : f32 to vector<2x1xf32>
    %972 = arith.mulf %971, %938 : vector<2x1xf32>
    %cst_300 = arith.constant 1.000000e-01 : f32
    %973 = vector.broadcast %cst_300 : f32 to vector<2x1xf32>
    %974 = arith.mulf %973, %970 : vector<2x1xf32>
    %975 = arith.addf %972, %974 : vector<2x1xf32>
    %cst_301 = arith.constant 9.990000e-01 : f32
    %976 = vector.broadcast %cst_301 : f32 to vector<2x1xf32>
    %977 = arith.mulf %976, %944 : vector<2x1xf32>
    %cst_302 = arith.constant 1.000000e-03 : f32
    %978 = vector.broadcast %cst_302 : f32 to vector<2x1xf32>
    %979 = arith.mulf %978, %970 : vector<2x1xf32>
    %980 = arith.mulf %979, %970 : vector<2x1xf32>
    %981 = arith.addf %977, %980 : vector<2x1xf32>
    %982 = math.sqrt %981 : vector<2x1xf32>
    %cst_303 = arith.constant 6.24055052 : f32
    %983 = vector.broadcast %cst_303 : f32 to vector<2x1xf32>
    %984 = arith.mulf %982, %983 : vector<2x1xf32>
    %cst_304 = arith.constant 9.99999993E-9 : f32
    %985 = vector.broadcast %cst_304 : f32 to vector<2x1xf32>
    %986 = arith.addf %984, %985 : vector<2x1xf32>
    %cst_305 = arith.constant 0.0534536876 : f32
    %987 = vector.broadcast %cst_305 : f32 to vector<2x1xf32>
    %988 = arith.mulf %987, %975 : vector<2x1xf32>
    %989 = tpu.reciprocal %986 {approx = true} : vector<2x1xf32> -> vector<2x1xf32>
    %990 = arith.mulf %988, %989 : vector<2x1xf32>
    %991 = arith.subf %954, %990 : vector<2x1xf32>
    %992 = vector.broadcast %991 : vector<2x1xf32> to vector<2x7xf32>
    %993 = arith.subf %992, %4 : vector<2x7xf32>
    %994 = arith.mulf %993, %993 : vector<2x7xf32>
    %cst_306 = arith.constant dense<0.000000e+00> : vector<7xf32>
    %995 = vector.multi_reduction <add>, %994, %cst_306 [0] : vector<2x7xf32> to vector<7xf32>
    %996 = vector.shape_cast %995 : vector<7xf32> to vector<1x7xf32>
    %cst_307 = arith.constant -5.000000e-01 : f32
    %997 = vector.broadcast %cst_307 : f32 to vector<1x7xf32>
    %998 = arith.mulf %996, %997 : vector<1x7xf32>
    %999 = math.exp %998 : vector<1x7xf32>
    %1000 = arith.mulf %27, %999 : vector<1x7xf32>
    %1001 = vector.broadcast %1000 : vector<1x7xf32> to vector<2x7xf32>
    %1002 = arith.mulf %1001, %993 : vector<2x7xf32>
    %cst_308 = arith.constant dense<0.000000e+00> : vector<2xf32>
    %1003 = vector.multi_reduction <add>, %1002, %cst_308 [1] : vector<2x7xf32> to vector<2xf32>
    %1004 = vector.shape_cast %1003 : vector<2xf32> to vector<2x1xf32>
    %cst_309 = arith.constant 9.99999974E-5 : f32
    %1005 = vector.broadcast %cst_309 : f32 to vector<2x1xf32>
    %1006 = arith.mulf %1005, %991 : vector<2x1xf32>
    %1007 = arith.addf %1004, %1006 : vector<2x1xf32>
    %cst_310 = arith.constant 0.899999976 : f32
    %1008 = vector.broadcast %cst_310 : f32 to vector<2x1xf32>
    %1009 = arith.mulf %1008, %975 : vector<2x1xf32>
    %cst_311 = arith.constant 1.000000e-01 : f32
    %1010 = vector.broadcast %cst_311 : f32 to vector<2x1xf32>
    %1011 = arith.mulf %1010, %1007 : vector<2x1xf32>
    %1012 = arith.addf %1009, %1011 : vector<2x1xf32>
    %cst_312 = arith.constant 9.990000e-01 : f32
    %1013 = vector.broadcast %cst_312 : f32 to vector<2x1xf32>
    %1014 = arith.mulf %1013, %981 : vector<2x1xf32>
    %cst_313 = arith.constant 1.000000e-03 : f32
    %1015 = vector.broadcast %cst_313 : f32 to vector<2x1xf32>
    %1016 = arith.mulf %1015, %1007 : vector<2x1xf32>
    %1017 = arith.mulf %1016, %1007 : vector<2x1xf32>
    %1018 = arith.addf %1014, %1017 : vector<2x1xf32>
    %1019 = math.sqrt %1018 : vector<2x1xf32>
    %cst_314 = arith.constant 6.12541961 : f32
    %1020 = vector.broadcast %cst_314 : f32 to vector<2x1xf32>
    %1021 = arith.mulf %1019, %1020 : vector<2x1xf32>
    %cst_315 = arith.constant 9.99999993E-9 : f32
    %1022 = vector.broadcast %cst_315 : f32 to vector<2x1xf32>
    %1023 = arith.addf %1021, %1022 : vector<2x1xf32>
    %cst_316 = arith.constant 0.0530869961 : f32
    %1024 = vector.broadcast %cst_316 : f32 to vector<2x1xf32>
    %1025 = arith.mulf %1024, %1012 : vector<2x1xf32>
    %1026 = tpu.reciprocal %1023 {approx = true} : vector<2x1xf32> -> vector<2x1xf32>
    %1027 = arith.mulf %1025, %1026 : vector<2x1xf32>
    %1028 = arith.subf %991, %1027 : vector<2x1xf32>
    %1029 = vector.broadcast %1028 : vector<2x1xf32> to vector<2x7xf32>
    %1030 = arith.subf %1029, %4 : vector<2x7xf32>
    %1031 = arith.mulf %1030, %1030 : vector<2x7xf32>
    %cst_317 = arith.constant dense<0.000000e+00> : vector<7xf32>
    %1032 = vector.multi_reduction <add>, %1031, %cst_317 [0] : vector<2x7xf32> to vector<7xf32>
    %1033 = vector.shape_cast %1032 : vector<7xf32> to vector<1x7xf32>
    %cst_318 = arith.constant -5.000000e-01 : f32
    %1034 = vector.broadcast %cst_318 : f32 to vector<1x7xf32>
    %1035 = arith.mulf %1033, %1034 : vector<1x7xf32>
    %1036 = math.exp %1035 : vector<1x7xf32>
    %1037 = arith.mulf %27, %1036 : vector<1x7xf32>
    %1038 = vector.broadcast %1037 : vector<1x7xf32> to vector<2x7xf32>
    %1039 = arith.mulf %1038, %1030 : vector<2x7xf32>
    %cst_319 = arith.constant dense<0.000000e+00> : vector<2xf32>
    %1040 = vector.multi_reduction <add>, %1039, %cst_319 [1] : vector<2x7xf32> to vector<2xf32>
    %1041 = vector.shape_cast %1040 : vector<2xf32> to vector<2x1xf32>
    %cst_320 = arith.constant 9.99999974E-5 : f32
    %1042 = vector.broadcast %cst_320 : f32 to vector<2x1xf32>
    %1043 = arith.mulf %1042, %1028 : vector<2x1xf32>
    %1044 = arith.addf %1041, %1043 : vector<2x1xf32>
    %cst_321 = arith.constant 0.899999976 : f32
    %1045 = vector.broadcast %cst_321 : f32 to vector<2x1xf32>
    %1046 = arith.mulf %1045, %1012 : vector<2x1xf32>
    %cst_322 = arith.constant 1.000000e-01 : f32
    %1047 = vector.broadcast %cst_322 : f32 to vector<2x1xf32>
    %1048 = arith.mulf %1047, %1044 : vector<2x1xf32>
    %1049 = arith.addf %1046, %1048 : vector<2x1xf32>
    %cst_323 = arith.constant 9.990000e-01 : f32
    %1050 = vector.broadcast %cst_323 : f32 to vector<2x1xf32>
    %1051 = arith.mulf %1050, %1018 : vector<2x1xf32>
    %cst_324 = arith.constant 1.000000e-03 : f32
    %1052 = vector.broadcast %cst_324 : f32 to vector<2x1xf32>
    %1053 = arith.mulf %1052, %1044 : vector<2x1xf32>
    %1054 = arith.mulf %1053, %1044 : vector<2x1xf32>
    %1055 = arith.addf %1051, %1054 : vector<2x1xf32>
    %1056 = math.sqrt %1055 : vector<2x1xf32>
    %cst_325 = arith.constant 6.01654052 : f32
    %1057 = vector.broadcast %cst_325 : f32 to vector<2x1xf32>
    %1058 = arith.mulf %1056, %1057 : vector<2x1xf32>
    %cst_326 = arith.constant 9.99999993E-9 : f32
    %1059 = vector.broadcast %cst_326 : f32 to vector<2x1xf32>
    %1060 = arith.addf %1058, %1059 : vector<2x1xf32>
    %cst_327 = arith.constant 0.0527612492 : f32
    %1061 = vector.broadcast %cst_327 : f32 to vector<2x1xf32>
    %1062 = arith.mulf %1061, %1049 : vector<2x1xf32>
    %1063 = tpu.reciprocal %1060 {approx = true} : vector<2x1xf32> -> vector<2x1xf32>
    %1064 = arith.mulf %1062, %1063 : vector<2x1xf32>
    %1065 = arith.subf %1028, %1064 : vector<2x1xf32>
    %1066 = vector.broadcast %1065 : vector<2x1xf32> to vector<2x7xf32>
    %1067 = arith.subf %1066, %4 : vector<2x7xf32>
    %1068 = arith.mulf %1067, %1067 : vector<2x7xf32>
    %cst_328 = arith.constant dense<0.000000e+00> : vector<7xf32>
    %1069 = vector.multi_reduction <add>, %1068, %cst_328 [0] : vector<2x7xf32> to vector<7xf32>
    %1070 = vector.shape_cast %1069 : vector<7xf32> to vector<1x7xf32>
    %cst_329 = arith.constant -5.000000e-01 : f32
    %1071 = vector.broadcast %cst_329 : f32 to vector<1x7xf32>
    %1072 = arith.mulf %1070, %1071 : vector<1x7xf32>
    %1073 = math.exp %1072 : vector<1x7xf32>
    %1074 = arith.mulf %27, %1073 : vector<1x7xf32>
    %1075 = vector.broadcast %1074 : vector<1x7xf32> to vector<2x7xf32>
    %1076 = arith.mulf %1075, %1067 : vector<2x7xf32>
    %cst_330 = arith.constant dense<0.000000e+00> : vector<2xf32>
    %1077 = vector.multi_reduction <add>, %1076, %cst_330 [1] : vector<2x7xf32> to vector<2xf32>
    %1078 = vector.shape_cast %1077 : vector<2xf32> to vector<2x1xf32>
    %cst_331 = arith.constant 9.99999974E-5 : f32
    %1079 = vector.broadcast %cst_331 : f32 to vector<2x1xf32>
    %1080 = arith.mulf %1079, %1065 : vector<2x1xf32>
    %1081 = arith.addf %1078, %1080 : vector<2x1xf32>
    %cst_332 = arith.constant 0.899999976 : f32
    %1082 = vector.broadcast %cst_332 : f32 to vector<2x1xf32>
    %1083 = arith.mulf %1082, %1049 : vector<2x1xf32>
    %cst_333 = arith.constant 1.000000e-01 : f32
    %1084 = vector.broadcast %cst_333 : f32 to vector<2x1xf32>
    %1085 = arith.mulf %1084, %1081 : vector<2x1xf32>
    %1086 = arith.addf %1083, %1085 : vector<2x1xf32>
    %cst_334 = arith.constant 9.990000e-01 : f32
    %1087 = vector.broadcast %cst_334 : f32 to vector<2x1xf32>
    %1088 = arith.mulf %1087, %1055 : vector<2x1xf32>
    %cst_335 = arith.constant 1.000000e-03 : f32
    %1089 = vector.broadcast %cst_335 : f32 to vector<2x1xf32>
    %1090 = arith.mulf %1089, %1081 : vector<2x1xf32>
    %1091 = arith.mulf %1090, %1081 : vector<2x1xf32>
    %1092 = arith.addf %1088, %1091 : vector<2x1xf32>
    %1093 = math.sqrt %1092 : vector<2x1xf32>
    %cst_336 = arith.constant 5.9133687 : f32
    %1094 = vector.broadcast %cst_336 : f32 to vector<2x1xf32>
    %1095 = arith.mulf %1093, %1094 : vector<2x1xf32>
    %cst_337 = arith.constant 9.99999993E-9 : f32
    %1096 = vector.broadcast %cst_337 : f32 to vector<2x1xf32>
    %1097 = arith.addf %1095, %1096 : vector<2x1xf32>
    %cst_338 = arith.constant 0.0524714738 : f32
    %1098 = vector.broadcast %cst_338 : f32 to vector<2x1xf32>
    %1099 = arith.mulf %1098, %1086 : vector<2x1xf32>
    %1100 = tpu.reciprocal %1097 {approx = true} : vector<2x1xf32> -> vector<2x1xf32>
    %1101 = arith.mulf %1099, %1100 : vector<2x1xf32>
    %1102 = arith.subf %1065, %1101 : vector<2x1xf32>
    %1103 = vector.broadcast %1102 : vector<2x1xf32> to vector<2x7xf32>
    %1104 = arith.subf %1103, %4 : vector<2x7xf32>
    %1105 = arith.mulf %1104, %1104 : vector<2x7xf32>
    %cst_339 = arith.constant dense<0.000000e+00> : vector<7xf32>
    %1106 = vector.multi_reduction <add>, %1105, %cst_339 [0] : vector<2x7xf32> to vector<7xf32>
    %1107 = vector.shape_cast %1106 : vector<7xf32> to vector<1x7xf32>
    %cst_340 = arith.constant -5.000000e-01 : f32
    %1108 = vector.broadcast %cst_340 : f32 to vector<1x7xf32>
    %1109 = arith.mulf %1107, %1108 : vector<1x7xf32>
    %1110 = math.exp %1109 : vector<1x7xf32>
    %1111 = arith.mulf %27, %1110 : vector<1x7xf32>
    %1112 = vector.broadcast %1111 : vector<1x7xf32> to vector<2x7xf32>
    %1113 = arith.mulf %1112, %1104 : vector<2x7xf32>
    %cst_341 = arith.constant dense<0.000000e+00> : vector<2xf32>
    %1114 = vector.multi_reduction <add>, %1113, %cst_341 [1] : vector<2x7xf32> to vector<2xf32>
    %1115 = vector.shape_cast %1114 : vector<2xf32> to vector<2x1xf32>
    %cst_342 = arith.constant 9.99999974E-5 : f32
    %1116 = vector.broadcast %cst_342 : f32 to vector<2x1xf32>
    %1117 = arith.mulf %1116, %1102 : vector<2x1xf32>
    %1118 = arith.addf %1115, %1117 : vector<2x1xf32>
    %cst_343 = arith.constant 0.899999976 : f32
    %1119 = vector.broadcast %cst_343 : f32 to vector<2x1xf32>
    %1120 = arith.mulf %1119, %1086 : vector<2x1xf32>
    %cst_344 = arith.constant 1.000000e-01 : f32
    %1121 = vector.broadcast %cst_344 : f32 to vector<2x1xf32>
    %1122 = arith.mulf %1121, %1118 : vector<2x1xf32>
    %1123 = arith.addf %1120, %1122 : vector<2x1xf32>
    %cst_345 = arith.constant 9.990000e-01 : f32
    %1124 = vector.broadcast %cst_345 : f32 to vector<2x1xf32>
    %1125 = arith.mulf %1124, %1092 : vector<2x1xf32>
    %cst_346 = arith.constant 1.000000e-03 : f32
    %1126 = vector.broadcast %cst_346 : f32 to vector<2x1xf32>
    %1127 = arith.mulf %1126, %1118 : vector<2x1xf32>
    %1128 = arith.mulf %1127, %1118 : vector<2x1xf32>
    %1129 = arith.addf %1125, %1128 : vector<2x1xf32>
    %1130 = math.sqrt %1129 : vector<2x1xf32>
    %cst_347 = arith.constant 5.81542492 : f32
    %1131 = vector.broadcast %cst_347 : f32 to vector<2x1xf32>
    %1132 = arith.mulf %1130, %1131 : vector<2x1xf32>
    %cst_348 = arith.constant 9.99999993E-9 : f32
    %1133 = vector.broadcast %cst_348 : f32 to vector<2x1xf32>
    %1134 = arith.addf %1132, %1133 : vector<2x1xf32>
    %cst_349 = arith.constant 0.0522133857 : f32
    %1135 = vector.broadcast %cst_349 : f32 to vector<2x1xf32>
    %1136 = arith.mulf %1135, %1123 : vector<2x1xf32>
    %1137 = tpu.reciprocal %1134 {approx = true} : vector<2x1xf32> -> vector<2x1xf32>
    %1138 = arith.mulf %1136, %1137 : vector<2x1xf32>
    %1139 = arith.subf %1102, %1138 : vector<2x1xf32>
    %1140 = vector.broadcast %1139 : vector<2x1xf32> to vector<2x7xf32>
    %1141 = arith.subf %1140, %4 : vector<2x7xf32>
    %1142 = arith.mulf %1141, %1141 : vector<2x7xf32>
    %cst_350 = arith.constant dense<0.000000e+00> : vector<7xf32>
    %1143 = vector.multi_reduction <add>, %1142, %cst_350 [0] : vector<2x7xf32> to vector<7xf32>
    %1144 = vector.shape_cast %1143 : vector<7xf32> to vector<1x7xf32>
    %cst_351 = arith.constant -5.000000e-01 : f32
    %1145 = vector.broadcast %cst_351 : f32 to vector<1x7xf32>
    %1146 = arith.mulf %1144, %1145 : vector<1x7xf32>
    %1147 = math.exp %1146 : vector<1x7xf32>
    %1148 = arith.mulf %27, %1147 : vector<1x7xf32>
    %1149 = vector.broadcast %1148 : vector<1x7xf32> to vector<2x7xf32>
    %1150 = arith.mulf %1149, %1141 : vector<2x7xf32>
    %cst_352 = arith.constant dense<0.000000e+00> : vector<2xf32>
    %1151 = vector.multi_reduction <add>, %1150, %cst_352 [1] : vector<2x7xf32> to vector<2xf32>
    %1152 = vector.shape_cast %1151 : vector<2xf32> to vector<2x1xf32>
    %cst_353 = arith.constant 9.99999974E-5 : f32
    %1153 = vector.broadcast %cst_353 : f32 to vector<2x1xf32>
    %1154 = arith.mulf %1153, %1139 : vector<2x1xf32>
    %1155 = arith.addf %1152, %1154 : vector<2x1xf32>
    %cst_354 = arith.constant 0.899999976 : f32
    %1156 = vector.broadcast %cst_354 : f32 to vector<2x1xf32>
    %1157 = arith.mulf %1156, %1123 : vector<2x1xf32>
    %cst_355 = arith.constant 1.000000e-01 : f32
    %1158 = vector.broadcast %cst_355 : f32 to vector<2x1xf32>
    %1159 = arith.mulf %1158, %1155 : vector<2x1xf32>
    %1160 = arith.addf %1157, %1159 : vector<2x1xf32>
    %cst_356 = arith.constant 9.990000e-01 : f32
    %1161 = vector.broadcast %cst_356 : f32 to vector<2x1xf32>
    %1162 = arith.mulf %1161, %1129 : vector<2x1xf32>
    %cst_357 = arith.constant 1.000000e-03 : f32
    %1163 = vector.broadcast %cst_357 : f32 to vector<2x1xf32>
    %1164 = arith.mulf %1163, %1155 : vector<2x1xf32>
    %1165 = arith.mulf %1164, %1155 : vector<2x1xf32>
    %1166 = arith.addf %1162, %1165 : vector<2x1xf32>
    %1167 = math.sqrt %1166 : vector<2x1xf32>
    %cst_358 = arith.constant 5.72228241 : f32
    %1168 = vector.broadcast %cst_358 : f32 to vector<2x1xf32>
    %1169 = arith.mulf %1167, %1168 : vector<2x1xf32>
    %cst_359 = arith.constant 9.99999993E-9 : f32
    %1170 = vector.broadcast %cst_359 : f32 to vector<2x1xf32>
    %1171 = arith.addf %1169, %1170 : vector<2x1xf32>
    %cst_360 = arith.constant 0.0519832671 : f32
    %1172 = vector.broadcast %cst_360 : f32 to vector<2x1xf32>
    %1173 = arith.mulf %1172, %1160 : vector<2x1xf32>
    %1174 = tpu.reciprocal %1171 {approx = true} : vector<2x1xf32> -> vector<2x1xf32>
    %1175 = arith.mulf %1173, %1174 : vector<2x1xf32>
    %1176 = arith.subf %1139, %1175 : vector<2x1xf32>
    %1177 = vector.broadcast %1176 : vector<2x1xf32> to vector<2x7xf32>
    %1178 = arith.subf %1177, %4 : vector<2x7xf32>
    %1179 = arith.mulf %1178, %1178 : vector<2x7xf32>
    %cst_361 = arith.constant dense<0.000000e+00> : vector<7xf32>
    %1180 = vector.multi_reduction <add>, %1179, %cst_361 [0] : vector<2x7xf32> to vector<7xf32>
    %1181 = vector.shape_cast %1180 : vector<7xf32> to vector<1x7xf32>
    %cst_362 = arith.constant -5.000000e-01 : f32
    %1182 = vector.broadcast %cst_362 : f32 to vector<1x7xf32>
    %1183 = arith.mulf %1181, %1182 : vector<1x7xf32>
    %1184 = math.exp %1183 : vector<1x7xf32>
    %1185 = arith.mulf %27, %1184 : vector<1x7xf32>
    %1186 = vector.broadcast %1185 : vector<1x7xf32> to vector<2x7xf32>
    %1187 = arith.mulf %1186, %1178 : vector<2x7xf32>
    %cst_363 = arith.constant dense<0.000000e+00> : vector<2xf32>
    %1188 = vector.multi_reduction <add>, %1187, %cst_363 [1] : vector<2x7xf32> to vector<2xf32>
    %1189 = vector.shape_cast %1188 : vector<2xf32> to vector<2x1xf32>
    %cst_364 = arith.constant 9.99999974E-5 : f32
    %1190 = vector.broadcast %cst_364 : f32 to vector<2x1xf32>
    %1191 = arith.mulf %1190, %1176 : vector<2x1xf32>
    %1192 = arith.addf %1189, %1191 : vector<2x1xf32>
    %cst_365 = arith.constant 0.899999976 : f32
    %1193 = vector.broadcast %cst_365 : f32 to vector<2x1xf32>
    %1194 = arith.mulf %1193, %1160 : vector<2x1xf32>
    %cst_366 = arith.constant 1.000000e-01 : f32
    %1195 = vector.broadcast %cst_366 : f32 to vector<2x1xf32>
    %1196 = arith.mulf %1195, %1192 : vector<2x1xf32>
    %1197 = arith.addf %1194, %1196 : vector<2x1xf32>
    %cst_367 = arith.constant 9.990000e-01 : f32
    %1198 = vector.broadcast %cst_367 : f32 to vector<2x1xf32>
    %1199 = arith.mulf %1198, %1166 : vector<2x1xf32>
    %cst_368 = arith.constant 1.000000e-03 : f32
    %1200 = vector.broadcast %cst_368 : f32 to vector<2x1xf32>
    %1201 = arith.mulf %1200, %1192 : vector<2x1xf32>
    %1202 = arith.mulf %1201, %1192 : vector<2x1xf32>
    %1203 = arith.addf %1199, %1202 : vector<2x1xf32>
    %1204 = math.sqrt %1203 : vector<2x1xf32>
    %cst_369 = arith.constant 5.63356352 : f32
    %1205 = vector.broadcast %cst_369 : f32 to vector<2x1xf32>
    %1206 = arith.mulf %1204, %1205 : vector<2x1xf32>
    %cst_370 = arith.constant 9.99999993E-9 : f32
    %1207 = vector.broadcast %cst_370 : f32 to vector<2x1xf32>
    %1208 = arith.addf %1206, %1207 : vector<2x1xf32>
    %cst_371 = arith.constant 0.0517778881 : f32
    %1209 = vector.broadcast %cst_371 : f32 to vector<2x1xf32>
    %1210 = arith.mulf %1209, %1197 : vector<2x1xf32>
    %1211 = tpu.reciprocal %1208 {approx = true} : vector<2x1xf32> -> vector<2x1xf32>
    %1212 = arith.mulf %1210, %1211 : vector<2x1xf32>
    %1213 = arith.subf %1176, %1212 : vector<2x1xf32>
    %1214 = vector.broadcast %1213 : vector<2x1xf32> to vector<2x7xf32>
    %1215 = arith.subf %1214, %4 : vector<2x7xf32>
    %1216 = arith.mulf %1215, %1215 : vector<2x7xf32>
    %cst_372 = arith.constant dense<0.000000e+00> : vector<7xf32>
    %1217 = vector.multi_reduction <add>, %1216, %cst_372 [0] : vector<2x7xf32> to vector<7xf32>
    %1218 = vector.shape_cast %1217 : vector<7xf32> to vector<1x7xf32>
    %cst_373 = arith.constant -5.000000e-01 : f32
    %1219 = vector.broadcast %cst_373 : f32 to vector<1x7xf32>
    %1220 = arith.mulf %1218, %1219 : vector<1x7xf32>
    %1221 = math.exp %1220 : vector<1x7xf32>
    %1222 = arith.mulf %27, %1221 : vector<1x7xf32>
    %1223 = vector.broadcast %1222 : vector<1x7xf32> to vector<2x7xf32>
    %1224 = arith.mulf %1223, %1215 : vector<2x7xf32>
    %cst_374 = arith.constant dense<0.000000e+00> : vector<2xf32>
    %1225 = vector.multi_reduction <add>, %1224, %cst_374 [1] : vector<2x7xf32> to vector<2xf32>
    %1226 = vector.shape_cast %1225 : vector<2xf32> to vector<2x1xf32>
    %cst_375 = arith.constant 9.99999974E-5 : f32
    %1227 = vector.broadcast %cst_375 : f32 to vector<2x1xf32>
    %1228 = arith.mulf %1227, %1213 : vector<2x1xf32>
    %1229 = arith.addf %1226, %1228 : vector<2x1xf32>
    %cst_376 = arith.constant 0.899999976 : f32
    %1230 = vector.broadcast %cst_376 : f32 to vector<2x1xf32>
    %1231 = arith.mulf %1230, %1197 : vector<2x1xf32>
    %cst_377 = arith.constant 1.000000e-01 : f32
    %1232 = vector.broadcast %cst_377 : f32 to vector<2x1xf32>
    %1233 = arith.mulf %1232, %1229 : vector<2x1xf32>
    %1234 = arith.addf %1231, %1233 : vector<2x1xf32>
    %cst_378 = arith.constant 9.990000e-01 : f32
    %1235 = vector.broadcast %cst_378 : f32 to vector<2x1xf32>
    %1236 = arith.mulf %1235, %1203 : vector<2x1xf32>
    %cst_379 = arith.constant 1.000000e-03 : f32
    %1237 = vector.broadcast %cst_379 : f32 to vector<2x1xf32>
    %1238 = arith.mulf %1237, %1229 : vector<2x1xf32>
    %1239 = arith.mulf %1238, %1229 : vector<2x1xf32>
    %1240 = arith.addf %1236, %1239 : vector<2x1xf32>
    %1241 = math.sqrt %1240 : vector<2x1xf32>
    %cst_380 = arith.constant 5.548930e+00 : f32
    %1242 = vector.broadcast %cst_380 : f32 to vector<2x1xf32>
    %1243 = arith.mulf %1241, %1242 : vector<2x1xf32>
    %cst_381 = arith.constant 9.99999993E-9 : f32
    %1244 = vector.broadcast %cst_381 : f32 to vector<2x1xf32>
    %1245 = arith.addf %1243, %1244 : vector<2x1xf32>
    %cst_382 = arith.constant 0.0515944324 : f32
    %1246 = vector.broadcast %cst_382 : f32 to vector<2x1xf32>
    %1247 = arith.mulf %1246, %1234 : vector<2x1xf32>
    %1248 = tpu.reciprocal %1245 {approx = true} : vector<2x1xf32> -> vector<2x1xf32>
    %1249 = arith.mulf %1247, %1248 : vector<2x1xf32>
    %1250 = arith.subf %1213, %1249 : vector<2x1xf32>
    %1251 = vector.broadcast %1250 : vector<2x1xf32> to vector<2x7xf32>
    %1252 = arith.subf %1251, %4 : vector<2x7xf32>
    %1253 = arith.mulf %1252, %1252 : vector<2x7xf32>
    %cst_383 = arith.constant dense<0.000000e+00> : vector<7xf32>
    %1254 = vector.multi_reduction <add>, %1253, %cst_383 [0] : vector<2x7xf32> to vector<7xf32>
    %1255 = vector.shape_cast %1254 : vector<7xf32> to vector<1x7xf32>
    %cst_384 = arith.constant -5.000000e-01 : f32
    %1256 = vector.broadcast %cst_384 : f32 to vector<1x7xf32>
    %1257 = arith.mulf %1255, %1256 : vector<1x7xf32>
    %1258 = math.exp %1257 : vector<1x7xf32>
    %1259 = arith.mulf %27, %1258 : vector<1x7xf32>
    %1260 = vector.broadcast %1259 : vector<1x7xf32> to vector<2x7xf32>
    %1261 = arith.mulf %1260, %1252 : vector<2x7xf32>
    %cst_385 = arith.constant dense<0.000000e+00> : vector<2xf32>
    %1262 = vector.multi_reduction <add>, %1261, %cst_385 [1] : vector<2x7xf32> to vector<2xf32>
    %1263 = vector.shape_cast %1262 : vector<2xf32> to vector<2x1xf32>
    %cst_386 = arith.constant 9.99999974E-5 : f32
    %1264 = vector.broadcast %cst_386 : f32 to vector<2x1xf32>
    %1265 = arith.mulf %1264, %1250 : vector<2x1xf32>
    %1266 = arith.addf %1263, %1265 : vector<2x1xf32>
    %cst_387 = arith.constant 0.899999976 : f32
    %1267 = vector.broadcast %cst_387 : f32 to vector<2x1xf32>
    %1268 = arith.mulf %1267, %1234 : vector<2x1xf32>
    %cst_388 = arith.constant 1.000000e-01 : f32
    %1269 = vector.broadcast %cst_388 : f32 to vector<2x1xf32>
    %1270 = arith.mulf %1269, %1266 : vector<2x1xf32>
    %1271 = arith.addf %1268, %1270 : vector<2x1xf32>
    %cst_389 = arith.constant 9.990000e-01 : f32
    %1272 = vector.broadcast %cst_389 : f32 to vector<2x1xf32>
    %1273 = arith.mulf %1272, %1240 : vector<2x1xf32>
    %cst_390 = arith.constant 1.000000e-03 : f32
    %1274 = vector.broadcast %cst_390 : f32 to vector<2x1xf32>
    %1275 = arith.mulf %1274, %1266 : vector<2x1xf32>
    %1276 = arith.mulf %1275, %1266 : vector<2x1xf32>
    %1277 = arith.addf %1273, %1276 : vector<2x1xf32>
    %1278 = math.sqrt %1277 : vector<2x1xf32>
    %cst_391 = arith.constant 5.46807909 : f32
    %1279 = vector.broadcast %cst_391 : f32 to vector<2x1xf32>
    %1280 = arith.mulf %1278, %1279 : vector<2x1xf32>
    %cst_392 = arith.constant 9.99999993E-9 : f32
    %1281 = vector.broadcast %cst_392 : f32 to vector<2x1xf32>
    %1282 = arith.addf %1280, %1281 : vector<2x1xf32>
    %cst_393 = arith.constant 0.0514304265 : f32
    %1283 = vector.broadcast %cst_393 : f32 to vector<2x1xf32>
    %1284 = arith.mulf %1283, %1271 : vector<2x1xf32>
    %1285 = tpu.reciprocal %1282 {approx = true} : vector<2x1xf32> -> vector<2x1xf32>
    %1286 = arith.mulf %1284, %1285 : vector<2x1xf32>
    %1287 = arith.subf %1250, %1286 : vector<2x1xf32>
    %1288 = vector.broadcast %1287 : vector<2x1xf32> to vector<2x7xf32>
    %1289 = arith.subf %1288, %4 : vector<2x7xf32>
    %1290 = arith.mulf %1289, %1289 : vector<2x7xf32>
    %cst_394 = arith.constant dense<0.000000e+00> : vector<7xf32>
    %1291 = vector.multi_reduction <add>, %1290, %cst_394 [0] : vector<2x7xf32> to vector<7xf32>
    %1292 = vector.shape_cast %1291 : vector<7xf32> to vector<1x7xf32>
    %cst_395 = arith.constant -5.000000e-01 : f32
    %1293 = vector.broadcast %cst_395 : f32 to vector<1x7xf32>
    %1294 = arith.mulf %1292, %1293 : vector<1x7xf32>
    %1295 = math.exp %1294 : vector<1x7xf32>
    %1296 = arith.mulf %27, %1295 : vector<1x7xf32>
    %1297 = vector.broadcast %1296 : vector<1x7xf32> to vector<2x7xf32>
    %1298 = arith.mulf %1297, %1289 : vector<2x7xf32>
    %cst_396 = arith.constant dense<0.000000e+00> : vector<2xf32>
    %1299 = vector.multi_reduction <add>, %1298, %cst_396 [1] : vector<2x7xf32> to vector<2xf32>
    %1300 = vector.shape_cast %1299 : vector<2xf32> to vector<2x1xf32>
    %cst_397 = arith.constant 9.99999974E-5 : f32
    %1301 = vector.broadcast %cst_397 : f32 to vector<2x1xf32>
    %1302 = arith.mulf %1301, %1287 : vector<2x1xf32>
    %1303 = arith.addf %1300, %1302 : vector<2x1xf32>
    %cst_398 = arith.constant 0.899999976 : f32
    %1304 = vector.broadcast %cst_398 : f32 to vector<2x1xf32>
    %1305 = arith.mulf %1304, %1271 : vector<2x1xf32>
    %cst_399 = arith.constant 1.000000e-01 : f32
    %1306 = vector.broadcast %cst_399 : f32 to vector<2x1xf32>
    %1307 = arith.mulf %1306, %1303 : vector<2x1xf32>
    %1308 = arith.addf %1305, %1307 : vector<2x1xf32>
    %cst_400 = arith.constant 9.990000e-01 : f32
    %1309 = vector.broadcast %cst_400 : f32 to vector<2x1xf32>
    %1310 = arith.mulf %1309, %1277 : vector<2x1xf32>
    %cst_401 = arith.constant 1.000000e-03 : f32
    %1311 = vector.broadcast %cst_401 : f32 to vector<2x1xf32>
    %1312 = arith.mulf %1311, %1303 : vector<2x1xf32>
    %1313 = arith.mulf %1312, %1303 : vector<2x1xf32>
    %1314 = arith.addf %1310, %1313 : vector<2x1xf32>
    %1315 = math.sqrt %1314 : vector<2x1xf32>
    %cst_402 = arith.constant 5.39073801 : f32
    %1316 = vector.broadcast %cst_402 : f32 to vector<2x1xf32>
    %1317 = arith.mulf %1315, %1316 : vector<2x1xf32>
    %cst_403 = arith.constant 9.99999993E-9 : f32
    %1318 = vector.broadcast %cst_403 : f32 to vector<2x1xf32>
    %1319 = arith.addf %1317, %1318 : vector<2x1xf32>
    %cst_404 = arith.constant 0.0512837097 : f32
    %1320 = vector.broadcast %cst_404 : f32 to vector<2x1xf32>
    %1321 = arith.mulf %1320, %1308 : vector<2x1xf32>
    %1322 = tpu.reciprocal %1319 {approx = true} : vector<2x1xf32> -> vector<2x1xf32>
    %1323 = arith.mulf %1321, %1322 : vector<2x1xf32>
    %1324 = arith.subf %1287, %1323 : vector<2x1xf32>
    %1325 = vector.broadcast %1324 : vector<2x1xf32> to vector<2x7xf32>
    %1326 = arith.subf %1325, %4 : vector<2x7xf32>
    %1327 = arith.mulf %1326, %1326 : vector<2x7xf32>
    %cst_405 = arith.constant dense<0.000000e+00> : vector<7xf32>
    %1328 = vector.multi_reduction <add>, %1327, %cst_405 [0] : vector<2x7xf32> to vector<7xf32>
    %1329 = vector.shape_cast %1328 : vector<7xf32> to vector<1x7xf32>
    %cst_406 = arith.constant -5.000000e-01 : f32
    %1330 = vector.broadcast %cst_406 : f32 to vector<1x7xf32>
    %1331 = arith.mulf %1329, %1330 : vector<1x7xf32>
    %1332 = math.exp %1331 : vector<1x7xf32>
    %1333 = arith.mulf %27, %1332 : vector<1x7xf32>
    %1334 = vector.broadcast %1333 : vector<1x7xf32> to vector<2x7xf32>
    %1335 = arith.mulf %1334, %1326 : vector<2x7xf32>
    %cst_407 = arith.constant dense<0.000000e+00> : vector<2xf32>
    %1336 = vector.multi_reduction <add>, %1335, %cst_407 [1] : vector<2x7xf32> to vector<2xf32>
    %1337 = vector.shape_cast %1336 : vector<2xf32> to vector<2x1xf32>
    %cst_408 = arith.constant 9.99999974E-5 : f32
    %1338 = vector.broadcast %cst_408 : f32 to vector<2x1xf32>
    %1339 = arith.mulf %1338, %1324 : vector<2x1xf32>
    %1340 = arith.addf %1337, %1339 : vector<2x1xf32>
    %cst_409 = arith.constant 0.899999976 : f32
    %1341 = vector.broadcast %cst_409 : f32 to vector<2x1xf32>
    %1342 = arith.mulf %1341, %1308 : vector<2x1xf32>
    %cst_410 = arith.constant 1.000000e-01 : f32
    %1343 = vector.broadcast %cst_410 : f32 to vector<2x1xf32>
    %1344 = arith.mulf %1343, %1340 : vector<2x1xf32>
    %1345 = arith.addf %1342, %1344 : vector<2x1xf32>
    %cst_411 = arith.constant 9.990000e-01 : f32
    %1346 = vector.broadcast %cst_411 : f32 to vector<2x1xf32>
    %1347 = arith.mulf %1346, %1314 : vector<2x1xf32>
    %cst_412 = arith.constant 1.000000e-03 : f32
    %1348 = vector.broadcast %cst_412 : f32 to vector<2x1xf32>
    %1349 = arith.mulf %1348, %1340 : vector<2x1xf32>
    %1350 = arith.mulf %1349, %1340 : vector<2x1xf32>
    %1351 = arith.addf %1347, %1350 : vector<2x1xf32>
    %1352 = math.sqrt %1351 : vector<2x1xf32>
    %cst_413 = arith.constant 5.31666136 : f32
    %1353 = vector.broadcast %cst_413 : f32 to vector<2x1xf32>
    %1354 = arith.mulf %1352, %1353 : vector<2x1xf32>
    %cst_414 = arith.constant 9.99999993E-9 : f32
    %1355 = vector.broadcast %cst_414 : f32 to vector<2x1xf32>
    %1356 = arith.addf %1354, %1355 : vector<2x1xf32>
    %cst_415 = arith.constant 0.051152382 : f32
    %1357 = vector.broadcast %cst_415 : f32 to vector<2x1xf32>
    %1358 = arith.mulf %1357, %1345 : vector<2x1xf32>
    %1359 = tpu.reciprocal %1356 {approx = true} : vector<2x1xf32> -> vector<2x1xf32>
    %1360 = arith.mulf %1358, %1359 : vector<2x1xf32>
    %1361 = arith.subf %1324, %1360 : vector<2x1xf32>
    %1362 = vector.broadcast %1361 : vector<2x1xf32> to vector<2x7xf32>
    %1363 = arith.subf %1362, %4 : vector<2x7xf32>
    %1364 = arith.mulf %1363, %1363 : vector<2x7xf32>
    %cst_416 = arith.constant dense<0.000000e+00> : vector<7xf32>
    %1365 = vector.multi_reduction <add>, %1364, %cst_416 [0] : vector<2x7xf32> to vector<7xf32>
    %1366 = vector.shape_cast %1365 : vector<7xf32> to vector<1x7xf32>
    %cst_417 = arith.constant -5.000000e-01 : f32
    %1367 = vector.broadcast %cst_417 : f32 to vector<1x7xf32>
    %1368 = arith.mulf %1366, %1367 : vector<1x7xf32>
    %1369 = math.exp %1368 : vector<1x7xf32>
    %1370 = arith.mulf %27, %1369 : vector<1x7xf32>
    %1371 = vector.broadcast %1370 : vector<1x7xf32> to vector<2x7xf32>
    %1372 = arith.mulf %1371, %1363 : vector<2x7xf32>
    %cst_418 = arith.constant dense<0.000000e+00> : vector<2xf32>
    %1373 = vector.multi_reduction <add>, %1372, %cst_418 [1] : vector<2x7xf32> to vector<2xf32>
    %1374 = vector.shape_cast %1373 : vector<2xf32> to vector<2x1xf32>
    %cst_419 = arith.constant 9.99999974E-5 : f32
    %1375 = vector.broadcast %cst_419 : f32 to vector<2x1xf32>
    %1376 = arith.mulf %1375, %1361 : vector<2x1xf32>
    %1377 = arith.addf %1374, %1376 : vector<2x1xf32>
    %cst_420 = arith.constant 0.899999976 : f32
    %1378 = vector.broadcast %cst_420 : f32 to vector<2x1xf32>
    %1379 = arith.mulf %1378, %1345 : vector<2x1xf32>
    %cst_421 = arith.constant 1.000000e-01 : f32
    %1380 = vector.broadcast %cst_421 : f32 to vector<2x1xf32>
    %1381 = arith.mulf %1380, %1377 : vector<2x1xf32>
    %1382 = arith.addf %1379, %1381 : vector<2x1xf32>
    %cst_422 = arith.constant 9.990000e-01 : f32
    %1383 = vector.broadcast %cst_422 : f32 to vector<2x1xf32>
    %1384 = arith.mulf %1383, %1351 : vector<2x1xf32>
    %cst_423 = arith.constant 1.000000e-03 : f32
    %1385 = vector.broadcast %cst_423 : f32 to vector<2x1xf32>
    %1386 = arith.mulf %1385, %1377 : vector<2x1xf32>
    %1387 = arith.mulf %1386, %1377 : vector<2x1xf32>
    %1388 = arith.addf %1384, %1387 : vector<2x1xf32>
    %1389 = math.sqrt %1388 : vector<2x1xf32>
    %cst_424 = arith.constant 5.24562645 : f32
    %1390 = vector.broadcast %cst_424 : f32 to vector<2x1xf32>
    %1391 = arith.mulf %1389, %1390 : vector<2x1xf32>
    %cst_425 = arith.constant 9.99999993E-9 : f32
    %1392 = vector.broadcast %cst_425 : f32 to vector<2x1xf32>
    %1393 = arith.addf %1391, %1392 : vector<2x1xf32>
    %cst_426 = arith.constant 0.0510347597 : f32
    %1394 = vector.broadcast %cst_426 : f32 to vector<2x1xf32>
    %1395 = arith.mulf %1394, %1382 : vector<2x1xf32>
    %1396 = tpu.reciprocal %1393 {approx = true} : vector<2x1xf32> -> vector<2x1xf32>
    %1397 = arith.mulf %1395, %1396 : vector<2x1xf32>
    %1398 = arith.subf %1361, %1397 : vector<2x1xf32>
    %1399 = vector.broadcast %1398 : vector<2x1xf32> to vector<2x7xf32>
    %1400 = arith.subf %1399, %4 : vector<2x7xf32>
    %1401 = arith.mulf %1400, %1400 : vector<2x7xf32>
    %cst_427 = arith.constant dense<0.000000e+00> : vector<7xf32>
    %1402 = vector.multi_reduction <add>, %1401, %cst_427 [0] : vector<2x7xf32> to vector<7xf32>
    %1403 = vector.shape_cast %1402 : vector<7xf32> to vector<1x7xf32>
    %cst_428 = arith.constant -5.000000e-01 : f32
    %1404 = vector.broadcast %cst_428 : f32 to vector<1x7xf32>
    %1405 = arith.mulf %1403, %1404 : vector<1x7xf32>
    %1406 = math.exp %1405 : vector<1x7xf32>
    %1407 = arith.mulf %27, %1406 : vector<1x7xf32>
    %1408 = vector.broadcast %1407 : vector<1x7xf32> to vector<2x7xf32>
    %1409 = arith.mulf %1408, %1400 : vector<2x7xf32>
    %cst_429 = arith.constant dense<0.000000e+00> : vector<2xf32>
    %1410 = vector.multi_reduction <add>, %1409, %cst_429 [1] : vector<2x7xf32> to vector<2xf32>
    %1411 = vector.shape_cast %1410 : vector<2xf32> to vector<2x1xf32>
    %cst_430 = arith.constant 9.99999974E-5 : f32
    %1412 = vector.broadcast %cst_430 : f32 to vector<2x1xf32>
    %1413 = arith.mulf %1412, %1398 : vector<2x1xf32>
    %1414 = arith.addf %1411, %1413 : vector<2x1xf32>
    %cst_431 = arith.constant 0.899999976 : f32
    %1415 = vector.broadcast %cst_431 : f32 to vector<2x1xf32>
    %1416 = arith.mulf %1415, %1382 : vector<2x1xf32>
    %cst_432 = arith.constant 1.000000e-01 : f32
    %1417 = vector.broadcast %cst_432 : f32 to vector<2x1xf32>
    %1418 = arith.mulf %1417, %1414 : vector<2x1xf32>
    %1419 = arith.addf %1416, %1418 : vector<2x1xf32>
    %cst_433 = arith.constant 9.990000e-01 : f32
    %1420 = vector.broadcast %cst_433 : f32 to vector<2x1xf32>
    %1421 = arith.mulf %1420, %1388 : vector<2x1xf32>
    %cst_434 = arith.constant 1.000000e-03 : f32
    %1422 = vector.broadcast %cst_434 : f32 to vector<2x1xf32>
    %1423 = arith.mulf %1422, %1414 : vector<2x1xf32>
    %1424 = arith.mulf %1423, %1414 : vector<2x1xf32>
    %1425 = arith.addf %1421, %1424 : vector<2x1xf32>
    %1426 = math.sqrt %1425 : vector<2x1xf32>
    %cst_435 = arith.constant 5.17743158 : f32
    %1427 = vector.broadcast %cst_435 : f32 to vector<2x1xf32>
    %1428 = arith.mulf %1426, %1427 : vector<2x1xf32>
    %cst_436 = arith.constant 9.99999993E-9 : f32
    %1429 = vector.broadcast %cst_436 : f32 to vector<2x1xf32>
    %1430 = arith.addf %1428, %1429 : vector<2x1xf32>
    %cst_437 = arith.constant 0.0509293601 : f32
    %1431 = vector.broadcast %cst_437 : f32 to vector<2x1xf32>
    %1432 = arith.mulf %1431, %1419 : vector<2x1xf32>
    %1433 = tpu.reciprocal %1430 {approx = true} : vector<2x1xf32> -> vector<2x1xf32>
    %1434 = arith.mulf %1432, %1433 : vector<2x1xf32>
    %1435 = arith.subf %1398, %1434 : vector<2x1xf32>
    %1436 = vector.broadcast %1435 : vector<2x1xf32> to vector<2x7xf32>
    %1437 = arith.subf %1436, %4 : vector<2x7xf32>
    %1438 = arith.mulf %1437, %1437 : vector<2x7xf32>
    %cst_438 = arith.constant dense<0.000000e+00> : vector<7xf32>
    %1439 = vector.multi_reduction <add>, %1438, %cst_438 [0] : vector<2x7xf32> to vector<7xf32>
    %1440 = vector.shape_cast %1439 : vector<7xf32> to vector<1x7xf32>
    %cst_439 = arith.constant -5.000000e-01 : f32
    %1441 = vector.broadcast %cst_439 : f32 to vector<1x7xf32>
    %1442 = arith.mulf %1440, %1441 : vector<1x7xf32>
    %1443 = math.exp %1442 : vector<1x7xf32>
    %1444 = arith.mulf %27, %1443 : vector<1x7xf32>
    %1445 = vector.broadcast %1444 : vector<1x7xf32> to vector<2x7xf32>
    %1446 = arith.mulf %1445, %1437 : vector<2x7xf32>
    %cst_440 = arith.constant dense<0.000000e+00> : vector<2xf32>
    %1447 = vector.multi_reduction <add>, %1446, %cst_440 [1] : vector<2x7xf32> to vector<2xf32>
    %1448 = vector.shape_cast %1447 : vector<2xf32> to vector<2x1xf32>
    %cst_441 = arith.constant 9.99999974E-5 : f32
    %1449 = vector.broadcast %cst_441 : f32 to vector<2x1xf32>
    %1450 = arith.mulf %1449, %1435 : vector<2x1xf32>
    %1451 = arith.addf %1448, %1450 : vector<2x1xf32>
    %cst_442 = arith.constant 0.899999976 : f32
    %1452 = vector.broadcast %cst_442 : f32 to vector<2x1xf32>
    %1453 = arith.mulf %1452, %1419 : vector<2x1xf32>
    %cst_443 = arith.constant 1.000000e-01 : f32
    %1454 = vector.broadcast %cst_443 : f32 to vector<2x1xf32>
    %1455 = arith.mulf %1454, %1451 : vector<2x1xf32>
    %1456 = arith.addf %1453, %1455 : vector<2x1xf32>
    %cst_444 = arith.constant 9.990000e-01 : f32
    %1457 = vector.broadcast %cst_444 : f32 to vector<2x1xf32>
    %1458 = arith.mulf %1457, %1425 : vector<2x1xf32>
    %cst_445 = arith.constant 1.000000e-03 : f32
    %1459 = vector.broadcast %cst_445 : f32 to vector<2x1xf32>
    %1460 = arith.mulf %1459, %1451 : vector<2x1xf32>
    %1461 = arith.mulf %1460, %1451 : vector<2x1xf32>
    %1462 = arith.addf %1458, %1461 : vector<2x1xf32>
    %1463 = math.sqrt %1462 : vector<2x1xf32>
    %cst_446 = arith.constant 5.11189365 : f32
    %1464 = vector.broadcast %cst_446 : f32 to vector<2x1xf32>
    %1465 = arith.mulf %1463, %1464 : vector<2x1xf32>
    %cst_447 = arith.constant 9.99999993E-9 : f32
    %1466 = vector.broadcast %cst_447 : f32 to vector<2x1xf32>
    %1467 = arith.addf %1465, %1466 : vector<2x1xf32>
    %cst_448 = arith.constant 0.0508348718 : f32
    %1468 = vector.broadcast %cst_448 : f32 to vector<2x1xf32>
    %1469 = arith.mulf %1468, %1456 : vector<2x1xf32>
    %1470 = tpu.reciprocal %1467 {approx = true} : vector<2x1xf32> -> vector<2x1xf32>
    %1471 = arith.mulf %1469, %1470 : vector<2x1xf32>
    %1472 = arith.subf %1435, %1471 : vector<2x1xf32>
    %1473 = vector.broadcast %1472 : vector<2x1xf32> to vector<2x7xf32>
    %1474 = arith.subf %1473, %4 : vector<2x7xf32>
    %1475 = arith.mulf %1474, %1474 : vector<2x7xf32>
    %cst_449 = arith.constant dense<0.000000e+00> : vector<7xf32>
    %1476 = vector.multi_reduction <add>, %1475, %cst_449 [0] : vector<2x7xf32> to vector<7xf32>
    %1477 = vector.shape_cast %1476 : vector<7xf32> to vector<1x7xf32>
    %cst_450 = arith.constant -5.000000e-01 : f32
    %1478 = vector.broadcast %cst_450 : f32 to vector<1x7xf32>
    %1479 = arith.mulf %1477, %1478 : vector<1x7xf32>
    %1480 = math.exp %1479 : vector<1x7xf32>
    %1481 = arith.mulf %27, %1480 : vector<1x7xf32>
    %1482 = vector.broadcast %1481 : vector<1x7xf32> to vector<2x7xf32>
    %1483 = arith.mulf %1482, %1474 : vector<2x7xf32>
    %cst_451 = arith.constant dense<0.000000e+00> : vector<2xf32>
    %1484 = vector.multi_reduction <add>, %1483, %cst_451 [1] : vector<2x7xf32> to vector<2xf32>
    %1485 = vector.shape_cast %1484 : vector<2xf32> to vector<2x1xf32>
    %cst_452 = arith.constant 9.99999974E-5 : f32
    %1486 = vector.broadcast %cst_452 : f32 to vector<2x1xf32>
    %1487 = arith.mulf %1486, %1472 : vector<2x1xf32>
    %1488 = arith.addf %1485, %1487 : vector<2x1xf32>
    %cst_453 = arith.constant 0.899999976 : f32
    %1489 = vector.broadcast %cst_453 : f32 to vector<2x1xf32>
    %1490 = arith.mulf %1489, %1456 : vector<2x1xf32>
    %cst_454 = arith.constant 1.000000e-01 : f32
    %1491 = vector.broadcast %cst_454 : f32 to vector<2x1xf32>
    %1492 = arith.mulf %1491, %1488 : vector<2x1xf32>
    %1493 = arith.addf %1490, %1492 : vector<2x1xf32>
    %cst_455 = arith.constant 9.990000e-01 : f32
    %1494 = vector.broadcast %cst_455 : f32 to vector<2x1xf32>
    %1495 = arith.mulf %1494, %1462 : vector<2x1xf32>
    %cst_456 = arith.constant 1.000000e-03 : f32
    %1496 = vector.broadcast %cst_456 : f32 to vector<2x1xf32>
    %1497 = arith.mulf %1496, %1488 : vector<2x1xf32>
    %1498 = arith.mulf %1497, %1488 : vector<2x1xf32>
    %1499 = arith.addf %1495, %1498 : vector<2x1xf32>
    %1500 = math.sqrt %1499 : vector<2x1xf32>
    %cst_457 = arith.constant 5.04884481 : f32
    %1501 = vector.broadcast %cst_457 : f32 to vector<2x1xf32>
    %1502 = arith.mulf %1500, %1501 : vector<2x1xf32>
    %cst_458 = arith.constant 9.99999993E-9 : f32
    %1503 = vector.broadcast %cst_458 : f32 to vector<2x1xf32>
    %1504 = arith.addf %1502, %1503 : vector<2x1xf32>
    %cst_459 = arith.constant 0.0507501327 : f32
    %1505 = vector.broadcast %cst_459 : f32 to vector<2x1xf32>
    %1506 = arith.mulf %1505, %1493 : vector<2x1xf32>
    %1507 = tpu.reciprocal %1504 {approx = true} : vector<2x1xf32> -> vector<2x1xf32>
    %1508 = arith.mulf %1506, %1507 : vector<2x1xf32>
    %1509 = arith.subf %1472, %1508 : vector<2x1xf32>
    %1510 = vector.broadcast %1509 : vector<2x1xf32> to vector<2x7xf32>
    %1511 = arith.subf %1510, %4 : vector<2x7xf32>
    %1512 = arith.mulf %1511, %1511 : vector<2x7xf32>
    %cst_460 = arith.constant dense<0.000000e+00> : vector<7xf32>
    %1513 = vector.multi_reduction <add>, %1512, %cst_460 [0] : vector<2x7xf32> to vector<7xf32>
    %1514 = vector.shape_cast %1513 : vector<7xf32> to vector<1x7xf32>
    %cst_461 = arith.constant -5.000000e-01 : f32
    %1515 = vector.broadcast %cst_461 : f32 to vector<1x7xf32>
    %1516 = arith.mulf %1514, %1515 : vector<1x7xf32>
    %1517 = math.exp %1516 : vector<1x7xf32>
    %1518 = arith.mulf %27, %1517 : vector<1x7xf32>
    %1519 = vector.broadcast %1518 : vector<1x7xf32> to vector<2x7xf32>
    %1520 = arith.mulf %1519, %1511 : vector<2x7xf32>
    %cst_462 = arith.constant dense<0.000000e+00> : vector<2xf32>
    %1521 = vector.multi_reduction <add>, %1520, %cst_462 [1] : vector<2x7xf32> to vector<2xf32>
    %1522 = vector.shape_cast %1521 : vector<2xf32> to vector<2x1xf32>
    %cst_463 = arith.constant 9.99999974E-5 : f32
    %1523 = vector.broadcast %cst_463 : f32 to vector<2x1xf32>
    %1524 = arith.mulf %1523, %1509 : vector<2x1xf32>
    %1525 = arith.addf %1522, %1524 : vector<2x1xf32>
    %cst_464 = arith.constant 0.899999976 : f32
    %1526 = vector.broadcast %cst_464 : f32 to vector<2x1xf32>
    %1527 = arith.mulf %1526, %1493 : vector<2x1xf32>
    %cst_465 = arith.constant 1.000000e-01 : f32
    %1528 = vector.broadcast %cst_465 : f32 to vector<2x1xf32>
    %1529 = arith.mulf %1528, %1525 : vector<2x1xf32>
    %1530 = arith.addf %1527, %1529 : vector<2x1xf32>
    %cst_466 = arith.constant 9.990000e-01 : f32
    %1531 = vector.broadcast %cst_466 : f32 to vector<2x1xf32>
    %1532 = arith.mulf %1531, %1499 : vector<2x1xf32>
    %cst_467 = arith.constant 1.000000e-03 : f32
    %1533 = vector.broadcast %cst_467 : f32 to vector<2x1xf32>
    %1534 = arith.mulf %1533, %1525 : vector<2x1xf32>
    %1535 = arith.mulf %1534, %1525 : vector<2x1xf32>
    %1536 = arith.addf %1532, %1535 : vector<2x1xf32>
    %1537 = math.sqrt %1536 : vector<2x1xf32>
    %cst_468 = arith.constant 4.98813248 : f32
    %1538 = vector.broadcast %cst_468 : f32 to vector<2x1xf32>
    %1539 = arith.mulf %1537, %1538 : vector<2x1xf32>
    %cst_469 = arith.constant 9.99999993E-9 : f32
    %1540 = vector.broadcast %cst_469 : f32 to vector<2x1xf32>
    %1541 = arith.addf %1539, %1540 : vector<2x1xf32>
    %cst_470 = arith.constant 0.0506741069 : f32
    %1542 = vector.broadcast %cst_470 : f32 to vector<2x1xf32>
    %1543 = arith.mulf %1542, %1530 : vector<2x1xf32>
    %1544 = tpu.reciprocal %1541 {approx = true} : vector<2x1xf32> -> vector<2x1xf32>
    %1545 = arith.mulf %1543, %1544 : vector<2x1xf32>
    %1546 = arith.subf %1509, %1545 : vector<2x1xf32>
    %1547 = vector.broadcast %1546 : vector<2x1xf32> to vector<2x7xf32>
    %1548 = arith.subf %1547, %4 : vector<2x7xf32>
    %1549 = arith.mulf %1548, %1548 : vector<2x7xf32>
    %cst_471 = arith.constant dense<0.000000e+00> : vector<7xf32>
    %1550 = vector.multi_reduction <add>, %1549, %cst_471 [0] : vector<2x7xf32> to vector<7xf32>
    %1551 = vector.shape_cast %1550 : vector<7xf32> to vector<1x7xf32>
    %cst_472 = arith.constant -5.000000e-01 : f32
    %1552 = vector.broadcast %cst_472 : f32 to vector<1x7xf32>
    %1553 = arith.mulf %1551, %1552 : vector<1x7xf32>
    %1554 = math.exp %1553 : vector<1x7xf32>
    %1555 = arith.mulf %27, %1554 : vector<1x7xf32>
    %1556 = vector.broadcast %1555 : vector<1x7xf32> to vector<2x7xf32>
    %1557 = arith.mulf %1556, %1548 : vector<2x7xf32>
    %cst_473 = arith.constant dense<0.000000e+00> : vector<2xf32>
    %1558 = vector.multi_reduction <add>, %1557, %cst_473 [1] : vector<2x7xf32> to vector<2xf32>
    %1559 = vector.shape_cast %1558 : vector<2xf32> to vector<2x1xf32>
    %cst_474 = arith.constant 9.99999974E-5 : f32
    %1560 = vector.broadcast %cst_474 : f32 to vector<2x1xf32>
    %1561 = arith.mulf %1560, %1546 : vector<2x1xf32>
    %1562 = arith.addf %1559, %1561 : vector<2x1xf32>
    %cst_475 = arith.constant 0.899999976 : f32
    %1563 = vector.broadcast %cst_475 : f32 to vector<2x1xf32>
    %1564 = arith.mulf %1563, %1530 : vector<2x1xf32>
    %cst_476 = arith.constant 1.000000e-01 : f32
    %1565 = vector.broadcast %cst_476 : f32 to vector<2x1xf32>
    %1566 = arith.mulf %1565, %1562 : vector<2x1xf32>
    %1567 = arith.addf %1564, %1566 : vector<2x1xf32>
    %cst_477 = arith.constant 9.990000e-01 : f32
    %1568 = vector.broadcast %cst_477 : f32 to vector<2x1xf32>
    %1569 = arith.mulf %1568, %1536 : vector<2x1xf32>
    %cst_478 = arith.constant 1.000000e-03 : f32
    %1570 = vector.broadcast %cst_478 : f32 to vector<2x1xf32>
    %1571 = arith.mulf %1570, %1562 : vector<2x1xf32>
    %1572 = arith.mulf %1571, %1562 : vector<2x1xf32>
    %1573 = arith.addf %1569, %1572 : vector<2x1xf32>
    %1574 = math.sqrt %1573 : vector<2x1xf32>
    %cst_479 = arith.constant 4.92961645 : f32
    %1575 = vector.broadcast %cst_479 : f32 to vector<2x1xf32>
    %1576 = arith.mulf %1574, %1575 : vector<2x1xf32>
    %cst_480 = arith.constant 9.99999993E-9 : f32
    %1577 = vector.broadcast %cst_480 : f32 to vector<2x1xf32>
    %1578 = arith.addf %1576, %1577 : vector<2x1xf32>
    %cst_481 = arith.constant 0.0506058782 : f32
    %1579 = vector.broadcast %cst_481 : f32 to vector<2x1xf32>
    %1580 = arith.mulf %1579, %1567 : vector<2x1xf32>
    %1581 = tpu.reciprocal %1578 {approx = true} : vector<2x1xf32> -> vector<2x1xf32>
    %1582 = arith.mulf %1580, %1581 : vector<2x1xf32>
    %1583 = arith.subf %1546, %1582 : vector<2x1xf32>
    %1584 = vector.broadcast %1583 : vector<2x1xf32> to vector<2x7xf32>
    %1585 = arith.subf %1584, %4 : vector<2x7xf32>
    %1586 = arith.mulf %1585, %1585 : vector<2x7xf32>
    %cst_482 = arith.constant dense<0.000000e+00> : vector<7xf32>
    %1587 = vector.multi_reduction <add>, %1586, %cst_482 [0] : vector<2x7xf32> to vector<7xf32>
    %1588 = vector.shape_cast %1587 : vector<7xf32> to vector<1x7xf32>
    %cst_483 = arith.constant -5.000000e-01 : f32
    %1589 = vector.broadcast %cst_483 : f32 to vector<1x7xf32>
    %1590 = arith.mulf %1588, %1589 : vector<1x7xf32>
    %1591 = math.exp %1590 : vector<1x7xf32>
    %1592 = arith.mulf %27, %1591 : vector<1x7xf32>
    %1593 = vector.broadcast %1592 : vector<1x7xf32> to vector<2x7xf32>
    %1594 = arith.mulf %1593, %1585 : vector<2x7xf32>
    %cst_484 = arith.constant dense<0.000000e+00> : vector<2xf32>
    %1595 = vector.multi_reduction <add>, %1594, %cst_484 [1] : vector<2x7xf32> to vector<2xf32>
    %1596 = vector.shape_cast %1595 : vector<2xf32> to vector<2x1xf32>
    %cst_485 = arith.constant 9.99999974E-5 : f32
    %1597 = vector.broadcast %cst_485 : f32 to vector<2x1xf32>
    %1598 = arith.mulf %1597, %1583 : vector<2x1xf32>
    %1599 = arith.addf %1596, %1598 : vector<2x1xf32>
    %cst_486 = arith.constant 0.899999976 : f32
    %1600 = vector.broadcast %cst_486 : f32 to vector<2x1xf32>
    %1601 = arith.mulf %1600, %1567 : vector<2x1xf32>
    %cst_487 = arith.constant 1.000000e-01 : f32
    %1602 = vector.broadcast %cst_487 : f32 to vector<2x1xf32>
    %1603 = arith.mulf %1602, %1599 : vector<2x1xf32>
    %1604 = arith.addf %1601, %1603 : vector<2x1xf32>
    %cst_488 = arith.constant 9.990000e-01 : f32
    %1605 = vector.broadcast %cst_488 : f32 to vector<2x1xf32>
    %1606 = arith.mulf %1605, %1573 : vector<2x1xf32>
    %cst_489 = arith.constant 1.000000e-03 : f32
    %1607 = vector.broadcast %cst_489 : f32 to vector<2x1xf32>
    %1608 = arith.mulf %1607, %1599 : vector<2x1xf32>
    %1609 = arith.mulf %1608, %1599 : vector<2x1xf32>
    %1610 = arith.addf %1606, %1609 : vector<2x1xf32>
    %1611 = math.sqrt %1610 : vector<2x1xf32>
    %cst_490 = arith.constant 4.87316847 : f32
    %1612 = vector.broadcast %cst_490 : f32 to vector<2x1xf32>
    %1613 = arith.mulf %1611, %1612 : vector<2x1xf32>
    %cst_491 = arith.constant 9.99999993E-9 : f32
    %1614 = vector.broadcast %cst_491 : f32 to vector<2x1xf32>
    %1615 = arith.addf %1613, %1614 : vector<2x1xf32>
    %cst_492 = arith.constant 0.0505446307 : f32
    %1616 = vector.broadcast %cst_492 : f32 to vector<2x1xf32>
    %1617 = arith.mulf %1616, %1604 : vector<2x1xf32>
    %1618 = tpu.reciprocal %1615 {approx = true} : vector<2x1xf32> -> vector<2x1xf32>
    %1619 = arith.mulf %1617, %1618 : vector<2x1xf32>
    %1620 = arith.subf %1583, %1619 : vector<2x1xf32>
    %1621 = vector.broadcast %1620 : vector<2x1xf32> to vector<2x7xf32>
    %1622 = arith.subf %1621, %4 : vector<2x7xf32>
    %1623 = arith.mulf %1622, %1622 : vector<2x7xf32>
    %cst_493 = arith.constant dense<0.000000e+00> : vector<7xf32>
    %1624 = vector.multi_reduction <add>, %1623, %cst_493 [0] : vector<2x7xf32> to vector<7xf32>
    %1625 = vector.shape_cast %1624 : vector<7xf32> to vector<1x7xf32>
    %cst_494 = arith.constant -5.000000e-01 : f32
    %1626 = vector.broadcast %cst_494 : f32 to vector<1x7xf32>
    %1627 = arith.mulf %1625, %1626 : vector<1x7xf32>
    %1628 = math.exp %1627 : vector<1x7xf32>
    %1629 = arith.mulf %27, %1628 : vector<1x7xf32>
    %1630 = vector.broadcast %1629 : vector<1x7xf32> to vector<2x7xf32>
    %1631 = arith.mulf %1630, %1622 : vector<2x7xf32>
    %cst_495 = arith.constant dense<0.000000e+00> : vector<2xf32>
    %1632 = vector.multi_reduction <add>, %1631, %cst_495 [1] : vector<2x7xf32> to vector<2xf32>
    %1633 = vector.shape_cast %1632 : vector<2xf32> to vector<2x1xf32>
    %cst_496 = arith.constant 9.99999974E-5 : f32
    %1634 = vector.broadcast %cst_496 : f32 to vector<2x1xf32>
    %1635 = arith.mulf %1634, %1620 : vector<2x1xf32>
    %1636 = arith.addf %1633, %1635 : vector<2x1xf32>
    %cst_497 = arith.constant 0.899999976 : f32
    %1637 = vector.broadcast %cst_497 : f32 to vector<2x1xf32>
    %1638 = arith.mulf %1637, %1604 : vector<2x1xf32>
    %cst_498 = arith.constant 1.000000e-01 : f32
    %1639 = vector.broadcast %cst_498 : f32 to vector<2x1xf32>
    %1640 = arith.mulf %1639, %1636 : vector<2x1xf32>
    %1641 = arith.addf %1638, %1640 : vector<2x1xf32>
    %cst_499 = arith.constant 9.990000e-01 : f32
    %1642 = vector.broadcast %cst_499 : f32 to vector<2x1xf32>
    %1643 = arith.mulf %1642, %1610 : vector<2x1xf32>
    %cst_500 = arith.constant 1.000000e-03 : f32
    %1644 = vector.broadcast %cst_500 : f32 to vector<2x1xf32>
    %1645 = arith.mulf %1644, %1636 : vector<2x1xf32>
    %1646 = arith.mulf %1645, %1636 : vector<2x1xf32>
    %1647 = arith.addf %1643, %1646 : vector<2x1xf32>
    %1648 = math.sqrt %1647 : vector<2x1xf32>
    %cst_501 = arith.constant 4.81866932 : f32
    %1649 = vector.broadcast %cst_501 : f32 to vector<2x1xf32>
    %1650 = arith.mulf %1648, %1649 : vector<2x1xf32>
    %cst_502 = arith.constant 9.99999993E-9 : f32
    %1651 = vector.broadcast %cst_502 : f32 to vector<2x1xf32>
    %1652 = arith.addf %1650, %1651 : vector<2x1xf32>
    %cst_503 = arith.constant 0.0504896343 : f32
    %1653 = vector.broadcast %cst_503 : f32 to vector<2x1xf32>
    %1654 = arith.mulf %1653, %1641 : vector<2x1xf32>
    %1655 = tpu.reciprocal %1652 {approx = true} : vector<2x1xf32> -> vector<2x1xf32>
    %1656 = arith.mulf %1654, %1655 : vector<2x1xf32>
    %1657 = arith.subf %1620, %1656 : vector<2x1xf32>
    %1658 = vector.broadcast %1657 : vector<2x1xf32> to vector<2x7xf32>
    %1659 = arith.subf %1658, %4 : vector<2x7xf32>
    %1660 = arith.mulf %1659, %1659 : vector<2x7xf32>
    %cst_504 = arith.constant dense<0.000000e+00> : vector<7xf32>
    %1661 = vector.multi_reduction <add>, %1660, %cst_504 [0] : vector<2x7xf32> to vector<7xf32>
    %1662 = vector.shape_cast %1661 : vector<7xf32> to vector<1x7xf32>
    %cst_505 = arith.constant -5.000000e-01 : f32
    %1663 = vector.broadcast %cst_505 : f32 to vector<1x7xf32>
    %1664 = arith.mulf %1662, %1663 : vector<1x7xf32>
    %1665 = math.exp %1664 : vector<1x7xf32>
    %1666 = arith.mulf %27, %1665 : vector<1x7xf32>
    %1667 = vector.broadcast %1666 : vector<1x7xf32> to vector<2x7xf32>
    %1668 = arith.mulf %1667, %1659 : vector<2x7xf32>
    %cst_506 = arith.constant dense<0.000000e+00> : vector<2xf32>
    %1669 = vector.multi_reduction <add>, %1668, %cst_506 [1] : vector<2x7xf32> to vector<2xf32>
    %1670 = vector.shape_cast %1669 : vector<2xf32> to vector<2x1xf32>
    %cst_507 = arith.constant 9.99999974E-5 : f32
    %1671 = vector.broadcast %cst_507 : f32 to vector<2x1xf32>
    %1672 = arith.mulf %1671, %1657 : vector<2x1xf32>
    %1673 = arith.addf %1670, %1672 : vector<2x1xf32>
    %cst_508 = arith.constant 0.899999976 : f32
    %1674 = vector.broadcast %cst_508 : f32 to vector<2x1xf32>
    %1675 = arith.mulf %1674, %1641 : vector<2x1xf32>
    %cst_509 = arith.constant 1.000000e-01 : f32
    %1676 = vector.broadcast %cst_509 : f32 to vector<2x1xf32>
    %1677 = arith.mulf %1676, %1673 : vector<2x1xf32>
    %1678 = arith.addf %1675, %1677 : vector<2x1xf32>
    %cst_510 = arith.constant 9.990000e-01 : f32
    %1679 = vector.broadcast %cst_510 : f32 to vector<2x1xf32>
    %1680 = arith.mulf %1679, %1647 : vector<2x1xf32>
    %cst_511 = arith.constant 1.000000e-03 : f32
    %1681 = vector.broadcast %cst_511 : f32 to vector<2x1xf32>
    %1682 = arith.mulf %1681, %1673 : vector<2x1xf32>
    %1683 = arith.mulf %1682, %1673 : vector<2x1xf32>
    %1684 = arith.addf %1680, %1683 : vector<2x1xf32>
    %1685 = math.sqrt %1684 : vector<2x1xf32>
    %cst_512 = arith.constant 4.76601124 : f32
    %1686 = vector.broadcast %cst_512 : f32 to vector<2x1xf32>
    %1687 = arith.mulf %1685, %1686 : vector<2x1xf32>
    %cst_513 = arith.constant 9.99999993E-9 : f32
    %1688 = vector.broadcast %cst_513 : f32 to vector<2x1xf32>
    %1689 = arith.addf %1687, %1688 : vector<2x1xf32>
    %cst_514 = arith.constant 0.0504402407 : f32
    %1690 = vector.broadcast %cst_514 : f32 to vector<2x1xf32>
    %1691 = arith.mulf %1690, %1678 : vector<2x1xf32>
    %1692 = tpu.reciprocal %1689 {approx = true} : vector<2x1xf32> -> vector<2x1xf32>
    %1693 = arith.mulf %1691, %1692 : vector<2x1xf32>
    %1694 = arith.subf %1657, %1693 : vector<2x1xf32>
    %1695 = vector.broadcast %1694 : vector<2x1xf32> to vector<2x7xf32>
    %1696 = arith.subf %1695, %4 : vector<2x7xf32>
    %1697 = arith.mulf %1696, %1696 : vector<2x7xf32>
    %cst_515 = arith.constant dense<0.000000e+00> : vector<7xf32>
    %1698 = vector.multi_reduction <add>, %1697, %cst_515 [0] : vector<2x7xf32> to vector<7xf32>
    %1699 = vector.shape_cast %1698 : vector<7xf32> to vector<1x7xf32>
    %cst_516 = arith.constant -5.000000e-01 : f32
    %1700 = vector.broadcast %cst_516 : f32 to vector<1x7xf32>
    %1701 = arith.mulf %1699, %1700 : vector<1x7xf32>
    %1702 = math.exp %1701 : vector<1x7xf32>
    %1703 = arith.mulf %27, %1702 : vector<1x7xf32>
    %1704 = vector.broadcast %1703 : vector<1x7xf32> to vector<2x7xf32>
    %1705 = arith.mulf %1704, %1696 : vector<2x7xf32>
    %cst_517 = arith.constant dense<0.000000e+00> : vector<2xf32>
    %1706 = vector.multi_reduction <add>, %1705, %cst_517 [1] : vector<2x7xf32> to vector<2xf32>
    %1707 = vector.shape_cast %1706 : vector<2xf32> to vector<2x1xf32>
    %cst_518 = arith.constant 9.99999974E-5 : f32
    %1708 = vector.broadcast %cst_518 : f32 to vector<2x1xf32>
    %1709 = arith.mulf %1708, %1694 : vector<2x1xf32>
    %1710 = arith.addf %1707, %1709 : vector<2x1xf32>
    %cst_519 = arith.constant 0.899999976 : f32
    %1711 = vector.broadcast %cst_519 : f32 to vector<2x1xf32>
    %1712 = arith.mulf %1711, %1678 : vector<2x1xf32>
    %cst_520 = arith.constant 1.000000e-01 : f32
    %1713 = vector.broadcast %cst_520 : f32 to vector<2x1xf32>
    %1714 = arith.mulf %1713, %1710 : vector<2x1xf32>
    %1715 = arith.addf %1712, %1714 : vector<2x1xf32>
    %cst_521 = arith.constant 9.990000e-01 : f32
    %1716 = vector.broadcast %cst_521 : f32 to vector<2x1xf32>
    %1717 = arith.mulf %1716, %1684 : vector<2x1xf32>
    %cst_522 = arith.constant 1.000000e-03 : f32
    %1718 = vector.broadcast %cst_522 : f32 to vector<2x1xf32>
    %1719 = arith.mulf %1718, %1710 : vector<2x1xf32>
    %1720 = arith.mulf %1719, %1710 : vector<2x1xf32>
    %1721 = arith.addf %1717, %1720 : vector<2x1xf32>
    %1722 = math.sqrt %1721 : vector<2x1xf32>
    %cst_523 = arith.constant 4.71509218 : f32
    %1723 = vector.broadcast %cst_523 : f32 to vector<2x1xf32>
    %1724 = arith.mulf %1722, %1723 : vector<2x1xf32>
    %cst_524 = arith.constant 9.99999993E-9 : f32
    %1725 = vector.broadcast %cst_524 : f32 to vector<2x1xf32>
    %1726 = arith.addf %1724, %1725 : vector<2x1xf32>
    %cst_525 = arith.constant 0.0503958687 : f32
    %1727 = vector.broadcast %cst_525 : f32 to vector<2x1xf32>
    %1728 = arith.mulf %1727, %1715 : vector<2x1xf32>
    %1729 = tpu.reciprocal %1726 {approx = true} : vector<2x1xf32> -> vector<2x1xf32>
    %1730 = arith.mulf %1728, %1729 : vector<2x1xf32>
    %1731 = arith.subf %1694, %1730 : vector<2x1xf32>
    %1732 = vector.broadcast %1731 : vector<2x1xf32> to vector<2x7xf32>
    %1733 = arith.subf %1732, %4 : vector<2x7xf32>
    %1734 = arith.mulf %1733, %1733 : vector<2x7xf32>
    %cst_526 = arith.constant dense<0.000000e+00> : vector<7xf32>
    %1735 = vector.multi_reduction <add>, %1734, %cst_526 [0] : vector<2x7xf32> to vector<7xf32>
    %1736 = vector.shape_cast %1735 : vector<7xf32> to vector<1x7xf32>
    %cst_527 = arith.constant -5.000000e-01 : f32
    %1737 = vector.broadcast %cst_527 : f32 to vector<1x7xf32>
    %1738 = arith.mulf %1736, %1737 : vector<1x7xf32>
    %1739 = math.exp %1738 : vector<1x7xf32>
    %1740 = arith.mulf %27, %1739 : vector<1x7xf32>
    %1741 = vector.broadcast %1740 : vector<1x7xf32> to vector<2x7xf32>
    %1742 = arith.mulf %1741, %1733 : vector<2x7xf32>
    %cst_528 = arith.constant dense<0.000000e+00> : vector<2xf32>
    %1743 = vector.multi_reduction <add>, %1742, %cst_528 [1] : vector<2x7xf32> to vector<2xf32>
    %1744 = vector.shape_cast %1743 : vector<2xf32> to vector<2x1xf32>
    %cst_529 = arith.constant 9.99999974E-5 : f32
    %1745 = vector.broadcast %cst_529 : f32 to vector<2x1xf32>
    %1746 = arith.mulf %1745, %1731 : vector<2x1xf32>
    %1747 = arith.addf %1744, %1746 : vector<2x1xf32>
    %cst_530 = arith.constant 0.899999976 : f32
    %1748 = vector.broadcast %cst_530 : f32 to vector<2x1xf32>
    %1749 = arith.mulf %1748, %1715 : vector<2x1xf32>
    %cst_531 = arith.constant 1.000000e-01 : f32
    %1750 = vector.broadcast %cst_531 : f32 to vector<2x1xf32>
    %1751 = arith.mulf %1750, %1747 : vector<2x1xf32>
    %1752 = arith.addf %1749, %1751 : vector<2x1xf32>
    %cst_532 = arith.constant 9.990000e-01 : f32
    %1753 = vector.broadcast %cst_532 : f32 to vector<2x1xf32>
    %1754 = arith.mulf %1753, %1721 : vector<2x1xf32>
    %cst_533 = arith.constant 1.000000e-03 : f32
    %1755 = vector.broadcast %cst_533 : f32 to vector<2x1xf32>
    %1756 = arith.mulf %1755, %1747 : vector<2x1xf32>
    %1757 = arith.mulf %1756, %1747 : vector<2x1xf32>
    %1758 = arith.addf %1754, %1757 : vector<2x1xf32>
    %1759 = math.sqrt %1758 : vector<2x1xf32>
    %cst_534 = arith.constant 4.66581964 : f32
    %1760 = vector.broadcast %cst_534 : f32 to vector<2x1xf32>
    %1761 = arith.mulf %1759, %1760 : vector<2x1xf32>
    %cst_535 = arith.constant 9.99999993E-9 : f32
    %1762 = vector.broadcast %cst_535 : f32 to vector<2x1xf32>
    %1763 = arith.addf %1761, %1762 : vector<2x1xf32>
    %cst_536 = arith.constant 5.035600e-02 : f32
    %1764 = vector.broadcast %cst_536 : f32 to vector<2x1xf32>
    %1765 = arith.mulf %1764, %1752 : vector<2x1xf32>
    %1766 = tpu.reciprocal %1763 {approx = true} : vector<2x1xf32> -> vector<2x1xf32>
    %1767 = arith.mulf %1765, %1766 : vector<2x1xf32>
    %1768 = arith.subf %1731, %1767 : vector<2x1xf32>
    %1769 = vector.broadcast %1768 : vector<2x1xf32> to vector<2x7xf32>
    %1770 = arith.subf %1769, %4 : vector<2x7xf32>
    %1771 = arith.mulf %1770, %1770 : vector<2x7xf32>
    %cst_537 = arith.constant dense<0.000000e+00> : vector<7xf32>
    %1772 = vector.multi_reduction <add>, %1771, %cst_537 [0] : vector<2x7xf32> to vector<7xf32>
    %1773 = vector.shape_cast %1772 : vector<7xf32> to vector<1x7xf32>
    %cst_538 = arith.constant -5.000000e-01 : f32
    %1774 = vector.broadcast %cst_538 : f32 to vector<1x7xf32>
    %1775 = arith.mulf %1773, %1774 : vector<1x7xf32>
    %1776 = math.exp %1775 : vector<1x7xf32>
    %1777 = arith.mulf %27, %1776 : vector<1x7xf32>
    %1778 = vector.broadcast %1777 : vector<1x7xf32> to vector<2x7xf32>
    %1779 = arith.mulf %1778, %1770 : vector<2x7xf32>
    %cst_539 = arith.constant dense<0.000000e+00> : vector<2xf32>
    %1780 = vector.multi_reduction <add>, %1779, %cst_539 [1] : vector<2x7xf32> to vector<2xf32>
    %1781 = vector.shape_cast %1780 : vector<2xf32> to vector<2x1xf32>
    %cst_540 = arith.constant 9.99999974E-5 : f32
    %1782 = vector.broadcast %cst_540 : f32 to vector<2x1xf32>
    %1783 = arith.mulf %1782, %1768 : vector<2x1xf32>
    %1784 = arith.addf %1781, %1783 : vector<2x1xf32>
    %cst_541 = arith.constant 0.899999976 : f32
    %1785 = vector.broadcast %cst_541 : f32 to vector<2x1xf32>
    %1786 = arith.mulf %1785, %1752 : vector<2x1xf32>
    %cst_542 = arith.constant 1.000000e-01 : f32
    %1787 = vector.broadcast %cst_542 : f32 to vector<2x1xf32>
    %1788 = arith.mulf %1787, %1784 : vector<2x1xf32>
    %1789 = arith.addf %1786, %1788 : vector<2x1xf32>
    %cst_543 = arith.constant 9.990000e-01 : f32
    %1790 = vector.broadcast %cst_543 : f32 to vector<2x1xf32>
    %1791 = arith.mulf %1790, %1758 : vector<2x1xf32>
    %cst_544 = arith.constant 1.000000e-03 : f32
    %1792 = vector.broadcast %cst_544 : f32 to vector<2x1xf32>
    %1793 = arith.mulf %1792, %1784 : vector<2x1xf32>
    %1794 = arith.mulf %1793, %1784 : vector<2x1xf32>
    %1795 = arith.addf %1791, %1794 : vector<2x1xf32>
    %1796 = math.sqrt %1795 : vector<2x1xf32>
    %cst_545 = arith.constant 4.61810732 : f32
    %1797 = vector.broadcast %cst_545 : f32 to vector<2x1xf32>
    %1798 = arith.mulf %1796, %1797 : vector<2x1xf32>
    %cst_546 = arith.constant 9.99999993E-9 : f32
    %1799 = vector.broadcast %cst_546 : f32 to vector<2x1xf32>
    %1800 = arith.addf %1798, %1799 : vector<2x1xf32>
    %cst_547 = arith.constant 0.0503201708 : f32
    %1801 = vector.broadcast %cst_547 : f32 to vector<2x1xf32>
    %1802 = arith.mulf %1801, %1789 : vector<2x1xf32>
    %1803 = tpu.reciprocal %1800 {approx = true} : vector<2x1xf32> -> vector<2x1xf32>
    %1804 = arith.mulf %1802, %1803 : vector<2x1xf32>
    %1805 = arith.subf %1768, %1804 : vector<2x1xf32>
    %1806 = vector.broadcast %1805 : vector<2x1xf32> to vector<2x7xf32>
    %1807 = arith.subf %1806, %4 : vector<2x7xf32>
    %1808 = arith.mulf %1807, %1807 : vector<2x7xf32>
    %cst_548 = arith.constant dense<0.000000e+00> : vector<7xf32>
    %1809 = vector.multi_reduction <add>, %1808, %cst_548 [0] : vector<2x7xf32> to vector<7xf32>
    %1810 = vector.shape_cast %1809 : vector<7xf32> to vector<1x7xf32>
    %cst_549 = arith.constant -5.000000e-01 : f32
    %1811 = vector.broadcast %cst_549 : f32 to vector<1x7xf32>
    %1812 = arith.mulf %1810, %1811 : vector<1x7xf32>
    %1813 = math.exp %1812 : vector<1x7xf32>
    %1814 = arith.mulf %27, %1813 : vector<1x7xf32>
    %1815 = vector.broadcast %1814 : vector<1x7xf32> to vector<2x7xf32>
    %1816 = arith.mulf %1815, %1807 : vector<2x7xf32>
    %cst_550 = arith.constant dense<0.000000e+00> : vector<2xf32>
    %1817 = vector.multi_reduction <add>, %1816, %cst_550 [1] : vector<2x7xf32> to vector<2xf32>
    %1818 = vector.shape_cast %1817 : vector<2xf32> to vector<2x1xf32>
    %cst_551 = arith.constant 9.99999974E-5 : f32
    %1819 = vector.broadcast %cst_551 : f32 to vector<2x1xf32>
    %1820 = arith.mulf %1819, %1805 : vector<2x1xf32>
    %1821 = arith.addf %1818, %1820 : vector<2x1xf32>
    %cst_552 = arith.constant 0.899999976 : f32
    %1822 = vector.broadcast %cst_552 : f32 to vector<2x1xf32>
    %1823 = arith.mulf %1822, %1789 : vector<2x1xf32>
    %cst_553 = arith.constant 1.000000e-01 : f32
    %1824 = vector.broadcast %cst_553 : f32 to vector<2x1xf32>
    %1825 = arith.mulf %1824, %1821 : vector<2x1xf32>
    %1826 = arith.addf %1823, %1825 : vector<2x1xf32>
    %cst_554 = arith.constant 9.990000e-01 : f32
    %1827 = vector.broadcast %cst_554 : f32 to vector<2x1xf32>
    %1828 = arith.mulf %1827, %1795 : vector<2x1xf32>
    %cst_555 = arith.constant 1.000000e-03 : f32
    %1829 = vector.broadcast %cst_555 : f32 to vector<2x1xf32>
    %1830 = arith.mulf %1829, %1821 : vector<2x1xf32>
    %1831 = arith.mulf %1830, %1821 : vector<2x1xf32>
    %1832 = arith.addf %1828, %1831 : vector<2x1xf32>
    %1833 = math.sqrt %1832 : vector<2x1xf32>
    %cst_556 = arith.constant 4.5718751 : f32
    %1834 = vector.broadcast %cst_556 : f32 to vector<2x1xf32>
    %1835 = arith.mulf %1833, %1834 : vector<2x1xf32>
    %cst_557 = arith.constant 9.99999993E-9 : f32
    %1836 = vector.broadcast %cst_557 : f32 to vector<2x1xf32>
    %1837 = arith.addf %1835, %1836 : vector<2x1xf32>
    %cst_558 = arith.constant 0.0502879694 : f32
    %1838 = vector.broadcast %cst_558 : f32 to vector<2x1xf32>
    %1839 = arith.mulf %1838, %1826 : vector<2x1xf32>
    %1840 = tpu.reciprocal %1837 {approx = true} : vector<2x1xf32> -> vector<2x1xf32>
    %1841 = arith.mulf %1839, %1840 : vector<2x1xf32>
    %1842 = arith.subf %1805, %1841 : vector<2x1xf32>
    %1843 = vector.broadcast %1842 : vector<2x1xf32> to vector<2x7xf32>
    %1844 = arith.subf %1843, %4 : vector<2x7xf32>
    %1845 = arith.mulf %1844, %1844 : vector<2x7xf32>
    %cst_559 = arith.constant dense<0.000000e+00> : vector<7xf32>
    %1846 = vector.multi_reduction <add>, %1845, %cst_559 [0] : vector<2x7xf32> to vector<7xf32>
    %1847 = vector.shape_cast %1846 : vector<7xf32> to vector<1x7xf32>
    %cst_560 = arith.constant -5.000000e-01 : f32
    %1848 = vector.broadcast %cst_560 : f32 to vector<1x7xf32>
    %1849 = arith.mulf %1847, %1848 : vector<1x7xf32>
    %1850 = math.exp %1849 : vector<1x7xf32>
    %1851 = arith.mulf %27, %1850 : vector<1x7xf32>
    %1852 = vector.broadcast %1851 : vector<1x7xf32> to vector<2x7xf32>
    %1853 = arith.mulf %1852, %1844 : vector<2x7xf32>
    %cst_561 = arith.constant dense<0.000000e+00> : vector<2xf32>
    %1854 = vector.multi_reduction <add>, %1853, %cst_561 [1] : vector<2x7xf32> to vector<2xf32>
    %1855 = vector.shape_cast %1854 : vector<2xf32> to vector<2x1xf32>
    %cst_562 = arith.constant 9.99999974E-5 : f32
    %1856 = vector.broadcast %cst_562 : f32 to vector<2x1xf32>
    %1857 = arith.mulf %1856, %1842 : vector<2x1xf32>
    %1858 = arith.addf %1855, %1857 : vector<2x1xf32>
    %cst_563 = arith.constant 0.899999976 : f32
    %1859 = vector.broadcast %cst_563 : f32 to vector<2x1xf32>
    %1860 = arith.mulf %1859, %1826 : vector<2x1xf32>
    %cst_564 = arith.constant 1.000000e-01 : f32
    %1861 = vector.broadcast %cst_564 : f32 to vector<2x1xf32>
    %1862 = arith.mulf %1861, %1858 : vector<2x1xf32>
    %1863 = arith.addf %1860, %1862 : vector<2x1xf32>
    %cst_565 = arith.constant 9.990000e-01 : f32
    %1864 = vector.broadcast %cst_565 : f32 to vector<2x1xf32>
    %1865 = arith.mulf %1864, %1832 : vector<2x1xf32>
    %cst_566 = arith.constant 1.000000e-03 : f32
    %1866 = vector.broadcast %cst_566 : f32 to vector<2x1xf32>
    %1867 = arith.mulf %1866, %1858 : vector<2x1xf32>
    %1868 = arith.mulf %1867, %1858 : vector<2x1xf32>
    %1869 = arith.addf %1865, %1868 : vector<2x1xf32>
    %1870 = math.sqrt %1869 : vector<2x1xf32>
    %cst_567 = arith.constant 4.52704859 : f32
    %1871 = vector.broadcast %cst_567 : f32 to vector<2x1xf32>
    %1872 = arith.mulf %1870, %1871 : vector<2x1xf32>
    %cst_568 = arith.constant 9.99999993E-9 : f32
    %1873 = vector.broadcast %cst_568 : f32 to vector<2x1xf32>
    %1874 = arith.addf %1872, %1873 : vector<2x1xf32>
    %cst_569 = arith.constant 0.0502590239 : f32
    %1875 = vector.broadcast %cst_569 : f32 to vector<2x1xf32>
    %1876 = arith.mulf %1875, %1863 : vector<2x1xf32>
    %1877 = tpu.reciprocal %1874 {approx = true} : vector<2x1xf32> -> vector<2x1xf32>
    %1878 = arith.mulf %1876, %1877 : vector<2x1xf32>
    %1879 = arith.subf %1842, %1878 : vector<2x1xf32>
    %1880 = vector.broadcast %1879 : vector<2x1xf32> to vector<2x7xf32>
    %1881 = arith.subf %1880, %4 : vector<2x7xf32>
    %1882 = arith.mulf %1881, %1881 : vector<2x7xf32>
    %cst_570 = arith.constant dense<0.000000e+00> : vector<7xf32>
    %1883 = vector.multi_reduction <add>, %1882, %cst_570 [0] : vector<2x7xf32> to vector<7xf32>
    %1884 = vector.shape_cast %1883 : vector<7xf32> to vector<1x7xf32>
    %cst_571 = arith.constant -5.000000e-01 : f32
    %1885 = vector.broadcast %cst_571 : f32 to vector<1x7xf32>
    %1886 = arith.mulf %1884, %1885 : vector<1x7xf32>
    %1887 = math.exp %1886 : vector<1x7xf32>
    %1888 = arith.mulf %1887, %25 : vector<1x7xf32>
    %cst_572 = arith.constant dense<0.000000e+00> : vector<1xf32>
    %1889 = vector.multi_reduction <add>, %1888, %cst_572 [1] : vector<1x7xf32> to vector<1xf32>
    %1890 = vector.shape_cast %1889 : vector<1xf32> to vector<1x1xf32>
    %c0_573 = arith.constant 0 : index
    %c0_574 = arith.constant 0 : index
    %c0_575 = arith.constant 0 : index
    %1891 = vector.load %arg7[%c0_573, %c0_574, %c0_575] : memref<1x3x1xf32, #tpu.memory_space<vmem>>, vector<1x1x1xf32>
    %1892 = vector.shape_cast %1891 : vector<1x1x1xf32> to vector<1x1xf32>
    %1893 = vector.shape_cast %1890 : vector<1x1xf32> to vector<1x1x1xf32>
    tpu.vector_store %arg7[%c0_573, %c0_574, %c0_575], %1893 {strides = array<i32>} : memref<1x3x1xf32, #tpu.memory_space<vmem>>, vector<1x1x1xf32>,
    %c0_576 = arith.constant 0 : index
    %c1 = arith.constant 1 : index
    %c0_577 = arith.constant 0 : index
    %1894 = vector.load %arg7[%c0_576, %c1, %c0_577] : memref<1x3x1xf32, #tpu.memory_space<vmem>>, vector<1x2x1xf32>
    %1895 = vector.shape_cast %1894 : vector<1x2x1xf32> to vector<2x1xf32>
    %1896 = vector.shape_cast %1879 : vector<2x1xf32> to vector<1x2x1xf32>
    tpu.vector_store %arg7[%c0_576, %c1, %c0_577], %1896 {strides = array<i32>} : memref<1x3x1xf32, #tpu.memory_space<vmem>>, vector<1x2x1xf32>,
    return
  }
  func.func @transform_0(%arg0: i32) -> (i32, i32, i32) {
    %c0_i32 = arith.constant 0 : i32
    %c0_i32_0 = arith.constant 0 : i32
    %c0_i32_1 = arith.constant 0 : i32
    return %arg0, %c0_i32, %c0_i32_0 : i32, i32, i32
  }
  func.func @transform_1(%arg0: i32) -> (i32, i32, i32) {
    %c0_i32 = arith.constant 0 : i32
    %c0_i32_0 = arith.constant 0 : i32
    %c0_i32_1 = arith.constant 0 : i32
    return %arg0, %c0_i32, %c0_i32_0 : i32, i32, i32
  }
  func.func @transform_2(%arg0: i32) -> (i32, i32) {
    %c0_i32 = arith.constant 0 : i32
    %c0_i32_0 = arith.constant 0 : i32
    %c0_i32_1 = arith.constant 0 : i32
    return %c0_i32, %c0_i32_0 : i32, i32
  }
  func.func @transform_3(%arg0: i32) -> (i32, i32) {
    %c0_i32 = arith.constant 0 : i32
    %c0_i32_0 = arith.constant 0 : i32
    %c0_i32_1 = arith.constant 0 : i32
    return %c0_i32, %c0_i32_0 : i32, i32
  }
  func.func @transform_4(%arg0: i32) -> (i32, i32) {
    %c0_i32 = arith.constant 0 : i32
    %c0_i32_0 = arith.constant 0 : i32
    %c0_i32_1 = arith.constant 0 : i32
    return %c0_i32, %c0_i32_0 : i32, i32
  }
  func.func @transform_5(%arg0: i32) -> (i32, i32) {
    %c0_i32 = arith.constant 0 : i32
    %c0_i32_0 = arith.constant 0 : i32
    %c0_i32_1 = arith.constant 0 : i32
    return %c0_i32, %c0_i32_0 : i32, i32
  }
  func.func @transform_6(%arg0: i32) -> (i32, i32, i32) {
    %c0_i32 = arith.constant 0 : i32
    %c0_i32_0 = arith.constant 0 : i32
    %c0_i32_1 = arith.constant 0 : i32
    return %arg0, %c0_i32, %c0_i32_0 : i32, i32, i32
  }
}

</mosaic_0001>

<bundles_post_ra>
// kernel: tpu_custom_call.1
= control target key start
LH: loop header
LB: loop body
LE: loop exit
PB: predicated region body
PF: predicated region fallthrough
CT: control target
= control target key end

     0   :  { %s3217_s21 = smov 0   ;;  %s3489_s0 = inlined_call_operand.vmem [shape: f32[2,4,1], index: 0, kind: input, shape index: {}]   ;;  %s3490_s1 = inlined_call_operand.vmem [shape: f32[2,2,1], index: 1, kind: input, shape index: {}]   ;;  %s3491_s2 = inlined_call_operand.vmem [shape: f32[4,2], index: 2, kind: input, shape index: {}]   ;;  %s3492_s3 = inlined_call_operand.vmem [shape: f32[7,2], index: 3, kind: input, shape index: {}]   ;;  %s3493_s4 = inlined_call_operand.vmem [shape: f32[2,7], index: 4, kind: input, shape index: {}]   ;;  %s3494_s5 = inlined_call_operand.vmem [shape: f32[7,7], index: 5, kind: input, shape index: {}]   ;;  %s3495_s6 = inlined_call_operand.vmem [shape: f32[2,3,1], index: 6, kind: output, shape index: {}]  }
   0x1 LB: > { %s2843_s22 = sadd.s32 4294967295, %s3179_s21   ;;  %p2847_p0 = scmp.ge.s32.totalorder %s3179_s21, 1  ;;  %s3179_s21 = sphi %s3217_s21, %s16_s21  }
   0x2   : > { %p220_p1 = scmp.lt.s32.totalorder %s3179_s21, 3 }
   0x4   : > { %p221_p2 = pnand %p2847_p0, %p220_p1 }
   0x5   : > { %p252_p3 = scmp.lt.s32.totalorder (!%p221_p2), %s2843_s22, 1 }
   0x6   : > { %224 = sbr.rel (%p221_p2) target bundleno = 15404 (0x3c2c), region = 44 }
   0xb   : > { %v3181_v0 = vmov 0   ;;  %s3497_s22 = smov (!%p252_p3, %s2843_s22), 1  ;;  %v265_v3 = vld [vmem:[%s3491_s2] sm:$0xf]  ;;  %vm276_vm0 = vcmask 11264   ;;  %vm286_vm1 = vcmask 14336  }
   0xc   : > { %2862 = vset.pattern.permute.xlu0 %v3181_v0  ;;  %2863 = vset.pattern.permute.xlu1 %v3181_v0  ;;  %s2848_s23 = sshll.u32 %s3497_s22, 2  ;;  %s2849_s27 = sshll.u32 %s3497_s22, 1  ;;  %v266_v12 = vld [vmem:[%s3492_s3] sm:$0x7f]  ;;  %vm310_vm2 = vcmask 50176   ;;  %vm295_vm3 = vcmask 55296  }
   0xd   : > { %2864 = vset.pattern.permute.xlu2 %v3181_v0  ;;  %s255_s26 = scalar_lea.vmem %s3489_s0, %s2848_s23  ;;  %s259_s30 = scalar_lea.vmem %s3490_s1, %s2849_s27  ;;  %v3249_v17 = vld [vmem:[%s3493_s4] sm:$0x3] }
   0xe   : > { %v264_v1 = vld [vmem:[%s255_s26] sm:$0xf]  ;;  %s263_s28 = scalar_lea.vmem %s3495_s6, %s2848_s23 }
   0xf   : > { %272 = vperm.xlu0 %2862, %v264_v1   ;;  %v3237_v2 = vld [vmem:[%s259_s30] sm:$0x3] }
  0x10   : > { %305 = vperm.xlu1 %2863, %v3237_v2   ;;  %v268_v32 = vld [vmem:[%s3494_s5] sm:$0x7f]  ;;  %v326_v48 = vmul.f32 0.0001, %v3237_v2 }
  0x81   : > { %v273_v4 = vpop.permute.xlu0 %272 }
  0x82   : > { %v275_v5 = vmul.f32 %v273_v4, %v265_v3  ;;  %v306_v18 = vpop.permute.xlu1 %305 }
  0x83   : > { %v308_v19 = vsub.f32 %v306_v18, %v3249_v17 }
  0x84   : > { %v277_v6 = vsel %vm276_vm0, %v275_v5, 0.0 }
  0x85   : > { %v278_v7 = vrot.slane %v277_v6, 4  ;;  %v309_v20 = vmul.f32 %v308_v19, %v308_v19 }
  0x87   : > { %v279_v8 = vadd.f32 %v278_v7, %v277_v6  ;;  %v311_v21 = vsel %vm310_vm2, %v309_v20, 0.0 }
  0x88   : > { %v312_v22 = vrot.slane %v311_v21, 4 }
  0x89   : > { %v280_v9 = vrot.slane %v279_v8, 2 }
  0x8a   : > { %v313_v23 = vadd.f32 %v312_v22, %v311_v21 }
  0x8b   : > { %v281_v10 = vadd.f32 %v280_v9, %v279_v8 }
  0x8c   : > { %v314_v24 = vrot.slane %v313_v23, 2 }
  0x8d   : > { %v282_v11 = vrot.slane %v281_v10, 1 }
  0x8e   : > { %v315_v27 = vadd.f32 %v314_v24, %v313_v23 }
  0x8f   : > { %v283_v13 = vadd.f32 %v282_v11, %v281_v10 }
  0x90   : > { %v316_v30 = vrot.slane %v315_v27, 1 }
  0x91   : > { %v284_v14 = vsub.f32 %v266_v12, %v283_v13 }
  0x92   : > { %v317_v31 = vadd.f32 %v316_v30, %v315_v27 }
  0x93   : > { %v285_v15 = vmul.f32 %v284_v14, %v284_v14 }
  0x94   : > { %v318_v34 = vmul.f32 -0.5, %v317_v31 }
  0x95   : > { %v287_v16 = vsel %vm286_vm1, %v285_v15, 0.0 }
  0x96   : > { %288 = vadd.xlane.f32.xlu0 %v287_v16  ;;  %v319_v38 = vmul.f32 1.442695, %v318_v34 }
 0x109   : > { %v289_v25 = vpop.xlane.xlu0 %288 }
 0x10a   : > { %v290_v26 = vsub.f32 0.0, %v289_v25 }
 0x10c   : > { %v291_v28 = vmul.f32 0.5, %v290_v26 }
 0x10e   : > { %v292_v29 = vmul.f32 1.442695, %v291_v28 }
 0x110   : > { %2865 = vpow2.f32 %v292_v29 }
 0x111   : > { %2867 = vpow2.f32 %v319_v38 }
 0x116   : > { %v2866_v33 = vpop.eup %2865 }
 0x117   : > { %v294_v35 = vmul.f32 %v2866_v33, %v268_v32  ;;  %v2868_v44 = vpop.eup %2867 }
 0x119   : > { %v296_v36 = vsel %vm295_vm3, %v294_v35, 0.0 }
 0x11a   : > { %v297_v37 = vrot.slane %v296_v36, 4 }
 0x11c   : > { %v298_v39 = vadd.f32 %v297_v37, %v296_v36 }
 0x11e   : > { %v299_v40 = vrot.slane %v298_v39, 2 }
 0x120   : > { %v300_v41 = vadd.f32 %v299_v40, %v298_v39 }
 0x122   : > { %v301_v42 = vrot.slane %v300_v41, 1 }
 0x124   : > { %v3256_v43 = vadd.f32 %v301_v42, %v300_v41 }
 0x126   : > { %v321_v45 = vmul.f32 %v2868_v44, %v3256_v43 }
 0x128   : > { %v322_v46 = vmul.f32 %v321_v45, %v308_v19 }
 0x12a   : > { %v323_v47 = vsel %vm310_vm2, %v322_v46, 0.0 }
 0x12b   : > { %324 = vadd.xlane.f32.xlu1 %v323_v47 }
 0x19e   : > { %v325_v49 = vpop.xlane.xlu1 %324 }
 0x19f   : > { %v327_v50 = vadd.f32 %v326_v48, %v325_v49 }
 0x1a1   : > { %v330_v51 = vmul.f32 0.001, %v327_v50  ;;  %v328_v1 = vmul.f32 0.1, %v327_v50 }
 0x1a3   : > { %v331_v52 = vmul.f32 %v330_v51, %v327_v50  ;;  %v347_v3 = vmul.f32 0.5, %v328_v1  ;;  %v375_v44 = vmul.f32 0.9, %v328_v1 }
 0x1a5   : > { %2869 = vrsqrt.f32 %v331_v52  ;;  %vm340_vm4 = vcmp.eq.f32.partialorder %v331_v52, inf  ;;  %v343_v60 = vand.u32 2147483648, %v331_v52  ;;  %vm342_vm5 = vcmp.eq.f32.partialorder %v331_v52, 0.0 }
 0x1a6   : > { %v378_v27 = vmul.f32 0.999, %v331_v52 }
 0x1ab   : > { %v2870_v53 = vpop.eup %2869 }
 0x1ac   : > { %v334_v54 = vmul.f32 %v2870_v53, %v331_v52 }
 0x1ae   : > { %v335_v55 = vmul.f32 %v2870_v53, %v334_v54 }
 0x1b0   : > { %v336_v56 = vmul.f32 0.5, %v335_v55 }
 0x1b2   : > { %v337_v57 = vsub.f32 1.5, %v336_v56 }
 0x1b4   : > { %v338_v58 = vmul.f32 %v2870_v53, %v337_v57 }
 0x1b6   : > { %v339_v59 = vmul.f32 %v338_v58, %v331_v52 }
 0x1b8   : > { %v341_v61 = vsel %vm340_vm4, %v331_v52, %v339_v59 }
 0x1b9   : > { %v344_v62 = vsel %vm342_vm5, %v343_v60, %v341_v61 }
 0x1ba   : > { %v345_v63 = vmul.f32 31.622776, %v344_v62 }
 0x1bc   : > { %v346_v0 = vadd.f32 1e-08, %v345_v63 }
 0x1be   : > { %2871 = vrcp.f32 %v346_v0 }
 0x1c4   : > { %v2872_v4 = vpop.eup %2871 }
 0x1c5   : > { %v349_v5 = vmul.f32 %v2872_v4, %v347_v3 }
 0x1c7   : > { %v350_v6 = vsub.f32 %v3237_v2, %v349_v5 }
 0x1c9   : > { %353 = vperm.xlu2 %2864, %v350_v6   ;;  %v373_v23 = vmul.f32 0.0001, %v350_v6 }
 0x223   : > { %v354_v7 = vpop.permute.xlu2 %353 }
 0x224   : > { %v356_v8 = vsub.f32 %v354_v7, %v3249_v17 }
 0x226   : > { %v357_v9 = vmul.f32 %v356_v8, %v356_v8 }
 0x228   : > { %v358_v10 = vsel %vm310_vm2, %v357_v9, 0.0 }
 0x229   : > { %v359_v11 = vrot.slane %v358_v10, 4 }
 0x22b   : > { %v360_v12 = vadd.f32 %v359_v11, %v358_v10 }
 0x22d   : > { %v361_v13 = vrot.slane %v360_v12, 2 }
 0x22f   : > { %v362_v14 = vadd.f32 %v361_v13, %v360_v12 }
 0x231   : > { %v363_v15 = vrot.slane %v362_v14, 1 }
 0x233   : > { %v364_v16 = vadd.f32 %v363_v15, %v362_v14 }
 0x235   : > { %v365_v18 = vmul.f32 -0.5, %v364_v16 }
 0x237   : > { %v366_v19 = vmul.f32 1.442695, %v365_v18 }
 0x239   : > { %2873 = vpow2.f32 %v366_v19 }
 0x23f   : > { %v2874_v20 = vpop.eup %2873 }
 0x240   : > { %v368_v21 = vmul.f32 %v2874_v20, %v3256_v43 }
 0x242   : > { %v369_v2 = vmul.f32 %v368_v21, %v356_v8 }
 0x244   : > { %v370_v22 = vsel %vm310_vm2, %v369_v2, 0.0 }
 0x245   : > { %371 = vadd.xlane.f32.xlu2 %v370_v22 }
 0x2b8   : > { %v372_v24 = vpop.xlane.xlu2 %371 }
 0x2b9   : > { %v374_v25 = vadd.f32 %v373_v23, %v372_v24 }
 0x2bb   : > { %v379_v26 = vmul.f32 0.001, %v374_v25  ;;  %v376_v41 = vmul.f32 0.1, %v374_v25 }
 0x2bd   : > { %v380_v28 = vmul.f32 %v379_v26, %v374_v25  ;;  %v377_v45 = vadd.f32 %v376_v41, %v375_v44 }
 0x2bf   : > { %v381_v29 = vadd.f32 %v380_v28, %v378_v27  ;;  %v396_v46 = vmul.f32 0.2631579, %v377_v45  ;;  %v424_v23 = vmul.f32 0.9, %v377_v45 }
 0x2c1   : > { %2875 = vrsqrt.f32 %v381_v29  ;;  %vm389_vm6 = vcmp.eq.f32.partialorder %v381_v29, inf  ;;  %v392_v37 = vand.u32 2147483648, %v381_v29  ;;  %vm391_vm7 = vcmp.eq.f32.partialorder %v381_v29, 0.0 }
 0x2c2   : > { %v427_v7 = vmul.f32 0.999, %v381_v29 }
 0x2c7   : > { %v2876_v30 = vpop.eup %2875 }
 0x2c8   : > { %v383_v31 = vmul.f32 %v2876_v30, %v381_v29 }
 0x2ca   : > { %v384_v32 = vmul.f32 %v2876_v30, %v383_v31 }
 0x2cc   : > { %v385_v33 = vmul.f32 0.5, %v384_v32 }
 0x2ce   : > { %v386_v34 = vsub.f32 1.5, %v385_v33 }
 0x2d0   : > { %v387_v35 = vmul.f32 %v2876_v30, %v386_v34 }
 0x2d2   : > { %v388_v36 = vmul.f32 %v387_v35, %v381_v29 }
 0x2d4   : > { %v390_v38 = vsel %vm389_vm6, %v381_v29, %v388_v36 }
 0x2d5   : > { %v393_v39 = vsel %vm391_vm7, %v392_v37, %v390_v38 }
 0x2d6   : > { %v394_v40 = vmul.f32 22.366272, %v393_v39 }
 0x2d8   : > { %v395_v42 = vadd.f32 1e-08, %v394_v40 }
 0x2da   : > { %2877 = vrcp.f32 %v395_v42 }
 0x2e0   : > { %v2878_v47 = vpop.eup %2877 }
 0x2e1   : > { %v398_v48 = vmul.f32 %v2878_v47, %v396_v46 }
 0x2e3   : > { %v399_v49 = vsub.f32 %v350_v6, %v398_v48 }
 0x2e5   : > { %402 = vperm.xlu2 %2864, %v399_v49   ;;  %v422_v3 = vmul.f32 0.0001, %v399_v49 }
 0x33f   : > { %v403_v50 = vpop.permute.xlu2 %402 }
 0x340   : > { %v405_v51 = vsub.f32 %v403_v50, %v3249_v17 }
 0x342   : > { %v406_v52 = vmul.f32 %v405_v51, %v405_v51 }
 0x344   : > { %v407_v53 = vsel %vm310_vm2, %v406_v52, 0.0 }
 0x345   : > { %v408_v54 = vrot.slane %v407_v53, 4 }
 0x347   : > { %v409_v55 = vadd.f32 %v408_v54, %v407_v53 }
 0x349   : > { %v410_v56 = vrot.slane %v409_v55, 2 }
 0x34b   : > { %v411_v57 = vadd.f32 %v410_v56, %v409_v55 }
 0x34d   : > { %v412_v58 = vrot.slane %v411_v57, 1 }
 0x34f   : > { %v413_v59 = vadd.f32 %v412_v58, %v411_v57 }
 0x351   : > { %v414_v60 = vmul.f32 -0.5, %v413_v59 }
 0x353   : > { %v415_v61 = vmul.f32 1.442695, %v414_v60 }
 0x355   : > { %2879 = vpow2.f32 %v415_v61 }
 0x35b   : > { %v2880_v62 = vpop.eup %2879 }
 0x35c   : > { %v417_v63 = vmul.f32 %v2880_v62, %v3256_v43 }
 0x35e   : > { %v418_v0 = vmul.f32 %v417_v63, %v405_v51 }
 0x360   : > { %v419_v1 = vsel %vm310_vm2, %v418_v0, 0.0 }
 0x361   : > { %420 = vadd.xlane.f32.xlu0 %v419_v1 }
 0x3d4   : > { %v421_v4 = vpop.xlane.xlu0 %420 }
 0x3d5   : > { %v423_v5 = vadd.f32 %v422_v3, %v421_v4 }
 0x3d7   : > { %v428_v6 = vmul.f32 0.001, %v423_v5  ;;  %v425_v2 = vmul.f32 0.1, %v423_v5 }
 0x3d9   : > { %v429_v8 = vmul.f32 %v428_v6, %v423_v5  ;;  %v426_v24 = vadd.f32 %v425_v2, %v424_v23 }
 0x3db   : > { %v430_v9 = vadd.f32 %v429_v8, %v427_v7  ;;  %v445_v25 = vmul.f32 0.18450184, %v426_v24  ;;  %v473_v3 = vmul.f32 0.9, %v426_v24 }
 0x3dd   : > { %2881 = vrsqrt.f32 %v430_v9  ;;  %vm438_vm8 = vcmp.eq.f32.partialorder %v430_v9, inf  ;;  %v441_v18 = vand.u32 2147483648, %v430_v9  ;;  %vm440_vm9 = vcmp.eq.f32.partialorder %v430_v9, 0.0 }
 0x3de   : > { %v476_v50 = vmul.f32 0.999, %v430_v9 }
 0x3e3   : > { %v2882_v10 = vpop.eup %2881 }
 0x3e4   : > { %v432_v11 = vmul.f32 %v2882_v10, %v430_v9 }
 0x3e6   : > { %v433_v12 = vmul.f32 %v2882_v10, %v432_v11 }
 0x3e8   : > { %v434_v13 = vmul.f32 0.5, %v433_v12 }
 0x3ea   : > { %v435_v14 = vsub.f32 1.5, %v434_v13 }
 0x3ec   : > { %v436_v15 = vmul.f32 %v2882_v10, %v435_v14 }
 0x3ee   : > { %v437_v16 = vmul.f32 %v436_v15, %v430_v9 }
 0x3f0   : > { %v439_v19 = vsel %vm438_vm8, %v430_v9, %v437_v16 }
 0x3f1   : > { %v442_v20 = vsel %vm440_vm9, %v441_v18, %v439_v19 }
 0x3f2   : > { %v443_v21 = vmul.f32 18.266552, %v442_v20 }
 0x3f4   : > { %v444_v22 = vadd.f32 1e-08, %v443_v21 }
 0x3f6   : > { %2883 = vrcp.f32 %v444_v22 }
 0x3fc   : > { %v2884_v26 = vpop.eup %2883 }
 0x3fd   : > { %v447_v27 = vmul.f32 %v2884_v26, %v445_v25 }
 0x3ff   : > { %v448_v28 = vsub.f32 %v399_v49, %v447_v27 }
 0x401   : > { %451 = vperm.xlu1 %2863, %v448_v28   ;;  %v471_v46 = vmul.f32 0.0001, %v448_v28 }
 0x473   : > { %v452_v29 = vpop.permute.xlu1 %451 }
 0x474   : > { %v454_v30 = vsub.f32 %v452_v29, %v3249_v17 }
 0x476   : > { %v455_v31 = vmul.f32 %v454_v30, %v454_v30 }
 0x478   : > { %v456_v32 = vsel %vm310_vm2, %v455_v31, 0.0 }
 0x479   : > { %v457_v33 = vrot.slane %v456_v32, 4 }
 0x47b   : > { %v458_v34 = vadd.f32 %v457_v33, %v456_v32 }
 0x47d   : > { %v459_v35 = vrot.slane %v458_v34, 2 }
 0x47f   : > { %v460_v36 = vadd.f32 %v459_v35, %v458_v34 }
 0x481   : > { %v461_v37 = vrot.slane %v460_v36, 1 }
 0x483   : > { %v462_v38 = vadd.f32 %v461_v37, %v460_v36 }
 0x485   : > { %v463_v39 = vmul.f32 -0.5, %v462_v38 }
 0x487   : > { %v464_v40 = vmul.f32 1.442695, %v463_v39 }
 0x489   : > { %2885 = vpow2.f32 %v464_v40 }
 0x48f   : > { %v2886_v41 = vpop.eup %2885 }
 0x490   : > { %v466_v42 = vmul.f32 %v2886_v41, %v3256_v43 }
 0x492   : > { %v467_v44 = vmul.f32 %v466_v42, %v454_v30 }
 0x494   : > { %v468_v45 = vsel %vm310_vm2, %v467_v44, 0.0 }
 0x495   : > { %469 = vadd.xlane.f32.xlu0 %v468_v45 }
 0x508   : > { %v470_v47 = vpop.xlane.xlu0 %469 }
 0x509   : > { %v472_v48 = vadd.f32 %v471_v46, %v470_v47 }
 0x50b   : > { %v477_v49 = vmul.f32 0.001, %v472_v48  ;;  %v474_v0 = vmul.f32 0.1, %v472_v48 }
 0x50d   : > { %v478_v51 = vmul.f32 %v477_v49, %v472_v48  ;;  %v475_v4 = vadd.f32 %v474_v0, %v473_v3 }
 0x50f   : > { %v479_v52 = vadd.f32 %v478_v51, %v476_v50  ;;  %v494_v5 = vmul.f32 0.1453911, %v475_v4  ;;  %v522_v46 = vmul.f32 0.9, %v475_v4 }
 0x511   : > { %2887 = vrsqrt.f32 %v479_v52  ;;  %vm487_vm10 = vcmp.eq.f32.partialorder %v479_v52, inf  ;;  %v490_v60 = vand.u32 2147483648, %v479_v52  ;;  %vm489_vm11 = vcmp.eq.f32.partialorder %v479_v52, 0.0 }
 0x512   : > { %v525_v29 = vmul.f32 0.999, %v479_v52 }
 0x517   : > { %v2888_v53 = vpop.eup %2887 }
 0x518   : > { %v481_v54 = vmul.f32 %v2888_v53, %v479_v52 }
 0x51a   : > { %v482_v55 = vmul.f32 %v2888_v53, %v481_v54 }
 0x51c   : > { %v483_v56 = vmul.f32 0.5, %v482_v55 }
 0x51e   : > { %v484_v57 = vsub.f32 1.5, %v483_v56 }
 0x520   : > { %v485_v58 = vmul.f32 %v2888_v53, %v484_v57 }
 0x522   : > { %v486_v59 = vmul.f32 %v485_v58, %v479_v52 }
 0x524   : > { %v488_v61 = vsel %vm487_vm10, %v479_v52, %v486_v59 }
 0x525   : > { %v491_v62 = vsel %vm489_vm11, %v490_v60, %v488_v61 }
 0x526   : > { %v492_v63 = vmul.f32 15.823253, %v491_v62 }
 0x528   : > { %v493_v1 = vadd.f32 1e-08, %v492_v63 }
 0x52a   : > { %2889 = vrcp.f32 %v493_v1 }
 0x530   : > { %v2890_v6 = vpop.eup %2889 }
 0x531   : > { %v496_v7 = vmul.f32 %v2890_v6, %v494_v5 }
 0x533   : > { %v497_v8 = vsub.f32 %v448_v28, %v496_v7 }
 0x535   : > { %500 = vperm.xlu0 %2862, %v497_v8   ;;  %v520_v25 = vmul.f32 0.0001, %v497_v8 }
 0x5a7   : > { %v501_v9 = vpop.permute.xlu0 %500 }
 0x5a8   : > { %v503_v10 = vsub.f32 %v501_v9, %v3249_v17 }
 0x5aa   : > { %v504_v11 = vmul.f32 %v503_v10, %v503_v10 }
 0x5ac   : > { %v505_v12 = vsel %vm310_vm2, %v504_v11, 0.0 }
 0x5ad   : > { %v506_v13 = vrot.slane %v505_v12, 4 }
 0x5af   : > { %v507_v14 = vadd.f32 %v506_v13, %v505_v12 }
 0x5b1   : > { %v508_v15 = vrot.slane %v507_v14, 2 }
 0x5b3   : > { %v509_v16 = vadd.f32 %v508_v15, %v507_v14 }
 0x5b5   : > { %v510_v18 = vrot.slane %v509_v16, 1 }
 0x5b7   : > { %v511_v19 = vadd.f32 %v510_v18, %v509_v16 }
 0x5b9   : > { %v512_v20 = vmul.f32 -0.5, %v511_v19 }
 0x5bb   : > { %v513_v21 = vmul.f32 1.442695, %v512_v20 }
 0x5bd   : > { %2891 = vpow2.f32 %v513_v21 }
 0x5c3   : > { %v2892_v2 = vpop.eup %2891 }
 0x5c4   : > { %v515_v22 = vmul.f32 %v2892_v2, %v3256_v43 }
 0x5c6   : > { %v516_v23 = vmul.f32 %v515_v22, %v503_v10 }
 0x5c8   : > { %v517_v24 = vsel %vm310_vm2, %v516_v23, 0.0 }
 0x5c9   : > { %518 = vadd.xlane.f32.xlu2 %v517_v24 }
 0x63c   : > { %v519_v26 = vpop.xlane.xlu2 %518 }
 0x63d   : > { %v521_v27 = vadd.f32 %v520_v25, %v519_v26 }
 0x63f   : > { %v526_v28 = vmul.f32 0.001, %v521_v27  ;;  %v523_v44 = vmul.f32 0.1, %v521_v27 }
 0x641   : > { %v527_v30 = vmul.f32 %v526_v28, %v521_v27  ;;  %v524_v47 = vadd.f32 %v523_v44, %v522_v46 }
 0x643   : > { %v528_v31 = vadd.f32 %v527_v30, %v525_v29  ;;  %v543_v48 = vmul.f32 0.12209714, %v524_v47  ;;  %v571_v25 = vmul.f32 0.9, %v524_v47 }
 0x645   : > { %2893 = vrsqrt.f32 %v528_v31  ;;  %vm536_vm12 = vcmp.eq.f32.partialorder %v528_v31, inf  ;;  %v539_v39 = vand.u32 2147483648, %v528_v31  ;;  %vm538_vm13 = vcmp.eq.f32.partialorder %v528_v31, 0.0 }
 0x646   : > { %v574_v9 = vmul.f32 0.999, %v528_v31 }
 0x64b   : > { %v2894_v32 = vpop.eup %2893 }
 0x64c   : > { %v530_v33 = vmul.f32 %v2894_v32, %v528_v31 }
 0x64e   : > { %v531_v34 = vmul.f32 %v2894_v32, %v530_v33 }
 0x650   : > { %v532_v35 = vmul.f32 0.5, %v531_v34 }
 0x652   : > { %v533_v36 = vsub.f32 1.5, %v532_v35 }
 0x654   : > { %v534_v37 = vmul.f32 %v2894_v32, %v533_v36 }
 0x656   : > { %v535_v38 = vmul.f32 %v534_v37, %v528_v31 }
 0x658   : > { %v537_v40 = vsel %vm536_vm12, %v528_v31, %v535_v38 }
 0x659   : > { %v540_v41 = vsel %vm538_vm13, %v539_v39, %v537_v40 }
 0x65a   : > { %v541_v42 = vmul.f32 14.156285, %v540_v41 }
 0x65c   : > { %v542_v45 = vadd.f32 1e-08, %v541_v42 }
 0x65e   : > { %2895 = vrcp.f32 %v542_v45 }
 0x664   : > { %v2896_v49 = vpop.eup %2895 }
 0x665   : > { %v545_v50 = vmul.f32 %v2896_v49, %v543_v48 }
 0x667   : > { %v546_v51 = vsub.f32 %v497_v8, %v545_v50 }
 0x669   : > { %549 = vperm.xlu1 %2863, %v546_v51   ;;  %v569_v5 = vmul.f32 0.0001, %v546_v51 }
 0x6db   : > { %v550_v52 = vpop.permute.xlu1 %549 }
 0x6dc   : > { %v552_v53 = vsub.f32 %v550_v52, %v3249_v17 }
 0x6de   : > { %v553_v54 = vmul.f32 %v552_v53, %v552_v53 }
 0x6e0   : > { %v554_v55 = vsel %vm310_vm2, %v553_v54, 0.0 }
 0x6e1   : > { %v555_v56 = vrot.slane %v554_v55, 4 }
 0x6e3   : > { %v556_v57 = vadd.f32 %v555_v56, %v554_v55 }
 0x6e5   : > { %v557_v58 = vrot.slane %v556_v57, 2 }
 0x6e7   : > { %v558_v59 = vadd.f32 %v557_v58, %v556_v57 }
 0x6e9   : > { %v559_v60 = vrot.slane %v558_v59, 1 }
 0x6eb   : > { %v560_v61 = vadd.f32 %v559_v60, %v558_v59 }
 0x6ed   : > { %v561_v62 = vmul.f32 -0.5, %v560_v61 }
 0x6ef   : > { %v562_v63 = vmul.f32 1.442695, %v561_v62 }
 0x6f1   : > { %2897 = vpow2.f32 %v562_v63 }
 0x6f7   : > { %v2898_v0 = vpop.eup %2897 }
 0x6f8   : > { %v564_v1 = vmul.f32 %v2898_v0, %v3256_v43 }
 0x6fa   : > { %v565_v3 = vmul.f32 %v564_v1, %v552_v53 }
 0x6fc   : > { %v566_v4 = vsel %vm310_vm2, %v565_v3, 0.0 }
 0x6fd   : > { %567 = vadd.xlane.f32.xlu1 %v566_v4 }
 0x770   : > { %v568_v6 = vpop.xlane.xlu1 %567 }
 0x771   : > { %v570_v7 = vadd.f32 %v569_v5, %v568_v6 }
 0x773   : > { %v575_v8 = vmul.f32 0.001, %v570_v7  ;;  %v572_v23 = vmul.f32 0.1, %v570_v7 }
 0x775   : > { %v576_v10 = vmul.f32 %v575_v8, %v570_v7  ;;  %v573_v26 = vadd.f32 %v572_v23, %v571_v25 }
 0x777   : > { %v577_v11 = vadd.f32 %v576_v10, %v574_v9  ;;  %v592_v27 = vmul.f32 0.10671015, %v573_v26  ;;  %v620_v5 = vmul.f32 0.9, %v573_v26 }
 0x779   : > { %2899 = vrsqrt.f32 %v577_v11  ;;  %vm585_vm14 = vcmp.eq.f32.partialorder %v577_v11, inf  ;;  %v588_v20 = vand.u32 2147483648, %v577_v11  ;;  %vm587_vm15 = vcmp.eq.f32.partialorder %v577_v11, 0.0 }
 0x77a   : > { %v623_v52 = vmul.f32 0.999, %v577_v11 }
 0x77f   : > { %v2900_v12 = vpop.eup %2899 }
 0x780   : > { %v579_v13 = vmul.f32 %v2900_v12, %v577_v11 }
 0x782   : > { %v580_v14 = vmul.f32 %v2900_v12, %v579_v13 }
 0x784   : > { %v581_v15 = vmul.f32 0.5, %v580_v14 }
 0x786   : > { %v582_v16 = vsub.f32 1.5, %v581_v15 }
 0x788   : > { %v583_v18 = vmul.f32 %v2900_v12, %v582_v16 }
 0x78a   : > { %v584_v19 = vmul.f32 %v583_v18, %v577_v11 }
 0x78c   : > { %v586_v21 = vsel %vm585_vm14, %v577_v11, %v584_v19 }
 0x78d   : > { %v589_v2 = vsel %vm587_vm15, %v588_v20, %v586_v21 }
 0x78e   : > { %v590_v22 = vmul.f32 12.92609, %v589_v2 }
 0x790   : > { %v591_v24 = vadd.f32 1e-08, %v590_v22 }
 0x792   : > { %2901 = vrcp.f32 %v591_v24 }
 0x798   : > { %v2902_v28 = vpop.eup %2901 }
 0x799   : > { %v594_v29 = vmul.f32 %v2902_v28, %v592_v27 }
 0x79b   : > { %v595_v30 = vsub.f32 %v546_v51, %v594_v29 }
 0x79d   : > { %598 = vperm.xlu0 %2862, %v595_v30   ;;  %v618_v48 = vmul.f32 0.0001, %v595_v30 }
 0x80f   : > { %v599_v31 = vpop.permute.xlu0 %598 }
 0x810   : > { %v601_v32 = vsub.f32 %v599_v31, %v3249_v17 }
 0x812   : > { %v602_v33 = vmul.f32 %v601_v32, %v601_v32 }
 0x814   : > { %v603_v34 = vsel %vm310_vm2, %v602_v33, 0.0 }
 0x815   : > { %v604_v35 = vrot.slane %v603_v34, 4 }
 0x817   : > { %v605_v36 = vadd.f32 %v604_v35, %v603_v34 }
 0x819   : > { %v606_v37 = vrot.slane %v605_v36, 2 }
 0x81b   : > { %v607_v38 = vadd.f32 %v606_v37, %v605_v36 }
 0x81d   : > { %v608_v39 = vrot.slane %v607_v38, 1 }
 0x81f   : > { %v609_v40 = vadd.f32 %v608_v39, %v607_v38 }
 0x821   : > { %v610_v41 = vmul.f32 -0.5, %v609_v40 }
 0x823   : > { %v611_v42 = vmul.f32 1.442695, %v610_v41 }
 0x825   : > { %2903 = vpow2.f32 %v611_v42 }
 0x82b   : > { %v2904_v44 = vpop.eup %2903 }
 0x82c   : > { %v613_v45 = vmul.f32 %v2904_v44, %v3256_v43 }
 0x82e   : > { %v614_v46 = vmul.f32 %v613_v45, %v601_v32 }
 0x830   : > { %v615_v47 = vsel %vm310_vm2, %v614_v46, 0.0 }
 0x831   : > { %616 = vadd.xlane.f32.xlu0 %v615_v47 }
 0x8a4   : > { %v617_v49 = vpop.xlane.xlu0 %616 }
 0x8a5   : > { %v619_v50 = vadd.f32 %v618_v48, %v617_v49 }
 0x8a7   : > { %v624_v51 = vmul.f32 0.001, %v619_v50  ;;  %v621_v3 = vmul.f32 0.1, %v619_v50 }
 0x8a9   : > { %v625_v53 = vmul.f32 %v624_v51, %v619_v50  ;;  %v622_v6 = vadd.f32 %v621_v3, %v620_v5 }
 0x8ab   : > { %v626_v54 = vadd.f32 %v625_v53, %v623_v52  ;;  %v641_v7 = vmul.f32 0.095839955, %v622_v6  ;;  %v669_v48 = vmul.f32 0.9, %v622_v6 }
 0x8ad   : > { %2905 = vrsqrt.f32 %v626_v54  ;;  %vm634_vm0 = vcmp.eq.f32.partialorder %v626_v54, inf  ;;  %v637_v62 = vand.u32 2147483648, %v626_v54  ;;  %vm636_vm1 = vcmp.eq.f32.partialorder %v626_v54, 0.0 }
 0x8ae   : > { %v672_v31 = vmul.f32 0.999, %v626_v54 }
 0x8b3   : > { %v2906_v55 = vpop.eup %2905 }
 0x8b4   : > { %v628_v56 = vmul.f32 %v2906_v55, %v626_v54 }
 0x8b6   : > { %v629_v57 = vmul.f32 %v2906_v55, %v628_v56 }
 0x8b8   : > { %v630_v58 = vmul.f32 0.5, %v629_v57 }
 0x8ba   : > { %v631_v59 = vsub.f32 1.5, %v630_v58 }
 0x8bc   : > { %v632_v60 = vmul.f32 %v2906_v55, %v631_v59 }
 0x8be   : > { %v633_v61 = vmul.f32 %v632_v60, %v626_v54 }
 0x8c0   : > { %v635_v63 = vsel %vm634_vm0, %v626_v54, %v633_v61 }
 0x8c1   : > { %v638_v0 = vsel %vm636_vm1, %v637_v62, %v635_v63 }
 0x8c2   : > { %v639_v1 = vmul.f32 11.970225, %v638_v0 }
 0x8c4   : > { %v640_v4 = vadd.f32 1e-08, %v639_v1 }
 0x8c6   : > { %2907 = vrcp.f32 %v640_v4 }
 0x8cc   : > { %v2908_v8 = vpop.eup %2907 }
 0x8cd   : > { %v643_v9 = vmul.f32 %v2908_v8, %v641_v7 }
 0x8cf   : > { %v644_v10 = vsub.f32 %v595_v30, %v643_v9 }
 0x8d1   : > { %647 = vperm.xlu2 %2864, %v644_v10   ;;  %v667_v27 = vmul.f32 0.0001, %v644_v10 }
 0x92b   : > { %v648_v11 = vpop.permute.xlu2 %647 }
 0x92c   : > { %v650_v12 = vsub.f32 %v648_v11, %v3249_v17 }
 0x92e   : > { %v651_v13 = vmul.f32 %v650_v12, %v650_v12 }
 0x930   : > { %v652_v14 = vsel %vm310_vm2, %v651_v13, 0.0 }
 0x931   : > { %v653_v15 = vrot.slane %v652_v14, 4 }
 0x933   : > { %v654_v16 = vadd.f32 %v653_v15, %v652_v14 }
 0x935   : > { %v655_v18 = vrot.slane %v654_v16, 2 }
 0x937   : > { %v656_v19 = vadd.f32 %v655_v18, %v654_v16 }
 0x939   : > { %v657_v20 = vrot.slane %v656_v19, 1 }
 0x93b   : > { %v658_v21 = vadd.f32 %v657_v20, %v656_v19 }
 0x93d   : > { %v659_v2 = vmul.f32 -0.5, %v658_v21 }
 0x93f   : > { %v660_v22 = vmul.f32 1.442695, %v659_v2 }
 0x941   : > { %2909 = vpow2.f32 %v660_v22 }
 0x947   : > { %v2910_v23 = vpop.eup %2909 }
 0x948   : > { %v662_v24 = vmul.f32 %v2910_v23, %v3256_v43 }
 0x94a   : > { %v663_v25 = vmul.f32 %v662_v24, %v650_v12 }
 0x94c   : > { %v664_v26 = vsel %vm310_vm2, %v663_v25, 0.0 }
 0x94d   : > { %665 = vadd.xlane.f32.xlu1 %v664_v26 }
 0x9c0   : > { %v666_v28 = vpop.xlane.xlu1 %665 }
 0x9c1   : > { %v668_v29 = vadd.f32 %v667_v27, %v666_v28 }
 0x9c3   : > { %v673_v30 = vmul.f32 0.001, %v668_v29  ;;  %v670_v46 = vmul.f32 0.1, %v668_v29 }
 0x9c5   : > { %v674_v32 = vmul.f32 %v673_v30, %v668_v29  ;;  %v671_v49 = vadd.f32 %v670_v46, %v669_v48 }
 0x9c7   : > { %v675_v33 = vadd.f32 %v674_v32, %v672_v31  ;;  %v690_v50 = vmul.f32 0.08779126, %v671_v49  ;;  %v718_v27 = vmul.f32 0.9, %v671_v49 }
 0x9c9   : > { %2911 = vrsqrt.f32 %v675_v33  ;;  %vm683_vm3 = vcmp.eq.f32.partialorder %v675_v33, inf  ;;  %v686_v41 = vand.u32 2147483648, %v675_v33  ;;  %vm685_vm4 = vcmp.eq.f32.partialorder %v675_v33, 0.0 }
 0x9ca   : > { %v721_v11 = vmul.f32 0.999, %v675_v33 }
 0x9cf   : > { %v2912_v34 = vpop.eup %2911 }
 0x9d0   : > { %v677_v35 = vmul.f32 %v2912_v34, %v675_v33 }
 0x9d2   : > { %v678_v36 = vmul.f32 %v2912_v34, %v677_v35 }
 0x9d4   : > { %v679_v37 = vmul.f32 0.5, %v678_v36 }
 0x9d6   : > { %v680_v38 = vsub.f32 1.5, %v679_v37 }
 0x9d8   : > { %v681_v39 = vmul.f32 %v2912_v34, %v680_v38 }
 0x9da   : > { %v682_v40 = vmul.f32 %v681_v39, %v675_v33 }
 0x9dc   : > { %v684_v42 = vsel %vm683_vm3, %v675_v33, %v682_v40 }
 0x9dd   : > { %v687_v44 = vsel %vm685_vm4, %v686_v41, %v684_v42 }
 0x9de   : > { %v688_v45 = vmul.f32 11.199918, %v687_v44 }
 0x9e0   : > { %v689_v47 = vadd.f32 1e-08, %v688_v45 }
 0x9e2   : > { %2913 = vrcp.f32 %v689_v47 }
 0x9e8   : > { %v2914_v51 = vpop.eup %2913 }
 0x9e9   : > { %v692_v52 = vmul.f32 %v2914_v51, %v690_v50 }
 0x9eb   : > { %v693_v53 = vsub.f32 %v644_v10, %v692_v52 }
 0x9ed   : > { %696 = vperm.xlu1 %2863, %v693_v53   ;;  %v716_v7 = vmul.f32 0.0001, %v693_v53 }
 0xa5f   : > { %v697_v54 = vpop.permute.xlu1 %696 }
 0xa60   : > { %v699_v55 = vsub.f32 %v697_v54, %v3249_v17 }
 0xa62   : > { %v700_v56 = vmul.f32 %v699_v55, %v699_v55 }
 0xa64   : > { %v701_v57 = vsel %vm310_vm2, %v700_v56, 0.0 }
 0xa65   : > { %v702_v58 = vrot.slane %v701_v57, 4 }
 0xa67   : > { %v703_v59 = vadd.f32 %v702_v58, %v701_v57 }
 0xa69   : > { %v704_v60 = vrot.slane %v703_v59, 2 }
 0xa6b   : > { %v705_v61 = vadd.f32 %v704_v60, %v703_v59 }
 0xa6d   : > { %v706_v62 = vrot.slane %v705_v61, 1 }
 0xa6f   : > { %v707_v63 = vadd.f32 %v706_v62, %v705_v61 }
 0xa71   : > { %v708_v0 = vmul.f32 -0.5, %v707_v63 }
 0xa73   : > { %v709_v1 = vmul.f32 1.442695, %v708_v0 }
 0xa75   : > { %2915 = vpow2.f32 %v709_v1 }
 0xa7b   : > { %v2916_v3 = vpop.eup %2915 }
 0xa7c   : > { %v711_v4 = vmul.f32 %v2916_v3, %v3256_v43 }
 0xa7e   : > { %v712_v5 = vmul.f32 %v711_v4, %v699_v55 }
 0xa80   : > { %v713_v6 = vsel %vm310_vm2, %v712_v5, 0.0 }
 0xa81   : > { %714 = vadd.xlane.f32.xlu0 %v713_v6 }
 0xaf4   : > { %v715_v8 = vpop.xlane.xlu0 %714 }
 0xaf5   : > { %v717_v9 = vadd.f32 %v716_v7, %v715_v8 }
 0xaf7   : > { %v722_v10 = vmul.f32 0.001, %v717_v9  ;;  %v719_v25 = vmul.f32 0.1, %v717_v9 }
 0xaf9   : > { %v723_v12 = vmul.f32 %v722_v10, %v717_v9  ;;  %v720_v28 = vadd.f32 %v719_v25, %v718_v27 }
 0xafb   : > { %v724_v13 = vadd.f32 %v723_v12, %v721_v11  ;;  %v739_v29 = vmul.f32 0.08162206, %v720_v28  ;;  %v767_v7 = vmul.f32 0.9, %v720_v28 }
 0xafd   : > { %2917 = vrsqrt.f32 %v724_v13  ;;  %vm732_vm5 = vcmp.eq.f32.partialorder %v724_v13, inf  ;;  %v735_v2 = vand.u32 2147483648, %v724_v13  ;;  %vm734_vm6 = vcmp.eq.f32.partialorder %v724_v13, 0.0 }
 0xafe   : > { %v770_v54 = vmul.f32 0.999, %v724_v13 }
 0xb03   : > { %v2918_v14 = vpop.eup %2917 }
 0xb04   : > { %v726_v15 = vmul.f32 %v2918_v14, %v724_v13 }
 0xb06   : > { %v727_v16 = vmul.f32 %v2918_v14, %v726_v15 }
 0xb08   : > { %v728_v18 = vmul.f32 0.5, %v727_v16 }
 0xb0a   : > { %v729_v19 = vsub.f32 1.5, %v728_v18 }
 0xb0c   : > { %v730_v20 = vmul.f32 %v2918_v14, %v729_v19 }
 0xb0e   : > { %v731_v21 = vmul.f32 %v730_v20, %v724_v13 }
 0xb10   : > { %v733_v22 = vsel %vm732_vm5, %v724_v13, %v731_v21 }
 0xb11   : > { %v736_v23 = vsel %vm734_vm6, %v735_v2, %v733_v22 }
 0xb12   : > { %v737_v24 = vmul.f32 10.562021, %v736_v23 }
 0xb14   : > { %v738_v26 = vadd.f32 1e-08, %v737_v24 }
 0xb16   : > { %2919 = vrcp.f32 %v738_v26 }
 0xb1c   : > { %v2920_v30 = vpop.eup %2919 }
 0xb1d   : > { %v741_v31 = vmul.f32 %v2920_v30, %v739_v29 }
 0xb1f   : > { %v742_v32 = vsub.f32 %v693_v53, %v741_v31 }
 0xb21   : > { %745 = vperm.xlu2 %2864, %v742_v32   ;;  %v765_v50 = vmul.f32 0.0001, %v742_v32 }
 0xb7b   : > { %v746_v33 = vpop.permute.xlu2 %745 }
 0xb7c   : > { %v748_v34 = vsub.f32 %v746_v33, %v3249_v17 }
 0xb7e   : > { %v749_v35 = vmul.f32 %v748_v34, %v748_v34 }
 0xb80   : > { %v750_v36 = vsel %vm310_vm2, %v749_v35, 0.0 }
 0xb81   : > { %v751_v37 = vrot.slane %v750_v36, 4 }
 0xb83   : > { %v752_v38 = vadd.f32 %v751_v37, %v750_v36 }
 0xb85   : > { %v753_v39 = vrot.slane %v752_v38, 2 }
 0xb87   : > { %v754_v40 = vadd.f32 %v753_v39, %v752_v38 }
 0xb89   : > { %v755_v41 = vrot.slane %v754_v40, 1 }
 0xb8b   : > { %v756_v42 = vadd.f32 %v755_v41, %v754_v40 }
 0xb8d   : > { %v757_v44 = vmul.f32 -0.5, %v756_v42 }
 0xb8f   : > { %v758_v45 = vmul.f32 1.442695, %v757_v44 }
 0xb91   : > { %2921 = vpow2.f32 %v758_v45 }
 0xb97   : > { %v2922_v46 = vpop.eup %2921 }
 0xb98   : > { %v760_v47 = vmul.f32 %v2922_v46, %v3256_v43 }
 0xb9a   : > { %v761_v48 = vmul.f32 %v760_v47, %v748_v34 }
 0xb9c   : > { %v762_v49 = vsel %vm310_vm2, %v761_v48, 0.0 }
 0xb9d   : > { %763 = vadd.xlane.f32.xlu0 %v762_v49 }
 0xc10   : > { %v764_v51 = vpop.xlane.xlu0 %763 }
 0xc11   : > { %v766_v52 = vadd.f32 %v765_v50, %v764_v51 }
 0xc13   : > { %v771_v53 = vmul.f32 0.001, %v766_v52  ;;  %v768_v5 = vmul.f32 0.1, %v766_v52 }
 0xc15   : > { %v772_v55 = vmul.f32 %v771_v53, %v766_v52  ;;  %v769_v8 = vadd.f32 %v768_v5, %v767_v7 }
 0xc17   : > { %v773_v56 = vadd.f32 %v772_v55, %v770_v54  ;;  %v788_v9 = vmul.f32 0.076767, %v769_v8  ;;  %v816_v49 = vmul.f32 0.9, %v769_v8 }
 0xc19   : > { %2923 = vrsqrt.f32 %v773_v56  ;;  %vm781_vm7 = vcmp.eq.f32.partialorder %v773_v56, inf  ;;  %v784_v0 = vand.u32 2147483648, %v773_v56  ;;  %vm783_vm8 = vcmp.eq.f32.partialorder %v773_v56, 0.0 }
 0xc1f   : > { %v2924_v57 = vpop.eup %2923 }
 0xc20   : > { %v775_v58 = vmul.f32 %v2924_v57, %v773_v56 }
 0xc22   : > { %v776_v59 = vmul.f32 %v2924_v57, %v775_v58 }
 0xc24   : > { %v777_v60 = vmul.f32 0.5, %v776_v59 }
 0xc26   : > { %v778_v61 = vsub.f32 1.5, %v777_v60 }
 0xc28   : > { %v779_v62 = vmul.f32 %v2924_v57, %v778_v61 }
 0xc2a   : > { %v780_v63 = vmul.f32 %v779_v62, %v773_v56 }
 0xc2c   : > { %v782_v1 = vsel %vm781_vm7, %v773_v56, %v780_v63 }
 0xc2d   : > { %v785_v3 = vsel %vm783_vm8, %v784_v0, %v782_v1 }
 0xc2e   : > { %v786_v4 = vmul.f32 10.022516, %v785_v3 }
 0xc30   : > { %v787_v6 = vadd.f32 1e-08, %v786_v4 }
 0xc32   : > { %2925 = vrcp.f32 %v787_v6 }
 0xc38   : > { %v2926_v10 = vpop.eup %2925 }
 0xc39   : > { %v790_v11 = vmul.f32 %v2926_v10, %v788_v9 }
 0xc3b   : > { %v791_v12 = vsub.f32 %v742_v32, %v790_v11  ;;  %v819_v32 = vmul.f32 0.999, %v773_v56  ;;  %v3305_v56 = vld [vmem:[%s3493_s4] sm:$0x3] }
 0xc3d   : > { %794 = vperm.xlu2 %2864, %v791_v12  }
 0xc97   : > { %v795_v13 = vpop.permute.xlu2 %794 }
 0xc98   : > { %v797_v14 = vsub.f32 %v795_v13, %v3249_v17  ;;  %v814_v17 = vmul.f32 0.0001, %v791_v12 }
 0xc9a   : > { %v798_v15 = vmul.f32 %v797_v14, %v797_v14 }
 0xc9c   : > { %v799_v16 = vsel %vm310_vm2, %v798_v15, 0.0 }
 0xc9d   : > { %v800_v18 = vrot.slane %v799_v16, 4 }
 0xc9f   : > { %v801_v19 = vadd.f32 %v800_v18, %v799_v16 }
 0xca1   : > { %v802_v20 = vrot.slane %v801_v19, 2 }
 0xca3   : > { %v803_v21 = vadd.f32 %v802_v20, %v801_v19 }
 0xca5   : > { %v804_v2 = vrot.slane %v803_v21, 1 }
 0xca7   : > { %v805_v22 = vadd.f32 %v804_v2, %v803_v21 }
 0xca9   : > { %v806_v23 = vmul.f32 -0.5, %v805_v22 }
 0xcab   : > { %v807_v24 = vmul.f32 1.442695, %v806_v23 }
 0xcad   : > { %2927 = vpow2.f32 %v807_v24 }
 0xcb3   : > { %v2928_v25 = vpop.eup %2927 }
 0xcb4   : > { %v809_v26 = vmul.f32 %v2928_v25, %v3256_v43 }
 0xcb6   : > { %v810_v27 = vmul.f32 %v809_v26, %v797_v14 }
 0xcb8   : > { %v811_v28 = vsel %vm310_vm2, %v810_v27, 0.0 }
 0xcb9   : > { %812 = vadd.xlane.f32.xlu0 %v811_v28 }
 0xd2c   : > { %v813_v29 = vpop.xlane.xlu0 %812 }
 0xd2d   : > { %v815_v30 = vadd.f32 %v814_v17, %v813_v29 }
 0xd2f   : > { %v820_v31 = vmul.f32 0.001, %v815_v30  ;;  %v817_v47 = vmul.f32 0.1, %v815_v30 }
 0xd31   : > { %v821_v33 = vmul.f32 %v820_v31, %v815_v30  ;;  %v818_v50 = vadd.f32 %v817_v47, %v816_v49 }
 0xd33   : > { %v822_v34 = vadd.f32 %v821_v33, %v819_v32  ;;  %v837_v51 = vmul.f32 0.07286618, %v818_v50  ;;  %v865_v17 = vmul.f32 0.9, %v818_v50 }
 0xd35   : > { %2929 = vrsqrt.f32 %v822_v34  ;;  %vm830_vm9 = vcmp.eq.f32.partialorder %v822_v34, inf  ;;  %v833_v42 = vand.u32 2147483648, %v822_v34  ;;  %vm832_vm10 = vcmp.eq.f32.partialorder %v822_v34, 0.0 }
 0xd36   : > { %v868_v13 = vmul.f32 0.999, %v822_v34 }
 0xd3b   : > { %v2930_v35 = vpop.eup %2929 }
 0xd3c   : > { %v824_v36 = vmul.f32 %v2930_v35, %v822_v34 }
 0xd3e   : > { %v825_v37 = vmul.f32 %v2930_v35, %v824_v36 }
 0xd40   : > { %v826_v38 = vmul.f32 0.5, %v825_v37 }
 0xd42   : > { %v827_v39 = vsub.f32 1.5, %v826_v38 }
 0xd44   : > { %v828_v40 = vmul.f32 %v2930_v35, %v827_v39 }
 0xd46   : > { %v829_v41 = vmul.f32 %v828_v40, %v822_v34 }
 0xd48   : > { %v831_v44 = vsel %vm830_vm9, %v822_v34, %v829_v41 }
 0xd49   : > { %v834_v45 = vsel %vm832_vm10, %v833_v42, %v831_v44 }
 0xd4a   : > { %v835_v46 = vmul.f32 9.55848, %v834_v45 }
 0xd4c   : > { %v836_v48 = vadd.f32 1e-08, %v835_v46 }
 0xd4e   : > { %2931 = vrcp.f32 %v836_v48 }
 0xd54   : > { %v2932_v52 = vpop.eup %2931 }
 0xd55   : > { %v839_v53 = vmul.f32 %v2932_v52, %v837_v51 }
 0xd57   : > { %v840_v54 = vsub.f32 %v791_v12, %v839_v53 }
 0xd59   : > { %843 = vperm.xlu2 %2864, %v840_v54   ;;  %v863_v9 = vmul.f32 0.0001, %v840_v54 }
 0xdb3   : > { %v844_v55 = vpop.permute.xlu2 %843 }
 0xdb4   : > { %v846_v57 = vsub.f32 %v844_v55, %v3305_v56 }
 0xdb6   : > { %v847_v58 = vmul.f32 %v846_v57, %v846_v57 }
 0xdb8   : > { %v848_v59 = vsel %vm310_vm2, %v847_v58, 0.0 }
 0xdb9   : > { %v849_v60 = vrot.slane %v848_v59, 4 }
 0xdbb   : > { %v850_v61 = vadd.f32 %v849_v60, %v848_v59 }
 0xdbd   : > { %v851_v62 = vrot.slane %v850_v61, 2 }
 0xdbf   : > { %v852_v63 = vadd.f32 %v851_v62, %v850_v61 }
 0xdc1   : > { %v853_v0 = vrot.slane %v852_v63, 1 }
 0xdc3   : > { %v854_v1 = vadd.f32 %v853_v0, %v852_v63 }
 0xdc5   : > { %v855_v3 = vmul.f32 -0.5, %v854_v1 }
 0xdc7   : > { %v856_v4 = vmul.f32 1.442695, %v855_v3 }
 0xdc9   : > { %2933 = vpow2.f32 %v856_v4 }
 0xdcf   : > { %v2934_v5 = vpop.eup %2933 }
 0xdd0   : > { %v858_v6 = vmul.f32 %v2934_v5, %v3256_v43 }
 0xdd2   : > { %v859_v7 = vmul.f32 %v858_v6, %v846_v57 }
 0xdd4   : > { %v860_v8 = vsel %vm310_vm2, %v859_v7, 0.0 }
 0xdd5   : > { %861 = vadd.xlane.f32.xlu1 %v860_v8 }
 0xe48   : > { %v862_v10 = vpop.xlane.xlu1 %861 }
 0xe49   : > { %v864_v11 = vadd.f32 %v863_v9, %v862_v10 }
 0xe4b   : > { %v869_v12 = vmul.f32 0.001, %v864_v11  ;;  %v866_v27 = vmul.f32 0.1, %v864_v11 }
 0xe4d   : > { %v870_v14 = vmul.f32 %v869_v12, %v864_v11  ;;  %v867_v29 = vadd.f32 %v866_v27, %v865_v17 }
 0xe4f   : > { %v871_v15 = vadd.f32 %v870_v14, %v868_v13  ;;  %v886_v30 = vmul.f32 0.069679566, %v867_v29  ;;  %v914_v9 = vmul.f32 0.9, %v867_v29 }
 0xe51   : > { %2935 = vrsqrt.f32 %v871_v15  ;;  %vm879_vm11 = vcmp.eq.f32.partialorder %v871_v15, inf  ;;  %v882_v23 = vand.u32 2147483648, %v871_v15  ;;  %vm881_vm12 = vcmp.eq.f32.partialorder %v871_v15, 0.0 }
 0xe52   : > { %v917_v55 = vmul.f32 0.999, %v871_v15 }
 0xe57   : > { %v2936_v16 = vpop.eup %2935 }
 0xe58   : > { %v873_v18 = vmul.f32 %v2936_v16, %v871_v15 }
 0xe5a   : > { %v874_v19 = vmul.f32 %v2936_v16, %v873_v18 }
 0xe5c   : > { %v875_v20 = vmul.f32 0.5, %v874_v19 }
 0xe5e   : > { %v876_v21 = vsub.f32 1.5, %v875_v20 }
 0xe60   : > { %v877_v2 = vmul.f32 %v2936_v16, %v876_v21 }
 0xe62   : > { %v878_v22 = vmul.f32 %v877_v2, %v871_v15 }
 0xe64   : > { %v880_v24 = vsel %vm879_vm11, %v871_v15, %v878_v22 }
 0xe65   : > { %v883_v25 = vsel %vm881_vm12, %v882_v23, %v880_v24 }
 0xe66   : > { %v884_v26 = vmul.f32 9.153833, %v883_v25 }
 0xe68   : > { %v885_v28 = vadd.f32 1e-08, %v884_v26 }
 0xe6a   : > { %2937 = vrcp.f32 %v885_v28 }
 0xe70   : > { %v2938_v31 = vpop.eup %2937 }
 0xe71   : > { %v888_v32 = vmul.f32 %v2938_v31, %v886_v30 }
 0xe73   : > { %v889_v33 = vsub.f32 %v840_v54, %v888_v32 }
 0xe75   : > { %892 = vperm.xlu0 %2862, %v889_v33   ;;  %v912_v51 = vmul.f32 0.0001, %v889_v33 }
 0xee7   : > { %v893_v34 = vpop.permute.xlu0 %892 }
 0xee8   : > { %v895_v35 = vsub.f32 %v893_v34, %v3305_v56 }
 0xeea   : > { %v896_v36 = vmul.f32 %v895_v35, %v895_v35 }
 0xeec   : > { %v897_v37 = vsel %vm310_vm2, %v896_v36, 0.0 }
 0xeed   : > { %v898_v38 = vrot.slane %v897_v37, 4 }
 0xeef   : > { %v899_v39 = vadd.f32 %v898_v38, %v897_v37 }
 0xef1   : > { %v900_v40 = vrot.slane %v899_v39, 2 }
 0xef3   : > { %v901_v41 = vadd.f32 %v900_v40, %v899_v39 }
 0xef5   : > { %v902_v42 = vrot.slane %v901_v41, 1 }
 0xef7   : > { %v903_v44 = vadd.f32 %v902_v42, %v901_v41 }
 0xef9   : > { %v904_v45 = vmul.f32 -0.5, %v903_v44 }
 0xefb   : > { %v905_v46 = vmul.f32 1.442695, %v904_v45 }
 0xefd   : > { %2939 = vpow2.f32 %v905_v46 }
 0xf03   : > { %v2940_v47 = vpop.eup %2939 }
 0xf04   : > { %v907_v48 = vmul.f32 %v2940_v47, %v3256_v43 }
 0xf06   : > { %v908_v49 = vmul.f32 %v907_v48, %v895_v35 }
 0xf08   : > { %v909_v50 = vsel %vm310_vm2, %v908_v49, 0.0 }
 0xf09   : > { %910 = vadd.xlane.f32.xlu2 %v909_v50 }
 0xf7c   : > { %v911_v52 = vpop.xlane.xlu2 %910 }
 0xf7d   : > { %v913_v53 = vadd.f32 %v912_v51, %v911_v52 }
 0xf7f   : > { %v918_v54 = vmul.f32 0.001, %v913_v53  ;;  %v915_v7 = vmul.f32 0.1, %v913_v53 }
 0xf81   : > { %v919_v57 = vmul.f32 %v918_v54, %v913_v53  ;;  %v916_v10 = vadd.f32 %v915_v7, %v914_v9 }
 0xf83   : > { %v920_v58 = vadd.f32 %v919_v57, %v917_v55  ;;  %v935_v11 = vmul.f32 0.0670409, %v916_v10  ;;  %v963_v51 = vmul.f32 0.9, %v916_v10 }
 0xf85   : > { %2941 = vrsqrt.f32 %v920_v58  ;;  %vm928_vm13 = vcmp.eq.f32.partialorder %v920_v58, inf  ;;  %v931_v3 = vand.u32 2147483648, %v920_v58  ;;  %vm930_vm14 = vcmp.eq.f32.partialorder %v920_v58, 0.0 }
 0xf86   : > { %v966_v34 = vmul.f32 0.999, %v920_v58 }
 0xf8b   : > { %v2942_v59 = vpop.eup %2941 }
 0xf8c   : > { %v922_v60 = vmul.f32 %v2942_v59, %v920_v58 }
 0xf8e   : > { %v923_v61 = vmul.f32 %v2942_v59, %v922_v60 }
 0xf90   : > { %v924_v62 = vmul.f32 0.5, %v923_v61 }
 0xf92   : > { %v925_v63 = vsub.f32 1.5, %v924_v62 }
 0xf94   : > { %v926_v0 = vmul.f32 %v2942_v59, %v925_v63 }
 0xf96   : > { %v927_v1 = vmul.f32 %v926_v0, %v920_v58 }
 0xf98   : > { %v929_v4 = vsel %vm928_vm13, %v920_v58, %v927_v1 }
 0xf99   : > { %v932_v5 = vsel %vm930_vm14, %v931_v3, %v929_v4 }
 0xf9a   : > { %v933_v6 = vmul.f32 8.796914, %v932_v5 }
 0xf9c   : > { %v934_v8 = vadd.f32 1e-08, %v933_v6 }
 0xf9e   : > { %2943 = vrcp.f32 %v934_v8 }
 0xfa4   : > { %v2944_v12 = vpop.eup %2943 }
 0xfa5   : > { %v937_v13 = vmul.f32 %v2944_v12, %v935_v11 }
 0xfa7   : > { %v938_v14 = vsub.f32 %v889_v33, %v937_v13 }
 0xfa9   : > { %941 = vperm.xlu0 %2862, %v938_v14   ;;  %v961_v30 = vmul.f32 0.0001, %v938_v14 }
0x101b   : > { %v942_v15 = vpop.permute.xlu0 %941 }
0x101c   : > { %v944_v16 = vsub.f32 %v942_v15, %v3305_v56 }
0x101e   : > { %v945_v18 = vmul.f32 %v944_v16, %v944_v16 }
0x1020   : > { %v946_v19 = vsel %vm310_vm2, %v945_v18, 0.0 }
0x1021   : > { %v947_v20 = vrot.slane %v946_v19, 4 }
0x1023   : > { %v948_v21 = vadd.f32 %v947_v20, %v946_v19 }
0x1025   : > { %v949_v2 = vrot.slane %v948_v21, 2 }
0x1027   : > { %v950_v22 = vadd.f32 %v949_v2, %v948_v21 }
0x1029   : > { %v951_v23 = vrot.slane %v950_v22, 1 }
0x102b   : > { %v952_v24 = vadd.f32 %v951_v23, %v950_v22 }
0x102d   : > { %v953_v25 = vmul.f32 -0.5, %v952_v24 }
0x102f   : > { %v954_v26 = vmul.f32 1.442695, %v953_v25 }
0x1031   : > { %2945 = vpow2.f32 %v954_v26 }
0x1037   : > { %v2946_v27 = vpop.eup %2945 }
0x1038   : > { %v956_v28 = vmul.f32 %v2946_v27, %v3256_v43 }
0x103a   : > { %v957_v17 = vmul.f32 %v956_v28, %v944_v16 }
0x103c   : > { %v958_v29 = vsel %vm310_vm2, %v957_v17, 0.0 }
0x103d   : > { %959 = vadd.xlane.f32.xlu0 %v958_v29 }
0x10b0   : > { %v960_v31 = vpop.xlane.xlu0 %959 }
0x10b1   : > { %v962_v32 = vadd.f32 %v961_v30, %v960_v31 }
0x10b3   : > { %v967_v33 = vmul.f32 0.001, %v962_v32  ;;  %v964_v49 = vmul.f32 0.1, %v962_v32 }
0x10b5   : > { %v968_v35 = vmul.f32 %v967_v33, %v962_v32  ;;  %v965_v52 = vadd.f32 %v964_v49, %v963_v51 }
0x10b7   : > { %v969_v36 = vadd.f32 %v968_v35, %v966_v34  ;;  %v984_v53 = vmul.f32 0.06483133, %v965_v52  ;;  %v1012_v30 = vmul.f32 0.9, %v965_v52 }
0x10b9   : > { %2947 = vrsqrt.f32 %v969_v36  ;;  %vm977_vm15 = vcmp.eq.f32.partialorder %v969_v36, inf  ;;  %v980_v45 = vand.u32 2147483648, %v969_v36  ;;  %vm979_vm0 = vcmp.eq.f32.partialorder %v969_v36, 0.0 }
0x10ba   : > { %v1015_v15 = vmul.f32 0.999, %v969_v36 }
0x10bf   : > { %v2948_v37 = vpop.eup %2947 }
0x10c0   : > { %v971_v38 = vmul.f32 %v2948_v37, %v969_v36 }
0x10c2   : > { %v972_v39 = vmul.f32 %v2948_v37, %v971_v38 }
0x10c4   : > { %v973_v40 = vmul.f32 0.5, %v972_v39 }
0x10c6   : > { %v974_v41 = vsub.f32 1.5, %v973_v40 }
0x10c8   : > { %v975_v42 = vmul.f32 %v2948_v37, %v974_v41 }
0x10ca   : > { %v976_v44 = vmul.f32 %v975_v42, %v969_v36 }
0x10cc   : > { %v978_v46 = vsel %vm977_vm15, %v969_v36, %v976_v44 }
0x10cd   : > { %v981_v47 = vsel %vm979_vm0, %v980_v45, %v978_v46 }
0x10ce   : > { %v982_v48 = vmul.f32 8.479034, %v981_v47 }
0x10d0   : > { %v983_v50 = vadd.f32 1e-08, %v982_v48 }
0x10d2   : > { %2949 = vrcp.f32 %v983_v50 }
0x10d8   : > { %v2950_v54 = vpop.eup %2949 }
0x10d9   : > { %v986_v55 = vmul.f32 %v2950_v54, %v984_v53 }
0x10db   : > { %v987_v57 = vsub.f32 %v938_v14, %v986_v55 }
0x10dd   : > { %990 = vperm.xlu1 %2863, %v987_v57   ;;  %v1010_v11 = vmul.f32 0.0001, %v987_v57 }
0x114f   : > { %v991_v58 = vpop.permute.xlu1 %990 }
0x1150   : > { %v993_v59 = vsub.f32 %v991_v58, %v3305_v56 }
0x1152   : > { %v994_v60 = vmul.f32 %v993_v59, %v993_v59 }
0x1154   : > { %v995_v61 = vsel %vm310_vm2, %v994_v60, 0.0 }
0x1155   : > { %v996_v62 = vrot.slane %v995_v61, 4 }
0x1157   : > { %v997_v63 = vadd.f32 %v996_v62, %v995_v61 }
0x1159   : > { %v998_v0 = vrot.slane %v997_v63, 2 }
0x115b   : > { %v999_v1 = vadd.f32 %v998_v0, %v997_v63 }
0x115d   : > { %v1000_v3 = vrot.slane %v999_v1, 1 }
0x115f   : > { %v1001_v4 = vadd.f32 %v1000_v3, %v999_v1 }
0x1161   : > { %v1002_v5 = vmul.f32 -0.5, %v1001_v4 }
0x1163   : > { %v1003_v6 = vmul.f32 1.442695, %v1002_v5 }
0x1165   : > { %2951 = vpow2.f32 %v1003_v6 }
0x116b   : > { %v2952_v7 = vpop.eup %2951 }
0x116c   : > { %v1005_v8 = vmul.f32 %v2952_v7, %v3256_v43 }
0x116e   : > { %v1006_v9 = vmul.f32 %v1005_v8, %v993_v59 }
0x1170   : > { %v1007_v10 = vsel %vm310_vm2, %v1006_v9, 0.0 }
0x1171   : > { %1008 = vadd.xlane.f32.xlu2 %v1007_v10 }
0x11e4   : > { %v1009_v12 = vpop.xlane.xlu2 %1008 }
0x11e5   : > { %v1011_v13 = vadd.f32 %v1010_v11, %v1009_v12 }
0x11e7   : > { %v1016_v14 = vmul.f32 0.001, %v1011_v13  ;;  %v1013_v17 = vmul.f32 0.1, %v1011_v13 }
0x11e9   : > { %v1017_v16 = vmul.f32 %v1016_v14, %v1011_v13  ;;  %v1014_v31 = vadd.f32 %v1013_v17, %v1012_v30 }
0x11eb   : > { %v1018_v18 = vadd.f32 %v1017_v16, %v1015_v15  ;;  %v1033_v32 = vmul.f32 0.06296366, %v1014_v31  ;;  %v1061_v11 = vmul.f32 0.9, %v1014_v31 }
0x11ed   : > { %2953 = vrsqrt.f32 %v1018_v18  ;;  %vm1026_vm1 = vcmp.eq.f32.partialorder %v1018_v18, inf  ;;  %v1029_v25 = vand.u32 2147483648, %v1018_v18  ;;  %vm1028_vm3 = vcmp.eq.f32.partialorder %v1018_v18, 0.0 }
0x11ee   : > { %v1064_v58 = vmul.f32 0.999, %v1018_v18 }
0x11f3   : > { %v2954_v19 = vpop.eup %2953 }
0x11f4   : > { %v1020_v20 = vmul.f32 %v2954_v19, %v1018_v18 }
0x11f6   : > { %v1021_v21 = vmul.f32 %v2954_v19, %v1020_v20 }
0x11f8   : > { %v1022_v2 = vmul.f32 0.5, %v1021_v21 }
0x11fa   : > { %v1023_v22 = vsub.f32 1.5, %v1022_v2 }
0x11fc   : > { %v1024_v23 = vmul.f32 %v2954_v19, %v1023_v22 }
0x11fe   : > { %v1025_v24 = vmul.f32 %v1024_v23, %v1018_v18 }
0x1200   : > { %v1027_v26 = vsel %vm1026_vm1, %v1018_v18, %v1025_v24 }
0x1201   : > { %v1030_v27 = vsel %vm1028_vm3, %v1029_v25, %v1027_v26 }
0x1202   : > { %v1031_v28 = vmul.f32 8.193569, %v1030_v27 }
0x1204   : > { %v1032_v29 = vadd.f32 1e-08, %v1031_v28 }
0x1206   : > { %2955 = vrcp.f32 %v1032_v29 }
0x120c   : > { %v2956_v33 = vpop.eup %2955 }
0x120d   : > { %v1035_v34 = vmul.f32 %v2956_v33, %v1033_v32 }
0x120f   : > { %v1036_v35 = vsub.f32 %v987_v57, %v1035_v34 }
0x1211   : > { %1039 = vperm.xlu2 %2864, %v1036_v35   ;;  %v1059_v53 = vmul.f32 0.0001, %v1036_v35 }
0x126b   : > { %v1040_v36 = vpop.permute.xlu2 %1039 }
0x126c   : > { %v1042_v37 = vsub.f32 %v1040_v36, %v3305_v56 }
0x126e   : > { %v1043_v38 = vmul.f32 %v1042_v37, %v1042_v37 }
0x1270   : > { %v1044_v39 = vsel %vm310_vm2, %v1043_v38, 0.0 }
0x1271   : > { %v1045_v40 = vrot.slane %v1044_v39, 4 }
0x1273   : > { %v1046_v41 = vadd.f32 %v1045_v40, %v1044_v39 }
0x1275   : > { %v1047_v42 = vrot.slane %v1046_v41, 2 }
0x1277   : > { %v1048_v44 = vadd.f32 %v1047_v42, %v1046_v41 }
0x1279   : > { %v1049_v45 = vrot.slane %v1048_v44, 1 }
0x127b   : > { %v1050_v46 = vadd.f32 %v1049_v45, %v1048_v44 }
0x127d   : > { %v1051_v47 = vmul.f32 -0.5, %v1050_v46 }
0x127f   : > { %v1052_v48 = vmul.f32 1.442695, %v1051_v47 }
0x1281   : > { %2957 = vpow2.f32 %v1052_v48 }
0x1287   : > { %v2958_v49 = vpop.eup %2957 }
0x1288   : > { %v1054_v50 = vmul.f32 %v2958_v49, %v3256_v43 }
0x128a   : > { %v1055_v51 = vmul.f32 %v1054_v50, %v1042_v37 }
0x128c   : > { %v1056_v52 = vsel %vm310_vm2, %v1055_v51, 0.0 }
0x128d   : > { %1057 = vadd.xlane.f32.xlu1 %v1056_v52 }
0x1300   : > { %v1058_v54 = vpop.xlane.xlu1 %1057 }
0x1301   : > { %v1060_v55 = vadd.f32 %v1059_v53, %v1058_v54 }
0x1303   : > { %v1065_v57 = vmul.f32 0.001, %v1060_v55  ;;  %v1062_v9 = vmul.f32 0.1, %v1060_v55 }
0x1305   : > { %v1066_v59 = vmul.f32 %v1065_v57, %v1060_v55  ;;  %v1063_v12 = vadd.f32 %v1062_v9, %v1061_v11 }
0x1307   : > { %v1067_v60 = vadd.f32 %v1066_v59, %v1064_v58  ;;  %v1082_v13 = vmul.f32 0.061372437, %v1063_v12  ;;  %v1110_v53 = vmul.f32 0.9, %v1063_v12 }
0x1309   : > { %2959 = vrsqrt.f32 %v1067_v60  ;;  %vm1075_vm4 = vcmp.eq.f32.partialorder %v1067_v60, inf  ;;  %v1078_v5 = vand.u32 2147483648, %v1067_v60  ;;  %vm1077_vm5 = vcmp.eq.f32.partialorder %v1067_v60, 0.0 }
0x130a   : > { %v1113_v36 = vmul.f32 0.999, %v1067_v60 }
0x130f   : > { %v2960_v61 = vpop.eup %2959 }
0x1310   : > { %v1069_v62 = vmul.f32 %v2960_v61, %v1067_v60 }
0x1312   : > { %v1070_v63 = vmul.f32 %v2960_v61, %v1069_v62 }
0x1314   : > { %v1071_v0 = vmul.f32 0.5, %v1070_v63 }
0x1316   : > { %v1072_v1 = vsub.f32 1.5, %v1071_v0 }
0x1318   : > { %v1073_v3 = vmul.f32 %v2960_v61, %v1072_v1 }
0x131a   : > { %v1074_v4 = vmul.f32 %v1073_v3, %v1067_v60 }
0x131c   : > { %v1076_v6 = vsel %vm1075_vm4, %v1067_v60, %v1074_v4 }
0x131d   : > { %v1079_v7 = vsel %vm1077_vm5, %v1078_v5, %v1076_v6 }
0x131e   : > { %v1080_v8 = vmul.f32 7.935369, %v1079_v7 }
0x1320   : > { %v1081_v10 = vadd.f32 1e-08, %v1080_v8 }
0x1322   : > { %2961 = vrcp.f32 %v1081_v10 }
0x1328   : > { %v2962_v14 = vpop.eup %2961 }
0x1329   : > { %v1084_v15 = vmul.f32 %v2962_v14, %v1082_v13 }
0x132b   : > { %v1085_v16 = vsub.f32 %v1036_v35, %v1084_v15 }
0x132d   : > { %1088 = vperm.xlu0 %2862, %v1085_v16   ;;  %v1108_v32 = vmul.f32 0.0001, %v1085_v16 }
0x139f   : > { %v1089_v18 = vpop.permute.xlu0 %1088 }
0x13a0   : > { %v1091_v19 = vsub.f32 %v1089_v18, %v3305_v56 }
0x13a2   : > { %v1092_v20 = vmul.f32 %v1091_v19, %v1091_v19 }
0x13a4   : > { %v1093_v21 = vsel %vm310_vm2, %v1092_v20, 0.0 }
0x13a5   : > { %v1094_v2 = vrot.slane %v1093_v21, 4 }
0x13a7   : > { %v1095_v22 = vadd.f32 %v1094_v2, %v1093_v21 }
0x13a9   : > { %v1096_v23 = vrot.slane %v1095_v22, 2 }
0x13ab   : > { %v1097_v24 = vadd.f32 %v1096_v23, %v1095_v22 }
0x13ad   : > { %v1098_v25 = vrot.slane %v1097_v24, 1 }
0x13af   : > { %v1099_v26 = vadd.f32 %v1098_v25, %v1097_v24 }
0x13b1   : > { %v1100_v27 = vmul.f32 -0.5, %v1099_v26 }
0x13b3   : > { %v1101_v28 = vmul.f32 1.442695, %v1100_v27 }
0x13b5   : > { %2963 = vpow2.f32 %v1101_v28 }
0x13bb   : > { %v2964_v17 = vpop.eup %2963 }
0x13bc   : > { %v1103_v29 = vmul.f32 %v2964_v17, %v3256_v43 }
0x13be   : > { %v1104_v30 = vmul.f32 %v1103_v29, %v1091_v19 }
0x13c0   : > { %v1105_v31 = vsel %vm310_vm2, %v1104_v30, 0.0 }
0x13c1   : > { %1106 = vadd.xlane.f32.xlu2 %v1105_v31 }
0x1434   : > { %v1107_v33 = vpop.xlane.xlu2 %1106 }
0x1435   : > { %v1109_v34 = vadd.f32 %v1108_v32, %v1107_v33 }
0x1437   : > { %v1114_v35 = vmul.f32 0.001, %v1109_v34  ;;  %v1111_v51 = vmul.f32 0.1, %v1109_v34 }
0x1439   : > { %v1115_v37 = vmul.f32 %v1114_v35, %v1109_v34  ;;  %v1112_v54 = vadd.f32 %v1111_v51, %v1110_v53 }
0x143b   : > { %v1116_v38 = vadd.f32 %v1115_v37, %v1113_v36  ;;  %v1131_v55 = vmul.f32 0.060007572, %v1112_v54  ;;  %v1159_v32 = vmul.f32 0.9, %v1112_v54 }
0x143d   : > { %2965 = vrsqrt.f32 %v1116_v38  ;;  %vm1124_vm6 = vcmp.eq.f32.partialorder %v1116_v38, inf  ;;  %v1127_v47 = vand.u32 2147483648, %v1116_v38  ;;  %vm1126_vm7 = vcmp.eq.f32.partialorder %v1116_v38, 0.0 }
0x143e   : > { %v1162_v18 = vmul.f32 0.999, %v1116_v38 }
0x1443   : > { %v2966_v39 = vpop.eup %2965 }
0x1444   : > { %v1118_v40 = vmul.f32 %v2966_v39, %v1116_v38 }
0x1446   : > { %v1119_v41 = vmul.f32 %v2966_v39, %v1118_v40 }
0x1448   : > { %v1120_v42 = vmul.f32 0.5, %v1119_v41 }
0x144a   : > { %v1121_v44 = vsub.f32 1.5, %v1120_v42 }
0x144c   : > { %v1122_v45 = vmul.f32 %v2966_v39, %v1121_v44 }
0x144e   : > { %v1123_v46 = vmul.f32 %v1122_v45, %v1116_v38 }
0x1450   : > { %v1125_v48 = vsel %vm1124_vm6, %v1116_v38, %v1123_v46 }
0x1451   : > { %v1128_v49 = vsel %vm1126_vm7, %v1127_v47, %v1125_v48 }
0x1452   : > { %v1129_v50 = vmul.f32 7.700359, %v1128_v49 }
0x1454   : > { %v1130_v52 = vadd.f32 1e-08, %v1129_v50 }
0x1456   : > { %2967 = vrcp.f32 %v1130_v52 }
0x145c   : > { %v2968_v57 = vpop.eup %2967 }
0x145d   : > { %v1133_v58 = vmul.f32 %v2968_v57, %v1131_v55 }
0x145f   : > { %v1134_v59 = vsub.f32 %v1085_v16, %v1133_v58 }
0x1461   : > { %1137 = vperm.xlu0 %2862, %v1134_v59   ;;  %v1157_v13 = vmul.f32 0.0001, %v1134_v59 }
0x14d3   : > { %v1138_v60 = vpop.permute.xlu0 %1137 }
0x14d4   : > { %v1140_v61 = vsub.f32 %v1138_v60, %v3305_v56 }
0x14d6   : > { %v1141_v62 = vmul.f32 %v1140_v61, %v1140_v61 }
0x14d8   : > { %v1142_v63 = vsel %vm310_vm2, %v1141_v62, 0.0 }
0x14d9   : > { %v1143_v0 = vrot.slane %v1142_v63, 4 }
0x14db   : > { %v1144_v1 = vadd.f32 %v1143_v0, %v1142_v63 }
0x14dd   : > { %v1145_v3 = vrot.slane %v1144_v1, 2 }
0x14df   : > { %v1146_v4 = vadd.f32 %v1145_v3, %v1144_v1 }
0x14e1   : > { %v1147_v5 = vrot.slane %v1146_v4, 1 }
0x14e3   : > { %v1148_v6 = vadd.f32 %v1147_v5, %v1146_v4 }
0x14e5   : > { %v1149_v7 = vmul.f32 -0.5, %v1148_v6 }
0x14e7   : > { %v1150_v8 = vmul.f32 1.442695, %v1149_v7 }
0x14e9   : > { %2969 = vpow2.f32 %v1150_v8 }
0x14ef   : > { %v2970_v9 = vpop.eup %2969 }
0x14f0   : > { %v1152_v10 = vmul.f32 %v2970_v9, %v3256_v43 }
0x14f2   : > { %v1153_v11 = vmul.f32 %v1152_v10, %v1140_v61 }
0x14f4   : > { %v1154_v12 = vsel %vm310_vm2, %v1153_v11, 0.0 }
0x14f5   : > { %1155 = vadd.xlane.f32.xlu0 %v1154_v12 }
0x1568   : > { %v1156_v14 = vpop.xlane.xlu0 %1155 }
0x1569   : > { %v1158_v15 = vadd.f32 %v1157_v13, %v1156_v14 }
0x156b   : > { %v1163_v16 = vmul.f32 0.001, %v1158_v15  ;;  %v1160_v30 = vmul.f32 0.1, %v1158_v15 }
0x156d   : > { %v1164_v19 = vmul.f32 %v1163_v16, %v1158_v15  ;;  %v1161_v33 = vadd.f32 %v1160_v30, %v1159_v32 }
0x156f   : > { %v1165_v20 = vadd.f32 %v1164_v19, %v1162_v18  ;;  %v1180_v34 = vmul.f32 0.05883008, %v1161_v33  ;;  %v1208_v13 = vmul.f32 0.9, %v1161_v33 }
0x1571   : > { %2971 = vrsqrt.f32 %v1165_v20  ;;  %vm1173_vm8 = vcmp.eq.f32.partialorder %v1165_v20, inf  ;;  %v1176_v27 = vand.u32 2147483648, %v1165_v20  ;;  %vm1175_vm9 = vcmp.eq.f32.partialorder %v1165_v20, 0.0 }
0x1572   : > { %v1211_v60 = vmul.f32 0.999, %v1165_v20 }
0x1577   : > { %v2972_v21 = vpop.eup %2971 }
0x1578   : > { %v1167_v2 = vmul.f32 %v2972_v21, %v1165_v20 }
0x157a   : > { %v1168_v22 = vmul.f32 %v2972_v21, %v1167_v2 }
0x157c   : > { %v1169_v23 = vmul.f32 0.5, %v1168_v22 }
0x157e   : > { %v1170_v24 = vsub.f32 1.5, %v1169_v23 }
0x1580   : > { %v1171_v25 = vmul.f32 %v2972_v21, %v1170_v24 }
0x1582   : > { %v1172_v26 = vmul.f32 %v1171_v25, %v1165_v20 }
0x1584   : > { %v1174_v28 = vsel %vm1173_vm8, %v1165_v20, %v1172_v26 }
0x1585   : > { %v1177_v17 = vsel %vm1175_vm9, %v1176_v27, %v1174_v28 }
0x1586   : > { %v1178_v29 = vmul.f32 7.4852705, %v1177_v17 }
0x1588   : > { %v1179_v31 = vadd.f32 1e-08, %v1178_v29 }
0x158a   : > { %2973 = vrcp.f32 %v1179_v31 }
0x1590   : > { %v2974_v35 = vpop.eup %2973 }
0x1591   : > { %v1182_v36 = vmul.f32 %v2974_v35, %v1180_v34 }
0x1593   : > { %v1183_v37 = vsub.f32 %v1134_v59, %v1182_v36 }
0x1595   : > { %1186 = vperm.xlu1 %2863, %v1183_v37   ;;  %v1206_v55 = vmul.f32 0.0001, %v1183_v37 }
0x1607   : > { %v1187_v38 = vpop.permute.xlu1 %1186 }
0x1608   : > { %v1189_v39 = vsub.f32 %v1187_v38, %v3305_v56 }
0x160a   : > { %v1190_v40 = vmul.f32 %v1189_v39, %v1189_v39 }
0x160c   : > { %v1191_v41 = vsel %vm310_vm2, %v1190_v40, 0.0 }
0x160d   : > { %v1192_v42 = vrot.slane %v1191_v41, 4 }
0x160f   : > { %v1193_v44 = vadd.f32 %v1192_v42, %v1191_v41 }
0x1611   : > { %v1194_v45 = vrot.slane %v1193_v44, 2 }
0x1613   : > { %v1195_v46 = vadd.f32 %v1194_v45, %v1193_v44 }
0x1615   : > { %v1196_v47 = vrot.slane %v1195_v46, 1 }
0x1617   : > { %v1197_v48 = vadd.f32 %v1196_v47, %v1195_v46 }
0x1619   : > { %v1198_v49 = vmul.f32 -0.5, %v1197_v48 }
0x161b   : > { %v1199_v50 = vmul.f32 1.442695, %v1198_v49 }
0x161d   : > { %2975 = vpow2.f32 %v1199_v50 }
0x1623   : > { %v2976_v51 = vpop.eup %2975 }
0x1624   : > { %v1201_v52 = vmul.f32 %v2976_v51, %v3256_v43 }
0x1626   : > { %v1202_v53 = vmul.f32 %v1201_v52, %v1189_v39 }
0x1628   : > { %v1203_v54 = vsel %vm310_vm2, %v1202_v53, 0.0 }
0x1629   : > { %1204 = vadd.xlane.f32.xlu2 %v1203_v54 }
0x169c   : > { %v1205_v57 = vpop.xlane.xlu2 %1204 }
0x169d   : > { %v1207_v58 = vadd.f32 %v1206_v55, %v1205_v57 }
0x169f   : > { %v1212_v59 = vmul.f32 0.001, %v1207_v58  ;;  %v1209_v11 = vmul.f32 0.1, %v1207_v58 }
0x16a1   : > { %v1213_v61 = vmul.f32 %v1212_v59, %v1207_v58  ;;  %v1210_v14 = vadd.f32 %v1209_v11, %v1208_v13 }
0x16a3   : > { %v1214_v62 = vadd.f32 %v1213_v61, %v1211_v60  ;;  %v1229_v15 = vmul.f32 0.05780916, %v1210_v14  ;;  %v1257_v55 = vmul.f32 0.9, %v1210_v14 }
0x16a5   : > { %2977 = vrsqrt.f32 %v1214_v62  ;;  %vm1222_vm10 = vcmp.eq.f32.partialorder %v1214_v62, inf  ;;  %v1225_v7 = vand.u32 2147483648, %v1214_v62  ;;  %vm1224_vm11 = vcmp.eq.f32.partialorder %v1214_v62, 0.0 }
0x16a6   : > { %v1260_v38 = vmul.f32 0.999, %v1214_v62 }
0x16ab   : > { %v2978_v63 = vpop.eup %2977 }
0x16ac   : > { %v1216_v0 = vmul.f32 %v2978_v63, %v1214_v62 }
0x16ae   : > { %v1217_v1 = vmul.f32 %v2978_v63, %v1216_v0 }
0x16b0   : > { %v1218_v3 = vmul.f32 0.5, %v1217_v1 }
0x16b2   : > { %v1219_v4 = vsub.f32 1.5, %v1218_v3 }
0x16b4   : > { %v1220_v5 = vmul.f32 %v2978_v63, %v1219_v4 }
0x16b6   : > { %v1221_v6 = vmul.f32 %v1220_v5, %v1214_v62 }
0x16b8   : > { %v1223_v8 = vsel %vm1222_vm10, %v1214_v62, %v1221_v6 }
0x16b9   : > { %v1226_v9 = vsel %vm1224_vm11, %v1225_v7, %v1223_v8 }
0x16ba   : > { %v1227_v10 = vmul.f32 7.287444, %v1226_v9 }
0x16bc   : > { %v1228_v12 = vadd.f32 1e-08, %v1227_v10 }
0x16be   : > { %2979 = vrcp.f32 %v1228_v12 }
0x16c4   : > { %v2980_v16 = vpop.eup %2979 }
0x16c5   : > { %v1231_v18 = vmul.f32 %v2980_v16, %v1229_v15 }
0x16c7   : > { %v1232_v19 = vsub.f32 %v1183_v37, %v1231_v18 }
0x16c9   : > { %1235 = vperm.xlu2 %2864, %v1232_v19   ;;  %v1255_v34 = vmul.f32 0.0001, %v1232_v19 }
0x1723   : > { %v1236_v20 = vpop.permute.xlu2 %1235 }
0x1724   : > { %v1238_v21 = vsub.f32 %v1236_v20, %v3305_v56 }
0x1726   : > { %v1239_v2 = vmul.f32 %v1238_v21, %v1238_v21 }
0x1728   : > { %v1240_v22 = vsel %vm310_vm2, %v1239_v2, 0.0 }
0x1729   : > { %v1241_v23 = vrot.slane %v1240_v22, 4 }
0x172b   : > { %v1242_v24 = vadd.f32 %v1241_v23, %v1240_v22 }
0x172d   : > { %v1243_v25 = vrot.slane %v1242_v24, 2 }
0x172f   : > { %v1244_v26 = vadd.f32 %v1243_v25, %v1242_v24 }
0x1731   : > { %v1245_v27 = vrot.slane %v1244_v26, 1 }
0x1733   : > { %v1246_v28 = vadd.f32 %v1245_v27, %v1244_v26 }
0x1735   : > { %v1247_v17 = vmul.f32 -0.5, %v1246_v28 }
0x1737   : > { %v1248_v29 = vmul.f32 1.442695, %v1247_v17 }
0x1739   : > { %2981 = vpow2.f32 %v1248_v29 }
0x173f   : > { %v2982_v30 = vpop.eup %2981 }
0x1740   : > { %v1250_v31 = vmul.f32 %v2982_v30, %v3256_v43 }
0x1742   : > { %v1251_v32 = vmul.f32 %v1250_v31, %v1238_v21 }
0x1744   : > { %v1252_v33 = vsel %vm310_vm2, %v1251_v32, 0.0 }
0x1745   : > { %1253 = vadd.xlane.f32.xlu1 %v1252_v33 }
0x17b8   : > { %v1254_v35 = vpop.xlane.xlu1 %1253 }
0x17b9   : > { %v1256_v36 = vadd.f32 %v1255_v34, %v1254_v35 }
0x17bb   : > { %v1261_v37 = vmul.f32 0.001, %v1256_v36  ;;  %v1258_v53 = vmul.f32 0.1, %v1256_v36 }
0x17bd   : > { %v1262_v39 = vmul.f32 %v1261_v37, %v1256_v36  ;;  %v1259_v57 = vadd.f32 %v1258_v53, %v1257_v55 }
0x17bf   : > { %v1263_v40 = vadd.f32 %v1262_v39, %v1260_v38  ;;  %v1278_v58 = vmul.f32 0.056920163, %v1259_v57  ;;  %v1306_v34 = vmul.f32 0.9, %v1259_v57 }
0x17c1   : > { %2983 = vrsqrt.f32 %v1263_v40  ;;  %vm1271_vm12 = vcmp.eq.f32.partialorder %v1263_v40, inf  ;;  %v1274_v49 = vand.u32 2147483648, %v1263_v40  ;;  %vm1273_vm13 = vcmp.eq.f32.partialorder %v1263_v40, 0.0 }
0x17c2   : > { %v1309_v20 = vmul.f32 0.999, %v1263_v40 }
0x17c7   : > { %v2984_v41 = vpop.eup %2983 }
0x17c8   : > { %v1265_v42 = vmul.f32 %v2984_v41, %v1263_v40 }
0x17ca   : > { %v1266_v44 = vmul.f32 %v2984_v41, %v1265_v42 }
0x17cc   : > { %v1267_v45 = vmul.f32 0.5, %v1266_v44 }
0x17ce   : > { %v1268_v46 = vsub.f32 1.5, %v1267_v45 }
0x17d0   : > { %v1269_v47 = vmul.f32 %v2984_v41, %v1268_v46 }
0x17d2   : > { %v1270_v48 = vmul.f32 %v1269_v47, %v1263_v40 }
0x17d4   : > { %v1272_v50 = vsel %vm1271_vm12, %v1263_v40, %v1270_v48 }
0x17d5   : > { %v1275_v51 = vsel %vm1273_vm13, %v1274_v49, %v1272_v50 }
0x17d6   : > { %v1276_v52 = vmul.f32 7.104693, %v1275_v51 }
0x17d8   : > { %v1277_v54 = vadd.f32 1e-08, %v1276_v52 }
0x17da   : > { %2985 = vrcp.f32 %v1277_v54 }
0x17e0   : > { %v2986_v59 = vpop.eup %2985 }
0x17e1   : > { %v1280_v60 = vmul.f32 %v2986_v59, %v1278_v58 }
0x17e3   : > { %v1281_v61 = vsub.f32 %v1232_v19, %v1280_v60 }
0x17e5   : > { %1284 = vperm.xlu0 %2862, %v1281_v61   ;;  %v1304_v15 = vmul.f32 0.0001, %v1281_v61 }
0x1857   : > { %v1285_v62 = vpop.permute.xlu0 %1284 }
0x1858   : > { %v1287_v63 = vsub.f32 %v1285_v62, %v3305_v56 }
0x185a   : > { %v1288_v0 = vmul.f32 %v1287_v63, %v1287_v63 }
0x185c   : > { %v1289_v1 = vsel %vm310_vm2, %v1288_v0, 0.0 }
0x185d   : > { %v1290_v3 = vrot.slane %v1289_v1, 4 }
0x185f   : > { %v1291_v4 = vadd.f32 %v1290_v3, %v1289_v1 }
0x1861   : > { %v1292_v5 = vrot.slane %v1291_v4, 2 }
0x1863   : > { %v1293_v6 = vadd.f32 %v1292_v5, %v1291_v4 }
0x1865   : > { %v1294_v7 = vrot.slane %v1293_v6, 1 }
0x1867   : > { %v1295_v8 = vadd.f32 %v1294_v7, %v1293_v6 }
0x1869   : > { %v1296_v9 = vmul.f32 -0.5, %v1295_v8 }
0x186b   : > { %v1297_v10 = vmul.f32 1.442695, %v1296_v9 }
0x186d   : > { %2987 = vpow2.f32 %v1297_v10 }
0x1873   : > { %v2988_v11 = vpop.eup %2987 }
0x1874   : > { %v1299_v12 = vmul.f32 %v2988_v11, %v3256_v43 }
0x1876   : > { %v1300_v13 = vmul.f32 %v1299_v12, %v1287_v63 }
0x1878   : > { %v1301_v14 = vsel %vm310_vm2, %v1300_v13, 0.0 }
0x1879   : > { %1302 = vadd.xlane.f32.xlu2 %v1301_v14 }
0x18ec   : > { %v1303_v16 = vpop.xlane.xlu2 %1302 }
0x18ed   : > { %v1305_v18 = vadd.f32 %v1304_v15, %v1303_v16 }
0x18ef   : > { %v1310_v19 = vmul.f32 0.001, %v1305_v18  ;;  %v1307_v32 = vmul.f32 0.1, %v1305_v18 }
0x18f1   : > { %v1311_v21 = vmul.f32 %v1310_v19, %v1305_v18  ;;  %v1308_v35 = vadd.f32 %v1307_v32, %v1306_v34 }
0x18f3   : > { %v1312_v2 = vadd.f32 %v1311_v21, %v1309_v20  ;;  %v1327_v36 = vmul.f32 0.056143124, %v1308_v35  ;;  %v1355_v14 = vmul.f32 0.9, %v1308_v35 }
0x18f5   : > { %2989 = vrsqrt.f32 %v1312_v2  ;;  %vm1320_vm14 = vcmp.eq.f32.partialorder %v1312_v2, inf  ;;  %v1323_v17 = vand.u32 2147483648, %v1312_v2  ;;  %vm1322_vm15 = vcmp.eq.f32.partialorder %v1312_v2, 0.0 }
0x18fb   : > { %v2990_v22 = vpop.eup %2989 }
0x18fc   : > { %v1314_v23 = vmul.f32 %v2990_v22, %v1312_v2 }
0x18fe   : > { %v1315_v24 = vmul.f32 %v2990_v22, %v1314_v23 }
0x1900   : > { %v1316_v25 = vmul.f32 0.5, %v1315_v24 }
0x1902   : > { %v1317_v26 = vsub.f32 1.5, %v1316_v25 }
0x1904   : > { %v1318_v27 = vmul.f32 %v2990_v22, %v1317_v26 }
0x1906   : > { %v1319_v28 = vmul.f32 %v1318_v27, %v1312_v2 }
0x1908   : > { %v1321_v29 = vsel %vm1320_vm14, %v1312_v2, %v1319_v28 }
0x1909   : > { %v1324_v30 = vsel %vm1322_vm15, %v1323_v17, %v1321_v29 }
0x190a   : > { %v1325_v31 = vmul.f32 6.935199, %v1324_v30 }
0x190c   : > { %v1326_v33 = vadd.f32 1e-08, %v1325_v31 }
0x190e   : > { %2991 = vrcp.f32 %v1326_v33 }
0x1914   : > { %v2992_v37 = vpop.eup %2991 }
0x1915   : > { %v1329_v38 = vmul.f32 %v2992_v37, %v1327_v36 }
0x1917   : > { %v1330_v39 = vsub.f32 %v1281_v61, %v1329_v38  ;;  %v1358_v61 = vmul.f32 0.999, %v1312_v2  ;;  %v3354_v2 = vld [vmem:[%s3493_s4] sm:$0x3] }
0x1919   : > { %1333 = vperm.xlu0 %2862, %v1330_v39  }
0x198b   : > { %v1334_v40 = vpop.permute.xlu0 %1333 }
0x198c   : > { %v1336_v41 = vsub.f32 %v1334_v40, %v3305_v56  ;;  %v1353_v56 = vmul.f32 0.0001, %v1330_v39 }
0x198e   : > { %v1337_v42 = vmul.f32 %v1336_v41, %v1336_v41 }
0x1990   : > { %v1338_v44 = vsel %vm310_vm2, %v1337_v42, 0.0 }
0x1991   : > { %v1339_v45 = vrot.slane %v1338_v44, 4 }
0x1993   : > { %v1340_v46 = vadd.f32 %v1339_v45, %v1338_v44 }
0x1995   : > { %v1341_v47 = vrot.slane %v1340_v46, 2 }
0x1997   : > { %v1342_v48 = vadd.f32 %v1341_v47, %v1340_v46 }
0x1999   : > { %v1343_v49 = vrot.slane %v1342_v48, 1 }
0x199b   : > { %v1344_v50 = vadd.f32 %v1343_v49, %v1342_v48 }
0x199d   : > { %v1345_v51 = vmul.f32 -0.5, %v1344_v50 }
0x199f   : > { %v1346_v52 = vmul.f32 1.442695, %v1345_v51 }
0x19a1   : > { %2993 = vpow2.f32 %v1346_v52 }
0x19a7   : > { %v2994_v53 = vpop.eup %2993 }
0x19a8   : > { %v1348_v54 = vmul.f32 %v2994_v53, %v3256_v43 }
0x19aa   : > { %v1349_v55 = vmul.f32 %v1348_v54, %v1336_v41 }
0x19ac   : > { %v1350_v57 = vsel %vm310_vm2, %v1349_v55, 0.0 }
0x19ad   : > { %1351 = vadd.xlane.f32.xlu0 %v1350_v57 }
0x1a20   : > { %v1352_v58 = vpop.xlane.xlu0 %1351 }
0x1a21   : > { %v1354_v59 = vadd.f32 %v1353_v56, %v1352_v58 }
0x1a23   : > { %v1359_v60 = vmul.f32 0.001, %v1354_v59  ;;  %v1356_v12 = vmul.f32 0.1, %v1354_v59 }
0x1a25   : > { %v1360_v62 = vmul.f32 %v1359_v60, %v1354_v59  ;;  %v1357_v15 = vadd.f32 %v1356_v12, %v1355_v14 }
0x1a27   : > { %v1361_v63 = vadd.f32 %v1360_v62, %v1358_v61  ;;  %v1376_v16 = vmul.f32 0.05546171, %v1357_v15  ;;  %v1404_v56 = vmul.f32 0.9, %v1357_v15 }
0x1a29   : > { %2995 = vrsqrt.f32 %v1361_v63  ;;  %vm1369_vm0 = vcmp.eq.f32.partialorder %v1361_v63, inf  ;;  %v1372_v8 = vand.u32 2147483648, %v1361_v63  ;;  %vm1371_vm1 = vcmp.eq.f32.partialorder %v1361_v63, 0.0 }
0x1a2a   : > { %v1407_v40 = vmul.f32 0.999, %v1361_v63 }
0x1a2f   : > { %v2996_v0 = vpop.eup %2995 }
0x1a30   : > { %v1363_v1 = vmul.f32 %v2996_v0, %v1361_v63 }
0x1a32   : > { %v1364_v3 = vmul.f32 %v2996_v0, %v1363_v1 }
0x1a34   : > { %v1365_v4 = vmul.f32 0.5, %v1364_v3 }
0x1a36   : > { %v1366_v5 = vsub.f32 1.5, %v1365_v4 }
0x1a38   : > { %v1367_v6 = vmul.f32 %v2996_v0, %v1366_v5 }
0x1a3a   : > { %v1368_v7 = vmul.f32 %v1367_v6, %v1361_v63 }
0x1a3c   : > { %v1370_v9 = vsel %vm1369_vm0, %v1361_v63, %v1368_v7 }
0x1a3d   : > { %v1373_v10 = vsel %vm1371_vm1, %v1372_v8, %v1370_v9 }
0x1a3e   : > { %v1374_v11 = vmul.f32 6.7774367, %v1373_v10 }
0x1a40   : > { %v1375_v13 = vadd.f32 1e-08, %v1374_v11 }
0x1a42   : > { %2997 = vrcp.f32 %v1375_v13 }
0x1a48   : > { %v2998_v18 = vpop.eup %2997 }
0x1a49   : > { %v1378_v19 = vmul.f32 %v2998_v18, %v1376_v16 }
0x1a4b   : > { %v1379_v20 = vsub.f32 %v1330_v39, %v1378_v19 }
0x1a4d   : > { %1382 = vperm.xlu1 %2863, %v1379_v20   ;;  %v1402_v36 = vmul.f32 0.0001, %v1379_v20 }
0x1abf   : > { %v1383_v21 = vpop.permute.xlu1 %1382 }
0x1ac0   : > { %v1385_v22 = vsub.f32 %v1383_v21, %v3354_v2 }
0x1ac2   : > { %v1386_v23 = vmul.f32 %v1385_v22, %v1385_v22 }
0x1ac4   : > { %v1387_v24 = vsel %vm310_vm2, %v1386_v23, 0.0 }
0x1ac5   : > { %v1388_v25 = vrot.slane %v1387_v24, 4 }
0x1ac7   : > { %v1389_v26 = vadd.f32 %v1388_v25, %v1387_v24 }
0x1ac9   : > { %v1390_v27 = vrot.slane %v1389_v26, 2 }
0x1acb   : > { %v1391_v28 = vadd.f32 %v1390_v27, %v1389_v26 }
0x1acd   : > { %v1392_v17 = vrot.slane %v1391_v28, 1 }
0x1acf   : > { %v1393_v29 = vadd.f32 %v1392_v17, %v1391_v28 }
0x1ad1   : > { %v1394_v30 = vmul.f32 -0.5, %v1393_v29 }
0x1ad3   : > { %v1395_v31 = vmul.f32 1.442695, %v1394_v30 }
0x1ad5   : > { %2999 = vpow2.f32 %v1395_v31 }
0x1adb   : > { %v3000_v32 = vpop.eup %2999 }
0x1adc   : > { %v1397_v33 = vmul.f32 %v3000_v32, %v3256_v43 }
0x1ade   : > { %v1398_v34 = vmul.f32 %v1397_v33, %v1385_v22 }
0x1ae0   : > { %v1399_v35 = vsel %vm310_vm2, %v1398_v34, 0.0 }
0x1ae1   : > { %1400 = vadd.xlane.f32.xlu2 %v1399_v35 }
0x1b54   : > { %v1401_v37 = vpop.xlane.xlu2 %1400 }
0x1b55   : > { %v1403_v38 = vadd.f32 %v1402_v36, %v1401_v37 }
0x1b57   : > { %v1408_v39 = vmul.f32 0.001, %v1403_v38  ;;  %v1405_v55 = vmul.f32 0.1, %v1403_v38 }
0x1b59   : > { %v1409_v41 = vmul.f32 %v1408_v39, %v1403_v38  ;;  %v1406_v58 = vadd.f32 %v1405_v55, %v1404_v56 }
0x1b5b   : > { %v1410_v42 = vadd.f32 %v1409_v41, %v1407_v40  ;;  %v1425_v59 = vmul.f32 0.05486242, %v1406_v58  ;;  %v1453_v36 = vmul.f32 0.9, %v1406_v58 }
0x1b5d   : > { %3001 = vrsqrt.f32 %v1410_v42  ;;  %vm1418_vm3 = vcmp.eq.f32.partialorder %v1410_v42, inf  ;;  %v1421_v51 = vand.u32 2147483648, %v1410_v42  ;;  %vm1420_vm4 = vcmp.eq.f32.partialorder %v1410_v42, 0.0 }
0x1b5e   : > { %v1456_v21 = vmul.f32 0.999, %v1410_v42 }
0x1b63   : > { %v3002_v44 = vpop.eup %3001 }
0x1b64   : > { %v1412_v45 = vmul.f32 %v3002_v44, %v1410_v42 }
0x1b66   : > { %v1413_v46 = vmul.f32 %v3002_v44, %v1412_v45 }
0x1b68   : > { %v1414_v47 = vmul.f32 0.5, %v1413_v46 }
0x1b6a   : > { %v1415_v48 = vsub.f32 1.5, %v1414_v47 }
0x1b6c   : > { %v1416_v49 = vmul.f32 %v3002_v44, %v1415_v48 }
0x1b6e   : > { %v1417_v50 = vmul.f32 %v1416_v49, %v1410_v42 }
0x1b70   : > { %v1419_v52 = vsel %vm1418_vm3, %v1410_v42, %v1417_v50 }
0x1b71   : > { %v1422_v53 = vsel %vm1420_vm4, %v1421_v51, %v1419_v52 }
0x1b72   : > { %v1423_v54 = vmul.f32 6.630116, %v1422_v53 }
0x1b74   : > { %v1424_v57 = vadd.f32 1e-08, %v1423_v54 }
0x1b76   : > { %3003 = vrcp.f32 %v1424_v57 }
0x1b7c   : > { %v3004_v60 = vpop.eup %3003 }
0x1b7d   : > { %v1427_v61 = vmul.f32 %v3004_v60, %v1425_v59 }
0x1b7f   : > { %v1428_v62 = vsub.f32 %v1379_v20, %v1427_v61 }
0x1b81   : > { %1431 = vperm.xlu2 %2864, %v1428_v62   ;;  %v1451_v16 = vmul.f32 0.0001, %v1428_v62 }
0x1bdb   : > { %v1432_v63 = vpop.permute.xlu2 %1431 }
0x1bdc   : > { %v1434_v0 = vsub.f32 %v1432_v63, %v3354_v2 }
0x1bde   : > { %v1435_v1 = vmul.f32 %v1434_v0, %v1434_v0 }
0x1be0   : > { %v1436_v3 = vsel %vm310_vm2, %v1435_v1, 0.0 }
0x1be1   : > { %v1437_v4 = vrot.slane %v1436_v3, 4 }
0x1be3   : > { %v1438_v5 = vadd.f32 %v1437_v4, %v1436_v3 }
0x1be5   : > { %v1439_v6 = vrot.slane %v1438_v5, 2 }
0x1be7   : > { %v1440_v7 = vadd.f32 %v1439_v6, %v1438_v5 }
0x1be9   : > { %v1441_v8 = vrot.slane %v1440_v7, 1 }
0x1beb   : > { %v1442_v9 = vadd.f32 %v1441_v8, %v1440_v7 }
0x1bed   : > { %v1443_v10 = vmul.f32 -0.5, %v1442_v9 }
0x1bef   : > { %v1444_v11 = vmul.f32 1.442695, %v1443_v10 }
0x1bf1   : > { %3005 = vpow2.f32 %v1444_v11 }
0x1bf7   : > { %v3006_v12 = vpop.eup %3005 }
0x1bf8   : > { %v1446_v13 = vmul.f32 %v3006_v12, %v3256_v43 }
0x1bfa   : > { %v1447_v14 = vmul.f32 %v1446_v13, %v1434_v0 }
0x1bfc   : > { %v1448_v15 = vsel %vm310_vm2, %v1447_v14, 0.0 }
0x1bfd   : > { %1449 = vadd.xlane.f32.xlu1 %v1448_v15 }
0x1c70   : > { %v1450_v18 = vpop.xlane.xlu1 %1449 }
0x1c71   : > { %v1452_v19 = vadd.f32 %v1451_v16, %v1450_v18 }
0x1c73   : > { %v1457_v20 = vmul.f32 0.001, %v1452_v19  ;;  %v1454_v34 = vmul.f32 0.1, %v1452_v19 }
0x1c75   : > { %v1458_v22 = vmul.f32 %v1457_v20, %v1452_v19  ;;  %v1455_v37 = vadd.f32 %v1454_v34, %v1453_v36 }
0x1c77   : > { %v1459_v23 = vadd.f32 %v1458_v22, %v1456_v21  ;;  %v1474_v38 = vmul.f32 0.054334033, %v1455_v37  ;;  %v1502_v16 = vmul.f32 0.9, %v1455_v37 }
0x1c79   : > { %3007 = vrsqrt.f32 %v1459_v23  ;;  %vm1467_vm5 = vcmp.eq.f32.partialorder %v1459_v23, inf  ;;  %v1470_v30 = vand.u32 2147483648, %v1459_v23  ;;  %vm1469_vm6 = vcmp.eq.f32.partialorder %v1459_v23, 0.0 }
0x1c7a   : > { %v1505_v63 = vmul.f32 0.999, %v1459_v23 }
0x1c7f   : > { %v3008_v24 = vpop.eup %3007 }
0x1c80   : > { %v1461_v25 = vmul.f32 %v3008_v24, %v1459_v23 }
0x1c82   : > { %v1462_v26 = vmul.f32 %v3008_v24, %v1461_v25 }
0x1c84   : > { %v1463_v27 = vmul.f32 0.5, %v1462_v26 }
0x1c86   : > { %v1464_v28 = vsub.f32 1.5, %v1463_v27 }
0x1c88   : > { %v1465_v17 = vmul.f32 %v3008_v24, %v1464_v28 }
0x1c8a   : > { %v1466_v29 = vmul.f32 %v1465_v17, %v1459_v23 }
0x1c8c   : > { %v1468_v31 = vsel %vm1467_vm5, %v1459_v23, %v1466_v29 }
0x1c8d   : > { %v1471_v32 = vsel %vm1469_vm6, %v1470_v30, %v1468_v31 }
0x1c8e   : > { %v1472_v33 = vmul.f32 6.492136, %v1471_v32 }
0x1c90   : > { %v1473_v35 = vadd.f32 1e-08, %v1472_v33 }
0x1c92   : > { %3009 = vrcp.f32 %v1473_v35 }
0x1c98   : > { %v3010_v39 = vpop.eup %3009 }
0x1c99   : > { %v1476_v40 = vmul.f32 %v3010_v39, %v1474_v38 }
0x1c9b   : > { %v1477_v41 = vsub.f32 %v1428_v62, %v1476_v40 }
0x1c9d   : > { %1480 = vperm.xlu0 %2862, %v1477_v41   ;;  %v1500_v59 = vmul.f32 0.0001, %v1477_v41 }
0x1d0f   : > { %v1481_v42 = vpop.permute.xlu0 %1480 }
0x1d10   : > { %v1483_v44 = vsub.f32 %v1481_v42, %v3354_v2 }
0x1d12   : > { %v1484_v45 = vmul.f32 %v1483_v44, %v1483_v44 }
0x1d14   : > { %v1485_v46 = vsel %vm310_vm2, %v1484_v45, 0.0 }
0x1d15   : > { %v1486_v47 = vrot.slane %v1485_v46, 4 }
0x1d17   : > { %v1487_v48 = vadd.f32 %v1486_v47, %v1485_v46 }
0x1d19   : > { %v1488_v49 = vrot.slane %v1487_v48, 2 }
0x1d1b   : > { %v1489_v50 = vadd.f32 %v1488_v49, %v1487_v48 }
0x1d1d   : > { %v1490_v51 = vrot.slane %v1489_v50, 1 }
0x1d1f   : > { %v1491_v52 = vadd.f32 %v1490_v51, %v1489_v50 }
0x1d21   : > { %v1492_v53 = vmul.f32 -0.5, %v1491_v52 }
0x1d23   : > { %v1493_v54 = vmul.f32 1.442695, %v1492_v53 }
0x1d25   : > { %3011 = vpow2.f32 %v1493_v54 }
0x1d2b   : > { %v3012_v55 = vpop.eup %3011 }
0x1d2c   : > { %v1495_v57 = vmul.f32 %v3012_v55, %v3256_v43 }
0x1d2e   : > { %v1496_v56 = vmul.f32 %v1495_v57, %v1483_v44 }
0x1d30   : > { %v1497_v58 = vsel %vm310_vm2, %v1496_v56, 0.0 }
0x1d31   : > { %1498 = vadd.xlane.f32.xlu2 %v1497_v58 }
0x1da4   : > { %v1499_v60 = vpop.xlane.xlu2 %1498 }
0x1da5   : > { %v1501_v61 = vadd.f32 %v1500_v59, %v1499_v60 }
0x1da7   : > { %v1506_v62 = vmul.f32 0.001, %v1501_v61  ;;  %v1503_v14 = vmul.f32 0.1, %v1501_v61 }
0x1da9   : > { %v1507_v0 = vmul.f32 %v1506_v62, %v1501_v61  ;;  %v1504_v18 = vadd.f32 %v1503_v14, %v1502_v16 }
0x1dab   : > { %v1508_v1 = vadd.f32 %v1507_v0, %v1505_v63  ;;  %v1523_v19 = vmul.f32 0.05386711, %v1504_v18  ;;  %v1551_v59 = vmul.f32 0.9, %v1504_v18 }
0x1dad   : > { %3013 = vrsqrt.f32 %v1508_v1  ;;  %vm1516_vm7 = vcmp.eq.f32.partialorder %v1508_v1, inf  ;;  %v1519_v10 = vand.u32 2147483648, %v1508_v1  ;;  %vm1518_vm8 = vcmp.eq.f32.partialorder %v1508_v1, 0.0 }
0x1dae   : > { %v1554_v42 = vmul.f32 0.999, %v1508_v1 }
0x1db3   : > { %v3014_v3 = vpop.eup %3013 }
0x1db4   : > { %v1510_v4 = vmul.f32 %v3014_v3, %v1508_v1 }
0x1db6   : > { %v1511_v5 = vmul.f32 %v3014_v3, %v1510_v4 }
0x1db8   : > { %v1512_v6 = vmul.f32 0.5, %v1511_v5 }
0x1dba   : > { %v1513_v7 = vsub.f32 1.5, %v1512_v6 }
0x1dbc   : > { %v1514_v8 = vmul.f32 %v3014_v3, %v1513_v7 }
0x1dbe   : > { %v1515_v9 = vmul.f32 %v1514_v8, %v1508_v1 }
0x1dc0   : > { %v1517_v11 = vsel %vm1516_vm7, %v1508_v1, %v1515_v9 }
0x1dc1   : > { %v1520_v12 = vsel %vm1518_vm8, %v1519_v10, %v1517_v11 }
0x1dc2   : > { %v1521_v13 = vmul.f32 6.362553, %v1520_v12 }
0x1dc4   : > { %v1522_v15 = vadd.f32 1e-08, %v1521_v13 }
0x1dc6   : > { %3015 = vrcp.f32 %v1522_v15 }
0x1dcc   : > { %v3016_v20 = vpop.eup %3015 }
0x1dcd   : > { %v1525_v21 = vmul.f32 %v3016_v20, %v1523_v19 }
0x1dcf   : > { %v1526_v22 = vsub.f32 %v1477_v41, %v1525_v21 }
0x1dd1   : > { %1529 = vperm.xlu0 %2862, %v1526_v22   ;;  %v1549_v38 = vmul.f32 0.0001, %v1526_v22 }
0x1e43   : > { %v1530_v23 = vpop.permute.xlu0 %1529 }
0x1e44   : > { %v1532_v24 = vsub.f32 %v1530_v23, %v3354_v2 }
0x1e46   : > { %v1533_v25 = vmul.f32 %v1532_v24, %v1532_v24 }
0x1e48   : > { %v1534_v26 = vsel %vm310_vm2, %v1533_v25, 0.0 }
0x1e49   : > { %v1535_v27 = vrot.slane %v1534_v26, 4 }
0x1e4b   : > { %v1536_v28 = vadd.f32 %v1535_v27, %v1534_v26 }
0x1e4d   : > { %v1537_v17 = vrot.slane %v1536_v28, 2 }
0x1e4f   : > { %v1538_v29 = vadd.f32 %v1537_v17, %v1536_v28 }
0x1e51   : > { %v1539_v30 = vrot.slane %v1538_v29, 1 }
0x1e53   : > { %v1540_v31 = vadd.f32 %v1539_v30, %v1538_v29 }
0x1e55   : > { %v1541_v32 = vmul.f32 -0.5, %v1540_v31 }
0x1e57   : > { %v1542_v33 = vmul.f32 1.442695, %v1541_v32 }
0x1e59   : > { %3017 = vpow2.f32 %v1542_v33 }
0x1e5f   : > { %v3018_v34 = vpop.eup %3017 }
0x1e60   : > { %v1544_v35 = vmul.f32 %v3018_v34, %v3256_v43 }
0x1e62   : > { %v1545_v36 = vmul.f32 %v1544_v35, %v1532_v24 }
0x1e64   : > { %v1546_v37 = vsel %vm310_vm2, %v1545_v36, 0.0 }
0x1e65   : > { %1547 = vadd.xlane.f32.xlu0 %v1546_v37 }
0x1ed8   : > { %v1548_v39 = vpop.xlane.xlu0 %1547 }
0x1ed9   : > { %v1550_v40 = vadd.f32 %v1549_v38, %v1548_v39 }
0x1edb   : > { %v1555_v41 = vmul.f32 0.001, %v1550_v40  ;;  %v1552_v56 = vmul.f32 0.1, %v1550_v40 }
0x1edd   : > { %v1556_v44 = vmul.f32 %v1555_v41, %v1550_v40  ;;  %v1553_v60 = vadd.f32 %v1552_v56, %v1551_v59 }
0x1edf   : > { %v1557_v45 = vadd.f32 %v1556_v44, %v1554_v42  ;;  %v1572_v61 = vmul.f32 0.053453688, %v1553_v60  ;;  %v1600_v38 = vmul.f32 0.9, %v1553_v60 }
0x1ee1   : > { %3019 = vrsqrt.f32 %v1557_v45  ;;  %vm1565_vm9 = vcmp.eq.f32.partialorder %v1557_v45, inf  ;;  %v1568_v53 = vand.u32 2147483648, %v1557_v45  ;;  %vm1567_vm10 = vcmp.eq.f32.partialorder %v1557_v45, 0.0 }
0x1ee2   : > { %v1603_v23 = vmul.f32 0.999, %v1557_v45 }
0x1ee7   : > { %v3020_v46 = vpop.eup %3019 }
0x1ee8   : > { %v1559_v47 = vmul.f32 %v3020_v46, %v1557_v45 }
0x1eea   : > { %v1560_v48 = vmul.f32 %v3020_v46, %v1559_v47 }
0x1eec   : > { %v1561_v49 = vmul.f32 0.5, %v1560_v48 }
0x1eee   : > { %v1562_v50 = vsub.f32 1.5, %v1561_v49 }
0x1ef0   : > { %v1563_v51 = vmul.f32 %v3020_v46, %v1562_v50 }
0x1ef2   : > { %v1564_v52 = vmul.f32 %v1563_v51, %v1557_v45 }
0x1ef4   : > { %v1566_v54 = vsel %vm1565_vm9, %v1557_v45, %v1564_v52 }
0x1ef5   : > { %v1569_v55 = vsel %vm1567_vm10, %v1568_v53, %v1566_v54 }
0x1ef6   : > { %v1570_v57 = vmul.f32 6.2405505, %v1569_v55 }
0x1ef8   : > { %v1571_v58 = vadd.f32 1e-08, %v1570_v57 }
0x1efa   : > { %3021 = vrcp.f32 %v1571_v58 }
0x1f00   : > { %v3022_v62 = vpop.eup %3021 }
0x1f01   : > { %v1574_v63 = vmul.f32 %v3022_v62, %v1572_v61 }
0x1f03   : > { %v1575_v0 = vsub.f32 %v1526_v22, %v1574_v63 }
0x1f05   : > { %1578 = vperm.xlu1 %2863, %v1575_v0   ;;  %v1598_v19 = vmul.f32 0.0001, %v1575_v0 }
0x1f77   : > { %v1579_v1 = vpop.permute.xlu1 %1578 }
0x1f78   : > { %v1581_v3 = vsub.f32 %v1579_v1, %v3354_v2 }
0x1f7a   : > { %v1582_v4 = vmul.f32 %v1581_v3, %v1581_v3 }
0x1f7c   : > { %v1583_v5 = vsel %vm310_vm2, %v1582_v4, 0.0 }
0x1f7d   : > { %v1584_v6 = vrot.slane %v1583_v5, 4 }
0x1f7f   : > { %v1585_v7 = vadd.f32 %v1584_v6, %v1583_v5 }
0x1f81   : > { %v1586_v8 = vrot.slane %v1585_v7, 2 }
0x1f83   : > { %v1587_v9 = vadd.f32 %v1586_v8, %v1585_v7 }
0x1f85   : > { %v1588_v10 = vrot.slane %v1587_v9, 1 }
0x1f87   : > { %v1589_v11 = vadd.f32 %v1588_v10, %v1587_v9 }
0x1f89   : > { %v1590_v12 = vmul.f32 -0.5, %v1589_v11 }
0x1f8b   : > { %v1591_v13 = vmul.f32 1.442695, %v1590_v12 }
0x1f8d   : > { %3023 = vpow2.f32 %v1591_v13 }
0x1f93   : > { %v3024_v14 = vpop.eup %3023 }
0x1f94   : > { %v1593_v15 = vmul.f32 %v3024_v14, %v3256_v43 }
0x1f96   : > { %v1594_v16 = vmul.f32 %v1593_v15, %v1581_v3 }
0x1f98   : > { %v1595_v18 = vsel %vm310_vm2, %v1594_v16, 0.0 }
0x1f99   : > { %1596 = vadd.xlane.f32.xlu2 %v1595_v18 }
0x200c   : > { %v1597_v20 = vpop.xlane.xlu2 %1596 }
0x200d   : > { %v1599_v21 = vadd.f32 %v1598_v19, %v1597_v20 }
0x200f   : > { %v1604_v22 = vmul.f32 0.001, %v1599_v21  ;;  %v1601_v36 = vmul.f32 0.1, %v1599_v21 }
0x2011   : > { %v1605_v24 = vmul.f32 %v1604_v22, %v1599_v21  ;;  %v1602_v39 = vadd.f32 %v1601_v36, %v1600_v38 }
0x2013   : > { %v1606_v25 = vadd.f32 %v1605_v24, %v1603_v23  ;;  %v1621_v40 = vmul.f32 0.053086996, %v1602_v39  ;;  %v1649_v19 = vmul.f32 0.9, %v1602_v39 }
0x2015   : > { %3025 = vrsqrt.f32 %v1606_v25  ;;  %vm1614_vm11 = vcmp.eq.f32.partialorder %v1606_v25, inf  ;;  %v1617_v32 = vand.u32 2147483648, %v1606_v25  ;;  %vm1616_vm12 = vcmp.eq.f32.partialorder %v1606_v25, 0.0 }
0x2016   : > { %v1652_v1 = vmul.f32 0.999, %v1606_v25 }
0x201b   : > { %v3026_v26 = vpop.eup %3025 }
0x201c   : > { %v1608_v27 = vmul.f32 %v3026_v26, %v1606_v25 }
0x201e   : > { %v1609_v28 = vmul.f32 %v3026_v26, %v1608_v27 }
0x2020   : > { %v1610_v17 = vmul.f32 0.5, %v1609_v28 }
0x2022   : > { %v1611_v29 = vsub.f32 1.5, %v1610_v17 }
0x2024   : > { %v1612_v30 = vmul.f32 %v3026_v26, %v1611_v29 }
0x2026   : > { %v1613_v31 = vmul.f32 %v1612_v30, %v1606_v25 }
0x2028   : > { %v1615_v33 = vsel %vm1614_vm11, %v1606_v25, %v1613_v31 }
0x2029   : > { %v1618_v34 = vsel %vm1616_vm12, %v1617_v32, %v1615_v33 }
0x202a   : > { %v1619_v35 = vmul.f32 6.1254196, %v1618_v34 }
0x202c   : > { %v1620_v37 = vadd.f32 1e-08, %v1619_v35 }
0x202e   : > { %3027 = vrcp.f32 %v1620_v37 }
0x2034   : > { %v3028_v41 = vpop.eup %3027 }
0x2035   : > { %v1623_v42 = vmul.f32 %v3028_v41, %v1621_v40 }
0x2037   : > { %v1624_v44 = vsub.f32 %v1575_v0, %v1623_v42 }
0x2039   : > { %1627 = vperm.xlu1 %2863, %v1624_v44   ;;  %v1647_v61 = vmul.f32 0.0001, %v1624_v44 }
0x20ab   : > { %v1628_v45 = vpop.permute.xlu1 %1627 }
0x20ac   : > { %v1630_v46 = vsub.f32 %v1628_v45, %v3354_v2 }
0x20ae   : > { %v1631_v47 = vmul.f32 %v1630_v46, %v1630_v46 }
0x20b0   : > { %v1632_v48 = vsel %vm310_vm2, %v1631_v47, 0.0 }
0x20b1   : > { %v1633_v49 = vrot.slane %v1632_v48, 4 }
0x20b3   : > { %v1634_v50 = vadd.f32 %v1633_v49, %v1632_v48 }
0x20b5   : > { %v1635_v51 = vrot.slane %v1634_v50, 2 }
0x20b7   : > { %v1636_v52 = vadd.f32 %v1635_v51, %v1634_v50 }
0x20b9   : > { %v1637_v53 = vrot.slane %v1636_v52, 1 }
0x20bb   : > { %v1638_v54 = vadd.f32 %v1637_v53, %v1636_v52 }
0x20bd   : > { %v1639_v55 = vmul.f32 -0.5, %v1638_v54 }
0x20bf   : > { %v1640_v57 = vmul.f32 1.442695, %v1639_v55 }
0x20c1   : > { %3029 = vpow2.f32 %v1640_v57 }
0x20c7   : > { %v3030_v56 = vpop.eup %3029 }
0x20c8   : > { %v1642_v58 = vmul.f32 %v3030_v56, %v3256_v43 }
0x20ca   : > { %v1643_v59 = vmul.f32 %v1642_v58, %v1630_v46 }
0x20cc   : > { %v1644_v60 = vsel %vm310_vm2, %v1643_v59, 0.0 }
0x20cd   : > { %1645 = vadd.xlane.f32.xlu2 %v1644_v60 }
0x2140   : > { %v1646_v62 = vpop.xlane.xlu2 %1645 }
0x2141   : > { %v1648_v63 = vadd.f32 %v1647_v61, %v1646_v62 }
0x2143   : > { %v1653_v0 = vmul.f32 0.001, %v1648_v63  ;;  %v1650_v16 = vmul.f32 0.1, %v1648_v63 }
0x2145   : > { %v1654_v3 = vmul.f32 %v1653_v0, %v1648_v63  ;;  %v1651_v20 = vadd.f32 %v1650_v16, %v1649_v19 }
0x2147   : > { %v1655_v4 = vadd.f32 %v1654_v3, %v1652_v1  ;;  %v1670_v21 = vmul.f32 0.05276125, %v1651_v20  ;;  %v1698_v61 = vmul.f32 0.9, %v1651_v20 }
0x2149   : > { %3031 = vrsqrt.f32 %v1655_v4  ;;  %vm1663_vm13 = vcmp.eq.f32.partialorder %v1655_v4, inf  ;;  %v1666_v12 = vand.u32 2147483648, %v1655_v4  ;;  %vm1665_vm14 = vcmp.eq.f32.partialorder %v1655_v4, 0.0 }
0x214a   : > { %v1701_v45 = vmul.f32 0.999, %v1655_v4 }
0x214f   : > { %v3032_v5 = vpop.eup %3031 }
0x2150   : > { %v1657_v6 = vmul.f32 %v3032_v5, %v1655_v4 }
0x2152   : > { %v1658_v7 = vmul.f32 %v3032_v5, %v1657_v6 }
0x2154   : > { %v1659_v8 = vmul.f32 0.5, %v1658_v7 }
0x2156   : > { %v1660_v9 = vsub.f32 1.5, %v1659_v8 }
0x2158   : > { %v1661_v10 = vmul.f32 %v3032_v5, %v1660_v9 }
0x215a   : > { %v1662_v11 = vmul.f32 %v1661_v10, %v1655_v4 }
0x215c   : > { %v1664_v13 = vsel %vm1663_vm13, %v1655_v4, %v1662_v11 }
0x215d   : > { %v1667_v14 = vsel %vm1665_vm14, %v1666_v12, %v1664_v13 }
0x215e   : > { %v1668_v15 = vmul.f32 6.0165405, %v1667_v14 }
0x2160   : > { %v1669_v18 = vadd.f32 1e-08, %v1668_v15 }
0x2162   : > { %3033 = vrcp.f32 %v1669_v18 }
0x2168   : > { %v3034_v22 = vpop.eup %3033 }
0x2169   : > { %v1672_v23 = vmul.f32 %v3034_v22, %v1670_v21 }
0x216b   : > { %v1673_v24 = vsub.f32 %v1624_v44, %v1672_v23 }
0x216d   : > { %1676 = vperm.xlu1 %2863, %v1673_v24   ;;  %v1696_v40 = vmul.f32 0.0001, %v1673_v24 }
0x21df   : > { %v1677_v25 = vpop.permute.xlu1 %1676 }
0x21e0   : > { %v1679_v26 = vsub.f32 %v1677_v25, %v3354_v2 }
0x21e2   : > { %v1680_v27 = vmul.f32 %v1679_v26, %v1679_v26 }
0x21e4   : > { %v1681_v28 = vsel %vm310_vm2, %v1680_v27, 0.0 }
0x21e5   : > { %v1682_v17 = vrot.slane %v1681_v28, 4 }
0x21e7   : > { %v1683_v29 = vadd.f32 %v1682_v17, %v1681_v28 }
0x21e9   : > { %v1684_v30 = vrot.slane %v1683_v29, 2 }
0x21eb   : > { %v1685_v31 = vadd.f32 %v1684_v30, %v1683_v29 }
0x21ed   : > { %v1686_v32 = vrot.slane %v1685_v31, 1 }
0x21ef   : > { %v1687_v33 = vadd.f32 %v1686_v32, %v1685_v31 }
0x21f1   : > { %v1688_v34 = vmul.f32 -0.5, %v1687_v33 }
0x21f3   : > { %v1689_v35 = vmul.f32 1.442695, %v1688_v34 }
0x21f5   : > { %3035 = vpow2.f32 %v1689_v35 }
0x21fb   : > { %v3036_v36 = vpop.eup %3035 }
0x21fc   : > { %v1691_v37 = vmul.f32 %v3036_v36, %v3256_v43 }
0x21fe   : > { %v1692_v38 = vmul.f32 %v1691_v37, %v1679_v26 }
0x2200   : > { %v1693_v39 = vsel %vm310_vm2, %v1692_v38, 0.0 }
0x2201   : > { %1694 = vadd.xlane.f32.xlu2 %v1693_v39 }
0x2274   : > { %v1695_v41 = vpop.xlane.xlu2 %1694 }
0x2275   : > { %v1697_v42 = vadd.f32 %v1696_v40, %v1695_v41 }
0x2277   : > { %v1702_v44 = vmul.f32 0.001, %v1697_v42  ;;  %v1699_v59 = vmul.f32 0.1, %v1697_v42 }
0x2279   : > { %v1703_v46 = vmul.f32 %v1702_v44, %v1697_v42  ;;  %v1700_v62 = vadd.f32 %v1699_v59, %v1698_v61 }
0x227b   : > { %v1704_v47 = vadd.f32 %v1703_v46, %v1701_v45  ;;  %v1719_v63 = vmul.f32 0.052471474, %v1700_v62  ;;  %v1747_v40 = vmul.f32 0.9, %v1700_v62 }
0x227d   : > { %3037 = vrsqrt.f32 %v1704_v47  ;;  %vm1712_vm15 = vcmp.eq.f32.partialorder %v1704_v47, inf  ;;  %v1715_v55 = vand.u32 2147483648, %v1704_v47  ;;  %vm1714_vm0 = vcmp.eq.f32.partialorder %v1704_v47, 0.0 }
0x227e   : > { %v1750_v25 = vmul.f32 0.999, %v1704_v47 }
0x2283   : > { %v3038_v48 = vpop.eup %3037 }
0x2284   : > { %v1706_v49 = vmul.f32 %v3038_v48, %v1704_v47 }
0x2286   : > { %v1707_v50 = vmul.f32 %v3038_v48, %v1706_v49 }
0x2288   : > { %v1708_v51 = vmul.f32 0.5, %v1707_v50 }
0x228a   : > { %v1709_v52 = vsub.f32 1.5, %v1708_v51 }
0x228c   : > { %v1710_v53 = vmul.f32 %v3038_v48, %v1709_v52 }
0x228e   : > { %v1711_v54 = vmul.f32 %v1710_v53, %v1704_v47 }
0x2290   : > { %v1713_v57 = vsel %vm1712_vm15, %v1704_v47, %v1711_v54 }
0x2291   : > { %v1716_v56 = vsel %vm1714_vm0, %v1715_v55, %v1713_v57 }
0x2292   : > { %v1717_v58 = vmul.f32 5.9133687, %v1716_v56 }
0x2294   : > { %v1718_v60 = vadd.f32 1e-08, %v1717_v58 }
0x2296   : > { %3039 = vrcp.f32 %v1718_v60 }
0x229c   : > { %v3040_v0 = vpop.eup %3039 }
0x229d   : > { %v1721_v1 = vmul.f32 %v3040_v0, %v1719_v63 }
0x229f   : > { %v1722_v3 = vsub.f32 %v1673_v24, %v1721_v1 }
0x22a1   : > { %1725 = vperm.xlu0 %2862, %v1722_v3   ;;  %v1745_v21 = vmul.f32 0.0001, %v1722_v3 }
0x2313   : > { %v1726_v4 = vpop.permute.xlu0 %1725 }
0x2314   : > { %v1728_v5 = vsub.f32 %v1726_v4, %v3354_v2 }
0x2316   : > { %v1729_v6 = vmul.f32 %v1728_v5, %v1728_v5 }
0x2318   : > { %v1730_v7 = vsel %vm310_vm2, %v1729_v6, 0.0 }
0x2319   : > { %v1731_v8 = vrot.slane %v1730_v7, 4 }
0x231b   : > { %v1732_v9 = vadd.f32 %v1731_v8, %v1730_v7 }
0x231d   : > { %v1733_v10 = vrot.slane %v1732_v9, 2 }
0x231f   : > { %v1734_v11 = vadd.f32 %v1733_v10, %v1732_v9 }
0x2321   : > { %v1735_v12 = vrot.slane %v1734_v11, 1 }
0x2323   : > { %v1736_v13 = vadd.f32 %v1735_v12, %v1734_v11 }
0x2325   : > { %v1737_v14 = vmul.f32 -0.5, %v1736_v13 }
0x2327   : > { %v1738_v15 = vmul.f32 1.442695, %v1737_v14 }
0x2329   : > { %3041 = vpow2.f32 %v1738_v15 }
0x232f   : > { %v3042_v16 = vpop.eup %3041 }
0x2330   : > { %v1740_v18 = vmul.f32 %v3042_v16, %v3256_v43 }
0x2332   : > { %v1741_v19 = vmul.f32 %v1740_v18, %v1728_v5 }
0x2334   : > { %v1742_v20 = vsel %vm310_vm2, %v1741_v19, 0.0 }
0x2335   : > { %1743 = vadd.xlane.f32.xlu1 %v1742_v20 }
0x23a8   : > { %v1744_v22 = vpop.xlane.xlu1 %1743 }
0x23a9   : > { %v1746_v23 = vadd.f32 %v1745_v21, %v1744_v22 }
0x23ab   : > { %v1751_v24 = vmul.f32 0.001, %v1746_v23  ;;  %v1748_v38 = vmul.f32 0.1, %v1746_v23 }
0x23ad   : > { %v1752_v26 = vmul.f32 %v1751_v24, %v1746_v23  ;;  %v1749_v41 = vadd.f32 %v1748_v38, %v1747_v40 }
0x23af   : > { %v1753_v27 = vadd.f32 %v1752_v26, %v1750_v25  ;;  %v1768_v42 = vmul.f32 0.052213386, %v1749_v41  ;;  %v1796_v21 = vmul.f32 0.9, %v1749_v41 }
0x23b1   : > { %3043 = vrsqrt.f32 %v1753_v27  ;;  %vm1761_vm1 = vcmp.eq.f32.partialorder %v1753_v27, inf  ;;  %v1764_v34 = vand.u32 2147483648, %v1753_v27  ;;  %vm1763_vm3 = vcmp.eq.f32.partialorder %v1753_v27, 0.0 }
0x23b2   : > { %v1799_v4 = vmul.f32 0.999, %v1753_v27 }
0x23b7   : > { %v3044_v28 = vpop.eup %3043 }
0x23b8   : > { %v1755_v17 = vmul.f32 %v3044_v28, %v1753_v27 }
0x23ba   : > { %v1756_v29 = vmul.f32 %v3044_v28, %v1755_v17 }
0x23bc   : > { %v1757_v30 = vmul.f32 0.5, %v1756_v29 }
0x23be   : > { %v1758_v31 = vsub.f32 1.5, %v1757_v30 }
0x23c0   : > { %v1759_v32 = vmul.f32 %v3044_v28, %v1758_v31 }
0x23c2   : > { %v1760_v33 = vmul.f32 %v1759_v32, %v1753_v27 }
0x23c4   : > { %v1762_v35 = vsel %vm1761_vm1, %v1753_v27, %v1760_v33 }
0x23c5   : > { %v1765_v36 = vsel %vm1763_vm3, %v1764_v34, %v1762_v35 }
0x23c6   : > { %v1766_v37 = vmul.f32 5.815425, %v1765_v36 }
0x23c8   : > { %v1767_v39 = vadd.f32 1e-08, %v1766_v37 }
0x23ca   : > { %3045 = vrcp.f32 %v1767_v39 }
0x23d0   : > { %v3046_v44 = vpop.eup %3045 }
0x23d1   : > { %v1770_v45 = vmul.f32 %v3046_v44, %v1768_v42 }
0x23d3   : > { %v1771_v46 = vsub.f32 %v1722_v3, %v1770_v45 }
0x23d5   : > { %1774 = vperm.xlu2 %2864, %v1771_v46   ;;  %v1794_v63 = vmul.f32 0.0001, %v1771_v46 }
0x242f   : > { %v1775_v47 = vpop.permute.xlu2 %1774 }
0x2430   : > { %v1777_v48 = vsub.f32 %v1775_v47, %v3354_v2 }
0x2432   : > { %v1778_v49 = vmul.f32 %v1777_v48, %v1777_v48 }
0x2434   : > { %v1779_v50 = vsel %vm310_vm2, %v1778_v49, 0.0 }
0x2435   : > { %v1780_v51 = vrot.slane %v1779_v50, 4 }
0x2437   : > { %v1781_v52 = vadd.f32 %v1780_v51, %v1779_v50 }
0x2439   : > { %v1782_v53 = vrot.slane %v1781_v52, 2 }
0x243b   : > { %v1783_v54 = vadd.f32 %v1782_v53, %v1781_v52 }
0x243d   : > { %v1784_v55 = vrot.slane %v1783_v54, 1 }
0x243f   : > { %v1785_v57 = vadd.f32 %v1784_v55, %v1783_v54 }
0x2441   : > { %v1786_v56 = vmul.f32 -0.5, %v1785_v57 }
0x2443   : > { %v1787_v58 = vmul.f32 1.442695, %v1786_v56 }
0x2445   : > { %3047 = vpow2.f32 %v1787_v58 }
0x244b   : > { %v3048_v59 = vpop.eup %3047 }
0x244c   : > { %v1789_v60 = vmul.f32 %v3048_v59, %v3256_v43 }
0x244e   : > { %v1790_v61 = vmul.f32 %v1789_v60, %v1777_v48 }
0x2450   : > { %v1791_v62 = vsel %vm310_vm2, %v1790_v61, 0.0 }
0x2451   : > { %1792 = vadd.xlane.f32.xlu0 %v1791_v62 }
0x24c4   : > { %v1793_v0 = vpop.xlane.xlu0 %1792 }
0x24c5   : > { %v1795_v1 = vadd.f32 %v1794_v63, %v1793_v0 }
0x24c7   : > { %v1800_v3 = vmul.f32 0.001, %v1795_v1  ;;  %v1797_v19 = vmul.f32 0.1, %v1795_v1 }
0x24c9   : > { %v1801_v5 = vmul.f32 %v1800_v3, %v1795_v1  ;;  %v1798_v22 = vadd.f32 %v1797_v19, %v1796_v21 }
0x24cb   : > { %v1802_v6 = vadd.f32 %v1801_v5, %v1799_v4  ;;  %v1817_v23 = vmul.f32 0.051983267, %v1798_v22  ;;  %v1845_v63 = vmul.f32 0.9, %v1798_v22 }
0x24cd   : > { %3049 = vrsqrt.f32 %v1802_v6  ;;  %vm1810_vm4 = vcmp.eq.f32.partialorder %v1802_v6, inf  ;;  %v1813_v14 = vand.u32 2147483648, %v1802_v6  ;;  %vm1812_vm5 = vcmp.eq.f32.partialorder %v1802_v6, 0.0 }
0x24ce   : > { %v1848_v47 = vmul.f32 0.999, %v1802_v6 }
0x24d3   : > { %v3050_v7 = vpop.eup %3049 }
0x24d4   : > { %v1804_v8 = vmul.f32 %v3050_v7, %v1802_v6 }
0x24d6   : > { %v1805_v9 = vmul.f32 %v3050_v7, %v1804_v8 }
0x24d8   : > { %v1806_v10 = vmul.f32 0.5, %v1805_v9 }
0x24da   : > { %v1807_v11 = vsub.f32 1.5, %v1806_v10 }
0x24dc   : > { %v1808_v12 = vmul.f32 %v3050_v7, %v1807_v11 }
0x24de   : > { %v1809_v13 = vmul.f32 %v1808_v12, %v1802_v6 }
0x24e0   : > { %v1811_v15 = vsel %vm1810_vm4, %v1802_v6, %v1809_v13 }
0x24e1   : > { %v1814_v16 = vsel %vm1812_vm5, %v1813_v14, %v1811_v15 }
0x24e2   : > { %v1815_v18 = vmul.f32 5.7222824, %v1814_v16 }
0x24e4   : > { %v1816_v20 = vadd.f32 1e-08, %v1815_v18 }
0x24e6   : > { %3051 = vrcp.f32 %v1816_v20 }
0x24ec   : > { %v3052_v24 = vpop.eup %3051 }
0x24ed   : > { %v1819_v25 = vmul.f32 %v3052_v24, %v1817_v23 }
0x24ef   : > { %v1820_v26 = vsub.f32 %v1771_v46, %v1819_v25 }
0x24f1   : > { %1823 = vperm.xlu2 %2864, %v1820_v26   ;;  %v1843_v42 = vmul.f32 0.0001, %v1820_v26 }
0x254b   : > { %v1824_v27 = vpop.permute.xlu2 %1823 }
0x254c   : > { %v1826_v28 = vsub.f32 %v1824_v27, %v3354_v2 }
0x254e   : > { %v1827_v17 = vmul.f32 %v1826_v28, %v1826_v28 }
0x2550   : > { %v1828_v29 = vsel %vm310_vm2, %v1827_v17, 0.0 }
0x2551   : > { %v1829_v30 = vrot.slane %v1828_v29, 4 }
0x2553   : > { %v1830_v31 = vadd.f32 %v1829_v30, %v1828_v29 }
0x2555   : > { %v1831_v32 = vrot.slane %v1830_v31, 2 }
0x2557   : > { %v1832_v33 = vadd.f32 %v1831_v32, %v1830_v31 }
0x2559   : > { %v1833_v34 = vrot.slane %v1832_v33, 1 }
0x255b   : > { %v1834_v35 = vadd.f32 %v1833_v34, %v1832_v33 }
0x255d   : > { %v1835_v36 = vmul.f32 -0.5, %v1834_v35 }
0x255f   : > { %v1836_v37 = vmul.f32 1.442695, %v1835_v36 }
0x2561   : > { %3053 = vpow2.f32 %v1836_v37 }
0x2567   : > { %v3054_v38 = vpop.eup %3053 }
0x2568   : > { %v1838_v39 = vmul.f32 %v3054_v38, %v3256_v43 }
0x256a   : > { %v1839_v40 = vmul.f32 %v1838_v39, %v1826_v28 }
0x256c   : > { %v1840_v41 = vsel %vm310_vm2, %v1839_v40, 0.0 }
0x256d   : > { %1841 = vadd.xlane.f32.xlu2 %v1840_v41 }
0x25e0   : > { %v1842_v44 = vpop.xlane.xlu2 %1841 }
0x25e1   : > { %v1844_v45 = vadd.f32 %v1843_v42, %v1842_v44 }
0x25e3   : > { %v1849_v46 = vmul.f32 0.001, %v1844_v45  ;;  %v1846_v61 = vmul.f32 0.1, %v1844_v45 }
0x25e5   : > { %v1850_v48 = vmul.f32 %v1849_v46, %v1844_v45  ;;  %v1847_v0 = vadd.f32 %v1846_v61, %v1845_v63 }
0x25e7   : > { %v1851_v49 = vadd.f32 %v1850_v48, %v1848_v47  ;;  %v1866_v1 = vmul.f32 0.051777888, %v1847_v0  ;;  %v1894_v41 = vmul.f32 0.9, %v1847_v0 }
0x25e9   : > { %3055 = vrsqrt.f32 %v1851_v49  ;;  %vm1859_vm6 = vcmp.eq.f32.partialorder %v1851_v49, inf  ;;  %v1862_v56 = vand.u32 2147483648, %v1851_v49  ;;  %vm1861_vm7 = vcmp.eq.f32.partialorder %v1851_v49, 0.0 }
0x25ef   : > { %v3056_v50 = vpop.eup %3055 }
0x25f0   : > { %v1853_v51 = vmul.f32 %v3056_v50, %v1851_v49 }
0x25f2   : > { %v1854_v52 = vmul.f32 %v3056_v50, %v1853_v51 }
0x25f4   : > { %v1855_v53 = vmul.f32 0.5, %v1854_v52 }
0x25f6   : > { %v1856_v54 = vsub.f32 1.5, %v1855_v53 }
0x25f8   : > { %v1857_v55 = vmul.f32 %v3056_v50, %v1856_v54 }
0x25fa   : > { %v1858_v57 = vmul.f32 %v1857_v55, %v1851_v49 }
0x25fc   : > { %v1860_v58 = vsel %vm1859_vm6, %v1851_v49, %v1858_v57 }
0x25fd   : > { %v1863_v59 = vsel %vm1861_vm7, %v1862_v56, %v1860_v58 }
0x25fe   : > { %v1864_v60 = vmul.f32 5.6335635, %v1863_v59 }
0x2600   : > { %v1865_v62 = vadd.f32 1e-08, %v1864_v60 }
0x2602   : > { %3057 = vrcp.f32 %v1865_v62 }
0x2608   : > { %v3058_v3 = vpop.eup %3057 }
0x2609   : > { %v1868_v4 = vmul.f32 %v3058_v3, %v1866_v1 }
0x260b   : > { %v1869_v5 = vsub.f32 %v1820_v26, %v1868_v4  ;;  %v1897_v26 = vmul.f32 0.999, %v1851_v49  ;;  %v3403_v49 = vld [vmem:[%s3493_s4] sm:$0x3] }
0x260d   : > { %1872 = vperm.xlu1 %2863, %v1869_v5  }
0x267f   : > { %v1873_v6 = vpop.permute.xlu1 %1872 }
0x2680   : > { %v1875_v7 = vsub.f32 %v1873_v6, %v3354_v2  ;;  %v1892_v2 = vmul.f32 0.0001, %v1869_v5 }
0x2682   : > { %v1876_v8 = vmul.f32 %v1875_v7, %v1875_v7 }
0x2684   : > { %v1877_v9 = vsel %vm310_vm2, %v1876_v8, 0.0 }
0x2685   : > { %v1878_v10 = vrot.slane %v1877_v9, 4 }
0x2687   : > { %v1879_v11 = vadd.f32 %v1878_v10, %v1877_v9 }
0x2689   : > { %v1880_v12 = vrot.slane %v1879_v11, 2 }
0x268b   : > { %v1881_v13 = vadd.f32 %v1880_v12, %v1879_v11 }
0x268d   : > { %v1882_v14 = vrot.slane %v1881_v13, 1 }
0x268f   : > { %v1883_v15 = vadd.f32 %v1882_v14, %v1881_v13 }
0x2691   : > { %v1884_v16 = vmul.f32 -0.5, %v1883_v15 }
0x2693   : > { %v1885_v18 = vmul.f32 1.442695, %v1884_v16 }
0x2695   : > { %3059 = vpow2.f32 %v1885_v18 }
0x269b   : > { %v3060_v19 = vpop.eup %3059 }
0x269c   : > { %v1887_v20 = vmul.f32 %v3060_v19, %v3256_v43 }
0x269e   : > { %v1888_v21 = vmul.f32 %v1887_v20, %v1875_v7 }
0x26a0   : > { %v1889_v22 = vsel %vm310_vm2, %v1888_v21, 0.0 }
0x26a1   : > { %1890 = vadd.xlane.f32.xlu0 %v1889_v22 }
0x2714   : > { %v1891_v23 = vpop.xlane.xlu0 %1890 }
0x2715   : > { %v1893_v24 = vadd.f32 %v1892_v2, %v1891_v23 }
0x2717   : > { %v1898_v25 = vmul.f32 0.001, %v1893_v24  ;;  %v1895_v39 = vmul.f32 0.1, %v1893_v24 }
0x2719   : > { %v1899_v27 = vmul.f32 %v1898_v25, %v1893_v24  ;;  %v1896_v42 = vadd.f32 %v1895_v39, %v1894_v41 }
0x271b   : > { %v1900_v28 = vadd.f32 %v1899_v27, %v1897_v26  ;;  %v1915_v44 = vmul.f32 0.051594432, %v1896_v42  ;;  %v1943_v2 = vmul.f32 0.9, %v1896_v42 }
0x271d   : > { %3061 = vrsqrt.f32 %v1900_v28  ;;  %vm1908_vm8 = vcmp.eq.f32.partialorder %v1900_v28, inf  ;;  %v1911_v35 = vand.u32 2147483648, %v1900_v28  ;;  %vm1910_vm9 = vcmp.eq.f32.partialorder %v1900_v28, 0.0 }
0x271e   : > { %v1946_v6 = vmul.f32 0.999, %v1900_v28 }
0x2723   : > { %v3062_v17 = vpop.eup %3061 }
0x2724   : > { %v1902_v29 = vmul.f32 %v3062_v17, %v1900_v28 }
0x2726   : > { %v1903_v30 = vmul.f32 %v3062_v17, %v1902_v29 }
0x2728   : > { %v1904_v31 = vmul.f32 0.5, %v1903_v30 }
0x272a   : > { %v1905_v32 = vsub.f32 1.5, %v1904_v31 }
0x272c   : > { %v1906_v33 = vmul.f32 %v3062_v17, %v1905_v32 }
0x272e   : > { %v1907_v34 = vmul.f32 %v1906_v33, %v1900_v28 }
0x2730   : > { %v1909_v36 = vsel %vm1908_vm8, %v1900_v28, %v1907_v34 }
0x2731   : > { %v1912_v37 = vsel %vm1910_vm9, %v1911_v35, %v1909_v36 }
0x2732   : > { %v1913_v38 = vmul.f32 5.54893, %v1912_v37 }
0x2734   : > { %v1914_v40 = vadd.f32 1e-08, %v1913_v38 }
0x2736   : > { %3063 = vrcp.f32 %v1914_v40 }
0x273c   : > { %v3064_v45 = vpop.eup %3063 }
0x273d   : > { %v1917_v46 = vmul.f32 %v3064_v45, %v1915_v44 }
0x273f   : > { %v1918_v47 = vsub.f32 %v1869_v5, %v1917_v46 }
0x2741   : > { %1921 = vperm.xlu1 %2863, %v1918_v47   ;;  %v1941_v1 = vmul.f32 0.0001, %v1918_v47 }
0x27b3   : > { %v1922_v48 = vpop.permute.xlu1 %1921 }
0x27b4   : > { %v1924_v50 = vsub.f32 %v1922_v48, %v3403_v49 }
0x27b6   : > { %v1925_v51 = vmul.f32 %v1924_v50, %v1924_v50 }
0x27b8   : > { %v1926_v52 = vsel %vm310_vm2, %v1925_v51, 0.0 }
0x27b9   : > { %v1927_v53 = vrot.slane %v1926_v52, 4 }
0x27bb   : > { %v1928_v54 = vadd.f32 %v1927_v53, %v1926_v52 }
0x27bd   : > { %v1929_v55 = vrot.slane %v1928_v54, 2 }
0x27bf   : > { %v1930_v57 = vadd.f32 %v1929_v55, %v1928_v54 }
0x27c1   : > { %v1931_v56 = vrot.slane %v1930_v57, 1 }
0x27c3   : > { %v1932_v58 = vadd.f32 %v1931_v56, %v1930_v57 }
0x27c5   : > { %v1933_v59 = vmul.f32 -0.5, %v1932_v58 }
0x27c7   : > { %v1934_v60 = vmul.f32 1.442695, %v1933_v59 }
0x27c9   : > { %3065 = vpow2.f32 %v1934_v60 }
0x27cf   : > { %v3066_v61 = vpop.eup %3065 }
0x27d0   : > { %v1936_v62 = vmul.f32 %v3066_v61, %v3256_v43 }
0x27d2   : > { %v1937_v63 = vmul.f32 %v1936_v62, %v1924_v50 }
0x27d4   : > { %v1938_v0 = vsel %vm310_vm2, %v1937_v63, 0.0 }
0x27d5   : > { %1939 = vadd.xlane.f32.xlu0 %v1938_v0 }
0x2848   : > { %v1940_v3 = vpop.xlane.xlu0 %1939 }
0x2849   : > { %v1942_v4 = vadd.f32 %v1941_v1, %v1940_v3 }
0x284b   : > { %v1947_v5 = vmul.f32 0.001, %v1942_v4  ;;  %v1944_v21 = vmul.f32 0.1, %v1942_v4 }
0x284d   : > { %v1948_v7 = vmul.f32 %v1947_v5, %v1942_v4  ;;  %v1945_v23 = vadd.f32 %v1944_v21, %v1943_v2 }
0x284f   : > { %v1949_v8 = vadd.f32 %v1948_v7, %v1946_v6  ;;  %v1964_v24 = vmul.f32 0.051430427, %v1945_v23  ;;  %v1992_v1 = vmul.f32 0.9, %v1945_v23 }
0x2851   : > { %3067 = vrsqrt.f32 %v1949_v8  ;;  %vm1957_vm10 = vcmp.eq.f32.partialorder %v1949_v8, inf  ;;  %v1960_v16 = vand.u32 2147483648, %v1949_v8  ;;  %vm1959_vm11 = vcmp.eq.f32.partialorder %v1949_v8, 0.0 }
0x2852   : > { %v1995_v48 = vmul.f32 0.999, %v1949_v8 }
0x2857   : > { %v3068_v9 = vpop.eup %3067 }
0x2858   : > { %v1951_v10 = vmul.f32 %v3068_v9, %v1949_v8 }
0x285a   : > { %v1952_v11 = vmul.f32 %v3068_v9, %v1951_v10 }
0x285c   : > { %v1953_v12 = vmul.f32 0.5, %v1952_v11 }
0x285e   : > { %v1954_v13 = vsub.f32 1.5, %v1953_v12 }
0x2860   : > { %v1955_v14 = vmul.f32 %v3068_v9, %v1954_v13 }
0x2862   : > { %v1956_v15 = vmul.f32 %v1955_v14, %v1949_v8 }
0x2864   : > { %v1958_v18 = vsel %vm1957_vm10, %v1949_v8, %v1956_v15 }
0x2865   : > { %v1961_v19 = vsel %vm1959_vm11, %v1960_v16, %v1958_v18 }
0x2866   : > { %v1962_v20 = vmul.f32 5.468079, %v1961_v19 }
0x2868   : > { %v1963_v22 = vadd.f32 1e-08, %v1962_v20 }
0x286a   : > { %3069 = vrcp.f32 %v1963_v22 }
0x2870   : > { %v3070_v25 = vpop.eup %3069 }
0x2871   : > { %v1966_v26 = vmul.f32 %v3070_v25, %v1964_v24 }
0x2873   : > { %v1967_v27 = vsub.f32 %v1918_v47, %v1966_v26 }
0x2875   : > { %1970 = vperm.xlu1 %2863, %v1967_v27   ;;  %v1990_v44 = vmul.f32 0.0001, %v1967_v27 }
0x28e7   : > { %v1971_v28 = vpop.permute.xlu1 %1970 }
0x28e8   : > { %v1973_v17 = vsub.f32 %v1971_v28, %v3403_v49 }
0x28ea   : > { %v1974_v29 = vmul.f32 %v1973_v17, %v1973_v17 }
0x28ec   : > { %v1975_v30 = vsel %vm310_vm2, %v1974_v29, 0.0 }
0x28ed   : > { %v1976_v31 = vrot.slane %v1975_v30, 4 }
0x28ef   : > { %v1977_v32 = vadd.f32 %v1976_v31, %v1975_v30 }
0x28f1   : > { %v1978_v33 = vrot.slane %v1977_v32, 2 }
0x28f3   : > { %v1979_v34 = vadd.f32 %v1978_v33, %v1977_v32 }
0x28f5   : > { %v1980_v35 = vrot.slane %v1979_v34, 1 }
0x28f7   : > { %v1981_v36 = vadd.f32 %v1980_v35, %v1979_v34 }
0x28f9   : > { %v1982_v37 = vmul.f32 -0.5, %v1981_v36 }
0x28fb   : > { %v1983_v38 = vmul.f32 1.442695, %v1982_v37 }
0x28fd   : > { %3071 = vpow2.f32 %v1983_v38 }
0x2903   : > { %v3072_v39 = vpop.eup %3071 }
0x2904   : > { %v1985_v40 = vmul.f32 %v3072_v39, %v3256_v43 }
0x2906   : > { %v1986_v41 = vmul.f32 %v1985_v40, %v1973_v17 }
0x2908   : > { %v1987_v42 = vsel %vm310_vm2, %v1986_v41, 0.0 }
0x2909   : > { %1988 = vadd.xlane.f32.xlu0 %v1987_v42 }
0x297c   : > { %v1989_v45 = vpop.xlane.xlu0 %1988 }
0x297d   : > { %v1991_v46 = vadd.f32 %v1990_v44, %v1989_v45 }
0x297f   : > { %v1996_v47 = vmul.f32 0.001, %v1991_v46  ;;  %v1993_v63 = vmul.f32 0.1, %v1991_v46 }
0x2981   : > { %v1997_v50 = vmul.f32 %v1996_v47, %v1991_v46  ;;  %v1994_v3 = vadd.f32 %v1993_v63, %v1992_v1 }
0x2983   : > { %v1998_v51 = vadd.f32 %v1997_v50, %v1995_v48  ;;  %v2013_v4 = vmul.f32 0.05128371, %v1994_v3  ;;  %v2041_v44 = vmul.f32 0.9, %v1994_v3 }
0x2985   : > { %3073 = vrsqrt.f32 %v1998_v51  ;;  %vm2006_vm12 = vcmp.eq.f32.partialorder %v1998_v51, inf  ;;  %v2009_v59 = vand.u32 2147483648, %v1998_v51  ;;  %vm2008_vm13 = vcmp.eq.f32.partialorder %v1998_v51, 0.0 }
0x2986   : > { %v2044_v28 = vmul.f32 0.999, %v1998_v51 }
0x298b   : > { %v3074_v52 = vpop.eup %3073 }
0x298c   : > { %v2000_v53 = vmul.f32 %v3074_v52, %v1998_v51 }
0x298e   : > { %v2001_v54 = vmul.f32 %v3074_v52, %v2000_v53 }
0x2990   : > { %v2002_v55 = vmul.f32 0.5, %v2001_v54 }
0x2992   : > { %v2003_v57 = vsub.f32 1.5, %v2002_v55 }
0x2994   : > { %v2004_v56 = vmul.f32 %v3074_v52, %v2003_v57 }
0x2996   : > { %v2005_v58 = vmul.f32 %v2004_v56, %v1998_v51 }
0x2998   : > { %v2007_v60 = vsel %vm2006_vm12, %v1998_v51, %v2005_v58 }
0x2999   : > { %v2010_v61 = vsel %vm2008_vm13, %v2009_v59, %v2007_v60 }
0x299a   : > { %v2011_v62 = vmul.f32 5.390738, %v2010_v61 }
0x299c   : > { %v2012_v0 = vadd.f32 1e-08, %v2011_v62 }
0x299e   : > { %3075 = vrcp.f32 %v2012_v0 }
0x29a4   : > { %v3076_v5 = vpop.eup %3075 }
0x29a5   : > { %v2015_v6 = vmul.f32 %v3076_v5, %v2013_v4 }
0x29a7   : > { %v2016_v7 = vsub.f32 %v1967_v27, %v2015_v6 }
0x29a9   : > { %2019 = vperm.xlu2 %2864, %v2016_v7   ;;  %v2039_v24 = vmul.f32 0.0001, %v2016_v7 }
0x2a03   : > { %v2020_v8 = vpop.permute.xlu2 %2019 }
0x2a04   : > { %v2022_v9 = vsub.f32 %v2020_v8, %v3403_v49 }
0x2a06   : > { %v2023_v10 = vmul.f32 %v2022_v9, %v2022_v9 }
0x2a08   : > { %v2024_v11 = vsel %vm310_vm2, %v2023_v10, 0.0 }
0x2a09   : > { %v2025_v12 = vrot.slane %v2024_v11, 4 }
0x2a0b   : > { %v2026_v13 = vadd.f32 %v2025_v12, %v2024_v11 }
0x2a0d   : > { %v2027_v14 = vrot.slane %v2026_v13, 2 }
0x2a0f   : > { %v2028_v15 = vadd.f32 %v2027_v14, %v2026_v13 }
0x2a11   : > { %v2029_v16 = vrot.slane %v2028_v15, 1 }
0x2a13   : > { %v2030_v18 = vadd.f32 %v2029_v16, %v2028_v15 }
0x2a15   : > { %v2031_v19 = vmul.f32 -0.5, %v2030_v18 }
0x2a17   : > { %v2032_v20 = vmul.f32 1.442695, %v2031_v19 }
0x2a19   : > { %3077 = vpow2.f32 %v2032_v20 }
0x2a1f   : > { %v3078_v21 = vpop.eup %3077 }
0x2a20   : > { %v2034_v22 = vmul.f32 %v3078_v21, %v3256_v43 }
0x2a22   : > { %v2035_v2 = vmul.f32 %v2034_v22, %v2022_v9 }
0x2a24   : > { %v2036_v23 = vsel %vm310_vm2, %v2035_v2, 0.0 }
0x2a25   : > { %2037 = vadd.xlane.f32.xlu1 %v2036_v23 }
0x2a98   : > { %v2038_v25 = vpop.xlane.xlu1 %2037 }
0x2a99   : > { %v2040_v26 = vadd.f32 %v2039_v24, %v2038_v25 }
0x2a9b   : > { %v2045_v27 = vmul.f32 0.001, %v2040_v26  ;;  %v2042_v41 = vmul.f32 0.1, %v2040_v26 }
0x2a9d   : > { %v2046_v17 = vmul.f32 %v2045_v27, %v2040_v26  ;;  %v2043_v45 = vadd.f32 %v2042_v41, %v2041_v44 }
0x2a9f   : > { %v2047_v29 = vadd.f32 %v2046_v17, %v2044_v28  ;;  %v2062_v46 = vmul.f32 0.051152382, %v2043_v45  ;;  %v2090_v24 = vmul.f32 0.9, %v2043_v45 }
0x2aa1   : > { %3079 = vrsqrt.f32 %v2047_v29  ;;  %vm2055_vm14 = vcmp.eq.f32.partialorder %v2047_v29, inf  ;;  %v2058_v37 = vand.u32 2147483648, %v2047_v29  ;;  %vm2057_vm15 = vcmp.eq.f32.partialorder %v2047_v29, 0.0 }
0x2aa2   : > { %v2093_v8 = vmul.f32 0.999, %v2047_v29 }
0x2aa7   : > { %v3080_v30 = vpop.eup %3079 }
0x2aa8   : > { %v2049_v31 = vmul.f32 %v3080_v30, %v2047_v29 }
0x2aaa   : > { %v2050_v32 = vmul.f32 %v3080_v30, %v2049_v31 }
0x2aac   : > { %v2051_v33 = vmul.f32 0.5, %v2050_v32 }
0x2aae   : > { %v2052_v34 = vsub.f32 1.5, %v2051_v33 }
0x2ab0   : > { %v2053_v35 = vmul.f32 %v3080_v30, %v2052_v34 }
0x2ab2   : > { %v2054_v36 = vmul.f32 %v2053_v35, %v2047_v29 }
0x2ab4   : > { %v2056_v38 = vsel %vm2055_vm14, %v2047_v29, %v2054_v36 }
0x2ab5   : > { %v2059_v39 = vsel %vm2057_vm15, %v2058_v37, %v2056_v38 }
0x2ab6   : > { %v2060_v40 = vmul.f32 5.3166614, %v2059_v39 }
0x2ab8   : > { %v2061_v42 = vadd.f32 1e-08, %v2060_v40 }
0x2aba   : > { %3081 = vrcp.f32 %v2061_v42 }
0x2ac0   : > { %v3082_v47 = vpop.eup %3081 }
0x2ac1   : > { %v2064_v48 = vmul.f32 %v3082_v47, %v2062_v46 }
0x2ac3   : > { %v2065_v50 = vsub.f32 %v2016_v7, %v2064_v48 }
0x2ac5   : > { %2068 = vperm.xlu0 %2862, %v2065_v50   ;;  %v2088_v4 = vmul.f32 0.0001, %v2065_v50 }
0x2b37   : > { %v2069_v51 = vpop.permute.xlu0 %2068 }
0x2b38   : > { %v2071_v52 = vsub.f32 %v2069_v51, %v3403_v49 }
0x2b3a   : > { %v2072_v53 = vmul.f32 %v2071_v52, %v2071_v52 }
0x2b3c   : > { %v2073_v54 = vsel %vm310_vm2, %v2072_v53, 0.0 }
0x2b3d   : > { %v2074_v55 = vrot.slane %v2073_v54, 4 }
0x2b3f   : > { %v2075_v57 = vadd.f32 %v2074_v55, %v2073_v54 }
0x2b41   : > { %v2076_v56 = vrot.slane %v2075_v57, 2 }
0x2b43   : > { %v2077_v58 = vadd.f32 %v2076_v56, %v2075_v57 }
0x2b45   : > { %v2078_v59 = vrot.slane %v2077_v58, 1 }
0x2b47   : > { %v2079_v60 = vadd.f32 %v2078_v59, %v2077_v58 }
0x2b49   : > { %v2080_v61 = vmul.f32 -0.5, %v2079_v60 }
0x2b4b   : > { %v2081_v62 = vmul.f32 1.442695, %v2080_v61 }
0x2b4d   : > { %3083 = vpow2.f32 %v2081_v62 }
0x2b53   : > { %v3084_v63 = vpop.eup %3083 }
0x2b54   : > { %v2083_v0 = vmul.f32 %v3084_v63, %v3256_v43 }
0x2b56   : > { %v2084_v1 = vmul.f32 %v2083_v0, %v2071_v52 }
0x2b58   : > { %v2085_v3 = vsel %vm310_vm2, %v2084_v1, 0.0 }
0x2b59   : > { %2086 = vadd.xlane.f32.xlu2 %v2085_v3 }
0x2bcc   : > { %v2087_v5 = vpop.xlane.xlu2 %2086 }
0x2bcd   : > { %v2089_v6 = vadd.f32 %v2088_v4, %v2087_v5 }
0x2bcf   : > { %v2094_v7 = vmul.f32 0.001, %v2089_v6  ;;  %v2091_v2 = vmul.f32 0.1, %v2089_v6 }
0x2bd1   : > { %v2095_v9 = vmul.f32 %v2094_v7, %v2089_v6  ;;  %v2092_v25 = vadd.f32 %v2091_v2, %v2090_v24 }
0x2bd3   : > { %v2096_v10 = vadd.f32 %v2095_v9, %v2093_v8  ;;  %v2111_v26 = vmul.f32 0.05103476, %v2092_v25  ;;  %v2139_v4 = vmul.f32 0.9, %v2092_v25 }
0x2bd5   : > { %3085 = vrsqrt.f32 %v2096_v10  ;;  %vm2104_vm0 = vcmp.eq.f32.partialorder %v2096_v10, inf  ;;  %v2107_v19 = vand.u32 2147483648, %v2096_v10  ;;  %vm2106_vm1 = vcmp.eq.f32.partialorder %v2096_v10, 0.0 }
0x2bd6   : > { %v2142_v51 = vmul.f32 0.999, %v2096_v10 }
0x2bdb   : > { %v3086_v11 = vpop.eup %3085 }
0x2bdc   : > { %v2098_v12 = vmul.f32 %v3086_v11, %v2096_v10 }
0x2bde   : > { %v2099_v13 = vmul.f32 %v3086_v11, %v2098_v12 }
0x2be0   : > { %v2100_v14 = vmul.f32 0.5, %v2099_v13 }
0x2be2   : > { %v2101_v15 = vsub.f32 1.5, %v2100_v14 }
0x2be4   : > { %v2102_v16 = vmul.f32 %v3086_v11, %v2101_v15 }
0x2be6   : > { %v2103_v18 = vmul.f32 %v2102_v16, %v2096_v10 }
0x2be8   : > { %v2105_v20 = vsel %vm2104_vm0, %v2096_v10, %v2103_v18 }
0x2be9   : > { %v2108_v21 = vsel %vm2106_vm1, %v2107_v19, %v2105_v20 }
0x2bea   : > { %v2109_v22 = vmul.f32 5.2456264, %v2108_v21 }
0x2bec   : > { %v2110_v23 = vadd.f32 1e-08, %v2109_v22 }
0x2bee   : > { %3087 = vrcp.f32 %v2110_v23 }
0x2bf4   : > { %v3088_v27 = vpop.eup %3087 }
0x2bf5   : > { %v2113_v28 = vmul.f32 %v3088_v27, %v2111_v26 }
0x2bf7   : > { %v2114_v17 = vsub.f32 %v2065_v50, %v2113_v28 }
0x2bf9   : > { %2117 = vperm.xlu0 %2862, %v2114_v17   ;;  %v2137_v46 = vmul.f32 0.0001, %v2114_v17 }
0x2c6b   : > { %v2118_v29 = vpop.permute.xlu0 %2117 }
0x2c6c   : > { %v2120_v30 = vsub.f32 %v2118_v29, %v3403_v49 }
0x2c6e   : > { %v2121_v31 = vmul.f32 %v2120_v30, %v2120_v30 }
0x2c70   : > { %v2122_v32 = vsel %vm310_vm2, %v2121_v31, 0.0 }
0x2c71   : > { %v2123_v33 = vrot.slane %v2122_v32, 4 }
0x2c73   : > { %v2124_v34 = vadd.f32 %v2123_v33, %v2122_v32 }
0x2c75   : > { %v2125_v35 = vrot.slane %v2124_v34, 2 }
0x2c77   : > { %v2126_v36 = vadd.f32 %v2125_v35, %v2124_v34 }
0x2c79   : > { %v2127_v37 = vrot.slane %v2126_v36, 1 }
0x2c7b   : > { %v2128_v38 = vadd.f32 %v2127_v37, %v2126_v36 }
0x2c7d   : > { %v2129_v39 = vmul.f32 -0.5, %v2128_v38 }
0x2c7f   : > { %v2130_v40 = vmul.f32 1.442695, %v2129_v39 }
0x2c81   : > { %3089 = vpow2.f32 %v2130_v40 }
0x2c87   : > { %v3090_v41 = vpop.eup %3089 }
0x2c88   : > { %v2132_v42 = vmul.f32 %v3090_v41, %v3256_v43 }
0x2c8a   : > { %v2133_v44 = vmul.f32 %v2132_v42, %v2120_v30 }
0x2c8c   : > { %v2134_v45 = vsel %vm310_vm2, %v2133_v44, 0.0 }
0x2c8d   : > { %2135 = vadd.xlane.f32.xlu0 %v2134_v45 }
0x2d00   : > { %v2136_v47 = vpop.xlane.xlu0 %2135 }
0x2d01   : > { %v2138_v48 = vadd.f32 %v2137_v46, %v2136_v47 }
0x2d03   : > { %v2143_v50 = vmul.f32 0.001, %v2138_v48  ;;  %v2140_v1 = vmul.f32 0.1, %v2138_v48 }
0x2d05   : > { %v2144_v52 = vmul.f32 %v2143_v50, %v2138_v48  ;;  %v2141_v5 = vadd.f32 %v2140_v1, %v2139_v4 }
0x2d07   : > { %v2145_v53 = vadd.f32 %v2144_v52, %v2142_v51  ;;  %v2160_v6 = vmul.f32 0.05092936, %v2141_v5  ;;  %v2188_v46 = vmul.f32 0.9, %v2141_v5 }
0x2d09   : > { %3091 = vrsqrt.f32 %v2145_v53  ;;  %vm2153_vm3 = vcmp.eq.f32.partialorder %v2145_v53, inf  ;;  %v2156_v61 = vand.u32 2147483648, %v2145_v53  ;;  %vm2155_vm4 = vcmp.eq.f32.partialorder %v2145_v53, 0.0 }
0x2d0a   : > { %v2191_v29 = vmul.f32 0.999, %v2145_v53 }
0x2d0f   : > { %v3092_v54 = vpop.eup %3091 }
0x2d10   : > { %v2147_v55 = vmul.f32 %v3092_v54, %v2145_v53 }
0x2d12   : > { %v2148_v57 = vmul.f32 %v3092_v54, %v2147_v55 }
0x2d14   : > { %v2149_v56 = vmul.f32 0.5, %v2148_v57 }
0x2d16   : > { %v2150_v58 = vsub.f32 1.5, %v2149_v56 }
0x2d18   : > { %v2151_v59 = vmul.f32 %v3092_v54, %v2150_v58 }
0x2d1a   : > { %v2152_v60 = vmul.f32 %v2151_v59, %v2145_v53 }
0x2d1c   : > { %v2154_v62 = vsel %vm2153_vm3, %v2145_v53, %v2152_v60 }
0x2d1d   : > { %v2157_v63 = vsel %vm2155_vm4, %v2156_v61, %v2154_v62 }
0x2d1e   : > { %v2158_v0 = vmul.f32 5.1774316, %v2157_v63 }
0x2d20   : > { %v2159_v3 = vadd.f32 1e-08, %v2158_v0 }
0x2d22   : > { %3093 = vrcp.f32 %v2159_v3 }
0x2d28   : > { %v3094_v7 = vpop.eup %3093 }
0x2d29   : > { %v2162_v8 = vmul.f32 %v3094_v7, %v2160_v6 }
0x2d2b   : > { %v2163_v9 = vsub.f32 %v2114_v17, %v2162_v8 }
0x2d2d   : > { %2166 = vperm.xlu1 %2863, %v2163_v9   ;;  %v2186_v26 = vmul.f32 0.0001, %v2163_v9 }
0x2d9f   : > { %v2167_v10 = vpop.permute.xlu1 %2166 }
0x2da0   : > { %v2169_v11 = vsub.f32 %v2167_v10, %v3403_v49 }
0x2da2   : > { %v2170_v12 = vmul.f32 %v2169_v11, %v2169_v11 }
0x2da4   : > { %v2171_v13 = vsel %vm310_vm2, %v2170_v12, 0.0 }
0x2da5   : > { %v2172_v14 = vrot.slane %v2171_v13, 4 }
0x2da7   : > { %v2173_v15 = vadd.f32 %v2172_v14, %v2171_v13 }
0x2da9   : > { %v2174_v16 = vrot.slane %v2173_v15, 2 }
0x2dab   : > { %v2175_v18 = vadd.f32 %v2174_v16, %v2173_v15 }
0x2dad   : > { %v2176_v19 = vrot.slane %v2175_v18, 1 }
0x2daf   : > { %v2177_v20 = vadd.f32 %v2176_v19, %v2175_v18 }
0x2db1   : > { %v2178_v21 = vmul.f32 -0.5, %v2177_v20 }
0x2db3   : > { %v2179_v22 = vmul.f32 1.442695, %v2178_v21 }
0x2db5   : > { %3095 = vpow2.f32 %v2179_v22 }
0x2dbb   : > { %v3096_v2 = vpop.eup %3095 }
0x2dbc   : > { %v2181_v23 = vmul.f32 %v3096_v2, %v3256_v43 }
0x2dbe   : > { %v2182_v24 = vmul.f32 %v2181_v23, %v2169_v11 }
0x2dc0   : > { %v2183_v25 = vsel %vm310_vm2, %v2182_v24, 0.0 }
0x2dc1   : > { %2184 = vadd.xlane.f32.xlu2 %v2183_v25 }
0x2e34   : > { %v2185_v27 = vpop.xlane.xlu2 %2184 }
0x2e35   : > { %v2187_v28 = vadd.f32 %v2186_v26, %v2185_v27 }
0x2e37   : > { %v2192_v17 = vmul.f32 0.001, %v2187_v28  ;;  %v2189_v44 = vmul.f32 0.1, %v2187_v28 }
0x2e39   : > { %v2193_v30 = vmul.f32 %v2192_v17, %v2187_v28  ;;  %v2190_v47 = vadd.f32 %v2189_v44, %v2188_v46 }
0x2e3b   : > { %v2194_v31 = vadd.f32 %v2193_v30, %v2191_v29  ;;  %v2209_v48 = vmul.f32 0.05083487, %v2190_v47  ;;  %v2237_v26 = vmul.f32 0.9, %v2190_v47 }
0x2e3d   : > { %3097 = vrsqrt.f32 %v2194_v31  ;;  %vm2202_vm5 = vcmp.eq.f32.partialorder %v2194_v31, inf  ;;  %v2205_v39 = vand.u32 2147483648, %v2194_v31  ;;  %vm2204_vm6 = vcmp.eq.f32.partialorder %v2194_v31, 0.0 }
0x2e3e   : > { %v2240_v10 = vmul.f32 0.999, %v2194_v31 }
0x2e43   : > { %v3098_v32 = vpop.eup %3097 }
0x2e44   : > { %v2196_v33 = vmul.f32 %v3098_v32, %v2194_v31 }
0x2e46   : > { %v2197_v34 = vmul.f32 %v3098_v32, %v2196_v33 }
0x2e48   : > { %v2198_v35 = vmul.f32 0.5, %v2197_v34 }
0x2e4a   : > { %v2199_v36 = vsub.f32 1.5, %v2198_v35 }
0x2e4c   : > { %v2200_v37 = vmul.f32 %v3098_v32, %v2199_v36 }
0x2e4e   : > { %v2201_v38 = vmul.f32 %v2200_v37, %v2194_v31 }
0x2e50   : > { %v2203_v40 = vsel %vm2202_vm5, %v2194_v31, %v2201_v38 }
0x2e51   : > { %v2206_v41 = vsel %vm2204_vm6, %v2205_v39, %v2203_v40 }
0x2e52   : > { %v2207_v42 = vmul.f32 5.1118937, %v2206_v41 }
0x2e54   : > { %v2208_v45 = vadd.f32 1e-08, %v2207_v42 }
0x2e56   : > { %3099 = vrcp.f32 %v2208_v45 }
0x2e5c   : > { %v3100_v50 = vpop.eup %3099 }
0x2e5d   : > { %v2211_v51 = vmul.f32 %v3100_v50, %v2209_v48 }
0x2e5f   : > { %v2212_v52 = vsub.f32 %v2163_v9, %v2211_v51 }
0x2e61   : > { %2215 = vperm.xlu1 %2863, %v2212_v52   ;;  %v2235_v6 = vmul.f32 0.0001, %v2212_v52 }
0x2ed3   : > { %v2216_v53 = vpop.permute.xlu1 %2215 }
0x2ed4   : > { %v2218_v54 = vsub.f32 %v2216_v53, %v3403_v49 }
0x2ed6   : > { %v2219_v55 = vmul.f32 %v2218_v54, %v2218_v54 }
0x2ed8   : > { %v2220_v57 = vsel %vm310_vm2, %v2219_v55, 0.0 }
0x2ed9   : > { %v2221_v56 = vrot.slane %v2220_v57, 4 }
0x2edb   : > { %v2222_v58 = vadd.f32 %v2221_v56, %v2220_v57 }
0x2edd   : > { %v2223_v59 = vrot.slane %v2222_v58, 2 }
0x2edf   : > { %v2224_v60 = vadd.f32 %v2223_v59, %v2222_v58 }
0x2ee1   : > { %v2225_v61 = vrot.slane %v2224_v60, 1 }
0x2ee3   : > { %v2226_v62 = vadd.f32 %v2225_v61, %v2224_v60 }
0x2ee5   : > { %v2227_v63 = vmul.f32 -0.5, %v2226_v62 }
0x2ee7   : > { %v2228_v0 = vmul.f32 1.442695, %v2227_v63 }
0x2ee9   : > { %3101 = vpow2.f32 %v2228_v0 }
0x2eef   : > { %v3102_v1 = vpop.eup %3101 }
0x2ef0   : > { %v2230_v3 = vmul.f32 %v3102_v1, %v3256_v43 }
0x2ef2   : > { %v2231_v4 = vmul.f32 %v2230_v3, %v2218_v54 }
0x2ef4   : > { %v2232_v5 = vsel %vm310_vm2, %v2231_v4, 0.0 }
0x2ef5   : > { %2233 = vadd.xlane.f32.xlu2 %v2232_v5 }
0x2f68   : > { %v2234_v7 = vpop.xlane.xlu2 %2233 }
0x2f69   : > { %v2236_v8 = vadd.f32 %v2235_v6, %v2234_v7 }
0x2f6b   : > { %v2241_v9 = vmul.f32 0.001, %v2236_v8  ;;  %v2238_v24 = vmul.f32 0.1, %v2236_v8 }
0x2f6d   : > { %v2242_v11 = vmul.f32 %v2241_v9, %v2236_v8  ;;  %v2239_v27 = vadd.f32 %v2238_v24, %v2237_v26 }
0x2f6f   : > { %v2243_v12 = vadd.f32 %v2242_v11, %v2240_v10  ;;  %v2258_v28 = vmul.f32 0.050750133, %v2239_v27  ;;  %v2286_v6 = vmul.f32 0.9, %v2239_v27 }
0x2f71   : > { %3103 = vrsqrt.f32 %v2243_v12  ;;  %vm2251_vm7 = vcmp.eq.f32.partialorder %v2243_v12, inf  ;;  %v2254_v21 = vand.u32 2147483648, %v2243_v12  ;;  %vm2253_vm8 = vcmp.eq.f32.partialorder %v2243_v12, 0.0 }
0x2f72   : > { %v2289_v53 = vmul.f32 0.999, %v2243_v12 }
0x2f77   : > { %v3104_v13 = vpop.eup %3103 }
0x2f78   : > { %v2245_v14 = vmul.f32 %v3104_v13, %v2243_v12 }
0x2f7a   : > { %v2246_v15 = vmul.f32 %v3104_v13, %v2245_v14 }
0x2f7c   : > { %v2247_v16 = vmul.f32 0.5, %v2246_v15 }
0x2f7e   : > { %v2248_v18 = vsub.f32 1.5, %v2247_v16 }
0x2f80   : > { %v2249_v19 = vmul.f32 %v3104_v13, %v2248_v18 }
0x2f82   : > { %v2250_v20 = vmul.f32 %v2249_v19, %v2243_v12 }
0x2f84   : > { %v2252_v22 = vsel %vm2251_vm7, %v2243_v12, %v2250_v20 }
0x2f85   : > { %v2255_v2 = vsel %vm2253_vm8, %v2254_v21, %v2252_v22 }
0x2f86   : > { %v2256_v23 = vmul.f32 5.048845, %v2255_v2 }
0x2f88   : > { %v2257_v25 = vadd.f32 1e-08, %v2256_v23 }
0x2f8a   : > { %3105 = vrcp.f32 %v2257_v25 }
0x2f90   : > { %v3106_v17 = vpop.eup %3105 }
0x2f91   : > { %v2260_v29 = vmul.f32 %v3106_v17, %v2258_v28 }
0x2f93   : > { %v2261_v30 = vsub.f32 %v2212_v52, %v2260_v29 }
0x2f95   : > { %2264 = vperm.xlu0 %2862, %v2261_v30   ;;  %v2284_v48 = vmul.f32 0.0001, %v2261_v30 }
0x3007   : > { %v2265_v31 = vpop.permute.xlu0 %2264 }
0x3008   : > { %v2267_v32 = vsub.f32 %v2265_v31, %v3403_v49 }
0x300a   : > { %v2268_v33 = vmul.f32 %v2267_v32, %v2267_v32 }
0x300c   : > { %v2269_v34 = vsel %vm310_vm2, %v2268_v33, 0.0 }
0x300d   : > { %v2270_v35 = vrot.slane %v2269_v34, 4 }
0x300f   : > { %v2271_v36 = vadd.f32 %v2270_v35, %v2269_v34 }
0x3011   : > { %v2272_v37 = vrot.slane %v2271_v36, 2 }
0x3013   : > { %v2273_v38 = vadd.f32 %v2272_v37, %v2271_v36 }
0x3015   : > { %v2274_v39 = vrot.slane %v2273_v38, 1 }
0x3017   : > { %v2275_v40 = vadd.f32 %v2274_v39, %v2273_v38 }
0x3019   : > { %v2276_v41 = vmul.f32 -0.5, %v2275_v40 }
0x301b   : > { %v2277_v42 = vmul.f32 1.442695, %v2276_v41 }
0x301d   : > { %3107 = vpow2.f32 %v2277_v42 }
0x3023   : > { %v3108_v44 = vpop.eup %3107 }
0x3024   : > { %v2279_v45 = vmul.f32 %v3108_v44, %v3256_v43 }
0x3026   : > { %v2280_v46 = vmul.f32 %v2279_v45, %v2267_v32 }
0x3028   : > { %v2281_v47 = vsel %vm310_vm2, %v2280_v46, 0.0 }
0x3029   : > { %2282 = vadd.xlane.f32.xlu1 %v2281_v47 }
0x309c   : > { %v2283_v50 = vpop.xlane.xlu1 %2282 }
0x309d   : > { %v2285_v51 = vadd.f32 %v2284_v48, %v2283_v50 }
0x309f   : > { %v2290_v52 = vmul.f32 0.001, %v2285_v51  ;;  %v2287_v4 = vmul.f32 0.1, %v2285_v51 }
0x30a1   : > { %v2291_v54 = vmul.f32 %v2290_v52, %v2285_v51  ;;  %v2288_v7 = vadd.f32 %v2287_v4, %v2286_v6 }
0x30a3   : > { %v2292_v55 = vadd.f32 %v2291_v54, %v2289_v53  ;;  %v2307_v8 = vmul.f32 0.050674107, %v2288_v7  ;;  %v2335_v48 = vmul.f32 0.9, %v2288_v7 }
0x30a5   : > { %3109 = vrsqrt.f32 %v2292_v55  ;;  %vm2300_vm9 = vcmp.eq.f32.partialorder %v2292_v55, inf  ;;  %v2303_v63 = vand.u32 2147483648, %v2292_v55  ;;  %vm2302_vm10 = vcmp.eq.f32.partialorder %v2292_v55, 0.0 }
0x30a6   : > { %v2338_v31 = vmul.f32 0.999, %v2292_v55 }
0x30ab   : > { %v3110_v57 = vpop.eup %3109 }
0x30ac   : > { %v2294_v56 = vmul.f32 %v3110_v57, %v2292_v55 }
0x30ae   : > { %v2295_v58 = vmul.f32 %v3110_v57, %v2294_v56 }
0x30b0   : > { %v2296_v59 = vmul.f32 0.5, %v2295_v58 }
0x30b2   : > { %v2297_v60 = vsub.f32 1.5, %v2296_v59 }
0x30b4   : > { %v2298_v61 = vmul.f32 %v3110_v57, %v2297_v60 }
0x30b6   : > { %v2299_v62 = vmul.f32 %v2298_v61, %v2292_v55 }
0x30b8   : > { %v2301_v0 = vsel %vm2300_vm9, %v2292_v55, %v2299_v62 }
0x30b9   : > { %v2304_v1 = vsel %vm2302_vm10, %v2303_v63, %v2301_v0 }
0x30ba   : > { %v2305_v3 = vmul.f32 4.9881325, %v2304_v1 }
0x30bc   : > { %v2306_v5 = vadd.f32 1e-08, %v2305_v3 }
0x30be   : > { %3111 = vrcp.f32 %v2306_v5 }
0x30c4   : > { %v3112_v9 = vpop.eup %3111 }
0x30c5   : > { %v2309_v10 = vmul.f32 %v3112_v9, %v2307_v8 }
0x30c7   : > { %v2310_v11 = vsub.f32 %v2261_v30, %v2309_v10 }
0x30c9   : > { %2313 = vperm.xlu2 %2864, %v2310_v11   ;;  %v2333_v28 = vmul.f32 0.0001, %v2310_v11 }
0x3123   : > { %v2314_v12 = vpop.permute.xlu2 %2313 }
0x3124   : > { %v2316_v13 = vsub.f32 %v2314_v12, %v3403_v49 }
0x3126   : > { %v2317_v14 = vmul.f32 %v2316_v13, %v2316_v13 }
0x3128   : > { %v2318_v15 = vsel %vm310_vm2, %v2317_v14, 0.0 }
0x3129   : > { %v2319_v16 = vrot.slane %v2318_v15, 4 }
0x312b   : > { %v2320_v18 = vadd.f32 %v2319_v16, %v2318_v15 }
0x312d   : > { %v2321_v19 = vrot.slane %v2320_v18, 2 }
0x312f   : > { %v2322_v20 = vadd.f32 %v2321_v19, %v2320_v18 }
0x3131   : > { %v2323_v21 = vrot.slane %v2322_v20, 1 }
0x3133   : > { %v2324_v22 = vadd.f32 %v2323_v21, %v2322_v20 }
0x3135   : > { %v2325_v2 = vmul.f32 -0.5, %v2324_v22 }
0x3137   : > { %v2326_v23 = vmul.f32 1.442695, %v2325_v2 }
0x3139   : > { %3113 = vpow2.f32 %v2326_v23 }
0x313f   : > { %v3114_v24 = vpop.eup %3113 }
0x3140   : > { %v2328_v25 = vmul.f32 %v3114_v24, %v3256_v43 }
0x3142   : > { %v2329_v26 = vmul.f32 %v2328_v25, %v2316_v13 }
0x3144   : > { %v2330_v27 = vsel %vm310_vm2, %v2329_v26, 0.0 }
0x3145   : > { %2331 = vadd.xlane.f32.xlu0 %v2330_v27 }
0x31b8   : > { %v2332_v17 = vpop.xlane.xlu0 %2331 }
0x31b9   : > { %v2334_v29 = vadd.f32 %v2333_v28, %v2332_v17 }
0x31bb   : > { %v2339_v30 = vmul.f32 0.001, %v2334_v29  ;;  %v2336_v46 = vmul.f32 0.1, %v2334_v29 }
0x31bd   : > { %v2340_v32 = vmul.f32 %v2339_v30, %v2334_v29  ;;  %v2337_v50 = vadd.f32 %v2336_v46, %v2335_v48 }
0x31bf   : > { %v2341_v33 = vadd.f32 %v2340_v32, %v2338_v31  ;;  %v2356_v51 = vmul.f32 0.05060588, %v2337_v50  ;;  %v2384_v28 = vmul.f32 0.9, %v2337_v50 }
0x31c1   : > { %3115 = vrsqrt.f32 %v2341_v33  ;;  %vm2349_vm11 = vcmp.eq.f32.partialorder %v2341_v33, inf  ;;  %v2352_v41 = vand.u32 2147483648, %v2341_v33  ;;  %vm2351_vm12 = vcmp.eq.f32.partialorder %v2341_v33, 0.0 }
0x31c2   : > { %v2387_v12 = vmul.f32 0.999, %v2341_v33 }
0x31c7   : > { %v3116_v34 = vpop.eup %3115 }
0x31c8   : > { %v2343_v35 = vmul.f32 %v3116_v34, %v2341_v33 }
0x31ca   : > { %v2344_v36 = vmul.f32 %v3116_v34, %v2343_v35 }
0x31cc   : > { %v2345_v37 = vmul.f32 0.5, %v2344_v36 }
0x31ce   : > { %v2346_v38 = vsub.f32 1.5, %v2345_v37 }
0x31d0   : > { %v2347_v39 = vmul.f32 %v3116_v34, %v2346_v38 }
0x31d2   : > { %v2348_v40 = vmul.f32 %v2347_v39, %v2341_v33 }
0x31d4   : > { %v2350_v42 = vsel %vm2349_vm11, %v2341_v33, %v2348_v40 }
0x31d5   : > { %v2353_v44 = vsel %vm2351_vm12, %v2352_v41, %v2350_v42 }
0x31d6   : > { %v2354_v45 = vmul.f32 4.9296165, %v2353_v44 }
0x31d8   : > { %v2355_v47 = vadd.f32 1e-08, %v2354_v45 }
0x31da   : > { %3117 = vrcp.f32 %v2355_v47 }
0x31e0   : > { %v3118_v52 = vpop.eup %3117 }
0x31e1   : > { %v2358_v53 = vmul.f32 %v3118_v52, %v2356_v51 }
0x31e3   : > { %v2359_v54 = vsub.f32 %v2310_v11, %v2358_v53 }
0x31e5   : > { %2362 = vperm.xlu2 %2864, %v2359_v54   ;;  %v2382_v8 = vmul.f32 0.0001, %v2359_v54 }
0x323f   : > { %v2363_v55 = vpop.permute.xlu2 %2362 }
0x3240   : > { %v2365_v57 = vsub.f32 %v2363_v55, %v3403_v49 }
0x3242   : > { %v2366_v56 = vmul.f32 %v2365_v57, %v2365_v57 }
0x3244   : > { %v2367_v58 = vsel %vm310_vm2, %v2366_v56, 0.0 }
0x3245   : > { %v2368_v59 = vrot.slane %v2367_v58, 4 }
0x3247   : > { %v2369_v60 = vadd.f32 %v2368_v59, %v2367_v58 }
0x3249   : > { %v2370_v61 = vrot.slane %v2369_v60, 2 }
0x324b   : > { %v2371_v62 = vadd.f32 %v2370_v61, %v2369_v60 }
0x324d   : > { %v2372_v63 = vrot.slane %v2371_v62, 1 }
0x324f   : > { %v2373_v0 = vadd.f32 %v2372_v63, %v2371_v62 }
0x3251   : > { %v2374_v1 = vmul.f32 -0.5, %v2373_v0 }
0x3253   : > { %v2375_v3 = vmul.f32 1.442695, %v2374_v1 }
0x3255   : > { %3119 = vpow2.f32 %v2375_v3 }
0x325b   : > { %v3120_v4 = vpop.eup %3119 }
0x325c   : > { %v2377_v5 = vmul.f32 %v3120_v4, %v3256_v43 }
0x325e   : > { %v2378_v6 = vmul.f32 %v2377_v5, %v2365_v57 }
0x3260   : > { %v2379_v7 = vsel %vm310_vm2, %v2378_v6, 0.0 }
0x3261   : > { %2380 = vadd.xlane.f32.xlu2 %v2379_v7 }
0x32d4   : > { %v2381_v9 = vpop.xlane.xlu2 %2380 }
0x32d5   : > { %v2383_v10 = vadd.f32 %v2382_v8, %v2381_v9 }
0x32d7   : > { %v2388_v11 = vmul.f32 0.001, %v2383_v10  ;;  %v2385_v26 = vmul.f32 0.1, %v2383_v10 }
0x32d9   : > { %v2389_v13 = vmul.f32 %v2388_v11, %v2383_v10  ;;  %v2386_v17 = vadd.f32 %v2385_v26, %v2384_v28 }
0x32db   : > { %v2390_v14 = vadd.f32 %v2389_v13, %v2387_v12  ;;  %v2405_v29 = vmul.f32 0.05054463, %v2386_v17  ;;  %v2433_v7 = vmul.f32 0.9, %v2386_v17 }
0x32dd   : > { %3121 = vrsqrt.f32 %v2390_v14  ;;  %vm2398_vm13 = vcmp.eq.f32.partialorder %v2390_v14, inf  ;;  %v2401_v2 = vand.u32 2147483648, %v2390_v14  ;;  %vm2400_vm14 = vcmp.eq.f32.partialorder %v2390_v14, 0.0 }
0x32e3   : > { %v3122_v15 = vpop.eup %3121 }
0x32e4   : > { %v2392_v16 = vmul.f32 %v3122_v15, %v2390_v14 }
0x32e6   : > { %v2393_v18 = vmul.f32 %v3122_v15, %v2392_v16 }
0x32e8   : > { %v2394_v19 = vmul.f32 0.5, %v2393_v18 }
0x32ea   : > { %v2395_v20 = vsub.f32 1.5, %v2394_v19 }
0x32ec   : > { %v2396_v21 = vmul.f32 %v3122_v15, %v2395_v20 }
0x32ee   : > { %v2397_v22 = vmul.f32 %v2396_v21, %v2390_v14 }
0x32f0   : > { %v2399_v23 = vsel %vm2398_vm13, %v2390_v14, %v2397_v22 }
0x32f1   : > { %v2402_v24 = vsel %vm2400_vm14, %v2401_v2, %v2399_v23  ;;  %vm2776_vm14 = vcmask 1024  }
0x32f2   : > { %v2403_v25 = vmul.f32 4.8731685, %v2402_v24 }
0x32f4   : > { %v2404_v27 = vadd.f32 1e-08, %v2403_v25 }
0x32f6   : > { %3123 = vrcp.f32 %v2404_v27 }
0x32fc   : > { %v3124_v30 = vpop.eup %3123 }
0x32fd   : > { %v2407_v31 = vmul.f32 %v3124_v30, %v2405_v29 }
0x32ff   : > { %v2408_v32 = vsub.f32 %v2359_v54, %v2407_v31  ;;  %v2436_v54 = vmul.f32 0.999, %v2390_v14  ;;  %v3452_v14 = vld [vmem:[%s3493_s4] sm:$0x3] }
0x3301   : > { %2411 = vperm.xlu1 %2863, %v2408_v32  }
0x3373   : > { %v2412_v33 = vpop.permute.xlu1 %2411 }
0x3374   : > { %v2414_v34 = vsub.f32 %v2412_v33, %v3403_v49  ;;  %v2431_v49 = vmul.f32 0.0001, %v2408_v32 }
0x3376   : > { %v2415_v35 = vmul.f32 %v2414_v34, %v2414_v34 }
0x3378   : > { %v2416_v36 = vsel %vm310_vm2, %v2415_v35, 0.0 }
0x3379   : > { %v2417_v37 = vrot.slane %v2416_v36, 4 }
0x337b   : > { %v2418_v38 = vadd.f32 %v2417_v37, %v2416_v36 }
0x337d   : > { %v2419_v39 = vrot.slane %v2418_v38, 2 }
0x337f   : > { %v2420_v40 = vadd.f32 %v2419_v39, %v2418_v38 }
0x3381   : > { %v2421_v41 = vrot.slane %v2420_v40, 1 }
0x3383   : > { %v2422_v42 = vadd.f32 %v2421_v41, %v2420_v40 }
0x3385   : > { %v2423_v44 = vmul.f32 -0.5, %v2422_v42 }
0x3387   : > { %v2424_v45 = vmul.f32 1.442695, %v2423_v44 }
0x3389   : > { %3125 = vpow2.f32 %v2424_v45 }
0x338f   : > { %v3126_v46 = vpop.eup %3125 }
0x3390   : > { %v2426_v47 = vmul.f32 %v3126_v46, %v3256_v43 }
0x3392   : > { %v2427_v48 = vmul.f32 %v2426_v47, %v2414_v34 }
0x3394   : > { %v2428_v50 = vsel %vm310_vm2, %v2427_v48, 0.0 }
0x3395   : > { %2429 = vadd.xlane.f32.xlu0 %v2428_v50 }
0x3408   : > { %v2430_v51 = vpop.xlane.xlu0 %2429 }
0x3409   : > { %v2432_v52 = vadd.f32 %v2431_v49, %v2430_v51 }
0x340b   : > { %v2437_v53 = vmul.f32 0.001, %v2432_v52  ;;  %v2434_v5 = vmul.f32 0.1, %v2432_v52 }
0x340d   : > { %v2438_v55 = vmul.f32 %v2437_v53, %v2432_v52  ;;  %v2435_v8 = vadd.f32 %v2434_v5, %v2433_v7 }
0x340f   : > { %v2439_v57 = vadd.f32 %v2438_v55, %v2436_v54  ;;  %v2454_v9 = vmul.f32 0.050489634, %v2435_v8  ;;  %v2482_v49 = vmul.f32 0.9, %v2435_v8 }
0x3411   : > { %3127 = vrsqrt.f32 %v2439_v57  ;;  %vm2447_vm15 = vcmp.eq.f32.partialorder %v2439_v57, inf  ;;  %v2450_v0 = vand.u32 2147483648, %v2439_v57  ;;  %vm2449_vm0 = vcmp.eq.f32.partialorder %v2439_v57, 0.0 }
0x3412   : > { %v2485_v33 = vmul.f32 0.999, %v2439_v57 }
0x3417   : > { %v3128_v56 = vpop.eup %3127 }
0x3418   : > { %v2441_v58 = vmul.f32 %v3128_v56, %v2439_v57 }
0x341a   : > { %v2442_v59 = vmul.f32 %v3128_v56, %v2441_v58 }
0x341c   : > { %v2443_v60 = vmul.f32 0.5, %v2442_v59 }
0x341e   : > { %v2444_v61 = vsub.f32 1.5, %v2443_v60 }
0x3420   : > { %v2445_v62 = vmul.f32 %v3128_v56, %v2444_v61 }
0x3422   : > { %v2446_v63 = vmul.f32 %v2445_v62, %v2439_v57 }
0x3424   : > { %v2448_v1 = vsel %vm2447_vm15, %v2439_v57, %v2446_v63  ;;  %vm2770_vm15 = vcmask 56320  }
0x3425   : > { %v2451_v3 = vsel %vm2449_vm0, %v2450_v0, %v2448_v1  ;;  %vm2774_vm0 = vcmask 0  }
0x3426   : > { %v2452_v4 = vmul.f32 4.8186693, %v2451_v3 }
0x3428   : > { %v2453_v6 = vadd.f32 1e-08, %v2452_v4 }
0x342a   : > { %3129 = vrcp.f32 %v2453_v6 }
0x3430   : > { %v3130_v10 = vpop.eup %3129 }
0x3431   : > { %v2456_v11 = vmul.f32 %v3130_v10, %v2454_v9 }
0x3433   : > { %v2457_v12 = vsub.f32 %v2408_v32, %v2456_v11 }
0x3435   : > { %2460 = vperm.xlu0 %2862, %v2457_v12   ;;  %v2480_v29 = vmul.f32 0.0001, %v2457_v12 }
0x34a7   : > { %v2461_v13 = vpop.permute.xlu0 %2460 }
0x34a8   : > { %v2463_v15 = vsub.f32 %v2461_v13, %v3452_v14 }
0x34aa   : > { %v2464_v16 = vmul.f32 %v2463_v15, %v2463_v15 }
0x34ac   : > { %v2465_v18 = vsel %vm310_vm2, %v2464_v16, 0.0 }
0x34ad   : > { %v2466_v19 = vrot.slane %v2465_v18, 4 }
0x34af   : > { %v2467_v20 = vadd.f32 %v2466_v19, %v2465_v18 }
0x34b1   : > { %v2468_v21 = vrot.slane %v2467_v20, 2 }
0x34b3   : > { %v2469_v22 = vadd.f32 %v2468_v21, %v2467_v20 }
0x34b5   : > { %v2470_v2 = vrot.slane %v2469_v22, 1 }
0x34b7   : > { %v2471_v23 = vadd.f32 %v2470_v2, %v2469_v22 }
0x34b9   : > { %v2472_v24 = vmul.f32 -0.5, %v2471_v23 }
0x34bb   : > { %v2473_v25 = vmul.f32 1.442695, %v2472_v24 }
0x34bd   : > { %3131 = vpow2.f32 %v2473_v25 }
0x34c3   : > { %v3132_v26 = vpop.eup %3131 }
0x34c4   : > { %v2475_v27 = vmul.f32 %v3132_v26, %v3256_v43 }
0x34c6   : > { %v2476_v28 = vmul.f32 %v2475_v27, %v2463_v15 }
0x34c8   : > { %v2477_v17 = vsel %vm310_vm2, %v2476_v28, 0.0 }
0x34c9   : > { %2478 = vadd.xlane.f32.xlu1 %v2477_v17 }
0x353c   : > { %v2479_v30 = vpop.xlane.xlu1 %2478 }
0x353d   : > { %v2481_v31 = vadd.f32 %v2480_v29, %v2479_v30 }
0x353f   : > { %v2486_v32 = vmul.f32 0.001, %v2481_v31  ;;  %v2483_v48 = vmul.f32 0.1, %v2481_v31 }
0x3541   : > { %v2487_v34 = vmul.f32 %v2486_v32, %v2481_v31  ;;  %v2484_v51 = vadd.f32 %v2483_v48, %v2482_v49 }
0x3543   : > { %v2488_v35 = vadd.f32 %v2487_v34, %v2485_v33  ;;  %v2503_v52 = vmul.f32 0.05044024, %v2484_v51  ;;  %v2531_v29 = vmul.f32 0.9, %v2484_v51 }
0x3545   : > { %3133 = vrsqrt.f32 %v2488_v35  ;;  %vm2496_vm1 = vcmp.eq.f32.partialorder %v2488_v35, inf  ;;  %v2499_v44 = vand.u32 2147483648, %v2488_v35  ;;  %vm2498_vm3 = vcmp.eq.f32.partialorder %v2488_v35, 0.0 }
0x3546   : > { %v2534_v13 = vmul.f32 0.999, %v2488_v35 }
0x354b   : > { %v3134_v36 = vpop.eup %3133 }
0x354c   : > { %v2490_v37 = vmul.f32 %v3134_v36, %v2488_v35 }
0x354e   : > { %v2491_v38 = vmul.f32 %v3134_v36, %v2490_v37 }
0x3550   : > { %v2492_v39 = vmul.f32 0.5, %v2491_v38 }
0x3552   : > { %v2493_v40 = vsub.f32 1.5, %v2492_v39 }
0x3554   : > { %v2494_v41 = vmul.f32 %v3134_v36, %v2493_v40 }
0x3556   : > { %v2495_v42 = vmul.f32 %v2494_v41, %v2488_v35 }
0x3558   : > { %v2497_v45 = vsel %vm2496_vm1, %v2488_v35, %v2495_v42 }
0x3559   : > { %v2500_v46 = vsel %vm2498_vm3, %v2499_v44, %v2497_v45 }
0x355a   : > { %v2501_v47 = vmul.f32 4.766011, %v2500_v46 }
0x355c   : > { %v2502_v50 = vadd.f32 1e-08, %v2501_v47 }
0x355e   : > { %3135 = vrcp.f32 %v2502_v50 }
0x3564   : > { %v3136_v53 = vpop.eup %3135 }
0x3565   : > { %v2505_v54 = vmul.f32 %v3136_v53, %v2503_v52 }
0x3567   : > { %v2506_v55 = vsub.f32 %v2457_v12, %v2505_v54 }
0x3569   : > { %2509 = vperm.xlu2 %2864, %v2506_v55   ;;  %v2529_v9 = vmul.f32 0.0001, %v2506_v55 }
0x35c3   : > { %v2510_v57 = vpop.permute.xlu2 %2509 }
0x35c4   : > { %v2512_v56 = vsub.f32 %v2510_v57, %v3452_v14 }
0x35c6   : > { %v2513_v58 = vmul.f32 %v2512_v56, %v2512_v56 }
0x35c8   : > { %v2514_v59 = vsel %vm310_vm2, %v2513_v58, 0.0 }
0x35c9   : > { %v2515_v60 = vrot.slane %v2514_v59, 4 }
0x35cb   : > { %v2516_v61 = vadd.f32 %v2515_v60, %v2514_v59 }
0x35cd   : > { %v2517_v62 = vrot.slane %v2516_v61, 2 }
0x35cf   : > { %v2518_v63 = vadd.f32 %v2517_v62, %v2516_v61 }
0x35d1   : > { %v2519_v0 = vrot.slane %v2518_v63, 1 }
0x35d3   : > { %v2520_v1 = vadd.f32 %v2519_v0, %v2518_v63 }
0x35d5   : > { %v2521_v3 = vmul.f32 -0.5, %v2520_v1 }
0x35d7   : > { %v2522_v4 = vmul.f32 1.442695, %v2521_v3 }
0x35d9   : > { %3137 = vpow2.f32 %v2522_v4 }
0x35df   : > { %v3138_v5 = vpop.eup %3137 }
0x35e0   : > { %v2524_v6 = vmul.f32 %v3138_v5, %v3256_v43 }
0x35e2   : > { %v2525_v7 = vmul.f32 %v2524_v6, %v2512_v56 }
0x35e4   : > { %v2526_v8 = vsel %vm310_vm2, %v2525_v7, 0.0 }
0x35e5   : > { %2527 = vadd.xlane.f32.xlu0 %v2526_v8 }
0x3658   : > { %v2528_v10 = vpop.xlane.xlu0 %2527 }
0x3659   : > { %v2530_v11 = vadd.f32 %v2529_v9, %v2528_v10 }
0x365b   : > { %v2535_v12 = vmul.f32 0.001, %v2530_v11  ;;  %v2532_v28 = vmul.f32 0.1, %v2530_v11 }
0x365d   : > { %v2536_v15 = vmul.f32 %v2535_v12, %v2530_v11  ;;  %v2533_v30 = vadd.f32 %v2532_v28, %v2531_v29 }
0x365f   : > { %v2537_v16 = vadd.f32 %v2536_v15, %v2534_v13  ;;  %v2552_v31 = vmul.f32 0.05039587, %v2533_v30  ;;  %v2580_v9 = vmul.f32 0.9, %v2533_v30 }
0x3661   : > { %3139 = vrsqrt.f32 %v2537_v16  ;;  %vm2545_vm4 = vcmp.eq.f32.partialorder %v2537_v16, inf  ;;  %v2548_v24 = vand.u32 2147483648, %v2537_v16  ;;  %vm2547_vm5 = vcmp.eq.f32.partialorder %v2537_v16, 0.0 }
0x3662   : > { %v2583_v57 = vmul.f32 0.999, %v2537_v16 }
0x3667   : > { %v3140_v18 = vpop.eup %3139 }
0x3668   : > { %v2539_v19 = vmul.f32 %v3140_v18, %v2537_v16 }
0x366a   : > { %v2540_v20 = vmul.f32 %v3140_v18, %v2539_v19 }
0x366c   : > { %v2541_v21 = vmul.f32 0.5, %v2540_v20 }
0x366e   : > { %v2542_v22 = vsub.f32 1.5, %v2541_v21 }
0x3670   : > { %v2543_v2 = vmul.f32 %v3140_v18, %v2542_v22 }
0x3672   : > { %v2544_v23 = vmul.f32 %v2543_v2, %v2537_v16 }
0x3674   : > { %v2546_v25 = vsel %vm2545_vm4, %v2537_v16, %v2544_v23 }
0x3675   : > { %v2549_v26 = vsel %vm2547_vm5, %v2548_v24, %v2546_v25 }
0x3676   : > { %v2550_v27 = vmul.f32 4.715092, %v2549_v26 }
0x3678   : > { %v2551_v17 = vadd.f32 1e-08, %v2550_v27 }
0x367a   : > { %3141 = vrcp.f32 %v2551_v17 }
0x3680   : > { %v3142_v32 = vpop.eup %3141 }
0x3681   : > { %v2554_v33 = vmul.f32 %v3142_v32, %v2552_v31 }
0x3683   : > { %v2555_v34 = vsub.f32 %v2506_v55, %v2554_v33 }
0x3685   : > { %2558 = vperm.xlu2 %2864, %v2555_v34   ;;  %v2578_v52 = vmul.f32 0.0001, %v2555_v34 }
0x36df   : > { %v2559_v35 = vpop.permute.xlu2 %2558 }
0x36e0   : > { %v2561_v36 = vsub.f32 %v2559_v35, %v3452_v14 }
0x36e2   : > { %v2562_v37 = vmul.f32 %v2561_v36, %v2561_v36 }
0x36e4   : > { %v2563_v38 = vsel %vm310_vm2, %v2562_v37, 0.0 }
0x36e5   : > { %v2564_v39 = vrot.slane %v2563_v38, 4 }
0x36e7   : > { %v2565_v40 = vadd.f32 %v2564_v39, %v2563_v38 }
0x36e9   : > { %v2566_v41 = vrot.slane %v2565_v40, 2 }
0x36eb   : > { %v2567_v42 = vadd.f32 %v2566_v41, %v2565_v40 }
0x36ed   : > { %v2568_v44 = vrot.slane %v2567_v42, 1 }
0x36ef   : > { %v2569_v45 = vadd.f32 %v2568_v44, %v2567_v42 }
0x36f1   : > { %v2570_v46 = vmul.f32 -0.5, %v2569_v45 }
0x36f3   : > { %v2571_v47 = vmul.f32 1.442695, %v2570_v46 }
0x36f5   : > { %3143 = vpow2.f32 %v2571_v47 }
0x36fb   : > { %v3144_v48 = vpop.eup %3143 }
0x36fc   : > { %v2573_v50 = vmul.f32 %v3144_v48, %v3256_v43 }
0x36fe   : > { %v2574_v49 = vmul.f32 %v2573_v50, %v2561_v36 }
0x3700   : > { %v2575_v51 = vsel %vm310_vm2, %v2574_v49, 0.0 }
0x3701   : > { %2576 = vadd.xlane.f32.xlu2 %v2575_v51 }
0x3774   : > { %v2577_v53 = vpop.xlane.xlu2 %2576 }
0x3775   : > { %v2579_v54 = vadd.f32 %v2578_v52, %v2577_v53 }
0x3777   : > { %v2584_v55 = vmul.f32 0.001, %v2579_v54  ;;  %v2581_v7 = vmul.f32 0.1, %v2579_v54 }
0x3779   : > { %v2585_v56 = vmul.f32 %v2584_v55, %v2579_v54  ;;  %v2582_v10 = vadd.f32 %v2581_v7, %v2580_v9 }
0x377b   : > { %v2586_v58 = vadd.f32 %v2585_v56, %v2583_v57  ;;  %v2601_v11 = vmul.f32 0.050356, %v2582_v10  ;;  %v2629_v52 = vmul.f32 0.9, %v2582_v10 }
0x377d   : > { %3145 = vrsqrt.f32 %v2586_v58  ;;  %vm2594_vm6 = vcmp.eq.f32.partialorder %v2586_v58, inf  ;;  %v2597_v3 = vand.u32 2147483648, %v2586_v58  ;;  %vm2596_vm7 = vcmp.eq.f32.partialorder %v2586_v58, 0.0 }
0x377e   : > { %v2632_v35 = vmul.f32 0.999, %v2586_v58 }
0x3783   : > { %v3146_v59 = vpop.eup %3145 }
0x3784   : > { %v2588_v60 = vmul.f32 %v3146_v59, %v2586_v58 }
0x3786   : > { %v2589_v61 = vmul.f32 %v3146_v59, %v2588_v60 }
0x3788   : > { %v2590_v62 = vmul.f32 0.5, %v2589_v61 }
0x378a   : > { %v2591_v63 = vsub.f32 1.5, %v2590_v62 }
0x378c   : > { %v2592_v0 = vmul.f32 %v3146_v59, %v2591_v63 }
0x378e   : > { %v2593_v1 = vmul.f32 %v2592_v0, %v2586_v58 }
0x3790   : > { %v2595_v4 = vsel %vm2594_vm6, %v2586_v58, %v2593_v1 }
0x3791   : > { %v2598_v5 = vsel %vm2596_vm7, %v2597_v3, %v2595_v4 }
0x3792   : > { %v2599_v6 = vmul.f32 4.6658196, %v2598_v5 }
0x3794   : > { %v2600_v8 = vadd.f32 1e-08, %v2599_v6 }
0x3796   : > { %3147 = vrcp.f32 %v2600_v8 }
0x379c   : > { %v3148_v12 = vpop.eup %3147 }
0x379d   : > { %v2603_v13 = vmul.f32 %v3148_v12, %v2601_v11 }
0x379f   : > { %v2604_v15 = vsub.f32 %v2555_v34, %v2603_v13 }
0x37a1   : > { %2607 = vperm.xlu1 %2863, %v2604_v15   ;;  %v2627_v31 = vmul.f32 0.0001, %v2604_v15 }
0x3813   : > { %v2608_v16 = vpop.permute.xlu1 %2607 }
0x3814   : > { %v2610_v18 = vsub.f32 %v2608_v16, %v3452_v14 }
0x3816   : > { %v2611_v19 = vmul.f32 %v2610_v18, %v2610_v18 }
0x3818   : > { %v2612_v20 = vsel %vm310_vm2, %v2611_v19, 0.0 }
0x3819   : > { %v2613_v21 = vrot.slane %v2612_v20, 4 }
0x381b   : > { %v2614_v22 = vadd.f32 %v2613_v21, %v2612_v20 }
0x381d   : > { %v2615_v2 = vrot.slane %v2614_v22, 2 }
0x381f   : > { %v2616_v23 = vadd.f32 %v2615_v2, %v2614_v22 }
0x3821   : > { %v2617_v24 = vrot.slane %v2616_v23, 1 }
0x3823   : > { %v2618_v25 = vadd.f32 %v2617_v24, %v2616_v23 }
0x3825   : > { %v2619_v26 = vmul.f32 -0.5, %v2618_v25 }
0x3827   : > { %v2620_v27 = vmul.f32 1.442695, %v2619_v26 }
0x3829   : > { %3149 = vpow2.f32 %v2620_v27 }
0x382f   : > { %v3150_v28 = vpop.eup %3149 }
0x3830   : > { %v2622_v17 = vmul.f32 %v3150_v28, %v3256_v43 }
0x3832   : > { %v2623_v29 = vmul.f32 %v2622_v17, %v2610_v18 }
0x3834   : > { %v2624_v30 = vsel %vm310_vm2, %v2623_v29, 0.0 }
0x3835   : > { %2625 = vadd.xlane.f32.xlu0 %v2624_v30 }
0x38a8   : > { %v2626_v32 = vpop.xlane.xlu0 %2625 }
0x38a9   : > { %v2628_v33 = vadd.f32 %v2627_v31, %v2626_v32 }
0x38ab   : > { %v2633_v34 = vmul.f32 0.001, %v2628_v33  ;;  %v2630_v49 = vmul.f32 0.1, %v2628_v33 }
0x38ad   : > { %v2634_v36 = vmul.f32 %v2633_v34, %v2628_v33  ;;  %v2631_v53 = vadd.f32 %v2630_v49, %v2629_v52 }
0x38af   : > { %v2635_v37 = vadd.f32 %v2634_v36, %v2632_v35  ;;  %v2650_v54 = vmul.f32 0.05032017, %v2631_v53  ;;  %v2678_v31 = vmul.f32 0.9, %v2631_v53 }
0x38b1   : > { %3151 = vrsqrt.f32 %v2635_v37  ;;  %vm2643_vm8 = vcmp.eq.f32.partialorder %v2635_v37, inf  ;;  %v2646_v46 = vand.u32 2147483648, %v2635_v37  ;;  %vm2645_vm9 = vcmp.eq.f32.partialorder %v2635_v37, 0.0 }
0x38b2   : > { %v2681_v16 = vmul.f32 0.999, %v2635_v37 }
0x38b7   : > { %v3152_v38 = vpop.eup %3151 }
0x38b8   : > { %v2637_v39 = vmul.f32 %v3152_v38, %v2635_v37 }
0x38ba   : > { %v2638_v40 = vmul.f32 %v3152_v38, %v2637_v39 }
0x38bc   : > { %v2639_v41 = vmul.f32 0.5, %v2638_v40 }
0x38be   : > { %v2640_v42 = vsub.f32 1.5, %v2639_v41 }
0x38c0   : > { %v2641_v44 = vmul.f32 %v3152_v38, %v2640_v42 }
0x38c2   : > { %v2642_v45 = vmul.f32 %v2641_v44, %v2635_v37 }
0x38c4   : > { %v2644_v47 = vsel %vm2643_vm8, %v2635_v37, %v2642_v45 }
0x38c5   : > { %v2647_v48 = vsel %vm2645_vm9, %v2646_v46, %v2644_v47 }
0x38c6   : > { %v2648_v50 = vmul.f32 4.6181073, %v2647_v48 }
0x38c8   : > { %v2649_v51 = vadd.f32 1e-08, %v2648_v50 }
0x38ca   : > { %3153 = vrcp.f32 %v2649_v51 }
0x38d0   : > { %v3154_v55 = vpop.eup %3153 }
0x38d1   : > { %v2652_v57 = vmul.f32 %v3154_v55, %v2650_v54 }
0x38d3   : > { %v2653_v56 = vsub.f32 %v2604_v15, %v2652_v57 }
0x38d5   : > { %2656 = vperm.xlu1 %2863, %v2653_v56   ;;  %v2676_v11 = vmul.f32 0.0001, %v2653_v56 }
0x3947   : > { %v2657_v58 = vpop.permute.xlu1 %2656 }
0x3948   : > { %v2659_v59 = vsub.f32 %v2657_v58, %v3452_v14 }
0x394a   : > { %v2660_v60 = vmul.f32 %v2659_v59, %v2659_v59 }
0x394c   : > { %v2661_v61 = vsel %vm310_vm2, %v2660_v60, 0.0 }
0x394d   : > { %v2662_v62 = vrot.slane %v2661_v61, 4 }
0x394f   : > { %v2663_v63 = vadd.f32 %v2662_v62, %v2661_v61 }
0x3951   : > { %v2664_v0 = vrot.slane %v2663_v63, 2 }
0x3953   : > { %v2665_v1 = vadd.f32 %v2664_v0, %v2663_v63 }
0x3955   : > { %v2666_v3 = vrot.slane %v2665_v1, 1 }
0x3957   : > { %v2667_v4 = vadd.f32 %v2666_v3, %v2665_v1 }
0x3959   : > { %v2668_v5 = vmul.f32 -0.5, %v2667_v4 }
0x395b   : > { %v2669_v6 = vmul.f32 1.442695, %v2668_v5 }
0x395d   : > { %3155 = vpow2.f32 %v2669_v6 }
0x3963   : > { %v3156_v7 = vpop.eup %3155 }
0x3964   : > { %v2671_v8 = vmul.f32 %v3156_v7, %v3256_v43 }
0x3966   : > { %v2672_v9 = vmul.f32 %v2671_v8, %v2659_v59 }
0x3968   : > { %v2673_v10 = vsel %vm310_vm2, %v2672_v9, 0.0 }
0x3969   : > { %2674 = vadd.xlane.f32.xlu0 %v2673_v10 }
0x39dc   : > { %v2675_v12 = vpop.xlane.xlu0 %2674 }
0x39dd   : > { %v2677_v13 = vadd.f32 %v2676_v11, %v2675_v12 }
0x39df   : > { %v2682_v15 = vmul.f32 0.001, %v2677_v13  ;;  %v2679_v29 = vmul.f32 0.1, %v2677_v13 }
0x39e1   : > { %v2683_v18 = vmul.f32 %v2682_v15, %v2677_v13  ;;  %v2680_v32 = vadd.f32 %v2679_v29, %v2678_v31 }
0x39e3   : > { %v2684_v19 = vadd.f32 %v2683_v18, %v2681_v16  ;;  %v2699_v33 = vmul.f32 0.05028797, %v2680_v32  ;;  %v2727_v11 = vmul.f32 0.9, %v2680_v32 }
0x39e5   : > { %3157 = vrsqrt.f32 %v2684_v19  ;;  %vm2692_vm10 = vcmp.eq.f32.partialorder %v2684_v19, inf  ;;  %v2695_v26 = vand.u32 2147483648, %v2684_v19  ;;  %vm2694_vm11 = vcmp.eq.f32.partialorder %v2684_v19, 0.0 }
0x39e6   : > { %v2730_v58 = vmul.f32 0.999, %v2684_v19 }
0x39eb   : > { %v3158_v20 = vpop.eup %3157 }
0x39ec   : > { %v2686_v21 = vmul.f32 %v3158_v20, %v2684_v19 }
0x39ee   : > { %v2687_v22 = vmul.f32 %v3158_v20, %v2686_v21 }
0x39f0   : > { %v2688_v2 = vmul.f32 0.5, %v2687_v22 }
0x39f2   : > { %v2689_v23 = vsub.f32 1.5, %v2688_v2 }
0x39f4   : > { %v2690_v24 = vmul.f32 %v3158_v20, %v2689_v23 }
0x39f6   : > { %v2691_v25 = vmul.f32 %v2690_v24, %v2684_v19 }
0x39f8   : > { %v2693_v27 = vsel %vm2692_vm10, %v2684_v19, %v2691_v25 }
0x39f9   : > { %v2696_v28 = vsel %vm2694_vm11, %v2695_v26, %v2693_v27 }
0x39fa   : > { %v2697_v17 = vmul.f32 4.571875, %v2696_v28 }
0x39fc   : > { %v2698_v30 = vadd.f32 1e-08, %v2697_v17 }
0x39fe   : > { %3159 = vrcp.f32 %v2698_v30 }
0x3a04   : > { %v3160_v34 = vpop.eup %3159 }
0x3a05   : > { %v2701_v35 = vmul.f32 %v3160_v34, %v2699_v33 }
0x3a07   : > { %v2702_v36 = vsub.f32 %v2653_v56, %v2701_v35 }
0x3a09   : > { %2705 = vperm.xlu1 %2863, %v2702_v36   ;;  %v2725_v54 = vmul.f32 0.0001, %v2702_v36 }
0x3a7b   : > { %v2706_v37 = vpop.permute.xlu1 %2705 }
0x3a7c   : > { %v2708_v38 = vsub.f32 %v2706_v37, %v3452_v14 }
0x3a7e   : > { %v2709_v39 = vmul.f32 %v2708_v38, %v2708_v38 }
0x3a80   : > { %v2710_v40 = vsel %vm310_vm2, %v2709_v39, 0.0 }
0x3a81   : > { %v2711_v41 = vrot.slane %v2710_v40, 4 }
0x3a83   : > { %v2712_v42 = vadd.f32 %v2711_v41, %v2710_v40 }
0x3a85   : > { %v2713_v44 = vrot.slane %v2712_v42, 2 }
0x3a87   : > { %v2714_v45 = vadd.f32 %v2713_v44, %v2712_v42 }
0x3a89   : > { %v2715_v46 = vrot.slane %v2714_v45, 1 }
0x3a8b   : > { %v2716_v47 = vadd.f32 %v2715_v46, %v2714_v45 }
0x3a8d   : > { %v2717_v48 = vmul.f32 -0.5, %v2716_v47 }
0x3a8f   : > { %v2718_v50 = vmul.f32 1.442695, %v2717_v48 }
0x3a91   : > { %3161 = vpow2.f32 %v2718_v50 }
0x3a97   : > { %v3162_v49 = vpop.eup %3161 }
0x3a98   : > { %v2720_v51 = vmul.f32 %v3162_v49, %v3256_v43 }
0x3a9a   : > { %v2721_v52 = vmul.f32 %v2720_v51, %v2708_v38 }
0x3a9c   : > { %v2722_v53 = vsel %vm310_vm2, %v2721_v52, 0.0 }
0x3a9d   : > { %2723 = vadd.xlane.f32.xlu0 %v2722_v53 }
0x3b10   : > { %v2724_v55 = vpop.xlane.xlu0 %2723 }
0x3b11   : > { %v2726_v57 = vadd.f32 %v2725_v54, %v2724_v55 }
0x3b13   : > { %v2731_v56 = vmul.f32 0.001, %v2726_v57  ;;  %v2728_v9 = vmul.f32 0.1, %v2726_v57 }
0x3b15   : > { %v2732_v59 = vmul.f32 %v2731_v56, %v2726_v57  ;;  %v2729_v12 = vadd.f32 %v2728_v9, %v2727_v11 }
0x3b17   : > { %v2733_v60 = vadd.f32 %v2732_v59, %v2730_v58  ;;  %v2748_v13 = vmul.f32 0.050259024, %v2729_v12 }
0x3b19   : > { %3163 = vrsqrt.f32 %v2733_v60  ;;  %vm2741_vm12 = vcmp.eq.f32.partialorder %v2733_v60, inf  ;;  %v2744_v5 = vand.u32 2147483648, %v2733_v60  ;;  %vm2743_vm13 = vcmp.eq.f32.partialorder %v2733_v60, 0.0 }
0x3b1f   : > { %v3164_v61 = vpop.eup %3163 }
0x3b20   : > { %v2735_v62 = vmul.f32 %v3164_v61, %v2733_v60 }
0x3b22   : > { %v2736_v63 = vmul.f32 %v3164_v61, %v2735_v62 }
0x3b24   : > { %v2737_v0 = vmul.f32 0.5, %v2736_v63 }
0x3b26   : > { %v2738_v1 = vsub.f32 1.5, %v2737_v0 }
0x3b28   : > { %v2739_v3 = vmul.f32 %v3164_v61, %v2738_v1 }
0x3b2a   : > { %v2740_v4 = vmul.f32 %v2739_v3, %v2733_v60 }
0x3b2c   : > { %v2742_v6 = vsel %vm2741_vm12, %v2733_v60, %v2740_v4 }
0x3b2d   : > { %v2745_v7 = vsel %vm2743_vm13, %v2744_v5, %v2742_v6 }
0x3b2e   : > { %v2746_v8 = vmul.f32 4.5270486, %v2745_v7 }
0x3b30   : > { %v2747_v10 = vadd.f32 1e-08, %v2746_v8 }
0x3b32   : > { %3165 = vrcp.f32 %v2747_v10 }
0x3b38   : > { %v3166_v15 = vpop.eup %3165 }
0x3b39   : > { %v2750_v16 = vmul.f32 %v3166_v15, %v2748_v13 }
0x3b3b   : > { %v2751_v18 = vsub.f32 %v2702_v36, %v2750_v16 }
0x3b3d   : > { %2754 = vperm.xlu2 %2864, %v2751_v18   ;;  %2777 = vst.msk [vmem:[%s263_s28 + $0x1] sm:$0x3] %vm2776_vm14, %v2751_v18 }
0x3b97   : > { %v2755_v19 = vpop.permute.xlu2 %2754 }
0x3b98   : > { %v2757_v20 = vsub.f32 %v2755_v19, %v3452_v14 }
0x3b9a   : > { %v2758_v21 = vmul.f32 %v2757_v20, %v2757_v20 }
0x3b9c   : > { %v2759_v22 = vsel %vm310_vm2, %v2758_v21, 0.0 }
0x3b9d   : > { %v2760_v2 = vrot.slane %v2759_v22, 4 }
0x3b9f   : > { %v2761_v23 = vadd.f32 %v2760_v2, %v2759_v22 }
0x3ba1   : > { %v2762_v24 = vrot.slane %v2761_v23, 2 }
0x3ba3   : > { %v2763_v25 = vadd.f32 %v2762_v24, %v2761_v23 }
0x3ba5   : > { %v2764_v26 = vrot.slane %v2763_v25, 1 }
0x3ba7   : > { %v2765_v27 = vadd.f32 %v2764_v26, %v2763_v25 }
0x3ba9   : > { %v2766_v28 = vmul.f32 -0.5, %v2765_v27 }
0x3bab   : > { %v2767_v17 = vmul.f32 1.442695, %v2766_v28 }
0x3bad   : > { %3167 = vpow2.f32 %v2767_v17 }
0x3bb3   : > { %v3168_v29 = vpop.eup %3167 }
0x3bb4   : > { %v2769_v30 = vmul.f32 %v3168_v29, %v3256_v43 }
0x3bb6   : > { %v2771_v31 = vsel %vm2770_vm15, %v2769_v30, 0.0 }
0x3bb7   : > { %2772 = vadd.xlane.f32.xlu1 %v2771_v31 }
0x3c2a   : > { %v2773_v14 = vpop.xlane.xlu1 %2772 }
0x3c2b   : > { %2775 = vst.msk [vmem:[%s263_s28] sm:$0x1] %vm2774_vm0, %v2773_v14 }
0x3c2c PF: > { %s16_s21 = sadd.s32 1, %s3179_s21  }
0x3c2d   : > { %p13_p4 = scmp.ge.s32.totalorder %s16_s21, 4  }
0x3c2f   :  { %15 = sbr.rel (!%p13_p4) target bundleno = 1 (0x1), region = 77 }

</bundles_post_ra>
